<compile_context>
chip_gen: v5e
topology: v5e:2x2
jax: 0.10.0
libtpu: 0.0.40
codegen_flags: <defaults>
</compile_context>

<pallas_src>
import functools

import numpy as np
import jax
import jax.numpy as jnp
from jax.experimental import pallas as pl
from jax.experimental.pallas import tpu as pltpu

_VMEM_LIMIT = 48 * 1024 * 1024  # explicit scoped-VMEM cap (v5e default 16 MiB is tight)
_POOL_K, _POOL_S = 5, 3


def _round_up(n, m):
    return ((n + m - 1) // m) * m


def _pool_matrix(H, W, k, s):
    """A^T with A[p, hw] = 1 iff flat position hw=(h*W+w) lies in pooling window p."""
    Ho = (H - k) // s + 1
    Wo = (W - k) // s + 1
    a = np.zeros((Ho * Wo, H * W), np.float32)
    for ho in range(Ho):
        for wo in range(Wo):
            p = ho * Wo + wo
            for dy in range(k):
                for dx in range(k):
                    a[p, (ho * s + dy) * W + (wo * s + dx)] = 1.0
    return jnp.asarray(a.T, dtype=jnp.float32), Ho, Wo  # (H*W, Ho*Wo)


# ----------------------------------------------------------------------------
# Kernel 1: fused avg_pool2d(5, 3) + BasicConv2d 1x1 (BN folded, ReLU)
# ----------------------------------------------------------------------------
def _pool_conv0_kernel(x_ref, at_ref, w0_ref, s0_ref, o_ref, *, inv_area):
    # x_ref : (bn, Cin, H*W) f32    at_ref: (H*W, P) f32
    # w0_ref: (128, Cin) bf16       s0_ref: (128, 1) f32
    # o_ref : (bn, 128, P) bf16
    at = at_ref[...]
    w0 = w0_ref[...]
    s0 = s0_ref[...]
    for b in range(x_ref.shape[0]):                 # static unroll over images
        # avg-pool as an exact 0/1 selection matmul, f32 accumulate, then / (k*k)
        pooled = jnp.dot(x_ref[b], at, preferred_element_type=jnp.float32) * inv_area
        # fused 1x1 conv + BN shift + ReLU (bf16 operands, f32 accumulate)
        y = jnp.dot(w0, pooled.astype(jnp.bfloat16),
                    preferred_element_type=jnp.float32)
        o_ref[b] = jnp.maximum(y + s0, 0.0).astype(o_ref.dtype)


def pool_conv0(x_nchw, at, w0, s0, P):
    N, C, H, W = x_nchw.shape
    HW = H * W
    cout0 = w0.shape[0]
    x = x_nchw.reshape(N, C, HW)                    # free reshape, stays fp32 NCHW
    bn = max(1, min(8, N // 2))                     # >=2 grid steps when N >= 2
    return pl.pallas_call(
        functools.partial(_pool_conv0_kernel,
                          inv_area=1.0 / float(_POOL_K * _POOL_K)),
        out_shape=jax.ShapeDtypeStruct((N, cout0, P), jnp.bfloat16),
        grid=(pl.cdiv(N, bn),),
        in_specs=[
            pl.BlockSpec((bn, C, HW), lambda i: (i, 0, 0)),
            pl.BlockSpec((HW, P), lambda i: (0, 0)),
            pl.BlockSpec((cout0, C), lambda i: (0, 0)),
            pl.BlockSpec((cout0, 1), lambda i: (0, 0)),
        ],
        out_specs=pl.BlockSpec((bn, cout0, P), lambda i: (i, 0, 0)),
        compiler_params=pltpu.CompilerParams(
            dimension_semantics=("parallel",),
            vmem_limit_bytes=_VMEM_LIMIT),
    )(x, at, w0, s0)


# ----------------------------------------------------------------------------
# Kernel 2: fused BasicConv2d 5x5 (BN folded, ReLU) + Linear head
# ----------------------------------------------------------------------------
def _conv1_fc_kernel(x_ref, w1_ref, s1_ref, wfc_ref, bfc_ref, o_ref):
    # x_ref : (tm, 3200) bf16   w1_ref: (3200, 768) bf16   s1_ref: (1, 768) f32
    # wfc_ref: (768, NCp) bf16  bfc_ref: (1, NCp) f32       o_ref: (tm, NCp) f32
    h = jnp.dot(x_ref[...], w1_ref[...], preferred_element_type=jnp.float32)
    h = jnp.maximum(h + s1_ref[...], 0.0)
    o_ref[...] = (jnp.dot(h.astype(jnp.bfloat16), wfc_ref[...],
                          preferred_element_type=jnp.float32) + bfc_ref[...])


def conv1_fc(y0, w1, s1, wfc, bfc):
    # y0: (N, 128, 25) bf16 -> (N, 3200); flatten order (cin, dy, dx) matches w1 fold.
    N = y0.shape[0]
    K = y0.shape[1] * y0.shape[2]
    cout1 = w1.shape[1]
    ncp = wfc.shape[1]
    x2 = y0.reshape(N, K)                           # free reshape
    if N <= 8:
        tm = N
    else:
        tm = min(128, _round_up((N + 1) // 2, 8))   # >=2 grid steps, 8-aligned tiles
    return pl.pallas_call(
        _conv1_fc_kernel,
        out_shape=jax.ShapeDtypeStruct((N, ncp), jnp.float32),
        grid=(pl.cdiv(N, tm),),
        in_specs=[
            pl.BlockSpec((tm, K), lambda i: (i, 0)),
            pl.BlockSpec((K, cout1), lambda i: (0, 0)),
            pl.BlockSpec((1, cout1), lambda i: (0, 0)),
            pl.BlockSpec((cout1, ncp), lambda i: (0, 0)),
            pl.BlockSpec((1, ncp), lambda i: (0, 0)),
        ],
        out_specs=pl.BlockSpec((tm, ncp), lambda i: (i, 0)),
        compiler_params=pltpu.CompilerParams(
            dimension_semantics=("parallel",),
            vmem_limit_bytes=_VMEM_LIMIT),
    )(x2, w1, s1, wfc, bfc)


# ----------------------------------------------------------------------------
# One-time parameter preparation: BN fold, transpose/reshape, bf16 cast, fc pad.
# ----------------------------------------------------------------------------
def prepare_params(params):
    c0, c1 = params["conv0"], params["conv1"]
    cout0, cin0 = c0["w"].shape[0], c0["w"].shape[1]
    cout1 = c1["w"].shape[0]

    w0 = c0["w"].reshape(cout0, cin0) * c0["scale"][:, None]            # (128, Cin)
    s0 = c0["shift"].reshape(cout0, 1)

    # rows indexed by (cin, dy, dx) -> matches NCHW flatten of conv0's output
    w1 = (jnp.transpose(c1["w"], (1, 2, 3, 0)).reshape(-1, cout1)
          * c1["scale"][None, :])                                       # (3200, 768)
    s1 = c1["shift"].reshape(1, cout1)

    nc = params["fc_w"].shape[1]
    ncp = _round_up(nc, 128)
    wfc = jnp.pad(params["fc_w"], ((0, 0), (0, ncp - nc)))
    bfc = jnp.pad(params["fc_b"], ((0, ncp - nc),)).reshape(1, ncp)

    return dict(w0=w0.astype(jnp.bfloat16), s0=s0.astype(jnp.float32),
                w1=w1.astype(jnp.bfloat16), s1=s1.astype(jnp.float32),
                wfc=wfc.astype(jnp.bfloat16), bfc=bfc.astype(jnp.float32))


# ----------------------------------------------------------------------------
# Module forward
# ----------------------------------------------------------------------------
def inception_aux_forward(x_nchw, prep, num_classes):
    N, C, H, W = x_nchw.shape
    at, Ho, Wo = _pool_matrix(H, W, _POOL_K, _POOL_S)
    # Linear(768) after a 5x5 conv requires a 5x5 pooled map (e.g. 17x17 input).
    assert Ho == 5 and Wo == 5, "InceptionAux expects the pooled map to be 5x5"
    y0 = pool_conv0(x_nchw, at, prep["w0"], prep["s0"], Ho * Wo)    # (N, 128, 25) bf16
    logits = conv1_fc(y0, prep["w1"], prep["s1"], prep["wfc"], prep["bfc"])
    if logits.shape[1] != num_classes:
        logits = logits[:, :num_classes]
    return logits                                                   # (N, num_classes) f32


# ----------------------------------------------------------------------------
# Parameter init (deterministic, synthetic)
# ----------------------------------------------------------------------------
def init_basic_conv(key, cin, cout, kh, kw, eps=1e-3):
    k1, k2, k3, k4, k5 = jax.random.split(key, 5)
    fan_in = cin * kh * kw
    w = jax.random.normal(k1, (cout, cin, kh, kw), jnp.float32) / np.sqrt(fan_in)
    gamma = 1.0 + 0.1 * jax.random.normal(k2, (cout,), jnp.float32)
    beta = 0.1 * jax.random.normal(k3, (cout,), jnp.float32)
    mean = 0.1 * jax.random.normal(k4, (cout,), jnp.float32)
    var = 1.0 + 0.1 * jax.random.uniform(k5, (cout,), jnp.float32)
    scale = gamma / jnp.sqrt(var + eps)          # folded BN (eval mode)
    shift = beta - mean * scale
    return dict(w=w, scale=scale, shift=shift)


def init_inception_aux(key, in_channels, num_classes):
    k0, k1, k2, k3 = jax.random.split(key, 4)
    fc_w = jax.random.normal(k2, (768, num_classes), jnp.float32) / np.sqrt(768.0)
    fc_b = 0.01 * jax.random.normal(k3, (num_classes,), jnp.float32)
    return dict(conv0=init_basic_conv(k0, in_channels, 128, 1, 1),
                conv1=init_basic_conv(k1, 128, 768, 5, 5),
                fc_w=fc_w, fc_b=fc_b)


# ----------------------------------------------------------------------------
# Pure-JAX fp32 reference (validates pooling, BN fold, im2col ordering, fc)
# ----------------------------------------------------------------------------
def _ref_conv_bn_relu(x_nchw, p):
    y = jax.lax.conv_general_dilated(
        x_nchw, p["w"], (1, 1), ((0, 0), (0, 0)),
        dimension_numbers=("NCHW", "OIHW", "NCHW"))
    return jnp.maximum(y * p["scale"].reshape(1, -1, 1, 1)
                       + p["shift"].reshape(1, -1, 1, 1), 0.0)


def _ref_forward(x_nchw, params):
    pooled = jax.lax.reduce_window(x_nchw, 0.0, jax.lax.add,
                                   (1, 1, 5, 5), (1, 1, 3, 3), "VALID") / 25.0
    y = _ref_conv_bn_relu(pooled, params["conv0"])
    y = _ref_conv_bn_relu(y, params["conv1"])
    y = y.reshape(y.shape[0], -1)
    return y @ params["fc_w"] + params["fc_b"]


# ----------------------------------------------------------------------------
if __name__ == "__main__":
    key = jax.random.PRNGKey(0)
    k_x, k_p = jax.random.split(key)

    # Small shapes consistent with the module: H=W=17 pools (k=5,s=3) to 5x5 and the
    # 5x5 conv then yields 1x1 so Linear(768, num_classes) applies.
    N, Cin, H, W = 2, 4, 17, 17
    num_classes = 10
    x = jax.random.normal(k_x, (N, Cin, H, W), jnp.float32)
    params = init_inception_aux(k_p, Cin, num_classes)
    prep = prepare_params(params)                    # one-time fold / cast / pad

    fwd = jax.jit(lambda xx, pp: inception_aux_forward(xx, pp, num_classes))
    out = jax.block_until_ready(fwd(x, prep))

    assert out.shape == (N, num_classes), (out.shape, (N, num_classes))

    ref = jax.block_until_ready(_ref_forward(x, params))
    # bf16 MXU operands with fp32 accumulation: intentional precision choice.
    np.testing.assert_allclose(np.asarray(out), np.asarray(ref),
                               rtol=2e-2, atol=2e-2)

    print("KERNEL_OK")
</pallas_src>

<mosaic_0001>
module attributes {stable_mosaic.version = 11 : i64} {
  func.func @_pool_conv0_kernel(%arg0: i32, %arg1: memref<1x4x289xf32, #tpu.memory_space<vmem>>, %arg2: memref<289x25xf32, #tpu.memory_space<vmem>>, %arg3: memref<128x4xbf16, #tpu.memory_space<vmem>>, %arg4: memref<128x1xf32, #tpu.memory_space<vmem>>, %arg5: memref<1x128x25xbf16, #tpu.memory_space<vmem>>) attributes {dimension_semantics = [#tpu.dimension_semantics<parallel>], iteration_bounds = array<i64: 2>, scalar_prefetch = 0 : i64, scratch_operands = 0 : i64, tpu.core_type = #tpu.core_type<tc>, window_params = [{transform_indices = @transform_0, window_bounds = array<i64: 1, 4, 289>}, {pipeline_mode = #tpu.pipeline_mode<synchronous>, transform_indices = @transform_1, window_bounds = array<i64: 289, 25>}, {pipeline_mode = #tpu.pipeline_mode<synchronous>, transform_indices = @transform_2, window_bounds = array<i64: 128, 4>}, {pipeline_mode = #tpu.pipeline_mode<synchronous>, transform_indices = @transform_3, window_bounds = array<i64: 128, 1>}, {transform_indices = @transform_4, window_bounds = array<i64: 1, 128, 25>}]} {
    %c0 = arith.constant 0 : index
    %c0_0 = arith.constant 0 : index
    %0 = vector.load %arg2[%c0, %c0_0] : memref<289x25xf32, #tpu.memory_space<vmem>>, vector<289x25xf32>
    %c0_1 = arith.constant 0 : index
    %c0_2 = arith.constant 0 : index
    %1 = vector.load %arg3[%c0_1, %c0_2] : memref<128x4xbf16, #tpu.memory_space<vmem>>, vector<128x4xbf16>
    %c0_3 = arith.constant 0 : index
    %c0_4 = arith.constant 0 : index
    %2 = vector.load %arg4[%c0_3, %c0_4] : memref<128x1xf32, #tpu.memory_space<vmem>>, vector<128x1xf32>
    %c0_5 = arith.constant 0 : index
    %c0_6 = arith.constant 0 : index
    %c0_7 = arith.constant 0 : index
    %3 = vector.load %arg1[%c0_5, %c0_6, %c0_7] : memref<1x4x289xf32, #tpu.memory_space<vmem>>, vector<1x4x289xf32>
    %4 = vector.shape_cast %3 : vector<1x4x289xf32> to vector<4x289xf32>
    %cst = arith.constant dense<0.000000e+00> : vector<4x25xf32>
    %5 = tpu.matmul %4, %0, %cst {dimension_numbers = #tpu.dot_dimension_numbers<[1], [0], [0], [1], [0, 0, 1, 1], [], []>} : vector<4x289xf32>, vector<289x25xf32>, vector<4x25xf32> -> vector<4x25xf32>
    %cst_8 = arith.constant 4.000000e-02 : f32
    %6 = vector.broadcast %cst_8 : f32 to vector<4x25xf32>
    %7 = arith.mulf %5, %6 : vector<4x25xf32>
    %8 = arith.truncf %7 : vector<4x25xf32> to vector<4x25xbf16>
    %cst_9 = arith.constant dense<0.000000e+00> : vector<128x25xf32>
    %9 = tpu.matmul %1, %8, %cst_9 {dimension_numbers = #tpu.dot_dimension_numbers<[1], [0], [0], [1], [0, 0, 1, 1], [], []>} : vector<128x4xbf16>, vector<4x25xbf16>, vector<128x25xf32> -> vector<128x25xf32>
    %10 = vector.broadcast %2 : vector<128x1xf32> to vector<128x25xf32>
    %11 = arith.addf %9, %10 : vector<128x25xf32>
    %cst_10 = arith.constant 0.000000e+00 : f32
    %12 = vector.broadcast %cst_10 : f32 to vector<128x25xf32>
    %13 = arith.maximumf %11, %12 : vector<128x25xf32>
    %14 = arith.truncf %13 : vector<128x25xf32> to vector<128x25xbf16>
    %c0_11 = arith.constant 0 : index
    %c0_12 = arith.constant 0 : index
    %c0_13 = arith.constant 0 : index
    %15 = vector.load %arg5[%c0_11, %c0_12, %c0_13] : memref<1x128x25xbf16, #tpu.memory_space<vmem>>, vector<1x128x25xbf16>
    %16 = vector.shape_cast %15 : vector<1x128x25xbf16> to vector<128x25xbf16>
    %17 = vector.shape_cast %14 : vector<128x25xbf16> to vector<1x128x25xbf16>
    tpu.vector_store %arg5[%c0_11, %c0_12, %c0_13], %17 {strides = array<i32>} : memref<1x128x25xbf16, #tpu.memory_space<vmem>>, vector<1x128x25xbf16>,
    return
  }
  func.func @transform_0(%arg0: i32) -> (i32, i32, i32) {
    %c0_i32 = arith.constant 0 : i32
    %c0_i32_0 = arith.constant 0 : i32
    %c0_i32_1 = arith.constant 0 : i32
    return %arg0, %c0_i32, %c0_i32_0 : i32, i32, i32
  }
  func.func @transform_1(%arg0: i32) -> (i32, i32) {
    %c0_i32 = arith.constant 0 : i32
    %c0_i32_0 = arith.constant 0 : i32
    %c0_i32_1 = arith.constant 0 : i32
    return %c0_i32, %c0_i32_0 : i32, i32
  }
  func.func @transform_2(%arg0: i32) -> (i32, i32) {
    %c0_i32 = arith.constant 0 : i32
    %c0_i32_0 = arith.constant 0 : i32
    %c0_i32_1 = arith.constant 0 : i32
    return %c0_i32, %c0_i32_0 : i32, i32
  }
  func.func @transform_3(%arg0: i32) -> (i32, i32) {
    %c0_i32 = arith.constant 0 : i32
    %c0_i32_0 = arith.constant 0 : i32
    %c0_i32_1 = arith.constant 0 : i32
    return %c0_i32, %c0_i32_0 : i32, i32
  }
  func.func @transform_4(%arg0: i32) -> (i32, i32, i32) {
    %c0_i32 = arith.constant 0 : i32
    %c0_i32_0 = arith.constant 0 : i32
    %c0_i32_1 = arith.constant 0 : i32
    return %arg0, %c0_i32, %c0_i32_0 : i32, i32, i32
  }
}

module attributes {stable_mosaic.version = 11 : i64} {
  func.func @_conv1_fc_kernel(%arg0: i32, %arg1: memref<2x3200xbf16, #tpu.memory_space<vmem>>, %arg2: memref<3200x768xbf16, #tpu.memory_space<vmem>>, %arg3: memref<1x768xf32, #tpu.memory_space<vmem>>, %arg4: memref<768x128xbf16, #tpu.memory_space<vmem>>, %arg5: memref<1x128xf32, #tpu.memory_space<vmem>>, %arg6: memref<2x128xf32, #tpu.memory_space<vmem>>) attributes {dimension_semantics = [#tpu.dimension_semantics<parallel>], iteration_bounds = array<i64: 1>, scalar_prefetch = 0 : i64, scratch_operands = 0 : i64, tpu.core_type = #tpu.core_type<tc>, window_params = [{transform_indices = @transform_0, window_bounds = array<i64: 2, 3200>}, {pipeline_mode = #tpu.pipeline_mode<synchronous>, transform_indices = @transform_1, window_bounds = array<i64: 3200, 768>}, {pipeline_mode = #tpu.pipeline_mode<synchronous>, transform_indices = @transform_2, window_bounds = array<i64: 1, 768>}, {pipeline_mode = #tpu.pipeline_mode<synchronous>, transform_indices = @transform_3, window_bounds = array<i64: 768, 128>}, {pipeline_mode = #tpu.pipeline_mode<synchronous>, transform_indices = @transform_4, window_bounds = array<i64: 1, 128>}, {transform_indices = @transform_5, window_bounds = array<i64: 2, 128>}]} {
    %c0 = arith.constant 0 : index
    %c0_0 = arith.constant 0 : index
    %0 = vector.load %arg1[%c0, %c0_0] : memref<2x3200xbf16, #tpu.memory_space<vmem>>, vector<2x3200xbf16>
    %c0_1 = arith.constant 0 : index
    %c0_2 = arith.constant 0 : index
    %1 = vector.load %arg2[%c0_1, %c0_2] : memref<3200x768xbf16, #tpu.memory_space<vmem>>, vector<3200x768xbf16>
    %cst = arith.constant dense<0.000000e+00> : vector<2x768xf32>
    %2 = tpu.matmul %0, %1, %cst {dimension_numbers = #tpu.dot_dimension_numbers<[1], [0], [0], [1], [0, 0, 1, 1], [], []>} : vector<2x3200xbf16>, vector<3200x768xbf16>, vector<2x768xf32> -> vector<2x768xf32>
    %c0_3 = arith.constant 0 : index
    %c0_4 = arith.constant 0 : index
    %3 = vector.load %arg3[%c0_3, %c0_4] : memref<1x768xf32, #tpu.memory_space<vmem>>, vector<1x768xf32>
    %4 = vector.broadcast %3 : vector<1x768xf32> to vector<2x768xf32>
    %5 = arith.addf %2, %4 : vector<2x768xf32>
    %cst_5 = arith.constant 0.000000e+00 : f32
    %6 = vector.broadcast %cst_5 : f32 to vector<2x768xf32>
    %7 = arith.maximumf %5, %6 : vector<2x768xf32>
    %8 = arith.truncf %7 : vector<2x768xf32> to vector<2x768xbf16>
    %c0_6 = arith.constant 0 : index
    %c0_7 = arith.constant 0 : index
    %9 = vector.load %arg4[%c0_6, %c0_7] : memref<768x128xbf16, #tpu.memory_space<vmem>>, vector<768x128xbf16>
    %cst_8 = arith.constant dense<0.000000e+00> : vector<2x128xf32>
    %10 = tpu.matmul %8, %9, %cst_8 {dimension_numbers = #tpu.dot_dimension_numbers<[1], [0], [0], [1], [0, 0, 1, 1], [], []>} : vector<2x768xbf16>, vector<768x128xbf16>, vector<2x128xf32> -> vector<2x128xf32>
    %c0_9 = arith.constant 0 : index
    %c0_10 = arith.constant 0 : index
    %11 = vector.load %arg5[%c0_9, %c0_10] : memref<1x128xf32, #tpu.memory_space<vmem>>, vector<1x128xf32>
    %12 = vector.broadcast %11 : vector<1x128xf32> to vector<2x128xf32>
    %13 = arith.addf %10, %12 : vector<2x128xf32>
    %c0_11 = arith.constant 0 : index
    %c0_12 = arith.constant 0 : index
    %14 = vector.load %arg6[%c0_11, %c0_12] : memref<2x128xf32, #tpu.memory_space<vmem>>, vector<2x128xf32>
    tpu.vector_store %arg6[%c0_11, %c0_12], %13 {strides = array<i32>} : memref<2x128xf32, #tpu.memory_space<vmem>>, vector<2x128xf32>,
    return
  }
  func.func @transform_0(%arg0: i32) -> (i32, i32) {
    %c0_i32 = arith.constant 0 : i32
    %c0_i32_0 = arith.constant 0 : i32
    return %arg0, %c0_i32 : i32, i32
  }
  func.func @transform_1(%arg0: i32) -> (i32, i32) {
    %c0_i32 = arith.constant 0 : i32
    %c0_i32_0 = arith.constant 0 : i32
    %c0_i32_1 = arith.constant 0 : i32
    return %c0_i32, %c0_i32_0 : i32, i32
  }
  func.func @transform_2(%arg0: i32) -> (i32, i32) {
    %c0_i32 = arith.constant 0 : i32
    %c0_i32_0 = arith.constant 0 : i32
    %c0_i32_1 = arith.constant 0 : i32
    return %c0_i32, %c0_i32_0 : i32, i32
  }
  func.func @transform_3(%arg0: i32) -> (i32, i32) {
    %c0_i32 = arith.constant 0 : i32
    %c0_i32_0 = arith.constant 0 : i32
    %c0_i32_1 = arith.constant 0 : i32
    return %c0_i32, %c0_i32_0 : i32, i32
  }
  func.func @transform_4(%arg0: i32) -> (i32, i32) {
    %c0_i32 = arith.constant 0 : i32
    %c0_i32_0 = arith.constant 0 : i32
    %c0_i32_1 = arith.constant 0 : i32
    return %c0_i32, %c0_i32_0 : i32, i32
  }
  func.func @transform_5(%arg0: i32) -> (i32, i32) {
    %c0_i32 = arith.constant 0 : i32
    %c0_i32_0 = arith.constant 0 : i32
    return %arg0, %c0_i32 : i32, i32
  }
}

</mosaic_0001>

<bundles_post_ra>
// kernel: _lambda_.2
= control target key start
LH: loop header
LB: loop body
LE: loop exit
PB: predicated region body
PF: predicated region fallthrough
CT: control target
= control target key end

     0   :  { %9 = vsyncpa [#allocation3], 0  ;;  %s842_s15 = smov 0   ;;  %s980_s0 = inlined_call_operand.vmem [shape: f32[2,4,289], index: 0, kind: input, shape index: {}]   ;;  %s981_s1 = inlined_call_operand.hbm [shape: f32[289,25], index: 1, kind: input, shape index: {}]   ;;  %s982_s2 = inlined_call_operand.vmem [shape: bf16[128,4], index: 2, kind: input, shape index: {}]   ;;  %s983_s3 = inlined_call_operand.vmem [shape: f32[128,1], index: 3, kind: input, shape index: {}]   ;;  %s984_s4 = inlined_call_operand.vmem [shape: bf16[2,128,25], index: 4, kind: output, shape index: {}]  }
   0x1 LB: > { %s146_s18 = sshll.u32 %s981_s1, 4  ;;  %s680_s19 = sadd.s32 4294967295, %s811_s15   ;;  %s811_s15 = sphi %s842_s15, %s15_s15   ;;  %s147_s18 = int_to_ptr.hbm [resolvable:$true] %s146_s18 }
   0x2   : > { %p682_p0 = scmp.ge.s32.totalorder %s811_s15, 1  ;;  %p135_p1 = scmp.lt.s32.totalorder %s811_s15, 3 }
   0x3   : > { %p754_p2 = scmp.eq.s32.totalorder %s680_s19, 0  ;;  %s813_s20 = smov [#allocation2]  }
   0x4   : > { %p136_p3 = pnand %p682_p0, %p135_p1  ;;  %s148_s21 = sshll.u32 %s813_s20, 4  ;;  %s149_s21 = int_to_ptr.vmem [resolvable:$true] %s148_s21 }
   0x5   : > { %s814_s22 = smov 128   ;;  %s815_s23 = smov 8  }
   0x6   : > { %p750_p4 = pneg %p136_p3  ;;  %178 = sbr.rel (%p136_p3) target bundleno = 379 (0x17b), region = 36 }
   0x8   : > { %p751_p5 = pnand %p754_p2, %p750_p4 }
   0xa   : > { %753 = dma.hbm_to_vmem [thread:$0]  (!%p751_p5), %s147_s18, 4736, %s149_s21, [#allocation3], %s814_s22, %s814_s22, %s815_s23  }
   0xb   : > { %806 = dma.done.wait (%p754_p2), [#allocation3], 4736  }
   0xc   : > { %808 = vsyncadd (%p754_p2), [#allocation3], 4294962560  ;;  %p205_p6 = scmp.lt.s32.totalorder %s680_s19, 1  ;;  %v231_v0 = vld [vmem:[#allocation2 + $0x78] sm:$0xff]  ;;  %v230_v2 = vld [vmem:[#allocation2 + $0x70] sm:$0xff]  ;;  %vm300_vm0 = vcmask 1040384  }
   0xd   : > { %v247_v1 = vld [vmem:[#allocation2 + $0xf8] sm:$0xff]  ;;  %304 = vmatpush.msra.mxu0 %v231_v0  ;;  %v246_v3 = vld [vmem:[#allocation2 + $0xf0] sm:$0xff]  ;;  %v229_v4 = vld [vmem:[#allocation2 + $0x68] sm:$0xff]  ;;  %vm297_vm1 = vcmask 269312   ;;  %v816_v42 = vmov 0   ;;  %vm511_vm2 = vcmask 1041408  }
   0xe   : > { %s986_s19 = smov (!%p205_p6, %s680_s19), 1  ;;  %324 = vmatpush.msra.mxu1 %v247_v1  ;;  %v245_v5 = vld [vmem:[#allocation2 + $0xe8] sm:$0xff]  ;;  %v228_v6 = vld [vmem:[#allocation2 + $0x60] sm:$0xff]  ;;  %v227_v8 = vld [vmem:[#allocation2 + $0x58] sm:$0xff]  ;;  %768 = vset.pattern.permute.xlu0 %v816_v42  ;;  %vm486_vm3 = vcmask 31744   ;;  %vm596_vm4 = vcmask 199680  }
   0xf   : > { %305 = vmatpush.msra.mxu0 %v230_v2  ;;  %v244_v7 = vld [vmem:[#allocation2 + $0xe0] sm:$0xff]  ;;  %s745_s24 = smul.u32 12, %s986_s19  ;;  %v243_v9 = vld [vmem:[#allocation2 + $0xd8] sm:$0xff]  ;;  %v226_v12 = vld [vmem:[#allocation2 + $0x50] sm:$0xff]  ;;  %769 = vset.pattern.permute.xlu1 %v816_v42  ;;  %s734_s28 = sshll.u32 %s986_s19, 6 }
  0x10   : > { %325 = vmatpush.msra.mxu1 %v246_v3  ;;  %v252_v10 = vld [vmem:[#allocation2 + $0x120] sm:$0x1]  ;;  %v251_v11 = vld [vmem:[#allocation2 + $0x118] sm:$0xff]  ;;  %v242_v13 = vld [vmem:[#allocation2 + $0xd0] sm:$0xff]  ;;  %770 = vset.pattern.permute.xlu2 %v816_v42  ;;  %s943_s5 = scalar_lea.vmem %s984_s4, %s734_s28 }
  0x11   : > { %306 = vmatpush.msra.mxu0 %v229_v4  ;;  %690 = vmatpush.msk.msra.mxu2 %vm300_vm0, %v252_v10  ;;  %s209_s27 = scalar_lea.vmem %s980_s0, %s745_s24  ;;  %v250_v14 = vld [vmem:[#allocation2 + $0x110] sm:$0xff]  ;;  %v225_v15 = vld [vmem:[#allocation2 + $0x48] sm:$0xff]  ;;  %v224_v19 = vld [vmem:[#allocation2 + $0x40] sm:$0xff] }
  0x12   : > { %326 = vmatpush.msra.mxu1 %v245_v5  ;;  %v241_v16 = vld [vmem:[#allocation2 + $0xc8] sm:$0xff]  ;;  %v286_v18 = vld [vmem:[%s209_s27 + $0x8] sm:$0xf]  ;;  %v285_v21 = vld [vmem:[%s209_s27] sm:$0xff] }
  0x13   : > { %307 = vmatpush.msra.mxu0 %v228_v6  ;;  %356 = vmatpush.msra.mxu2 %v251_v11  ;;  %v249_v17 = vld [vmem:[#allocation2 + $0x108] sm:$0xff]  ;;  %v240_v20 = vld [vmem:[#allocation2 + $0xc0] sm:$0xff]  ;;  %291 = vst [vmem:[#allocation1 + $0x10] ss:$2 sm:$0xff] %v286_v18  ;;  %v223_v23 = vld [vmem:[#allocation2 + $0x38] sm:$0xff] }
  0x14   : > { %327 = vmatpush.msra.mxu1 %v244_v7  ;;  %v248_v22 = vld [vmem:[#allocation2 + $0x100] sm:$0xff]  ;;  %289 = vst [vmem:[#allocation1] ss:$2 sm:$0xff] %v285_v21  ;;  %v239_v24 = vld [vmem:[#allocation2 + $0xb8] sm:$0xff]  ;;  %v222_v25 = vld [vmem:[#allocation2 + $0x30] sm:$0xff] }
  0x15   : > { %308 = vmatpush.msra.mxu0 %v227_v8  ;;  %357 = vmatpush.msra.mxu2 %v250_v14  ;;  %v238_v26 = vld [vmem:[#allocation2 + $0xb0] sm:$0xff]  ;;  %v221_v27 = vld [vmem:[#allocation2 + $0x28] sm:$0xff]  ;;  %v220_v30 = vld [vmem:[#allocation2 + $0x20] sm:$0xff] }
  0x16   : > { %328 = vmatpush.msra.mxu1 %v243_v9  ;;  %v237_v28 = vld [vmem:[#allocation2 + $0xa8] sm:$0xff]  ;;  %v236_v31 = vld [vmem:[#allocation2 + $0xa0] sm:$0xff]  ;;  %v219_v32 = vld [vmem:[#allocation2 + $0x18] sm:$0xff] }
  0x17   : > { %309 = vmatpush.msra.mxu0 %v226_v12  ;;  %358 = vmatpush.msra.mxu2 %v249_v17  ;;  %v235_v33 = vld [vmem:[#allocation2 + $0x98] sm:$0xff]  ;;  %v218_v34 = vld [vmem:[#allocation2 + $0x10] sm:$0xff]  ;;  %v217_v36 = vld [vmem:[#allocation2 + $0x8] sm:$0xff] }
  0x18   : > { %329 = vmatpush.msra.mxu1 %v242_v13  ;;  %v234_v35 = vld [vmem:[#allocation2 + $0x90] sm:$0xff]  ;;  %v233_v37 = vld [vmem:[#allocation2 + $0x88] sm:$0xff]  ;;  %v216_v38 = vld [vmem:[#allocation2] sm:$0xff] }
  0x19   : > { %310 = vmatpush.msra.mxu0 %v225_v15  ;;  %359 = vmatpush.msra.mxu2 %v248_v22  ;;  %v232_v39 = vld [vmem:[#allocation2 + $0x80] sm:$0xff]  ;;  %v269_v43 = vld [vmem:[%s983_s3] sm:$0xff]  ;;  %v271_v45 = vld [vmem:[%s983_s3 + $0x10] sm:$0xff] }
  0x1a   : > { %330 = vmatpush.msra.mxu1 %v241_v16  ;;  %v294_v29 = vld.sshfl [vmem:[#allocation1 + $0x10] sm:$0xff pattern:$0x75316420]  ;;  %368 = vperm.xlu0 %768, %v269_v43   ;;  %v270_v44 = vld [vmem:[%s983_s3 + $0x8] sm:$0xff]  ;;  %v272_v47 = vld [vmem:[%s983_s3 + $0x18] sm:$0xff] }
  0x1b   : > { %311 = vmatpush.msra.mxu0 %v224_v19  ;;  %691 = vmatmul.msk.f32.vlgmr.msra.gmra.mxu2 %vm297_vm1, %v294_v29  ;;  %v292_v40 = vld.sshfl [vmem:[#allocation1] sm:$0xff pattern:$0x75316420]  ;;  %v293_v41 = vld.sshfl [vmem:[#allocation1 + $0x8] sm:$0xff pattern:$0x75316420] }
  0x1c   : > { %331 = vmatpush.msra.mxu1 %v240_v20  ;;  %378 = vperm.xlu1 %769, %v271_v45   ;;  %v275_v46 = vld [vmem:[%s983_s3 + $0x30] sm:$0xff]  ;;  %v278_v48 = vld [vmem:[%s983_s3 + $0x48] sm:$0xff]  ;;  %v273_v49 = vld [vmem:[%s983_s3 + $0x20] sm:$0xff] }
  0x1d   : > { %312 = vmatpush.msra.mxu0 %v223_v23  ;;  %388 = vperm.xlu2 %770, %v273_v49   ;;  %v276_v55 = vld [vmem:[%s983_s3 + $0x38] sm:$0xff]  ;;  %v281_v56 = vld [vmem:[%s983_s3 + $0x60] sm:$0xff]  ;;  %v736_v60 = vld [vmem:[%s982_s2 + $0x8] sm:$0xff] }
  0x1e   : > { %332 = vmatpush.msra.mxu1 %v239_v24  ;;  %v735_v61 = vld [vmem:[%s982_s2] sm:$0xff]  ;;  %v274_v63 = vld [vmem:[%s983_s3 + $0x28] sm:$0xff]  ;;  %v279_v0 = vld [vmem:[%s983_s3 + $0x50] sm:$0xff] }
  0x1f   : > { %313 = vmatpush.msra.mxu0 %v222_v25  ;;  %v739_v62 = vld [vmem:[%s982_s2 + $0x20] sm:$0xff]  ;;  %v284_v1 = vld [vmem:[%s983_s3 + $0x78] sm:$0xff]  ;;  %v282_v3 = vld [vmem:[%s983_s3 + $0x68] sm:$0xff] }
  0x20   : > { %333 = vmatpush.msra.mxu1 %v238_v26  ;;  %v277_v2 = vld [vmem:[%s983_s3 + $0x40] sm:$0xff]  ;;  %v737_v4 = vld [vmem:[%s982_s2 + $0x10] sm:$0xff]  ;;  %v740_v5 = vld [vmem:[%s982_s2 + $0x28] sm:$0xff] }
  0x21   : > { %314 = vmatpush.msra.mxu0 %v221_v27  ;;  %v280_v6 = vld [vmem:[%s983_s3 + $0x58] sm:$0xff]  ;;  %v283_v7 = vld [vmem:[%s983_s3 + $0x70] sm:$0xff] }
  0x22   : > { %334 = vmatpush.msra.mxu1 %v237_v28  ;;  %373 = vperm.xlu0 %768, %v270_v44   ;;  %v738_v8 = vld [vmem:[%s982_s2 + $0x18] sm:$0xff]  ;;  %v741_v9 = vld [vmem:[%s982_s2 + $0x30] sm:$0xff] }
  0x23   : > { %315 = vmatpush.msra.mxu0 %v220_v30  ;;  %v742_v10 = vld [vmem:[%s982_s2 + $0x38] sm:$0xff] }
  0x24   : > { %335 = vmatpush.msra.mxu1 %v236_v31  ;;  %383 = vperm.xlu1 %769, %v272_v47  }
  0x25   : > { %316 = vmatpush.msra.mxu0 %v219_v32  ;;  %393 = vperm.xlu2 %770, %v274_v63  }
  0x26   : > { %336 = vmatpush.msra.mxu1 %v235_v33 }
  0x27   : > { %317 = vmatpush.msra.mxu0 %v218_v34 }
  0x28   : > { %337 = vmatpush.msra.mxu1 %v234_v35 }
  0x29   : > { %318 = vmatpush.msra.mxu0 %v217_v36 }
  0x2a   : > { %338 = vmatpush.msra.mxu1 %v233_v37  ;;  %398 = vperm.xlu0 %768, %v275_v46  }
  0x2b   : > { %319 = vmatpush.msra.mxu0 %v216_v38 }
  0x2c   : > { %339 = vmatpush.msra.mxu1 %v232_v39  ;;  %320 = vmatmul.f32.vlgmr.msra.gmra.mxu0 %v292_v40 }
  0x2d   : > { %340 = vmatmul.f32.vlgmr.msra.gmra.mxu1 %v293_v41  ;;  %403 = vperm.xlu1 %769, %v276_v55  }
  0x2e   : > { %408 = vperm.xlu2 %770, %v277_v2  }
  0x32   : > { %413 = vperm.xlu0 %768, %v278_v48  }
  0x35   : > { %418 = vperm.xlu1 %769, %v279_v0  }
  0x36   : > { %423 = vperm.xlu2 %770, %v280_v6  }
  0x3a   : > { %428 = vperm.xlu0 %768, %v281_v56  }
  0x3d   : > { %433 = vperm.xlu1 %769, %v282_v3  }
  0x3e   : > { %438 = vperm.xlu2 %770, %v283_v7  }
  0x42   : > { %443 = vperm.xlu0 %768, %v284_v1  }
  0x77   : > { %v389_v12 = vpop.permute.xlu2 %388 }
  0x7f   : > { %v394_v15 = vpop.permute.xlu2 %393 }
  0x88   : > { %v409_v21 = vpop.permute.xlu2 %408 }
  0x8c   : > { %v369_v11 = vpop.permute.xlu0 %368 }
  0x8e   : > { %v379_v13 = vpop.permute.xlu1 %378 }
  0x90   : > { %v424_v55 = vpop.permute.xlu2 %423 }
  0x94   : > { %v374_v14 = vpop.permute.xlu0 %373 }
  0x96   : > { %v384_v17 = vpop.permute.xlu1 %383 }
  0x9c   : > { %v399_v20 = vpop.permute.xlu0 %398 }
  0x9e   : > { %v361_v50 = vpop.f32.mrf.mxu2 }
  0x9f   : > { %v404_v32 = vpop.permute.xlu1 %403 }
  0xa4   : > { %v414_v37 = vpop.permute.xlu0 %413 }
  0xa7   : > { %v419_v45 = vpop.permute.xlu1 %418 }
  0xa9   : > { %v321_v51 = vpop.f32.mrf.mxu0 }
  0xaa   : > { %v341_v52 = vpop.f32.mrf.mxu1 }
  0xab   : > { %v342_v53 = vadd.f32 %v341_v52, %v321_v51 }
  0xac   : > { %v429_v0 = vpop.permute.xlu0 %428 }
  0xad   : > { %v362_v54 = vadd.f32 %v361_v50, %v342_v53 }
  0xaf   : > { %v364_v57 = vmul.f32 0.04, %v362_v54 }
  0xb1   : > { %v365_v58 = vpack.c.bf16 %v364_v57, %v364_v57 }
  0xb3   : > { %v513_v59 = vsel %vm511_vm2, %v365_v58, 0 }
  0xb4   : > { %522 = vmatpush.bf16.msrb.mxu0 %v513_v59  ;;  %743 = vmatpush.bf16.msrb.mxu2 %v513_v59 }
  0xb5   : > { %744 = vmatpush.bf16.msra.mxu3 %v513_v59 }
  0xb7   : > { %725 = vmatmul.msk.bf16.vlgmr.msrb.gmra.mxu2 %vm486_vm3, %v736_v60  ;;  %724 = vmatmul.msk.bf16.vlgmr.msrb.gmra.mxu0 %vm486_vm3, %v735_v61 }
  0xb8   : > { %728 = vmatmul.msk.bf16.vlgmr.msra.gmra.mxu3 %vm486_vm3, %v739_v62 }
  0xc7   : > { %726 = vmatmul.msk.bf16.gmra.mxu2 %vm486_vm3, %v737_v4 }
  0xc8   : > { %729 = vmatmul.msk.bf16.gmra.mxu3 %vm486_vm3, %v740_v5 }
  0xd7   : > { %727 = vmatmul.msk.bf16.gmra.mxu2 %vm486_vm3, %v738_v8 }
  0xd8   : > { %730 = vmatmul.msk.bf16.gmra.mxu3 %vm486_vm3, %v741_v9  ;;  %v434_v9 = vpop.permute.xlu1 %433 }
  0xe8   : > { %731 = vmatmul.msk.bf16.gmra.mxu3 %vm486_vm3, %v742_v10 }
 0x134   : > { %v524_v16 = vpop.f32.mrf.mxu0 }
 0x135   : > { %v525_v18 = vadd.f32 %v524_v16, %v369_v11 }
 0x137   : > { %v564_v19 = vmax.f32 %v525_v18, 0.0 }
 0x139   : > { %v580_v22 = vpack.c.bf16 %v564_v19, %v564_v19 }
 0x13a   : > { %v529_v23 = vpop.f32.mrf.mxu2 }
 0x13b   : > { %v530_v24 = vadd.f32 %v529_v23, %v379_v13  ;;  %v544_v25 = vpop.f32.mrf.mxu3  ;;  %597 = vst.msk [vmem:[%s943_s5] sm:$0xf] %vm596_vm4, %v580_v22  ;;  %v444_v22 = vpop.permute.xlu0 %443 }
 0x13c   : > { %v545_v26 = vadd.f32 %v544_v25, %v409_v21  ;;  %v526_v27 = vpop.f32.mrf.mxu0 }
 0x13d   : > { %v566_v28 = vmax.f32 %v530_v24, 0.0  ;;  %v527_v29 = vadd.f32 %v526_v27, %v374_v14 }
 0x13e   : > { %v572_v30 = vmax.f32 %v545_v26, 0.0 }
 0x13f   : > { %v582_v31 = vpack.c.bf16 %v566_v28, %v566_v28  ;;  %v565_v33 = vmax.f32 %v527_v29, 0.0 }
 0x140   : > { %v588_v34 = vpack.c.bf16 %v572_v30, %v572_v30 }
 0x141   : > { %599 = vst.msk [vmem:[%s943_s5 + $0x8] sm:$0xf] %vm596_vm4, %v582_v31  ;;  %v581_v35 = vpack.c.bf16 %v565_v33, %v565_v33 }
 0x142   : > { %605 = vst.msk [vmem:[%s943_s5 + $0x20] sm:$0xf] %vm596_vm4, %v588_v34  ;;  %v531_v36 = vpop.f32.mrf.mxu2 }
 0x143   : > { %v532_v38 = vadd.f32 %v531_v36, %v384_v17  ;;  %v546_v39 = vpop.f32.mrf.mxu3  ;;  %598 = vst.msk [vmem:[%s943_s5 + $0x4] sm:$0xf] %vm596_vm4, %v581_v35  ;;  %v439_v17 = vpop.permute.xlu2 %438 }
 0x144   : > { %v547_v40 = vadd.f32 %v546_v39, %v414_v37 }
 0x145   : > { %v567_v41 = vmax.f32 %v532_v38, 0.0 }
 0x146   : > { %v573_v42 = vmax.f32 %v547_v40, 0.0 }
 0x147   : > { %v583_v43 = vpack.c.bf16 %v567_v41, %v567_v41 }
 0x148   : > { %v589_v44 = vpack.c.bf16 %v573_v42, %v573_v42 }
 0x149   : > { %600 = vst.msk [vmem:[%s943_s5 + $0xc] sm:$0xf] %vm596_vm4, %v583_v43 }
 0x14a   : > { %606 = vst.msk [vmem:[%s943_s5 + $0x24] sm:$0xf] %vm596_vm4, %v589_v44  ;;  %v534_v46 = vpop.f32.mrf.mxu2 }
 0x14b   : > { %v535_v47 = vadd.f32 %v534_v46, %v389_v12  ;;  %v549_v48 = vpop.f32.mrf.mxu3 }
 0x14c   : > { %v550_v49 = vadd.f32 %v549_v48, %v419_v45 }
 0x14d   : > { %v568_v50 = vmax.f32 %v535_v47, 0.0 }
 0x14e   : > { %v574_v51 = vmax.f32 %v550_v49, 0.0 }
 0x14f   : > { %v584_v52 = vpack.c.bf16 %v568_v50, %v568_v50 }
 0x150   : > { %v590_v53 = vpack.c.bf16 %v574_v51, %v574_v51 }
 0x151   : > { %601 = vst.msk [vmem:[%s943_s5 + $0x10] sm:$0xf] %vm596_vm4, %v584_v52 }
 0x152   : > { %607 = vst.msk [vmem:[%s943_s5 + $0x28] sm:$0xf] %vm596_vm4, %v590_v53  ;;  %v536_v54 = vpop.f32.mrf.mxu2 }
 0x153   : > { %v537_v56 = vadd.f32 %v536_v54, %v394_v15  ;;  %v551_v57 = vpop.f32.mrf.mxu3 }
 0x154   : > { %v552_v58 = vadd.f32 %v551_v57, %v424_v55 }
 0x155   : > { %v569_v59 = vmax.f32 %v537_v56, 0.0 }
 0x156   : > { %v575_v60 = vmax.f32 %v552_v58, 0.0 }
 0x157   : > { %v585_v61 = vpack.c.bf16 %v569_v59, %v569_v59 }
 0x158   : > { %v591_v62 = vpack.c.bf16 %v575_v60, %v575_v60 }
 0x159   : > { %602 = vst.msk [vmem:[%s943_s5 + $0x14] sm:$0xf] %vm596_vm4, %v585_v61 }
 0x15a   : > { %608 = vst.msk [vmem:[%s943_s5 + $0x2c] sm:$0xf] %vm596_vm4, %v591_v62  ;;  %v539_v63 = vpop.f32.mrf.mxu2 }
 0x15b   : > { %v540_v1 = vadd.f32 %v539_v63, %v399_v20  ;;  %v554_v2 = vpop.f32.mrf.mxu3 }
 0x15c   : > { %v555_v3 = vadd.f32 %v554_v2, %v429_v0 }
 0x15d   : > { %v570_v4 = vmax.f32 %v540_v1, 0.0 }
 0x15e   : > { %v576_v5 = vmax.f32 %v555_v3, 0.0 }
 0x15f   : > { %v586_v6 = vpack.c.bf16 %v570_v4, %v570_v4 }
 0x160   : > { %v592_v7 = vpack.c.bf16 %v576_v5, %v576_v5 }
 0x161   : > { %603 = vst.msk [vmem:[%s943_s5 + $0x18] sm:$0xf] %vm596_vm4, %v586_v6 }
 0x162   : > { %609 = vst.msk [vmem:[%s943_s5 + $0x30] sm:$0xf] %vm596_vm4, %v592_v7  ;;  %v541_v8 = vpop.f32.mrf.mxu2 }
 0x163   : > { %v542_v10 = vadd.f32 %v541_v8, %v404_v32  ;;  %v556_v11 = vpop.f32.mrf.mxu3 }
 0x164   : > { %v557_v12 = vadd.f32 %v556_v11, %v434_v9 }
 0x165   : > { %v571_v13 = vmax.f32 %v542_v10, 0.0 }
 0x166   : > { %v577_v14 = vmax.f32 %v557_v12, 0.0 }
 0x167   : > { %v587_v15 = vpack.c.bf16 %v571_v13, %v571_v13 }
 0x168   : > { %v593_v16 = vpack.c.bf16 %v577_v14, %v577_v14 }
 0x169   : > { %604 = vst.msk [vmem:[%s943_s5 + $0x1c] sm:$0xf] %vm596_vm4, %v587_v15 }
 0x16a   : > { %610 = vst.msk [vmem:[%s943_s5 + $0x34] sm:$0xf] %vm596_vm4, %v593_v16 }
 0x16b   : > { %v559_v18 = vpop.f32.mrf.mxu3 }
 0x16c   : > { %v560_v19 = vadd.f32 %v559_v18, %v439_v17 }
 0x16e   : > { %v578_v20 = vmax.f32 %v560_v19, 0.0 }
 0x170   : > { %v594_v21 = vpack.c.bf16 %v578_v20, %v578_v20 }
 0x172   : > { %611 = vst.msk [vmem:[%s943_s5 + $0x38] sm:$0xf] %vm596_vm4, %v594_v21 }
 0x173   : > { %v561_v23 = vpop.f32.mrf.mxu3 }
 0x174   : > { %v562_v24 = vadd.f32 %v561_v23, %v444_v22 }
 0x176   : > { %v579_v25 = vmax.f32 %v562_v24, 0.0 }
 0x178   : > { %v595_v26 = vpack.c.bf16 %v579_v25, %v579_v25 }
 0x17a   : > { %612 = vst.msk [vmem:[%s943_s5 + $0x3c] sm:$0xf] %vm596_vm4, %v595_v26 }
 0x17b PF: > { %s15_s15 = sadd.s32 1, %s811_s15  }
 0x17c   : > { %p12_p7 = scmp.ge.s32.totalorder %s15_s15, 4  }
 0x17e   :  { %14 = sbr.rel (!%p12_p7) target bundleno = 1 (0x1), region = 72 }
 0x183   :  { %634 = vsyncpa [#allocation3], 1 }
 0x184   :  { %636 = vsyncpa [#allocation3 + $0x1], 1 }

// kernel: _lambda_.3
= control target key start
LH: loop header
LB: loop body
LE: loop exit
PB: predicated region body
PF: predicated region fallthrough
CT: control target
= control target key end

     0   :  { %10 = vsyncpa [#allocation3], 0  ;;  %s16561_s0 = inlined_call_operand.vmem [shape: bf16[2,3200], index: 0, kind: input, shape index: {}]   ;;  %s16562_s1 = inlined_call_operand.hbm [shape: bf16[3200,768], index: 1, kind: input, shape index: {}]   ;;  %s16563_s2 = inlined_call_operand.hbm [shape: f32[1,768], index: 2, kind: input, shape index: {}]   ;;  %s16564_s3 = inlined_call_operand.hbm [shape: bf16[768,128], index: 3, kind: input, shape index: {}]   ;;  %s16565_s4 = inlined_call_operand.hbm [shape: f32[1,128], index: 4, kind: input, shape index: {}]   ;;  %s16566_s5 = inlined_call_operand.hbm [shape: f32[2,128], index: 5, kind: output, shape index: {}]  }
   0x1   :  { %11 = vsyncpa [#allocation6], 0 }
   0x2   :  { %12 = vsyncpa [#allocation9], 0  ;;  %s34_s20 = sshll.u32 %s16563_s2, 4  ;;  %s35_s20 = int_to_ptr.hbm [resolvable:$true] %s34_s20 }
   0x3   :  { %13 = vsyncpa [#allocation4], 0  ;;  %s16192_s21 = smov [#allocation5]   ;;  %s20_s25 = sshll.u32 %s16562_s1, 4  ;;  %s21_s25 = int_to_ptr.hbm [resolvable:$true] %s20_s25 }
   0x4   :  { %s36_s22 = sshll.u32 %s16192_s21, 4  ;;  %s16193_s26 = smov [#allocation2]   ;;  %s37_s22 = int_to_ptr.vmem [resolvable:$true] %s36_s22 }
   0x5   :  { %39 = dma.hbm_to_vmem [thread:$0]  %s35_s20, 96, %s37_s22, [#allocation6]  }
   0x6   :  { %s22_s27 = sshll.u32 %s16193_s26, 4  ;;  %s16194_s28 = smov 384   ;;  %s23_s27 = int_to_ptr.vmem [resolvable:$true] %s22_s27 }
   0x7   :  { %s16195_s29 = smov 24   ;;  %s44_s2 = sshll.u32 %s16564_s3, 4  ;;  %s45_s2 = int_to_ptr.hbm [resolvable:$true] %s44_s2 }
   0x8   :  { %28 = dma.hbm_to_vmem [thread:$0]  %s21_s25, 153600, %s23_s27, [#allocation3], %s16194_s28, %s16194_s28, %s16195_s29  }
   0x9   :  { %s16196_s7 = smov [#allocation7]   ;;  %s58_s1 = sshll.u32 %s16565_s4, 4  ;;  %s59_s1 = int_to_ptr.hbm [resolvable:$true] %s58_s1 }
   0xa   :  { %s46_s8 = sshll.u32 %s16196_s7, 4  ;;  %s16197_s11 = smov 64   ;;  %s47_s8 = int_to_ptr.vmem [resolvable:$true] %s46_s8 }
   0xb   :  { %s16198_s12 = smov 4   ;;  %s16199_s13 = smov [#allocation8]  }
   0xc   :  { %52 = dma.hbm_to_vmem [thread:$0]  %s45_s2, 6144, %s47_s8, [#allocation6], %s16197_s11, %s16197_s11, %s16198_s12  }
   0xd   :  { %s60_s14 = sshll.u32 %s16199_s13, 4  ;;  %s61_s14 = int_to_ptr.vmem [resolvable:$true] %s60_s14 }
   0xe   :  { %63 = dma.hbm_to_vmem [thread:$0]  %s59_s1, 16, %s61_s14, [#allocation9]  }
   0xf   :  { %16184 = dma.done.wait [#allocation3], 153600  }
  0x10   :  { %16185 = vsyncadd [#allocation3], 4294813696 }
  0x11   :  { %16186 = dma.done.wait [#allocation6], 6240  }
  0x12   :  { %16187 = vsyncadd [#allocation6], 4294961056 }
  0x13   :  { %16188 = dma.done.wait [#allocation9], 16  }
  0x14   :  { %16189 = vsyncadd [#allocation9], 4294967280  ;;  %v9974_v0 = vld [vmem:[#allocation2 + $0x150] sm:$0xf]  ;;  %v14841_v1 = vld [vmem:[#allocation2 + $0x164] sm:$0xf0] }
  0x15   :  { %v10166_v2 = vld [vmem:[#allocation2 + $0x2d0] sm:$0xf]  ;;  %v9975_v3 = vor.u32 %v14841_v1, %v9974_v0  ;;  %v14889_v4 = vld [vmem:[#allocation2 + $0x2e4] sm:$0xf0]  ;;  %v9950_v11 = vld [vmem:[#allocation2 + $0x120] sm:$0xf] }
  0x16   :  { %v10358_v5 = vld [vmem:[#allocation2 + $0x450] sm:$0xf]  ;;  %v14937_v6 = vld [vmem:[#allocation2 + $0x464] sm:$0xf0]  ;;  %v10167_v7 = vor.u32 %v14889_v4, %v10166_v2  ;;  %v14835_v13 = vld [vmem:[#allocation2 + $0x134] sm:$0xf0] }
  0x17   :  { %v10359_v8 = vor.u32 %v14937_v6, %v10358_v5  ;;  %v10550_v9 = vld [vmem:[#allocation2 + $0x5d0] sm:$0xf]  ;;  %v14985_v10 = vld [vmem:[#allocation2 + $0x5e4] sm:$0xf0]  ;;  %7356 = vmatpush.bf16.msra.mxu0 %v9975_v3  ;;  %v10142_v14 = vld [vmem:[#allocation2 + $0x2a0] sm:$0xf]  ;;  %v9951_v16 = vor.u32 %v14835_v13, %v9950_v11 }
  0x18   :  { %v10551_v12 = vor.u32 %v14985_v10, %v10550_v9  ;;  %v14883_v15 = vld [vmem:[#allocation2 + $0x2b4] sm:$0xf0]  ;;  %7369 = vmatpush.bf16.msra.mxu1 %v10167_v7  ;;  %v10334_v18 = vld [vmem:[#allocation2 + $0x420] sm:$0xf]  ;;  %v9926_v23 = vld [vmem:[#allocation2 + $0xf0] sm:$0xf] }
  0x19   :  { %7382 = vmatpush.bf16.msra.mxu2 %v10359_v8  ;;  %v10143_v17 = vor.u32 %v14883_v15, %v10142_v14  ;;  %v14931_v19 = vld [vmem:[#allocation2 + $0x434] sm:$0xf0]  ;;  %v10526_v20 = vld [vmem:[#allocation2 + $0x5a0] sm:$0xf]  ;;  %v14829_v24 = vld [vmem:[#allocation2 + $0x104] sm:$0xf0] }
  0x1a   :  { %7395 = vmatpush.bf16.msra.mxu3 %v10551_v12  ;;  %v10335_v21 = vor.u32 %v14931_v19, %v10334_v18  ;;  %v14979_v22 = vld [vmem:[#allocation2 + $0x5b4] sm:$0xf0]  ;;  %v10118_v26 = vld [vmem:[#allocation2 + $0x270] sm:$0xf]  ;;  %v14877_v27 = vld [vmem:[#allocation2 + $0x284] sm:$0xf0]  ;;  %v9927_v29 = vor.u32 %v14829_v24, %v9926_v23 }
  0x1b   :  { %v10527_v25 = vor.u32 %v14979_v22, %v10526_v20  ;;  %v10310_v28 = vld [vmem:[#allocation2 + $0x3f0] sm:$0xf]  ;;  %7357 = vmatpush.bf16.msra.mxu0 %v9951_v16  ;;  %v14925_v30 = vld [vmem:[#allocation2 + $0x404] sm:$0xf0]  ;;  %v10119_v33 = vor.u32 %v14877_v27, %v10118_v26  ;;  %v9902_v35 = vld [vmem:[#allocation2 + $0xc0] sm:$0xf] }
  0x1c   :  { %v10502_v31 = vld [vmem:[#allocation2 + $0x570] sm:$0xf]  ;;  %v14973_v32 = vld [vmem:[#allocation2 + $0x584] sm:$0xf0]  ;;  %7370 = vmatpush.bf16.msra.mxu1 %v10143_v17  ;;  %v10311_v34 = vor.u32 %v14925_v30, %v10310_v28  ;;  %v14823_v36 = vld [vmem:[#allocation2 + $0xd4] sm:$0xf0] }
  0x1d   :  { %7383 = vmatpush.bf16.msra.mxu2 %v10335_v21  ;;  %v10094_v37 = vld [vmem:[#allocation2 + $0x240] sm:$0xf]  ;;  %v10503_v38 = vor.u32 %v14973_v32, %v10502_v31  ;;  %v14871_v39 = vld [vmem:[#allocation2 + $0x254] sm:$0xf0]  ;;  %v9903_v44 = vor.u32 %v14823_v36, %v9902_v35  ;;  %v9878_v47 = vld [vmem:[#allocation2 + $0x90] sm:$0xf] }
  0x1e   :  { %7396 = vmatpush.bf16.msra.mxu3 %v10527_v25  ;;  %v10286_v40 = vld [vmem:[#allocation2 + $0x3c0] sm:$0xf]  ;;  %v14919_v41 = vld [vmem:[#allocation2 + $0x3d4] sm:$0xf0]  ;;  %v10095_v45 = vor.u32 %v14871_v39, %v10094_v37  ;;  %v14817_v48 = vld [vmem:[#allocation2 + $0xa4] sm:$0xf0] }
  0x1f   :  { %v10478_v42 = vld [vmem:[#allocation2 + $0x540] sm:$0xf]  ;;  %v14967_v43 = vld [vmem:[#allocation2 + $0x554] sm:$0xf0]  ;;  %7358 = vmatpush.bf16.msra.mxu0 %v9927_v29  ;;  %v10287_v46 = vor.u32 %v14919_v41, %v10286_v40  ;;  %v10070_v49 = vld [vmem:[#allocation2 + $0x210] sm:$0xf]  ;;  %v9879_v56 = vor.u32 %v14817_v48, %v9878_v47 }
  0x20   :  { %7371 = vmatpush.bf16.msra.mxu1 %v10119_v33  ;;  %v10479_v50 = vor.u32 %v14967_v43, %v10478_v42  ;;  %v14865_v51 = vld [vmem:[#allocation2 + $0x224] sm:$0xf0]  ;;  %v10262_v52 = vld [vmem:[#allocation2 + $0x390] sm:$0xf]  ;;  %v9854_v59 = vld [vmem:[#allocation2 + $0x60] sm:$0xf] }
  0x21   :  { %7384 = vmatpush.bf16.msra.mxu2 %v10311_v34  ;;  %v14913_v53 = vld [vmem:[#allocation2 + $0x3a4] sm:$0xf0]  ;;  %v10454_v54 = vld [vmem:[#allocation2 + $0x510] sm:$0xf]  ;;  %v10071_v57 = vor.u32 %v14865_v51, %v10070_v49  ;;  %v14811_v60 = vld [vmem:[#allocation2 + $0x74] sm:$0xf0] }
  0x22   :  { %7397 = vmatpush.bf16.msra.mxu3 %v10503_v38  ;;  %v14961_v55 = vld [vmem:[#allocation2 + $0x524] sm:$0xf0]  ;;  %v10263_v58 = vor.u32 %v14913_v53, %v10262_v52  ;;  %v10046_v61 = vld [vmem:[#allocation2 + $0x1e0] sm:$0xf]  ;;  %v14859_v63 = vld [vmem:[#allocation2 + $0x1f4] sm:$0xf0]  ;;  %v9855_v4 = vor.u32 %v14811_v60, %v9854_v59 }
  0x23   :  { %7359 = vmatpush.bf16.msra.mxu0 %v9903_v44  ;;  %v10455_v62 = vor.u32 %v14961_v55, %v10454_v54  ;;  %v10238_v0 = vld [vmem:[#allocation2 + $0x360] sm:$0xf]  ;;  %v14907_v1 = vld [vmem:[#allocation2 + $0x374] sm:$0xf0]  ;;  %v10047_v5 = vor.u32 %v14859_v63, %v10046_v61  ;;  %v9830_v7 = vld [vmem:[#allocation2 + $0x30] sm:$0xf] }
  0x24   :  { %7372 = vmatpush.bf16.msra.mxu1 %v10095_v45  ;;  %v10430_v2 = vld [vmem:[#allocation2 + $0x4e0] sm:$0xf]  ;;  %v14955_v3 = vld [vmem:[#allocation2 + $0x4f4] sm:$0xf0]  ;;  %v10239_v6 = vor.u32 %v14907_v1, %v10238_v0  ;;  %v14805_v8 = vld [vmem:[#allocation2 + $0x44] sm:$0xf0] }
  0x25   :  { %7385 = vmatpush.bf16.msra.mxu2 %v10287_v46  ;;  %v10022_v9 = vld [vmem:[#allocation2 + $0x1b0] sm:$0xf]  ;;  %v10431_v10 = vor.u32 %v14955_v3, %v10430_v2  ;;  %v14853_v11 = vld [vmem:[#allocation2 + $0x1c4] sm:$0xf0]  ;;  %v9831_v16 = vor.u32 %v14805_v8, %v9830_v7  ;;  %v9806_v17 = vld [vmem:[#allocation2] sm:$0xf] }
  0x26   :  { %7398 = vmatpush.bf16.msra.mxu3 %v10479_v50  ;;  %v10214_v12 = vld [vmem:[#allocation2 + $0x330] sm:$0xf]  ;;  %v14901_v13 = vld [vmem:[#allocation2 + $0x344] sm:$0xf0]  ;;  %v14799_v18 = vld [vmem:[#allocation2 + $0x14] sm:$0xf0]  ;;  %v10023_v19 = vor.u32 %v14853_v11, %v10022_v9 }
  0x27   :  { %7360 = vmatpush.bf16.msra.mxu0 %v9879_v56  ;;  %v10406_v14 = vld [vmem:[#allocation2 + $0x4b0] sm:$0xf]  ;;  %v14949_v15 = vld [vmem:[#allocation2 + $0x4c4] sm:$0xf0]  ;;  %v10215_v20 = vor.u32 %v14901_v13, %v10214_v12  ;;  %v9998_v21 = vld [vmem:[#allocation2 + $0x180] sm:$0xf]  ;;  %v9807_v31 = vor.u32 %v14799_v18, %v9806_v17 }
  0x28   :  { %7373 = vmatpush.bf16.msra.mxu1 %v10071_v57  ;;  %v14847_v22 = vld [vmem:[#allocation2 + $0x194] sm:$0xf0]  ;;  %v10190_v23 = vld [vmem:[#allocation2 + $0x300] sm:$0xf]  ;;  %v10407_v24 = vor.u32 %v14949_v15, %v10406_v14  ;;  %v10742_v28 = vld [vmem:[#allocation2 + $0x750] sm:$0xf] }
  0x29   :  { %7386 = vmatpush.bf16.msra.mxu2 %v10263_v58  ;;  %v14895_v25 = vld [vmem:[#allocation2 + $0x314] sm:$0xf0]  ;;  %v10382_v26 = vld [vmem:[#allocation2 + $0x480] sm:$0xf]  ;;  %v15033_v29 = vld [vmem:[#allocation2 + $0x764] sm:$0xf0]  ;;  %v9999_v35 = vor.u32 %v14847_v22, %v9998_v21 }
  0x2a   :  { %7399 = vmatpush.bf16.msra.mxu3 %v10455_v62  ;;  %v14943_v27 = vld [vmem:[#allocation2 + $0x494] sm:$0xf0]  ;;  %v10934_v30 = vld [vmem:[#allocation2 + $0x8d0] sm:$0xf]  ;;  %v15081_v32 = vld [vmem:[#allocation2 + $0x8e4] sm:$0xf0]  ;;  %v10191_v36 = vor.u32 %v14895_v25, %v10190_v23  ;;  %v10743_v40 = vor.u32 %v15033_v29, %v10742_v28 }
  0x2b   :  { %7361 = vmatpush.bf16.msra.mxu0 %v9855_v4  ;;  %v11126_v33 = vld [vmem:[#allocation2 + $0xa50] sm:$0xf]  ;;  %v15129_v34 = vld [vmem:[#allocation2 + $0xa64] sm:$0xf0]  ;;  %v10383_v39 = vor.u32 %v14943_v27, %v10382_v26  ;;  %v10935_v41 = vor.u32 %v15081_v32, %v10934_v30  ;;  %v10718_v43 = vld [vmem:[#allocation2 + $0x720] sm:$0xf] }
  0x2c   :  { %7374 = vmatpush.bf16.msra.mxu1 %v10047_v5  ;;  %v11318_v37 = vld [vmem:[#allocation2 + $0xbd0] sm:$0xf]  ;;  %v15177_v38 = vld [vmem:[#allocation2 + $0xbe4] sm:$0xf0]  ;;  %v11127_v42 = vor.u32 %v15129_v34, %v11126_v33  ;;  %v15027_v44 = vld [vmem:[#allocation2 + $0x734] sm:$0xf0] }
  0x2d   :  { %7387 = vmatpush.bf16.msra.mxu2 %v10239_v6  ;;  %v10910_v45 = vld [vmem:[#allocation2 + $0x8a0] sm:$0xf]  ;;  %v11319_v46 = vor.u32 %v15177_v38, %v11318_v37  ;;  %v15075_v47 = vld [vmem:[#allocation2 + $0x8b4] sm:$0xf0]  ;;  %v10719_v52 = vor.u32 %v15027_v44, %v10718_v43  ;;  %v10694_v53 = vld [vmem:[#allocation2 + $0x6f0] sm:$0xf] }
  0x2e   :  { %7400 = vmatpush.bf16.msra.mxu3 %v10431_v10  ;;  %v11102_v48 = vld [vmem:[#allocation2 + $0xa20] sm:$0xf]  ;;  %v15123_v49 = vld [vmem:[#allocation2 + $0xa34] sm:$0xf0]  ;;  %v15021_v54 = vld [vmem:[#allocation2 + $0x704] sm:$0xf0]  ;;  %v10911_v55 = vor.u32 %v15075_v47, %v10910_v45 }
  0x2f   :  { %7362 = vmatpush.bf16.msra.mxu0 %v9831_v16  ;;  %v11294_v50 = vld [vmem:[#allocation2 + $0xba0] sm:$0xf]  ;;  %v15171_v51 = vld [vmem:[#allocation2 + $0xbb4] sm:$0xf0]  ;;  %v11103_v56 = vor.u32 %v15123_v49, %v11102_v48  ;;  %v10886_v57 = vld [vmem:[#allocation2 + $0x870] sm:$0xf]  ;;  %v10695_v1 = vor.u32 %v15021_v54, %v10694_v53 }
  0x30   :  { %7375 = vmatpush.bf16.msra.mxu1 %v10023_v19  ;;  %v15069_v58 = vld [vmem:[#allocation2 + $0x884] sm:$0xf0]  ;;  %v80_v59 = vld [vmem:[%s16561_s0] sm:$0xff]  ;;  %v11295_v60 = vor.u32 %v15171_v51, %v11294_v50  ;;  %v11078_v61 = vld [vmem:[#allocation2 + $0x9f0] sm:$0xf]  ;;  %s9792_s24 = sshll.u32 %s16566_s5, 4  ;;  %s9793_s24 = int_to_ptr.hbm [resolvable:$true] %s9792_s24 }
  0x31   :  { %7388 = vmatpush.bf16.msra.mxu2 %v10215_v20  ;;  %v15117_v62 = vld [vmem:[#allocation2 + $0xa04] sm:$0xf0]  ;;  %1299 = vst [vmem:[#allocation1] ss:$9 sm:$0xff] %v80_v59  ;;  %v11270_v63 = vld [vmem:[#allocation2 + $0xb70] sm:$0xf]  ;;  %v10887_v2 = vor.u32 %v15069_v58, %v10886_v57 }
  0x32   :  { %7401 = vmatpush.bf16.msra.mxu3 %v10407_v24  ;;  %v15165_v0 = vld [vmem:[#allocation2 + $0xb84] sm:$0xf0]  ;;  %v11079_v3 = vor.u32 %v15117_v62, %v11078_v61  ;;  %v10670_v4 = vld [vmem:[#allocation2 + $0x6c0] sm:$0xf]  ;;  %v15015_v5 = vld [vmem:[#allocation2 + $0x6d4] sm:$0xf0] }
  0x33   :  { %7363 = vmatpush.bf16.msra.mxu0 %v9807_v31  ;;  %v10862_v6 = vld [vmem:[#allocation2 + $0x840] sm:$0xf]  ;;  %v11271_v7 = vor.u32 %v15165_v0, %v11270_v63  ;;  %v15063_v8 = vld [vmem:[#allocation2 + $0x854] sm:$0xf0]  ;;  %v10646_v13 = vld [vmem:[#allocation2 + $0x690] sm:$0xf]  ;;  %v10671_v14 = vor.u32 %v15015_v5, %v10670_v4 }
  0x34   :  { %7376 = vmatpush.bf16.msra.mxu1 %v9999_v35  ;;  %v11054_v9 = vld [vmem:[#allocation2 + $0x9c0] sm:$0xf]  ;;  %v15111_v10 = vld [vmem:[#allocation2 + $0x9d4] sm:$0xf0]  ;;  %v15009_v15 = vld [vmem:[#allocation2 + $0x6a4] sm:$0xf0]  ;;  %v10863_v18 = vor.u32 %v15063_v8, %v10862_v6 }
  0x35   :  { %7389 = vmatpush.bf16.msra.mxu2 %v10191_v36  ;;  %v11246_v11 = vld [vmem:[#allocation2 + $0xb40] sm:$0xf]  ;;  %v15159_v12 = vld [vmem:[#allocation2 + $0xb54] sm:$0xf0]  ;;  %v10838_v16 = vld [vmem:[#allocation2 + $0x810] sm:$0xf]  ;;  %v11055_v19 = vor.u32 %v15111_v10, %v11054_v9  ;;  %v10647_v29 = vor.u32 %v15009_v15, %v10646_v13 }
  0x36   :  { %7402 = vmatpush.bf16.msra.mxu3 %v10383_v39  ;;  %v15057_v17 = vld [vmem:[#allocation2 + $0x824] sm:$0xf0]  ;;  %v11247_v23 = vor.u32 %v15159_v12, %v11246_v11  ;;  %v11030_v24 = vld [vmem:[#allocation2 + $0x990] sm:$0xf]  ;;  %v10622_v32 = vld [vmem:[#allocation2 + $0x660] sm:$0xf] }
  0x37   :  { %7408 = vmatpush.bf16.msrb.mxu0 %v10743_v40  ;;  %v15105_v25 = vld [vmem:[#allocation2 + $0x9a4] sm:$0xf0]  ;;  %v11222_v27 = vld [vmem:[#allocation2 + $0xb10] sm:$0xf]  ;;  %v10839_v30 = vor.u32 %v15057_v17, %v10838_v16  ;;  %v15003_v33 = vld [vmem:[#allocation2 + $0x674] sm:$0xf0] }
  0x38   :  { %7421 = vmatpush.bf16.msrb.mxu1 %v10935_v41  ;;  %v16246_v20 = vld [vmem:[#allocation1 + $0x12] sm:$0xff]  ;;  %v16248_v21 = vld [vmem:[#allocation1] sm:$0xff]  ;;  %v16253_v26 = vld [vmem:[#allocation1 + $0x9] sm:$0xff]  ;;  %v11031_v31 = vor.u32 %v15105_v25, %v11030_v24  ;;  %v10623_v41 = vor.u32 %v15003_v33, %v10622_v32 }
  0x39   :  { %7434 = vmatpush.bf16.msrb.mxu2 %v11127_v42  ;;  %v16250_v22 = vld [vmem:[#allocation1 + $0x1b] sm:$0xff]  ;;  %v15153_v28 = vld [vmem:[#allocation2 + $0xb24] sm:$0xf0]  ;;  %7364 = vmatmul.bf16.vlgmr.msra.gmra.mxu0 %v16248_v21  ;;  %v10814_v34 = vld [vmem:[#allocation2 + $0x7e0] sm:$0xf] }
  0x3a   :  { %7447 = vmatpush.bf16.msrb.mxu3 %v11319_v46  ;;  %7390 = vmatmul.bf16.vlgmr.msra.gmra.mxu2 %v16246_v20  ;;  %v11223_v35 = vor.u32 %v15153_v28, %v11222_v27  ;;  %v15051_v36 = vld [vmem:[#allocation2 + $0x7f4] sm:$0xf0]  ;;  %v11006_v37 = vld [vmem:[#allocation2 + $0x960] sm:$0xf]  ;;  %v10598_v44 = vld [vmem:[#allocation2 + $0x630] sm:$0xf] }
  0x3b   :  { %7409 = vmatpush.bf16.msrb.mxu0 %v10719_v52  ;;  %7403 = vmatmul.bf16.vlgmr.msra.gmra.mxu3 %v16250_v22  ;;  %v15099_v38 = vld [vmem:[#allocation2 + $0x974] sm:$0xf0]  ;;  %v11198_v39 = vld [vmem:[#allocation2 + $0xae0] sm:$0xf]  ;;  %v10815_v42 = vor.u32 %v15051_v36, %v10814_v34  ;;  %v14997_v45 = vld [vmem:[#allocation2 + $0x644] sm:$0xf0] }
  0x3c   :  { %7422 = vmatpush.bf16.msrb.mxu1 %v10911_v55  ;;  %v15147_v40 = vld [vmem:[#allocation2 + $0xaf4] sm:$0xf0]  ;;  %v11007_v43 = vor.u32 %v15099_v38, %v11006_v37  ;;  %v10790_v46 = vld [vmem:[#allocation2 + $0x7b0] sm:$0xf]  ;;  %v15045_v48 = vld [vmem:[#allocation2 + $0x7c4] sm:$0xf0]  ;;  %v10599_v53 = vor.u32 %v14997_v45, %v10598_v44 }
  0x3d   :  { %7435 = vmatpush.bf16.msrb.mxu2 %v11103_v56  ;;  %7377 = vmatmul.bf16.vlgmr.msra.gmra.mxu1 %v16253_v26  ;;  %v11199_v47 = vor.u32 %v15147_v40, %v11198_v39  ;;  %v10982_v49 = vld [vmem:[#allocation2 + $0x930] sm:$0xf]  ;;  %v15093_v50 = vld [vmem:[#allocation2 + $0x944] sm:$0xf0]  ;;  %v10574_v54 = vld [vmem:[#allocation2 + $0x600] sm:$0xf]  ;;  %v10791_v56 = vor.u32 %v15045_v48, %v10790_v46 }
  0x3e   :  { %7448 = vmatpush.bf16.msrb.mxu3 %v11295_v60  ;;  %v11174_v51 = vld [vmem:[#allocation2 + $0xab0] sm:$0xf]  ;;  %v15141_v52 = vld [vmem:[#allocation2 + $0xac4] sm:$0xf0]  ;;  %v14991_v55 = vld [vmem:[#allocation2 + $0x614] sm:$0xf0]  ;;  %v10983_v57 = vor.u32 %v15093_v50, %v10982_v49 }
  0x3f   :  { %7410 = vmatpush.bf16.msrb.mxu0 %v10695_v1  ;;  %v10766_v58 = vld [vmem:[#allocation2 + $0x780] sm:$0xf]  ;;  %v15039_v59 = vld [vmem:[#allocation2 + $0x794] sm:$0xf0]  ;;  %v11175_v61 = vor.u32 %v15141_v52, %v11174_v51  ;;  %v11510_v1 = vld [vmem:[#allocation2 + $0xd50] sm:$0xf]  ;;  %v10575_v4 = vor.u32 %v14991_v55, %v10574_v54 }
  0x40   :  { %7423 = vmatpush.bf16.msrb.mxu1 %v10887_v2  ;;  %v10958_v60 = vld [vmem:[#allocation2 + $0x900] sm:$0xf]  ;;  %v15087_v62 = vld [vmem:[#allocation2 + $0x914] sm:$0xf0]  ;;  %v15225_v2 = vld [vmem:[#allocation2 + $0xd64] sm:$0xf0]  ;;  %v10767_v8 = vor.u32 %v15039_v59, %v10766_v58 }
  0x41   :  { %7436 = vmatpush.bf16.msrb.mxu2 %v11079_v3  ;;  %v11150_v63 = vld [vmem:[#allocation2 + $0xa80] sm:$0xf]  ;;  %v15135_v0 = vld [vmem:[#allocation2 + $0xa94] sm:$0xf0]  ;;  %v11702_v3 = vld [vmem:[#allocation2 + $0xed0] sm:$0xf]  ;;  %v10959_v9 = vor.u32 %v15087_v62, %v10958_v60  ;;  %v11511_v13 = vor.u32 %v15225_v2, %v11510_v1 }
  0x42   :  { %7449 = vmatpush.bf16.msrb.mxu3 %v11271_v7  ;;  %v15273_v5 = vld [vmem:[#allocation2 + $0xee4] sm:$0xf0]  ;;  %v11894_v6 = vld [vmem:[#allocation2 + $0x1050] sm:$0xf]  ;;  %v11151_v12 = vor.u32 %v15135_v0, %v11150_v63  ;;  %v11486_v16 = vld [vmem:[#allocation2 + $0xd20] sm:$0xf] }
  0x43   :  { %7411 = vmatpush.bf16.msrb.mxu0 %v10671_v14  ;;  %v15321_v7 = vld [vmem:[#allocation2 + $0x1064] sm:$0xf0]  ;;  %v12086_v10 = vld [vmem:[#allocation2 + $0x11d0] sm:$0xf]  ;;  %v11703_v14 = vor.u32 %v15273_v5, %v11702_v3  ;;  %v15219_v17 = vld [vmem:[#allocation2 + $0xd34] sm:$0xf0] }
  0x44   :  { %7424 = vmatpush.bf16.msrb.mxu1 %v10863_v18  ;;  %v15369_v11 = vld [vmem:[#allocation2 + $0x11e4] sm:$0xf0]  ;;  %v11895_v15 = vor.u32 %v15321_v7, %v11894_v6  ;;  %v11678_v18 = vld [vmem:[#allocation2 + $0xea0] sm:$0xf]  ;;  %v15315_v25 = vld [vmem:[#allocation2 + $0x1034] sm:$0xf0] }
  0x45   :  { %7437 = vmatpush.bf16.msrb.mxu2 %v11055_v19  ;;  %v12087_v19 = vor.u32 %v15369_v11, %v12086_v10  ;;  %v11870_v24 = vld [vmem:[#allocation2 + $0x1020] sm:$0xf]  ;;  %v15363_v28 = vld [vmem:[#allocation2 + $0x11b4] sm:$0xf0]  ;;  %v11462_v33 = vld [vmem:[#allocation2 + $0xcf0] sm:$0xf] }
  0x46   :  { %7450 = vmatpush.bf16.msrb.mxu3 %v11247_v23  ;;  %v15267_v23 = vld [vmem:[#allocation2 + $0xeb4] sm:$0xf0]  ;;  %v12062_v27 = vld [vmem:[#allocation2 + $0x11a0] sm:$0xf]  ;;  %v15213_v36 = vld [vmem:[#allocation2 + $0xd04] sm:$0xf0] }
  0x47   :  { %7412 = vmatpush.bf16.msrb.mxu0 %v10647_v29  ;;  %v16258_v29 = vld [vmem:[#allocation1 + $0x36] sm:$0xff]  ;;  %v16262_v32 = vld [vmem:[#allocation1 + $0x3f] sm:$0xff]  ;;  %v11679_v34 = vor.u32 %v15267_v23, %v11678_v18  ;;  %v16264_v38 = vld [vmem:[#allocation1 + $0x2d] sm:$0xff]  ;;  %v12063_v39 = vor.u32 %v15363_v28, %v12062_v27  ;;  %v11463_v45 = vor.u32 %v15213_v36, %v11462_v33 }
  0x48   :  { %7425 = vmatpush.bf16.msrb.mxu1 %v10839_v30  ;;  %v11487_v30 = vor.u32 %v15219_v17, %v11486_v16  ;;  %v11654_v37 = vld [vmem:[#allocation2 + $0xe70] sm:$0xf]  ;;  %v15261_v40 = vld [vmem:[#allocation2 + $0xe84] sm:$0xf0]  ;;  %v11438_v48 = vld [vmem:[#allocation2 + $0xcc0] sm:$0xf] }
  0x49   :  { %7438 = vmatpush.bf16.msrb.mxu2 %v11031_v31  ;;  %v16260_v31 = vld [vmem:[#allocation1 + $0x24] sm:$0xff]  ;;  %v15357_v44 = vld [vmem:[#allocation2 + $0x1184] sm:$0xf0]  ;;  %v11655_v46 = vor.u32 %v15261_v40, %v11654_v37  ;;  %v15207_v49 = vld [vmem:[#allocation2 + $0xcd4] sm:$0xf0] }
  0x4a   :  { %7451 = vmatpush.bf16.msrb.mxu3 %v11223_v35  ;;  %v11871_v35 = vor.u32 %v15315_v25, %v11870_v24  ;;  %v11630_v50 = vld [vmem:[#allocation2 + $0xe40] sm:$0xf]  ;;  %v15255_v52 = vld [vmem:[#allocation2 + $0xe54] sm:$0xf0]  ;;  %v11439_v58 = vor.u32 %v15207_v49, %v11438_v48  ;;  %v15201_v62 = vld [vmem:[#allocation2 + $0xca4] sm:$0xf0] }
  0x4b   :  { %7413 = vmatpush.bf16.msrb.mxu0 %v10623_v41  ;;  %v11846_v41 = vld [vmem:[#allocation2 + $0xff0] sm:$0xf]  ;;  %v15303_v54 = vld [vmem:[#allocation2 + $0xfd4] sm:$0xf0]  ;;  %v12014_v55 = vld [vmem:[#allocation2 + $0x1140] sm:$0xf]  ;;  %v11631_v59 = vor.u32 %v15255_v52, %v11630_v50 }
  0x4c   :  { %7426 = vmatpush.bf16.msrb.mxu1 %v10815_v42  ;;  %v15309_v42 = vld [vmem:[#allocation2 + $0x1004] sm:$0xf0]  ;;  %v11606_v63 = vld [vmem:[#allocation2 + $0xe10] sm:$0xf]  ;;  %v15195_v10 = vld [vmem:[#allocation2 + $0xc74] sm:$0xf0] }
  0x4d   :  { %7439 = vmatpush.bf16.msrb.mxu2 %v11007_v43  ;;  %v12038_v43 = vld [vmem:[#allocation2 + $0x1170] sm:$0xf]  ;;  %v15249_v1 = vld [vmem:[#allocation2 + $0xe24] sm:$0xf0]  ;;  %v11582_v11 = vld [vmem:[#allocation2 + $0xde0] sm:$0xf] }
  0x4e   :  { %7452 = vmatpush.bf16.msrb.mxu3 %v11199_v47  ;;  %v11847_v47 = vor.u32 %v15309_v42, %v11846_v41  ;;  %v12039_v51 = vor.u32 %v15357_v44, %v12038_v43  ;;  %v11798_v2 = vld [vmem:[#allocation2 + $0xf90] sm:$0xf]  ;;  %v15297_v3 = vld [vmem:[#allocation2 + $0xfa4] sm:$0xf0]  ;;  %v11607_v7 = vor.u32 %v15249_v1, %v11606_v63  ;;  %v11966_v16 = vld [vmem:[#allocation2 + $0x10e0] sm:$0xf] }
  0x4f   :  { %7414 = vmatpush.bf16.msrb.mxu0 %v10599_v53  ;;  %v11822_v53 = vld [vmem:[#allocation2 + $0xfc0] sm:$0xf]  ;;  %v15345_v5 = vld [vmem:[#allocation2 + $0x1124] sm:$0xf0]  ;;  %v15339_v17 = vld [vmem:[#allocation2 + $0x10f4] sm:$0xf0] }
  0x50   :  { %7427 = vmatpush.bf16.msrb.mxu1 %v10791_v56  ;;  %v15351_v56 = vld [vmem:[#allocation2 + $0x1154] sm:$0xf0]  ;;  %v11823_v60 = vor.u32 %v15303_v54, %v11822_v53  ;;  %v11366_v24 = vld [vmem:[#allocation2 + $0xc30] sm:$0xf]  ;;  %v15189_v25 = vld [vmem:[#allocation2 + $0xc44] sm:$0xf0]  ;;  %v11967_v28 = vor.u32 %v15339_v17, %v11966_v16 }
  0x51   :  { %7440 = vmatpush.bf16.msrb.mxu2 %v10983_v57  ;;  %v81_v57 = vld [vmem:[%s16561_s0 + $0x8] sm:$0xff]  ;;  %v12015_v0 = vor.u32 %v15351_v56, %v12014_v55  ;;  %v11558_v27 = vld [vmem:[#allocation2 + $0xdb0] sm:$0xf]  ;;  %v15333_v36 = vld [vmem:[#allocation2 + $0x10c4] sm:$0xf0]  ;;  %v11367_v37 = vor.u32 %v15189_v25, %v11366_v24 }
  0x52   :  { %7453 = vmatpush.bf16.msrb.mxu3 %v11175_v61  ;;  %1309 = vst [vmem:[#allocation1] ss:$9 sm:$0xff] %v81_v57  ;;  %v11414_v61 = vld [vmem:[#allocation2 + $0xc90] sm:$0xf]  ;;  %v15183_v40 = vld [vmem:[#allocation2 + $0xc14] sm:$0xf0] }
  0x53   :  { %7415 = vmatpush.bf16.msrb.mxu0 %v10575_v4  ;;  %v11990_v4 = vld [vmem:[#allocation2 + $0x1110] sm:$0xf]  ;;  %v11415_v6 = vor.u32 %v15201_v62, %v11414_v61  ;;  %v11534_v43 = vld [vmem:[#allocation2 + $0xd80] sm:$0xf]  ;;  %v15231_v44 = vld [vmem:[#allocation2 + $0xd94] sm:$0xf0] }
  0x54   :  { %7428 = vmatpush.bf16.msrb.mxu1 %v10767_v8  ;;  %v11799_v8 = vor.u32 %v15297_v3, %v11798_v2  ;;  %v11750_v33 = vld [vmem:[#allocation2 + $0xf30] sm:$0xf]  ;;  %v11918_v48 = vld [vmem:[#allocation2 + $0x1080] sm:$0xf]  ;;  %v15327_v49 = vld [vmem:[#allocation2 + $0x1094] sm:$0xf0]  ;;  %v11535_v57 = vor.u32 %v15231_v44, %v11534_v43 }
  0x55   :  { %7441 = vmatpush.bf16.msrb.mxu2 %v10959_v9  ;;  %v11390_v9 = vld [vmem:[#allocation2 + $0xc60] sm:$0xf]  ;;  %v12278_v50 = vld [vmem:[#allocation2 + $0x1350] sm:$0xf]  ;;  %v15465_v54 = vld [vmem:[#allocation2 + $0x14e4] sm:$0xf0]  ;;  %v11919_v61 = vor.u32 %v15327_v49, %v11918_v48 }
  0x56   :  { %7454 = vmatpush.bf16.msrb.mxu3 %v11151_v12  ;;  %7416 = vmatmul.bf16.vlgmr.msrb.gmra.mxu0 %v16260_v31  ;;  %v11991_v12 = vor.u32 %v15345_v5, %v11990_v4  ;;  %v11391_v18 = vor.u32 %v15195_v10, %v11390_v9  ;;  %v12470_v52 = vld [vmem:[#allocation2 + $0x14d0] sm:$0xf]  ;;  %v15513_v56 = vld [vmem:[#allocation2 + $0x1664] sm:$0xf0]  ;;  %v12254_v1 = vld [vmem:[#allocation2 + $0x1320] sm:$0xf] }
  0x57   :  { %7460 = vmatpush.bf16.msra.mxu0 %v11511_v13  ;;  %7429 = vmatmul.bf16.vlgmr.msrb.gmra.mxu1 %v16264_v38  ;;  %v15243_v13 = vld [vmem:[#allocation2 + $0xdf4] sm:$0xf0]  ;;  %v12662_v55 = vld [vmem:[#allocation2 + $0x1650] sm:$0xf]  ;;  %v12471_v63 = vor.u32 %v15465_v54, %v12470_v52  ;;  %v12446_v3 = vld [vmem:[#allocation2 + $0x14a0] sm:$0xf] }
  0x58   :  { %7473 = vmatpush.bf16.msra.mxu1 %v11703_v14  ;;  %7442 = vmatmul.bf16.vlgmr.msrb.gmra.mxu2 %v16258_v29  ;;  %v11774_v14 = vld [vmem:[#allocation2 + $0xf60] sm:$0xf]  ;;  %v15411_v2 = vld [vmem:[#allocation2 + $0x1334] sm:$0xf0]  ;;  %v15453_v24 = vld [vmem:[#allocation2 + $0x1484] sm:$0xf0] }
  0x59   :  { %7486 = vmatpush.bf16.msra.mxu2 %v11895_v15  ;;  %7455 = vmatmul.bf16.vlgmr.msrb.gmra.mxu3 %v16262_v32  ;;  %v15291_v15 = vld [vmem:[#allocation2 + $0xf74] sm:$0xf0]  ;;  %v12830_v9 = vld [vmem:[#allocation2 + $0x17a0] sm:$0xf]  ;;  %v12614_v25 = vld [vmem:[#allocation2 + $0x15f0] sm:$0xf] }
  0x5a   :  { %7499 = vmatpush.bf16.msra.mxu3 %v12087_v19  ;;  %v11583_v19 = vor.u32 %v15243_v13, %v11582_v11  ;;  %v11775_v23 = vor.u32 %v15291_v15, %v11774_v14  ;;  %v15459_v5 = vld [vmem:[#allocation2 + $0x14b4] sm:$0xf0]  ;;  %v16275_v11 = vld [vmem:[#allocation1 + $0x12] sm:$0xff]  ;;  %v12255_v13 = vor.u32 %v15411_v2, %v12254_v1  ;;  %v12782_v44 = vld [vmem:[#allocation2 + $0x1740] sm:$0xf] }
  0x5b   :  { %7461 = vmatpush.bf16.msra.mxu0 %v11487_v30  ;;  %v15237_v30 = vld [vmem:[#allocation2 + $0xdc4] sm:$0xf0]  ;;  %v15555_v10 = vld [vmem:[#allocation2 + $0x17b4] sm:$0xf0]  ;;  %v12230_v14 = vld [vmem:[#allocation2 + $0x12f0] sm:$0xf]  ;;  %v12447_v16 = vor.u32 %v15459_v5, %v12446_v3 }
  0x5c   :  { %7474 = vmatpush.bf16.msra.mxu1 %v11679_v34  ;;  %v15285_v34 = vld [vmem:[#allocation2 + $0xf44] sm:$0xf0]  ;;  %v11559_v41 = vor.u32 %v15237_v30, %v11558_v27  ;;  %v16279_v15 = vld [vmem:[#allocation1 + $0x1b] sm:$0xff]  ;;  %v12542_v2 = vld [vmem:[#allocation2 + $0x1560] sm:$0xf] }
  0x5d   :  { %7487 = vmatpush.bf16.msra.mxu2 %v11871_v35  ;;  %v11942_v35 = vld [vmem:[#allocation2 + $0x10b0] sm:$0xf]  ;;  %v11751_v42 = vor.u32 %v15285_v34, %v11750_v33  ;;  %v15501_v27 = vld [vmem:[#allocation2 + $0x1604] sm:$0xf0]  ;;  %v15495_v43 = vld [vmem:[#allocation2 + $0x15d4] sm:$0xf0] }
  0x5e   :  { %7500 = vmatpush.bf16.msra.mxu3 %v12063_v39  ;;  %v11342_v39 = vld [vmem:[#allocation2 + $0xc00] sm:$0xf]  ;;  %v15549_v30 = vld [vmem:[#allocation2 + $0x1784] sm:$0xf0]  ;;  %v12182_v49 = vld [vmem:[#allocation2 + $0x1290] sm:$0xf] }
  0x5f   :  { %7462 = vmatpush.bf16.msra.mxu0 %v11463_v45  ;;  %v11726_v45 = vld [vmem:[#allocation2 + $0xf00] sm:$0xf]  ;;  %v11343_v53 = vor.u32 %v15183_v40, %v11342_v39  ;;  %v12566_v54 = vld [vmem:[#allocation2 + $0x1590] sm:$0xf]  ;;  %v15435_v1 = vld [vmem:[#allocation2 + $0x13f4] sm:$0xf0] }
  0x60   :  { %7475 = vmatpush.bf16.msra.mxu1 %v11655_v46  ;;  %v11943_v46 = vor.u32 %v15333_v36, %v11942_v35  ;;  %v12615_v35 = vor.u32 %v15501_v27, %v12614_v25  ;;  %v12206_v36 = vld [vmem:[#allocation2 + $0x12c0] sm:$0xf]  ;;  %v15483_v3 = vld [vmem:[#allocation2 + $0x1574] sm:$0xf0] }
  0x61   :  { %7488 = vmatpush.bf16.msra.mxu2 %v11847_v47  ;;  %v15279_v47 = vld [vmem:[#allocation2 + $0xf14] sm:$0xf0]  ;;  %v12398_v39 = vld [vmem:[#allocation2 + $0x1440] sm:$0xf] }
  0x62   :  { %7501 = vmatpush.bf16.msra.mxu3 %v12039_v51  ;;  %v15417_v51 = vld [vmem:[#allocation2 + $0x1364] sm:$0xf0]  ;;  %v15531_v5 = vld [vmem:[#allocation2 + $0x16f4] sm:$0xf0]  ;;  %v12110_v25 = vld [vmem:[#allocation2 + $0x1200] sm:$0xf] }
  0x63   :  { %7463 = vmatpush.bf16.msra.mxu0 %v11439_v58  ;;  %v11727_v58 = vor.u32 %v15279_v47, %v11726_v45  ;;  %v12279_v62 = vor.u32 %v15417_v51, %v12278_v50  ;;  %v15543_v45 = vld [vmem:[#allocation2 + $0x1754] sm:$0xf0]  ;;  %v15393_v50 = vld [vmem:[#allocation2 + $0x12a4] sm:$0xf0]  ;;  %v12374_v51 = vld [vmem:[#allocation2 + $0x1410] sm:$0xf] }
  0x64   :  { %7476 = vmatpush.bf16.msra.mxu1 %v11631_v59  ;;  %v12854_v59 = vld [vmem:[#allocation2 + $0x17d0] sm:$0xf]  ;;  %v12783_v52 = vor.u32 %v15543_v45, %v12782_v44  ;;  %v15375_v27 = vld [vmem:[#allocation2 + $0x1214] sm:$0xf0]  ;;  %v15657_v45 = vld [vmem:[#allocation2 + $0x1ae4] sm:$0xf0] }
  0x65   :  { %7489 = vmatpush.bf16.msra.mxu2 %v11823_v60  ;;  %v15561_v60 = vld [vmem:[#allocation2 + $0x17e4] sm:$0xf0]  ;;  %v13238_v44 = vld [vmem:[#allocation2 + $0x1ad0] sm:$0xf] }
  0x66   :  { %7502 = vmatpush.bf16.msra.mxu3 %v12015_v0  ;;  %v12663_v0 = vor.u32 %v15513_v56, %v12662_v55  ;;  %v12855_v4 = vor.u32 %v15561_v60, %v12854_v59  ;;  %v15489_v55 = vld [vmem:[#allocation2 + $0x15a4] sm:$0xf0]  ;;  %v12758_v56 = vld [vmem:[#allocation2 + $0x1710] sm:$0xf] }
  0x67   :  { %7464 = vmatpush.bf16.msra.mxu0 %v11415_v6  ;;  %v12638_v6 = vld [vmem:[#allocation2 + $0x1620] sm:$0xf]  ;;  %v12567_v60 = vor.u32 %v15489_v55, %v12566_v54 }
  0x68   :  { %7477 = vmatpush.bf16.msra.mxu1 %v11607_v7  ;;  %v15507_v7 = vld [vmem:[#allocation2 + $0x1634] sm:$0xf0] }
  0x69   :  { %7490 = vmatpush.bf16.msra.mxu2 %v11799_v8  ;;  %v16273_v8 = vld [vmem:[#allocation1] sm:$0xff]  ;;  %v12639_v17 = vor.u32 %v15507_v7, %v12638_v6  ;;  %v12134_v7 = vld [vmem:[#allocation2 + $0x1230] sm:$0xf] }
  0x6a   :  { %7503 = vmatpush.bf16.msra.mxu3 %v11991_v12  ;;  %v16277_v12 = vld [vmem:[#allocation1 + $0x9] sm:$0xff] }
  0x6b   :  { %7465 = vmatpush.bf16.msra.mxu0 %v11391_v18  ;;  %v15405_v18 = vld [vmem:[#allocation2 + $0x1304] sm:$0xf0] }
  0x6c   :  { %7478 = vmatpush.bf16.msra.mxu1 %v11583_v19  ;;  %v12422_v19 = vld [vmem:[#allocation2 + $0x1470] sm:$0xf]  ;;  %v12231_v33 = vor.u32 %v15405_v18, %v12230_v14 }
  0x6d   :  { %7491 = vmatpush.bf16.msra.mxu2 %v11775_v23  ;;  %v12831_v23 = vor.u32 %v15555_v10, %v12830_v9  ;;  %v12423_v34 = vor.u32 %v15453_v24, %v12422_v19  ;;  %v12543_v10 = vor.u32 %v15483_v3, %v12542_v2  ;;  %v12326_v14 = vld [vmem:[#allocation2 + $0x13b0] sm:$0xf]  ;;  %v15477_v19 = vld [vmem:[#allocation2 + $0x1544] sm:$0xf0]  ;;  %v15651_v2 = vld [vmem:[#allocation2 + $0x1ab4] sm:$0xf0] }
  0x6e   :  { %7504 = vmatpush.bf16.msra.mxu3 %v11967_v28  ;;  %v12806_v28 = vld [vmem:[#allocation2 + $0x1770] sm:$0xf]  ;;  %v15525_v24 = vld [vmem:[#allocation2 + $0x16c4] sm:$0xf0]  ;;  %v13406_v3 = vld [vmem:[#allocation2 + $0x1c20] sm:$0xf] }
  0x6f   :  { %7466 = vmatpush.bf16.msra.mxu0 %v11367_v37  ;;  %v15399_v37 = vld [vmem:[#allocation2 + $0x12d4] sm:$0xf0]  ;;  %v12807_v40 = vor.u32 %v15549_v30, %v12806_v28  ;;  %v12518_v18 = vld [vmem:[#allocation2 + $0x1530] sm:$0xf]  ;;  %v12302_v30 = vld [vmem:[#allocation2 + $0x1380] sm:$0xf] }
  0x70   :  { %7479 = vmatpush.bf16.msra.mxu1 %v11559_v41  ;;  %v15447_v41 = vld [vmem:[#allocation2 + $0x1454] sm:$0xf0] }
  0x71   :  { %7492 = vmatpush.bf16.msra.mxu2 %v11751_v42  ;;  %v12590_v42 = vld [vmem:[#allocation2 + $0x15c0] sm:$0xf]  ;;  %v12399_v47 = vor.u32 %v15447_v41, %v12398_v39  ;;  %v13046_v41 = vld [vmem:[#allocation2 + $0x1950] sm:$0xf] }
  0x72   :  { %7505 = vmatpush.bf16.msra.mxu3 %v11943_v46  ;;  %v12207_v46 = vor.u32 %v15399_v37, %v12206_v36  ;;  %v12591_v48 = vor.u32 %v15495_v43, %v12590_v42  ;;  %v12519_v37 = vor.u32 %v15477_v19, %v12518_v18  ;;  %v12686_v39 = vld [vmem:[#allocation2 + $0x1680] sm:$0xf]  ;;  %v15609_v42 = vld [vmem:[#allocation2 + $0x1964] sm:$0xf0]  ;;  %v13382_v19 = vld [vmem:[#allocation2 + $0x1bf0] sm:$0xf] }
  0x73   :  { %7467 = vmatpush.bf16.msra.mxu0 %v11343_v53  ;;  %v15441_v53 = vld [vmem:[#allocation2 + $0x1424] sm:$0xf0] }
  0x74   :  { %7480 = vmatpush.bf16.msra.mxu1 %v11535_v57  ;;  %v15537_v57 = vld [vmem:[#allocation2 + $0x1724] sm:$0xf0]  ;;  %v12375_v59 = vor.u32 %v15441_v53, %v12374_v51  ;;  %v12111_v51 = vor.u32 %v15375_v27, %v12110_v25 }
  0x75   :  { %7493 = vmatpush.bf16.msra.mxu2 %v11727_v58  ;;  %v12183_v58 = vor.u32 %v15393_v50, %v12182_v49  ;;  %v16291_v49 = vld [vmem:[#allocation1 + $0x3f] sm:$0xff]  ;;  %v82_v50 = vld [vmem:[%s16561_s0 + $0x10] sm:$0xff] }
  0x76   :  { %7506 = vmatpush.bf16.msra.mxu3 %v11919_v61  ;;  %7468 = vmatmul.bf16.vlgmr.msra.gmra.mxu0 %v16273_v8  ;;  %v12158_v61 = vld [vmem:[#allocation2 + $0x1260] sm:$0xf]  ;;  %v15705_v53 = vld [vmem:[#allocation2 + $0x1c64] sm:$0xf0] }
  0x77   :  { %7512 = vmatpush.bf16.msrb.mxu0 %v12279_v62  ;;  %7481 = vmatmul.bf16.vlgmr.msra.gmra.mxu1 %v16277_v12  ;;  %v15387_v62 = vld [vmem:[#allocation2 + $0x1274] sm:$0xf0]  ;;  %v15645_v18 = vld [vmem:[#allocation2 + $0x1a84] sm:$0xf0] }
  0x78   :  { %7525 = vmatpush.bf16.msrb.mxu1 %v12471_v63  ;;  %7494 = vmatmul.bf16.vlgmr.msra.gmra.mxu2 %v16275_v11  ;;  %v12350_v63 = vld [vmem:[#allocation2 + $0x13e0] sm:$0xf]  ;;  %v12159_v6 = vor.u32 %v15387_v62, %v12158_v61  ;;  %v15741_v25 = vld [vmem:[#allocation2 + $0x1d84] sm:$0xf0] }
  0x79   :  { %7538 = vmatpush.bf16.msrb.mxu2 %v12663_v0  ;;  %7507 = vmatmul.bf16.vlgmr.msra.gmra.mxu3 %v16279_v15  ;;  %v12759_v0 = vor.u32 %v15537_v57, %v12758_v56  ;;  %v12351_v9 = vor.u32 %v15435_v1, %v12350_v63  ;;  %v13622_v56 = vld [vmem:[#allocation2 + $0x1dd0] sm:$0xf]  ;;  %v15753_v57 = vld [vmem:[#allocation2 + $0x1de4] sm:$0xf0]  ;;  %v13022_v62 = vld [vmem:[#allocation2 + $0x1920] sm:$0xf] }
  0x7a   :  { %7551 = vmatpush.bf16.msrb.mxu3 %v12855_v4  ;;  %v12734_v4 = vld [vmem:[#allocation2 + $0x16e0] sm:$0xf]  ;;  %v15603_v63 = vld [vmem:[#allocation2 + $0x1934] sm:$0xf0]  ;;  %v13623_v1 = vor.u32 %v15753_v57, %v13622_v56  ;;  %v15681_v56 = vld [vmem:[#allocation2 + $0x1ba4] sm:$0xf0] }
  0x7b   :  { %7513 = vmatpush.bf16.msrb.mxu0 %v12255_v13  ;;  %v15381_v13 = vld [vmem:[#allocation2 + $0x1244] sm:$0xf0]  ;;  %v13526_v57 = vld [vmem:[#allocation2 + $0x1d10] sm:$0xf] }
  0x7c   :  { %7526 = vmatpush.bf16.msrb.mxu1 %v12447_v16  ;;  %v15429_v16 = vld [vmem:[#allocation2 + $0x13c4] sm:$0xf0]  ;;  %v12135_v28 = vor.u32 %v15381_v13, %v12134_v7  ;;  %v13023_v7 = vor.u32 %v15603_v63, %v13022_v62  ;;  %v12998_v13 = vld [vmem:[#allocation2 + $0x18f0] sm:$0xf]  ;;  %v12926_v62 = vld [vmem:[#allocation2 + $0x1860] sm:$0xf] }
  0x7d   :  { %7539 = vmatpush.bf16.msrb.mxu2 %v12639_v17  ;;  %v12735_v17 = vor.u32 %v15531_v5, %v12734_v4  ;;  %v12327_v36 = vor.u32 %v15429_v16, %v12326_v14  ;;  %v15699_v4 = vld [vmem:[#allocation2 + $0x1c34] sm:$0xf0]  ;;  %v13598_v5 = vld [vmem:[#allocation2 + $0x1da0] sm:$0xf]  ;;  %v15597_v14 = vld [vmem:[#allocation2 + $0x1904] sm:$0xf0] }
  0x7e   :  { %7552 = vmatpush.bf16.msrb.mxu3 %v12831_v23  ;;  %v12710_v23 = vld [vmem:[#allocation2 + $0x16b0] sm:$0xf]  ;;  %v12999_v27 = vor.u32 %v15597_v14, %v12998_v13  ;;  %v15579_v63 = vld [vmem:[#allocation2 + $0x1874] sm:$0xf0]  ;;  %v15573_v14 = vld [vmem:[#allocation2 + $0x1844] sm:$0xf0] }
  0x7f   :  { %7514 = vmatpush.bf16.msrb.mxu0 %v12231_v33  ;;  %v15423_v33 = vld [vmem:[#allocation2 + $0x1394] sm:$0xf0]  ;;  %v12711_v43 = vor.u32 %v15525_v24, %v12710_v23  ;;  %v13190_v16 = vld [vmem:[#allocation2 + $0x1a70] sm:$0xf]  ;;  %v15693_v23 = vld [vmem:[#allocation2 + $0x1c04] sm:$0xf0] }
  0x80   :  { %7527 = vmatpush.bf16.msrb.mxu1 %v12423_v34  ;;  %v12494_v34 = vld [vmem:[#allocation2 + $0x1500] sm:$0xf]  ;;  %v12303_v54 = vor.u32 %v15423_v33, %v12302_v30  ;;  %v13574_v24 = vld [vmem:[#allocation2 + $0x1d70] sm:$0xf]  ;;  %v13383_v30 = vor.u32 %v15693_v23, %v13382_v19  ;;  %v15669_v23 = vld [vmem:[#allocation2 + $0x1b44] sm:$0xf0] }
  0x81   :  { %7540 = vmatpush.bf16.msrb.mxu2 %v12615_v35  ;;  %v15471_v35 = vld [vmem:[#allocation2 + $0x1514] sm:$0xf0]  ;;  %v12974_v33 = vld [vmem:[#allocation2 + $0x18c0] sm:$0xf]  ;;  %v12902_v13 = vld [vmem:[#allocation2 + $0x1830] sm:$0xf] }
  0x82   :  { %7553 = vmatpush.bf16.msrb.mxu3 %v12807_v40  ;;  %v15519_v40 = vld [vmem:[#allocation2 + $0x1694] sm:$0xf0]  ;;  %v12495_v55 = vor.u32 %v15471_v35, %v12494_v34  ;;  %v13166_v35 = vld [vmem:[#allocation2 + $0x1a40] sm:$0xf]  ;;  %v13286_v19 = vld [vmem:[#allocation2 + $0x1b30] sm:$0xf] }
  0x83   :  { %7515 = vmatpush.bf16.msrb.mxu0 %v12207_v46  ;;  %v16285_v46 = vld [vmem:[#allocation1 + $0x24] sm:$0xff]  ;;  %v15591_v34 = vld [vmem:[#allocation2 + $0x18d4] sm:$0xf0] }
  0x84   :  { %7528 = vmatpush.bf16.msrb.mxu1 %v12399_v47  ;;  %v16287_v47 = vld [vmem:[#allocation1 + $0x36] sm:$0xff] }
  0x85   :  { %7541 = vmatpush.bf16.msrb.mxu2 %v12591_v48  ;;  %v16289_v48 = vld [vmem:[#allocation1 + $0x2d] sm:$0xff] }
  0x86   :  { %7554 = vmatpush.bf16.msrb.mxu3 %v12783_v52  ;;  %v13430_v52 = vld [vmem:[#allocation2 + $0x1c50] sm:$0xf]  ;;  %1319 = vst [vmem:[#allocation1] ss:$9 sm:$0xff] %v82_v50 }
  0x87   :  { %7516 = vmatpush.bf16.msrb.mxu0 %v12183_v58  ;;  %v12687_v58 = vor.u32 %v15519_v40, %v12686_v39  ;;  %v13431_v61 = vor.u32 %v15705_v53, %v13430_v52  ;;  %v13358_v39 = vld [vmem:[#allocation2 + $0x1bc0] sm:$0xf]  ;;  %v15687_v40 = vld [vmem:[#allocation2 + $0x1bd4] sm:$0xf0]  ;;  %v12950_v50 = vld [vmem:[#allocation2 + $0x1890] sm:$0xf] }
  0x88   :  { %7529 = vmatpush.bf16.msrb.mxu1 %v12375_v59  ;;  %v13047_v59 = vor.u32 %v15609_v42, %v13046_v41  ;;  %v13550_v41 = vld [vmem:[#allocation2 + $0x1d40] sm:$0xf]  ;;  %v15735_v42 = vld [vmem:[#allocation2 + $0x1d54] sm:$0xf0]  ;;  %v13142_v52 = vld [vmem:[#allocation2 + $0x1a10] sm:$0xf] }
  0x89   :  { %7542 = vmatpush.bf16.msrb.mxu2 %v12567_v60  ;;  %v13239_v60 = vor.u32 %v15657_v45, %v13238_v44  ;;  %v13359_v45 = vor.u32 %v15687_v40, %v13358_v39  ;;  %v13551_v53 = vor.u32 %v15735_v42, %v13550_v41  ;;  %v15663_v40 = vld [vmem:[#allocation2 + $0x1b14] sm:$0xf0]  ;;  %v13454_v41 = vld [vmem:[#allocation2 + $0x1c80] sm:$0xf] }
  0x8a   :  { %7555 = vmatpush.bf16.msrb.mxu3 %v12759_v0  ;;  %v13214_v0 = vld [vmem:[#allocation2 + $0x1aa0] sm:$0xf]  ;;  %v15711_v42 = vld [vmem:[#allocation2 + $0x1c94] sm:$0xf0] }
  0x8b   :  { %7517 = vmatpush.bf16.msrb.mxu0 %v12159_v6  ;;  %v15747_v6 = vld [vmem:[#allocation2 + $0x1db4] sm:$0xf0] }
  0x8c   :  { %7530 = vmatpush.bf16.msrb.mxu1 %v12351_v9  ;;  %v13215_v9 = vor.u32 %v15651_v2, %v13214_v0  ;;  %v13118_v0 = vld [vmem:[#allocation2 + $0x19e0] sm:$0xf]  ;;  %v15627_v2 = vld [vmem:[#allocation2 + $0x19f4] sm:$0xf0] }
  0x8d   :  { %7543 = vmatpush.bf16.msrb.mxu2 %v12543_v10  ;;  %v13407_v10 = vor.u32 %v15699_v4, %v13406_v3  ;;  %v13310_v3 = vld [vmem:[#allocation2 + $0x1b60] sm:$0xf]  ;;  %v15675_v4 = vld [vmem:[#allocation2 + $0x1b74] sm:$0xf0] }
  0x8e   :  { %7556 = vmatpush.bf16.msrb.mxu3 %v12735_v17  ;;  %v13599_v17 = vor.u32 %v15747_v6, %v13598_v5  ;;  %v13502_v5 = vld [vmem:[#allocation2 + $0x1ce0] sm:$0xf]  ;;  %v15723_v6 = vld [vmem:[#allocation2 + $0x1cf4] sm:$0xf0] }
  0x8f   :  { %7518 = vmatpush.bf16.msrb.mxu0 %v12135_v28  ;;  %v13191_v28 = vor.u32 %v15645_v18, %v13190_v16  ;;  %v13094_v16 = vld [vmem:[#allocation2 + $0x19b0] sm:$0xf]  ;;  %v15621_v18 = vld [vmem:[#allocation2 + $0x19c4] sm:$0xf0] }
  0x90   :  { %7531 = vmatpush.bf16.msrb.mxu1 %v12327_v36  ;;  %v13575_v36 = vor.u32 %v15741_v25, %v13574_v24  ;;  %v13478_v24 = vld [vmem:[#allocation2 + $0x1cb0] sm:$0xf]  ;;  %v15717_v25 = vld [vmem:[#allocation2 + $0x1cc4] sm:$0xf0] }
  0x91   :  { %7544 = vmatpush.bf16.msrb.mxu2 %v12519_v37  ;;  %v15639_v37 = vld [vmem:[#allocation2 + $0x1a54] sm:$0xf0]  ;;  %v13479_v39 = vor.u32 %v15717_v25, %v13478_v24  ;;  %v15837_v25 = vld [vmem:[#allocation2 + $0x2084] sm:$0xf0] }
  0x92   :  { %7557 = vmatpush.bf16.msrb.mxu3 %v12711_v43  ;;  %v12975_v43 = vor.u32 %v15591_v34, %v12974_v33  ;;  %v13167_v44 = vor.u32 %v15639_v37, %v13166_v35  ;;  %v13095_v33 = vor.u32 %v15621_v18, %v13094_v16  ;;  %v13287_v34 = vor.u32 %v15669_v23, %v13286_v19  ;;  %v13070_v35 = vld [vmem:[#allocation2 + $0x1980] sm:$0xf]  ;;  %v13766_v18 = vld [vmem:[#allocation2 + $0x1ef0] sm:$0xf]  ;;  %v15789_v19 = vld [vmem:[#allocation2 + $0x1f04] sm:$0xf0] }
  0x93   :  { %7519 = vmatpush.bf16.msrb.mxu0 %v12111_v51  ;;  %v15585_v51 = vld [vmem:[#allocation2 + $0x18a4] sm:$0xf0]  ;;  %v13262_v37 = vld [vmem:[#allocation2 + $0x1b00] sm:$0xf]  ;;  %v13958_v23 = vld [vmem:[#allocation2 + $0x2070] sm:$0xf] }
  0x94   :  { %7532 = vmatpush.bf16.msrb.mxu1 %v12303_v54  ;;  %v15633_v54 = vld [vmem:[#allocation2 + $0x1a24] sm:$0xf0] }
  0x95   :  { %7545 = vmatpush.bf16.msrb.mxu2 %v12495_v55  ;;  %v13334_v55 = vld [vmem:[#allocation2 + $0x1b90] sm:$0xf] }
  0x96   :  { %7558 = vmatpush.bf16.msrb.mxu3 %v12687_v58  ;;  %7520 = vmatmul.bf16.vlgmr.msrb.gmra.mxu0 %v16285_v46  ;;  %v15729_v58 = vld [vmem:[#allocation2 + $0x1d24] sm:$0xf0] }
  0x97   :  { %7564 = vmatpush.bf16.msra.mxu0 %v13047_v59  ;;  %7533 = vmatmul.bf16.vlgmr.msrb.gmra.mxu1 %v16289_v48  ;;  %v12951_v59 = vor.u32 %v15585_v51, %v12950_v50  ;;  %v15849_v51 = vld [vmem:[#allocation2 + $0x20e4] sm:$0xf0] }
  0x98   :  { %7577 = vmatpush.bf16.msra.mxu1 %v13239_v60  ;;  %7546 = vmatmul.bf16.vlgmr.msrb.gmra.mxu2 %v16287_v47  ;;  %v13143_v60 = vor.u32 %v15633_v54, %v13142_v52  ;;  %v14198_v52 = vld [vmem:[#allocation2 + $0x2250] sm:$0xf] }
  0x99   :  { %7590 = vmatpush.bf16.msra.mxu2 %v13431_v61  ;;  %7559 = vmatmul.bf16.vlgmr.msrb.gmra.mxu3 %v16291_v49  ;;  %v13335_v61 = vor.u32 %v15681_v56, %v13334_v55  ;;  %v13263_v55 = vor.u32 %v15663_v40, %v13262_v37  ;;  %v14390_v56 = vld [vmem:[#allocation2 + $0x23d0] sm:$0xf]  ;;  %v13742_v37 = vld [vmem:[#allocation2 + $0x1ec0] sm:$0xf] }
  0x9a   :  { %7603 = vmatpush.bf16.msra.mxu3 %v13623_v1  ;;  %v13527_v1 = vor.u32 %v15729_v58, %v13526_v57  ;;  %v15945_v57 = vld [vmem:[#allocation2 + $0x23e4] sm:$0xf0]  ;;  %v13455_v58 = vor.u32 %v15711_v42, %v13454_v41  ;;  %v13934_v40 = vld [vmem:[#allocation2 + $0x2040] sm:$0xf]  ;;  %v15831_v42 = vld [vmem:[#allocation2 + $0x2054] sm:$0xf0] }
  0x9b   :  { %7565 = vmatpush.bf16.msra.mxu0 %v13023_v7  ;;  %v12927_v7 = vor.u32 %v15579_v63, %v12926_v62  ;;  %v13790_v62 = vld [vmem:[#allocation2 + $0x1f20] sm:$0xf]  ;;  %v15795_v63 = vld [vmem:[#allocation2 + $0x1f34] sm:$0xf0] }
  0x9c   :  { %7578 = vmatpush.bf16.msra.mxu1 %v13215_v9  ;;  %v13119_v9 = vor.u32 %v15627_v2, %v13118_v0  ;;  %v13982_v0 = vld [vmem:[#allocation2 + $0x20a0] sm:$0xf]  ;;  %v15843_v2 = vld [vmem:[#allocation2 + $0x20b4] sm:$0xf0] }
  0x9d   :  { %7591 = vmatpush.bf16.msra.mxu2 %v13407_v10  ;;  %v13311_v10 = vor.u32 %v15675_v4, %v13310_v3  ;;  %v14174_v3 = vld [vmem:[#allocation2 + $0x2220] sm:$0xf]  ;;  %v15891_v4 = vld [vmem:[#allocation2 + $0x2234] sm:$0xf0]  ;;  %v13983_v16 = vor.u32 %v15843_v2, %v13982_v0 }
  0x9e   :  { %7604 = vmatpush.bf16.msra.mxu3 %v13599_v17  ;;  %v13503_v17 = vor.u32 %v15723_v6, %v13502_v5  ;;  %v16300_v5 = vld [vmem:[#allocation1] sm:$0xff]  ;;  %v14366_v6 = vld [vmem:[#allocation2 + $0x23a0] sm:$0xf] }
  0x9f   :  { %7566 = vmatpush.bf16.msra.mxu0 %v12999_v27  ;;  %v12903_v27 = vor.u32 %v15573_v14, %v12902_v13  ;;  %v16306_v13 = vld [vmem:[#allocation1 + $0x1b] sm:$0xff]  ;;  %v13791_v14 = vor.u32 %v15795_v63, %v13790_v62  ;;  %v15921_v63 = vld [vmem:[#allocation2 + $0x2324] sm:$0xf0] }
  0xa0   :  { %7579 = vmatpush.bf16.msra.mxu1 %v13191_v28  ;;  %v12878_v28 = vld [vmem:[#allocation2 + $0x1800] sm:$0xf]  ;;  %v14294_v62 = vld [vmem:[#allocation2 + $0x2310] sm:$0xf] }
  0xa1   :  { %7592 = vmatpush.bf16.msra.mxu2 %v13383_v30  ;;  %v15567_v30 = vld [vmem:[#allocation2 + $0x1814] sm:$0xf0] }
  0xa2   :  { %7605 = vmatpush.bf16.msra.mxu3 %v13575_v36  ;;  %v15615_v36 = vld [vmem:[#allocation2 + $0x1994] sm:$0xf0]  ;;  %v12879_v50 = vor.u32 %v15567_v30, %v12878_v28  ;;  %v15885_v28 = vld [vmem:[#allocation2 + $0x2204] sm:$0xf0]  ;;  %v14342_v30 = vld [vmem:[#allocation2 + $0x2370] sm:$0xf] }
  0xa3   :  { %7567 = vmatpush.bf16.msra.mxu0 %v12975_v43  ;;  %v13814_v43 = vld [vmem:[#allocation2 + $0x1f50] sm:$0xf]  ;;  %v13071_v54 = vor.u32 %v15615_v36, %v13070_v35  ;;  %v13959_v35 = vor.u32 %v15837_v25, %v13958_v23  ;;  %v15915_v23 = vld [vmem:[#allocation2 + $0x22f4] sm:$0xf0] }
  0xa4   :  { %7580 = vmatpush.bf16.msra.mxu1 %v13167_v44  ;;  %v15801_v44 = vld [vmem:[#allocation2 + $0x1f64] sm:$0xf0]  ;;  %v13670_v25 = vld [vmem:[#allocation2 + $0x1e30] sm:$0xf] }
  0xa5   :  { %7593 = vmatpush.bf16.msra.mxu2 %v13359_v45  ;;  %v14006_v45 = vld [vmem:[#allocation2 + $0x20d0] sm:$0xf] }
  0xa6   :  { %7606 = vmatpush.bf16.msra.mxu3 %v13551_v53  ;;  %v15897_v53 = vld [vmem:[#allocation2 + $0x2264] sm:$0xf0] }
  0xa7   :  { %7568 = vmatpush.bf16.msra.mxu0 %v12951_v59  ;;  %v13815_v59 = vor.u32 %v15801_v44, %v13814_v43  ;;  %v14126_v43 = vld [vmem:[#allocation2 + $0x21c0] sm:$0xf]  ;;  %v15879_v44 = vld [vmem:[#allocation2 + $0x21d4] sm:$0xf0] }
  0xa8   :  { %7581 = vmatpush.bf16.msra.mxu1 %v13143_v60  ;;  %v14007_v60 = vor.u32 %v15849_v51, %v14006_v45  ;;  %v14318_v45 = vld [vmem:[#allocation2 + $0x2340] sm:$0xf] }
  0xa9   :  { %7594 = vmatpush.bf16.msra.mxu2 %v13335_v61  ;;  %v14199_v61 = vor.u32 %v15897_v53, %v14198_v52  ;;  %v13718_v52 = vld [vmem:[#allocation2 + $0x1e90] sm:$0xf]  ;;  %v13935_v53 = vor.u32 %v15831_v42, %v13934_v40 }
  0xaa   :  { %7607 = vmatpush.bf16.msra.mxu3 %v13527_v1  ;;  %v14391_v1 = vor.u32 %v15945_v57, %v14390_v56  ;;  %v13910_v56 = vld [vmem:[#allocation2 + $0x2010] sm:$0xf]  ;;  %v15825_v57 = vld [vmem:[#allocation2 + $0x2024] sm:$0xf0] }
  0xab   :  { %7569 = vmatpush.bf16.msra.mxu0 %v12927_v7  ;;  %v15939_v7 = vld [vmem:[#allocation2 + $0x23b4] sm:$0xf0]  ;;  %v13911_v2 = vor.u32 %v15825_v57, %v13910_v56  ;;  %v14054_v40 = vld [vmem:[#allocation2 + $0x2130] sm:$0xf] }
  0xac   :  { %7582 = vmatpush.bf16.msra.mxu1 %v13119_v9  ;;  %v16302_v9 = vld [vmem:[#allocation1 + $0x12] sm:$0xff]  ;;  %v14367_v24 = vor.u32 %v15939_v7, %v14366_v6  ;;  %v13886_v6 = vld [vmem:[#allocation2 + $0x1fe0] sm:$0xf] }
  0xad   :  { %7595 = vmatpush.bf16.msra.mxu2 %v13311_v10  ;;  %v16304_v10 = vld [vmem:[#allocation1 + $0x9] sm:$0xff]  ;;  %v14246_v42 = vld [vmem:[#allocation2 + $0x22b0] sm:$0xf] }
  0xae   :  { %7608 = vmatpush.bf16.msra.mxu3 %v13503_v17  ;;  %v14175_v17 = vor.u32 %v15891_v4, %v14174_v3  ;;  %v15771_v4 = vld [vmem:[#allocation2 + $0x1e74] sm:$0xf0] }
  0xaf   :  { %7570 = vmatpush.bf16.msra.mxu0 %v12903_v27  ;;  %v14150_v27 = vld [vmem:[#allocation2 + $0x21f0] sm:$0xf] }
  0xb0   :  { %7583 = vmatpush.bf16.msra.mxu1 %v13095_v33  ;;  %v15933_v33 = vld [vmem:[#allocation2 + $0x2384] sm:$0xf0]  ;;  %v14151_v36 = vor.u32 %v15885_v28, %v14150_v27 }
  0xb1   :  { %7596 = vmatpush.bf16.msra.mxu2 %v13287_v34  ;;  %v13767_v34 = vor.u32 %v15789_v19, %v13766_v18  ;;  %v14343_v41 = vor.u32 %v15933_v33, %v14342_v30  ;;  %v15867_v18 = vld [vmem:[#allocation2 + $0x2174] sm:$0xf0]  ;;  %v14270_v19 = vld [vmem:[#allocation2 + $0x22e0] sm:$0xf]  ;;  %v15765_v33 = vld [vmem:[#allocation2 + $0x1e44] sm:$0xf0] }
  0xb2   :  { %7609 = vmatpush.bf16.msra.mxu3 %v13479_v39  ;;  %v15783_v39 = vld [vmem:[#allocation2 + $0x1ed4] sm:$0xf0] }
  0xb3   :  { %7571 = vmatpush.bf16.msra.mxu0 %v12879_v50  ;;  %v15927_v50 = vld [vmem:[#allocation2 + $0x2354] sm:$0xf0]  ;;  %v13743_v51 = vor.u32 %v15783_v39, %v13742_v37  ;;  %v14271_v39 = vor.u32 %v15915_v23, %v14270_v19  ;;  %v10168_v19 = vld [vmem:[#allocation2 + $0x2e8] sm:$0xf0] }
  0xb4   :  { %7584 = vmatpush.bf16.msra.mxu1 %v13071_v54  ;;  %v14127_v54 = vor.u32 %v15879_v44, %v14126_v43  ;;  %v15909_v43 = vld [vmem:[#allocation2 + $0x22c4] sm:$0xf0]  ;;  %v13646_v44 = vld [vmem:[#allocation2 + $0x1e00] sm:$0xf] }
  0xb5   :  { %7597 = vmatpush.bf16.msra.mxu2 %v13263_v55  ;;  %v15777_v55 = vld [vmem:[#allocation2 + $0x1ea4] sm:$0xf0] }
  0xb6   :  { %7610 = vmatpush.bf16.msra.mxu3 %v13455_v58  ;;  %7572 = vmatmul.bf16.vlgmr.msra.gmra.mxu0 %v16300_v5  ;;  %v14319_v58 = vor.u32 %v15927_v50, %v14318_v45  ;;  %v13719_v0 = vor.u32 %v15777_v55, %v13718_v52  ;;  %v7365_v27 = vpop.f32.mrf.mxu0  ;;  %v15759_v45 = vld [vmem:[#allocation2 + $0x1e14] sm:$0xf0]  ;;  %v13838_v52 = vld [vmem:[#allocation2 + $0x1f80] sm:$0xf] }
  0xb7   :  { %7616 = vmatpush.bf16.msrb.mxu0 %v13815_v59  ;;  %7585 = vmatmul.bf16.vlgmr.msra.gmra.mxu1 %v16304_v10  ;;  %v14102_v59 = vld [vmem:[#allocation2 + $0x2190] sm:$0xf]  ;;  %v15855_v55 = vld [vmem:[#allocation2 + $0x2114] sm:$0xf0] }
  0xb8   :  { %7629 = vmatpush.bf16.msrb.mxu1 %v14007_v60  ;;  %7598 = vmatmul.bf16.vlgmr.msra.gmra.mxu2 %v16302_v9  ;;  %v15873_v60 = vld [vmem:[#allocation2 + $0x21a4] sm:$0xf0] }
  0xb9   :  { %7642 = vmatpush.bf16.msrb.mxu2 %v14199_v61  ;;  %7611 = vmatmul.bf16.vlgmr.msra.gmra.mxu3 %v16306_v13  ;;  %v1284_v61 = vld [vmem:[#allocation5] sm:$0x3f]  ;;  %v14103_v3 = vor.u32 %v15873_v60, %v14102_v59  ;;  %v15903_v59 = vld [vmem:[#allocation2 + $0x2294] sm:$0xf0]  ;;  %v14582_v60 = vld [vmem:[#allocation2 + $0x2550] sm:$0xf] }
  0xba   :  { %7655 = vmatpush.bf16.msrb.mxu3 %v14391_v1  ;;  %v13694_v1 = vld [vmem:[#allocation2 + $0x1e60] sm:$0xf]  ;;  %v1286_v7 = vperm.slane %v1284_v61, 0  ;;  %v7378_v37 = vpop.f32.mrf.mxu1  ;;  %v15993_v61 = vld [vmem:[#allocation2 + $0x2564] sm:$0xf0] }
  0xbb   :  { %7617 = vmatpush.bf16.msrb.mxu0 %v13791_v14  ;;  %v14295_v14 = vor.u32 %v15921_v63, %v14294_v62  ;;  %v14247_v63 = vor.u32 %v15909_v43, %v14246_v42  ;;  %v9952_v43 = vld [vmem:[#allocation2 + $0x138] sm:$0xf0] }
  0xbc   :  { %7630 = vmatpush.bf16.msrb.mxu1 %v13983_v16  ;;  %v15819_v16 = vld [vmem:[#allocation2 + $0x1ff4] sm:$0xf0] }
  0xbd   :  { %7643 = vmatpush.bf16.msrb.mxu2 %v14175_v17  ;;  %v14078_v17 = vld [vmem:[#allocation2 + $0x2160] sm:$0xf]  ;;  %v13887_v28 = vor.u32 %v15819_v16, %v13886_v6  ;;  %v7391_v62 = vpop.f32.mrf.mxu2  ;;  %v83_v16 = vld [vmem:[%s16561_s0 + $0x18] sm:$0x1]  ;;  %s16200_s0 = smov [#allocation10]  }
  0xbe   :  { %7656 = vmatpush.bf16.msrb.mxu3 %v14367_v24  ;;  %v13695_v24 = vor.u32 %v15771_v4, %v13694_v1  ;;  %v14079_v30 = vor.u32 %v15867_v18, %v14078_v17  ;;  %v9976_v1 = vld [vmem:[#allocation2 + $0x168] sm:$0xf0]  ;;  %v7404_v6 = vpop.f32.mrf.mxu3  ;;  %v13647_v17 = vor.u32 %v15759_v45, %v13646_v44  ;;  %v14886_v18 = vld [vmem:[#allocation2 + $0x2d4] sm:$0xf]  ;;  %v14880_v44 = vld [vmem:[#allocation2 + $0x2a4] sm:$0xf] }
  0xbf   :  { %7618 = vmatpush.bf16.msrb.mxu0 %v13767_v34  ;;  %v13862_v34 = vld [vmem:[#allocation2 + $0x1fb0] sm:$0xf]  ;;  %v10144_v45 = vld [vmem:[#allocation2 + $0x2b8] sm:$0xf0]  ;;  %s9790_s21 = sshll.u32 %s16200_s0, 4  ;;  %s9791_s21 = int_to_ptr.vmem [resolvable:$true] %s9790_s21 }
  0xc0   :  { %7631 = vmatpush.bf16.msrb.mxu1 %v13959_v35  ;;  %v15813_v35 = vld [vmem:[#allocation2 + $0x1fc4] sm:$0xf0] }
  0xc1   :  { %7644 = vmatpush.bf16.msrb.mxu2 %v14151_v36  ;;  %v7366_v36 = vadd.f32 %v7365_v27, %v1286_v7  ;;  %v13863_v56 = vor.u32 %v15813_v35, %v13862_v34  ;;  %v16316_v7 = vld [vmem:[#allocation1 + $0x2d] sm:$0xff]  ;;  %v14583_v35 = vor.u32 %v15993_v61, %v14582_v60 }
  0xc2   :  { %7657 = vmatpush.bf16.msrb.mxu3 %v14343_v41  ;;  %v15861_v41 = vld [vmem:[#allocation2 + $0x2144] sm:$0xf0]  ;;  %v9928_v61 = vld [vmem:[#allocation2 + $0x108] sm:$0xf0] }
  0xc3   :  { %7619 = vmatpush.bf16.msrb.mxu0 %v13743_v51  ;;  %v7379_v50 = vadd.f32 %v7378_v37, %v7366_v36  ;;  %v13671_v51 = vor.u32 %v15765_v33, %v13670_v25  ;;  %v14055_v57 = vor.u32 %v15861_v41, %v14054_v40  ;;  %v7380_v33 = vpop.f32.mrf.mxu1  ;;  %v10171_v37 = vor.u32 %v14886_v18, %v10168_v19  ;;  %v15987_v40 = vld [vmem:[#allocation2 + $0x2534] sm:$0xf0]  ;;  %v14832_v41 = vld [vmem:[#allocation2 + $0x124] sm:$0xf] }
  0xc4   :  { %7632 = vmatpush.bf16.msrb.mxu1 %v13935_v53  ;;  %v15807_v53 = vld [vmem:[#allocation2 + $0x1f94] sm:$0xf0]  ;;  %v14820_v19 = vld [vmem:[#allocation2 + $0xc4] sm:$0xf]  ;;  %v10288_v33 = vld [vmem:[#allocation2 + $0x3d8] sm:$0xf0] }
  0xc5   :  { %7645 = vmatpush.bf16.msrb.mxu2 %v14127_v54  ;;  %v14030_v54 = vld [vmem:[#allocation2 + $0x2100] sm:$0xf]  ;;  %v7392_v4 = vadd.f32 %v7391_v62, %v7379_v50  ;;  %v13839_v25 = vor.u32 %v15807_v53, %v13838_v52  ;;  %v14928_v50 = vld [vmem:[#allocation2 + $0x424] sm:$0xf]  ;;  %v7393_v52 = vpop.f32.mrf.mxu2  ;;  %v14874_v62 = vld [vmem:[#allocation2 + $0x274] sm:$0xf] }
  0xc6   :  { %7658 = vmatpush.bf16.msrb.mxu3 %v14319_v58  ;;  %v14222_v58 = vld [vmem:[#allocation2 + $0x2280] sm:$0xf]  ;;  %v14031_v27 = vor.u32 %v15855_v55, %v14030_v54  ;;  %v7406_v54 = vpop.f32.mrf.mxu3  ;;  %v9955_v55 = vor.u32 %v14832_v41, %v9952_v43  ;;  %v15975_v18 = vld [vmem:[#allocation2 + $0x24d4] sm:$0xf0]  ;;  %v14814_v41 = vld [vmem:[#allocation2 + $0x94] sm:$0xf] }
  0xc7   :  { %7620 = vmatpush.bf16.msrb.mxu0 %v13719_v0  ;;  %v14838_v0 = vld [vmem:[#allocation2 + $0x154] sm:$0xf]  ;;  %v16323_v23 = vadd.f32 %v7404_v6, %v7392_v4  ;;  %v14223_v34 = vor.u32 %v15903_v59, %v14222_v58  ;;  %v15981_v58 = vld [vmem:[#allocation2 + $0x2504] sm:$0xf0] }
  0xc8   :  { %7633 = vmatpush.bf16.msrb.mxu1 %v13911_v2  ;;  %v16312_v2 = vld [vmem:[#allocation1 + $0x24] sm:$0xff]  ;;  %v9979_v36 = vor.u32 %v14838_v0, %v9976_v1  ;;  %v14826_v59 = vld [vmem:[#allocation2 + $0xf4] sm:$0xf]  ;;  %v10312_v1 = vld [vmem:[#allocation2 + $0x408] sm:$0xf0] }
  0xc9   :  { %7646 = vmatpush.bf16.msrb.mxu2 %v14103_v3  ;;  %v16314_v3 = vld [vmem:[#allocation1 + $0x36] sm:$0xff]  ;;  %v9931_v6 = vor.u32 %v14826_v59, %v9928_v61  ;;  %v15963_v59 = vld [vmem:[#allocation2 + $0x2474] sm:$0xf0] }
  0xca   :  { %7659 = vmatpush.bf16.msrb.mxu3 %v14295_v14  ;;  %v16318_v14 = vld [vmem:[#allocation1 + $0x3f] sm:$0xff] }
  0xcb   :  { %7621 = vmatpush.bf16.msrb.mxu0 %v13695_v24  ;;  %v7367_v24 = vpop.f32.mrf.mxu0  ;;  %1329 = vst [vmem:[#allocation1] ss:$9 sm:$0xff] %v83_v16  ;;  %v14922_v0 = vld [vmem:[#allocation2 + $0x3f4] sm:$0xf] }
  0xcc   :  { %7634 = vmatpush.bf16.msrb.mxu1 %v13887_v28  ;;  %v14934_v28 = vld [vmem:[#allocation2 + $0x454] sm:$0xf]  ;;  %v10315_v24 = vor.u32 %v14922_v0, %v10312_v1  ;;  %v10048_v0 = vld [vmem:[#allocation2 + $0x1f8] sm:$0xf0] }
  0xcd   :  { %7647 = vmatpush.bf16.msrb.mxu2 %v14079_v30  ;;  %v10360_v30 = vld [vmem:[#allocation2 + $0x468] sm:$0xf0]  ;;  %v14910_v52 = vld [vmem:[#allocation2 + $0x394] sm:$0xf] }
  0xce   :  { %7660 = vmatpush.bf16.msrb.mxu3 %v14271_v39  ;;  %v14558_v39 = vld [vmem:[#allocation2 + $0x2520] sm:$0xf]  ;;  %v10363_v42 = vor.u32 %v14934_v28, %v10360_v30  ;;  %v10096_v28 = vld [vmem:[#allocation2 + $0x258] sm:$0xf0]  ;;  %v14916_v30 = vld [vmem:[#allocation2 + $0x3c4] sm:$0xf] }
  0xcf   :  { %7622 = vmatpush.bf16.msrb.mxu0 %v13671_v51  ;;  %v10336_v51 = vld [vmem:[#allocation2 + $0x438] sm:$0xf0]  ;;  %v14559_v53 = vor.u32 %v15987_v40, %v14558_v39  ;;  %v14486_v39 = vld [vmem:[#allocation2 + $0x2490] sm:$0xf]  ;;  %v15969_v40 = vld [vmem:[#allocation2 + $0x24a4] sm:$0xf0] }
  0xd0   :  { %7635 = vmatpush.bf16.msrb.mxu1 %v13863_v56  ;;  %v10147_v56 = vor.u32 %v14880_v44, %v10144_v45  ;;  %v10339_v60 = vor.u32 %v14928_v50, %v10336_v51  ;;  %v10291_v44 = vor.u32 %v14916_v30, %v10288_v33  ;;  %v9880_v45 = vld [vmem:[#allocation2 + $0xa8] sm:$0xf0]  ;;  %v14862_v50 = vld [vmem:[#allocation2 + $0x214] sm:$0xf] }
  0xd1   :  { %7648 = vmatpush.bf16.msrb.mxu2 %v14055_v57  ;;  %v14534_v57 = vld [vmem:[#allocation2 + $0x24f0] sm:$0xf]  ;;  %v10072_v51 = vld [vmem:[#allocation2 + $0x228] sm:$0xf0]  ;;  %v14802_v30 = vld [vmem:[#allocation2 + $0x34] sm:$0xf] }
  0xd2   :  { %7661 = vmatpush.bf16.msrb.mxu3 %v14247_v63  ;;  %v10120_v63 = vld [vmem:[#allocation2 + $0x288] sm:$0xf0]  ;;  %v14535_v4 = vor.u32 %v15981_v58, %v14534_v57  ;;  %v10075_v57 = vor.u32 %v14862_v50, %v10072_v51  ;;  %v14462_v58 = vld [vmem:[#allocation2 + $0x2460] sm:$0xf]  ;;  %v14796_v50 = vld [vmem:[#allocation2 + $0x4] sm:$0xf] }
  0xd3   :  { %7623 = vmatpush.bf16.msrb.mxu0 %v13647_v17  ;;  %v10123_v16 = vor.u32 %v14874_v62, %v10120_v63  ;;  %v14510_v17 = vld [vmem:[#allocation2 + $0x24c0] sm:$0xf]  ;;  %v9856_v62 = vld [vmem:[#allocation2 + $0x78] sm:$0xf0]  ;;  %v14856_v63 = vld [vmem:[#allocation2 + $0x1e4] sm:$0xf] }
  0xd4   :  { %7636 = vmatpush.bf16.msrb.mxu1 %v13839_v25  ;;  %v9904_v25 = vld [vmem:[#allocation2 + $0xd8] sm:$0xf0]  ;;  %v7430_v43 = vpop.f32.mrf.mxu1 }
  0xd5   :  { %7649 = vmatpush.bf16.msrb.mxu2 %v14031_v27  ;;  %v14868_v27 = vld [vmem:[#allocation2 + $0x244] sm:$0xf]  ;;  %v9808_v51 = vld [vmem:[#allocation2 + $0x18] sm:$0xf0] }
  0xd6   :  { %7662 = vmatpush.bf16.msrb.mxu3 %v14223_v34  ;;  %7624 = vmatmul.bf16.vlgmr.msrb.gmra.mxu0 %v16312_v2  ;;  %v14511_v34 = vor.u32 %v15975_v18, %v14510_v17  ;;  %v14463_v17 = vor.u32 %v15963_v59, %v14462_v58  ;;  %v14982_v59 = vld [vmem:[#allocation2 + $0x5d4] sm:$0xf] }
  0xd7   :  { %7668 = vmatpush.bf16.msra.mxu0 %v14583_v35  ;;  %7637 = vmatmul.bf16.vlgmr.msrb.gmra.mxu1 %v16316_v7  ;;  %v7417_v35 = vpop.f32.mrf.mxu0 }
  0xd8   :  { %7681 = vmatpush.bf16.msra.mxu1 %v9979_v36  ;;  %7650 = vmatmul.bf16.vlgmr.msrb.gmra.mxu2 %v16314_v3  ;;  %v9907_v36 = vor.u32 %v14820_v19, %v9904_v25  ;;  %v10051_v25 = vor.u32 %v14856_v63, %v10048_v0  ;;  %v15078_v63 = vld [vmem:[#allocation2 + $0x8d4] sm:$0xf]  ;;  %v10936_v0 = vld [vmem:[#allocation2 + $0x8e8] sm:$0xf0] }
  0xd9   :  { %7694 = vmatpush.bf16.msra.mxu2 %v10171_v37  ;;  %7663 = vmatmul.bf16.vlgmr.msrb.gmra.mxu3 %v16318_v14  ;;  %v10099_v37 = vor.u32 %v14868_v27, %v10096_v28  ;;  %v14438_v27 = vld [vmem:[#allocation2 + $0x2430] sm:$0xf]  ;;  %v15957_v28 = vld [vmem:[#allocation2 + $0x2444] sm:$0xf0] }
  0xda   :  { %7707 = vmatpush.bf16.msra.mxu3 %v10363_v42  ;;  %v7418_v42 = vadd.f32 %v7417_v35, %v16323_v23  ;;  %v9832_v35 = vld [vmem:[#allocation2 + $0x48] sm:$0xf0] }
  0xdb   :  { %7669 = vmatpush.bf16.msra.mxu0 %v14559_v53  ;;  %v10264_v53 = vld [vmem:[#allocation2 + $0x3a8] sm:$0xf0]  ;;  %v7443_v61 = vpop.f32.mrf.mxu2 }
  0xdc   :  { %7682 = vmatpush.bf16.msra.mxu1 %v9955_v55  ;;  %v7431_v54 = vadd.f32 %v7430_v43, %v7418_v42  ;;  %v14487_v55 = vor.u32 %v15969_v40, %v14486_v39  ;;  %v10267_v23 = vor.u32 %v14910_v52, %v10264_v53  ;;  %v7432_v33 = vpop.f32.mrf.mxu1  ;;  %v14898_v39 = vld [vmem:[#allocation2 + $0x334] sm:$0xf]  ;;  %v10216_v40 = vld [vmem:[#allocation2 + $0x348] sm:$0xf0]  ;;  %v14414_v42 = vld [vmem:[#allocation2 + $0x2400] sm:$0xf] }
  0xdd   :  { %7695 = vmatpush.bf16.msra.mxu2 %v10147_v56  ;;  %v9883_v56 = vor.u32 %v14814_v41, %v9880_v45  ;;  %v14439_v41 = vor.u32 %v15957_v28, %v14438_v27  ;;  %v15951_v43 = vld [vmem:[#allocation2 + $0x2414] sm:$0xf0]  ;;  %v14844_v52 = vld [vmem:[#allocation2 + $0x184] sm:$0xf]  ;;  %v10528_v28 = vld [vmem:[#allocation2 + $0x5b8] sm:$0xf0] }
  0xde   :  { %7708 = vmatpush.bf16.msra.mxu3 %v10339_v60  ;;  %v14808_v60 = vld [vmem:[#allocation2 + $0x64] sm:$0xf]  ;;  %v7444_v1 = vadd.f32 %v7443_v61, %v7431_v54  ;;  %v10219_v54 = vor.u32 %v14898_v39, %v10216_v40  ;;  %v15030_v61 = vld [vmem:[#allocation2 + $0x754] sm:$0xf]  ;;  %v11104_v40 = vld [vmem:[#allocation2 + $0xa38] sm:$0xf0] }
  0xdf   :  { %7670 = vmatpush.bf16.msra.mxu0 %v14535_v4  ;;  %v7456_v4 = vpop.f32.mrf.mxu3  ;;  %v7419_v19 = vpop.f32.mrf.mxu0  ;;  %v14976_v27 = vld [vmem:[#allocation2 + $0x5a4] sm:$0xf] }
  0xe0   :  { %7683 = vmatpush.bf16.msra.mxu1 %v9931_v6  ;;  %v14904_v6 = vld [vmem:[#allocation2 + $0x364] sm:$0xf]  ;;  %v16330_v18 = vadd.f32 %v7456_v4, %v7444_v1  ;;  %v9811_v1 = vor.u32 %v14796_v50, %v9808_v51  ;;  %v15018_v50 = vld [vmem:[#allocation2 + $0x6f4] sm:$0xf] }
  0xe1   :  { %7696 = vmatpush.bf16.msra.mxu2 %v10123_v16  ;;  %v10240_v16 = vld [vmem:[#allocation2 + $0x378] sm:$0xf0]  ;;  %v15120_v39 = vld [vmem:[#allocation2 + $0xa24] sm:$0xf] }
  0xe2   :  { %7709 = vmatpush.bf16.msra.mxu3 %v10315_v24  ;;  %v9859_v24 = vor.u32 %v14808_v60, %v9856_v62  ;;  %v10552_v60 = vld [vmem:[#allocation2 + $0x5e8] sm:$0xf0]  ;;  %v11107_v51 = vor.u32 %v15120_v39, %v11104_v40  ;;  %v15102_v40 = vld [vmem:[#allocation2 + $0x994] sm:$0xf] }
  0xe3   :  { %7671 = vmatpush.bf16.msra.mxu0 %v14511_v34  ;;  %v10243_v34 = vor.u32 %v14904_v6, %v10240_v16  ;;  %v7445_v53 = vpop.f32.mrf.mxu2  ;;  %v10744_v62 = vld [vmem:[#allocation2 + $0x768] sm:$0xf0]  ;;  %v15126_v6 = vld [vmem:[#allocation2 + $0xa54] sm:$0xf]  ;;  %v10555_v19 = vor.u32 %v14982_v59, %v10552_v60  ;;  %v14964_v60 = vld [vmem:[#allocation2 + $0x544] sm:$0xf] }
  0xe4   :  { %7684 = vmatpush.bf16.msra.mxu1 %v9907_v36  ;;  %v14850_v36 = vld [vmem:[#allocation2 + $0x1b4] sm:$0xf]  ;;  %v11128_v16 = vld [vmem:[#allocation2 + $0xa68] sm:$0xf0] }
  0xe5   :  { %7697 = vmatpush.bf16.msra.mxu2 %v10099_v37  ;;  %v10024_v37 = vld [vmem:[#allocation2 + $0x1c8] sm:$0xf0]  ;;  %v11131_v33 = vor.u32 %v15126_v6, %v11128_v16  ;;  %v15066_v53 = vld [vmem:[#allocation2 + $0x874] sm:$0xf]  ;;  %v15108_v6 = vld [vmem:[#allocation2 + $0x9c4] sm:$0xf] }
  0xe6   :  { %7710 = vmatpush.bf16.msra.mxu3 %v10291_v44  ;;  %v9835_v44 = vor.u32 %v14802_v30, %v9832_v35  ;;  %v10027_v45 = vor.u32 %v14850_v36, %v10024_v37  ;;  %v15024_v30 = vld [vmem:[#allocation2 + $0x724] sm:$0xf]  ;;  %v10912_v36 = vld [vmem:[#allocation2 + $0x8b8] sm:$0xf0]  ;;  %v10840_v39 = vld [vmem:[#allocation2 + $0x828] sm:$0xf0] }
  0xe7   :  { %7672 = vmatpush.bf16.msra.mxu0 %v14487_v55  ;;  %v10000_v55 = vld [vmem:[#allocation2 + $0x198] sm:$0xf0]  ;;  %v7458_v58 = vpop.f32.mrf.mxu3  ;;  %v15072_v35 = vld [vmem:[#allocation2 + $0x8a4] sm:$0xf] }
  0xe8   :  { %7685 = vmatpush.bf16.msra.mxu1 %v9883_v56  ;;  %v14892_v56 = vld [vmem:[#allocation2 + $0x304] sm:$0xf]  ;;  %v10003_v4 = vor.u32 %v14844_v52, %v10000_v55  ;;  %v1330_v37 = vld [vmem:[#allocation1] sm:$0xff]  ;;  %v10696_v52 = vld [vmem:[#allocation2 + $0x708] sm:$0xf0] }
  0xe9   :  { %7698 = vmatpush.bf16.msra.mxu2 %v10075_v57  ;;  %v10192_v57 = vld [vmem:[#allocation2 + $0x318] sm:$0xf0]  ;;  %v15114_v55 = vld [vmem:[#allocation2 + $0x9f4] sm:$0xf]  ;;  %v10699_v58 = vor.u32 %v15018_v50, %v10696_v52  ;;  %v15000_v50 = vld [vmem:[#allocation2 + $0x664] sm:$0xf] }
  0xea   :  { %7711 = vmatpush.bf16.msra.mxu3 %v10267_v23  ;;  %v14415_v23 = vor.u32 %v15951_v43, %v14414_v42  ;;  %v10915_v43 = vor.u32 %v15072_v35, %v10912_v36  ;;  %v11056_v16 = vld [vmem:[#allocation2 + $0x9d8] sm:$0xf0]  ;;  %v10648_v36 = vld [vmem:[#allocation2 + $0x6a8] sm:$0xf0] }
  0xeb   :  { %7673 = vmatpush.bf16.msra.mxu0 %v14463_v17  ;;  %v10195_v17 = vor.u32 %v14892_v56, %v10192_v57  ;;  %v11080_v56 = vld [vmem:[#allocation2 + $0xa08] sm:$0xf0] }
  0xec   :  { %7686 = vmatpush.bf16.msra.mxu1 %v9859_v24  ;;  %v10747_v24 = vor.u32 %v15030_v61, %v10744_v62  ;;  %v10480_v61 = vld [vmem:[#allocation2 + $0x558] sm:$0xf0]  ;;  %v11083_v62 = vor.u32 %v15114_v55, %v11080_v56 }
  0xed   :  { %7699 = vmatpush.bf16.msra.mxu2 %v10051_v25  ;;  %v10939_v25 = vor.u32 %v15078_v63, %v10936_v0  ;;  %v10672_v63 = vld [vmem:[#allocation2 + $0x6d8] sm:$0xf0]  ;;  %v15060_v0 = vld [vmem:[#allocation2 + $0x844] sm:$0xf] }
  0xee   :  { %7712 = vmatpush.bf16.msra.mxu3 %v10243_v34  ;;  %v10720_v34 = vld [vmem:[#allocation2 + $0x738] sm:$0xf0] }
  0xef   :  { %7674 = vmatpush.bf16.msra.mxu0 %v14439_v41  ;;  %v10531_v41 = vor.u32 %v14976_v27, %v10528_v28  ;;  %v10723_v42 = vor.u32 %v15024_v30, %v10720_v34  ;;  %v14958_v28 = vld [vmem:[#allocation2 + $0x514] sm:$0xf]  ;;  %v10456_v30 = vld [vmem:[#allocation2 + $0x528] sm:$0xf0]  ;;  %v11059_v34 = vor.u32 %v15108_v6, %v11056_v16  ;;  %v10816_v55 = vld [vmem:[#allocation2 + $0x7f8] sm:$0xf0] }
  0xf0   :  { %7687 = vmatpush.bf16.msra.mxu1 %v9835_v44  ;;  %v14970_v44 = vld [vmem:[#allocation2 + $0x574] sm:$0xf] }
  0xf1   :  { %7700 = vmatpush.bf16.msra.mxu2 %v10027_v45  ;;  %v10504_v45 = vld [vmem:[#allocation2 + $0x588] sm:$0xf0]  ;;  %v14994_v6 = vld [vmem:[#allocation2 + $0x634] sm:$0xf] }
  0xf2   :  { %7713 = vmatpush.bf16.msra.mxu3 %v10219_v54  ;;  %v10888_v54 = vld [vmem:[#allocation2 + $0x888] sm:$0xf0]  ;;  %v10507_v57 = vor.u32 %v14970_v44, %v10504_v45  ;;  %v14952_v44 = vld [vmem:[#allocation2 + $0x4e4] sm:$0xf]  ;;  %v10432_v45 = vld [vmem:[#allocation2 + $0x4f8] sm:$0xf0] }
  0xf3   :  { %7675 = vmatpush.bf16.msra.mxu0 %v14415_v23  ;;  %v10891_v59 = vor.u32 %v15066_v53, %v10888_v54  ;;  %v15012_v23 = vld [vmem:[#allocation2 + $0x6c4] sm:$0xf]  ;;  %v10624_v53 = vld [vmem:[#allocation2 + $0x678] sm:$0xf0] }
  0xf4   :  { %7688 = vmatpush.bf16.msra.mxu1 %v9811_v1  ;;  %v10864_v1 = vld [vmem:[#allocation2 + $0x858] sm:$0xf0]  ;;  %v15048_v54 = vld [vmem:[#allocation2 + $0x7e4] sm:$0xf] }
  0xf5   :  { %7701 = vmatpush.bf16.msra.mxu2 %v10003_v4  ;;  %v7469_v4 = vpop.f32.mrf.mxu0  ;;  %v10867_v27 = vor.u32 %v15060_v0, %v10864_v1  ;;  %v10819_v0 = vor.u32 %v15048_v54, %v10816_v55  ;;  %v14946_v1 = vld [vmem:[#allocation2 + $0x4b4] sm:$0xf]  ;;  %v11704_v55 = vld [vmem:[#allocation2 + $0xee8] sm:$0xf0] }
  0xf6   :  { %7714 = vmatpush.bf16.msra.mxu3 %v10195_v17  ;;  %7676 = vmatmul.bf16.vlgmr.msra.gmra.mxu0 %v1330_v37  ;;  %v7470_v17 = vadd.f32 %v7469_v4, %v16330_v18  ;;  %v15054_v37 = vld [vmem:[#allocation2 + $0x814] sm:$0xf]  ;;  %v10408_v4 = vld [vmem:[#allocation2 + $0x4c8] sm:$0xf0] }
  0xf7   :  { %7720 = vmatpush.bf16.msrb.mxu0 %v10555_v19  ;;  %7689 = vmatmul.bf16.vlgmr.msra.gmra.mxu1 %v16248_v21  ;;  %v10483_v19 = vor.u32 %v14964_v60, %v10480_v61  ;;  %v10435_v61 = vor.u32 %v14952_v44, %v10432_v45  ;;  %v15174_v44 = vld [vmem:[#allocation2 + $0xbd4] sm:$0xf]  ;;  %v11320_v45 = vld [vmem:[#allocation2 + $0xbe8] sm:$0xf0] }
  0xf8   :  { %7733 = vmatpush.bf16.msrb.mxu1 %v10747_v24  ;;  %7702 = vmatmul.bf16.vlgmr.msra.gmra.mxu2 %v16253_v26  ;;  %v7482_v24 = vpop.f32.mrf.mxu1  ;;  %v15270_v54 = vld [vmem:[#allocation2 + $0xed4] sm:$0xf] }
  0xf9   :  { %7746 = vmatpush.bf16.msrb.mxu2 %v10939_v25  ;;  %7715 = vmatmul.bf16.vlgmr.msra.gmra.mxu3 %v16246_v20  ;;  %v10675_v25 = vor.u32 %v15012_v23, %v10672_v63  ;;  %v7483_v35 = vadd.f32 %v7482_v24, %v7470_v17  ;;  %v10627_v63 = vor.u32 %v15000_v50, %v10624_v53  ;;  %v10600_v17 = vld [vmem:[#allocation2 + $0x648] sm:$0xf0]  ;;  %v15222_v50 = vld [vmem:[#allocation2 + $0xd54] sm:$0xf] }
  0xfa   :  { %7759 = vmatpush.bf16.msrb.mxu3 %v11131_v33  ;;  %v15006_v33 = vld [vmem:[#allocation2 + $0x694] sm:$0xf]  ;;  %v10792_v24 = vld [vmem:[#allocation2 + $0x7c8] sm:$0xf0] }
  0xfb   :  { %7721 = vmatpush.bf16.msrb.mxu0 %v10531_v41  ;;  %v11032_v41 = vld [vmem:[#allocation2 + $0x9a8] sm:$0xf0]  ;;  %v10651_v18 = vor.u32 %v15006_v33, %v10648_v36  ;;  %v7495_v52 = vpop.f32.mrf.mxu2  ;;  %v10384_v33 = vld [vmem:[#allocation2 + $0x498] sm:$0xf0]  ;;  %v14988_v36 = vld [vmem:[#allocation2 + $0x604] sm:$0xf] }
  0xfc   :  { %7734 = vmatpush.bf16.msrb.mxu1 %v10723_v42  ;;  %v10459_v42 = vor.u32 %v14958_v28, %v10456_v30  ;;  %v7496_v56 = vadd.f32 %v7495_v52, %v7483_v35  ;;  %v10411_v28 = vor.u32 %v14946_v1, %v10408_v4  ;;  %v14940_v30 = vld [vmem:[#allocation2 + $0x484] sm:$0xf]  ;;  %v11512_v53 = vld [vmem:[#allocation2 + $0xd68] sm:$0xf0]  ;;  %v11296_v1 = vld [vmem:[#allocation2 + $0xbb8] sm:$0xf0] }
  0xfd   :  { %7747 = vmatpush.bf16.msrb.mxu2 %v10915_v43  ;;  %v10843_v43 = vor.u32 %v15054_v37, %v10840_v39  ;;  %v7471_v60 = vpop.f32.mrf.mxu0  ;;  %v10576_v37 = vld [vmem:[#allocation2 + $0x618] sm:$0xf0]  ;;  %v15036_v39 = vld [vmem:[#allocation2 + $0x784] sm:$0xf]  ;;  %v10387_v52 = vor.u32 %v14940_v30, %v10384_v33  ;;  %v15162_v33 = vld [vmem:[#allocation2 + $0xb74] sm:$0xf] }
  0xfe   :  { %7760 = vmatpush.bf16.msrb.mxu3 %v11107_v51  ;;  %v11035_v51 = vor.u32 %v15102_v40, %v11032_v41  ;;  %v10768_v41 = vld [vmem:[#allocation2 + $0x798] sm:$0xf0]  ;;  %v15216_v4 = vld [vmem:[#allocation2 + $0xd24] sm:$0xf] }
  0xff   :  { %7722 = vmatpush.bf16.msrb.mxu0 %v10507_v57  ;;  %v7508_v57 = vpop.f32.mrf.mxu3 }
 0x100   :  { %7735 = vmatpush.bf16.msrb.mxu1 %v10699_v58  ;;  %v15096_v58 = vld [vmem:[#allocation2 + $0x964] sm:$0xf]  ;;  %v7484_v23 = vpop.f32.mrf.mxu1 }
 0x101   :  { %7748 = vmatpush.bf16.msrb.mxu2 %v10891_v59  ;;  %v11008_v59 = vld [vmem:[#allocation2 + $0x978] sm:$0xf0]  ;;  %v11515_v23 = vor.u32 %v15222_v50, %v11512_v53 }
 0x102   :  { %7761 = vmatpush.bf16.msrb.mxu3 %v11083_v62  ;;  %v16336_v62 = vadd.f32 %v7508_v57, %v7496_v56  ;;  %v11011_v16 = vor.u32 %v15096_v58, %v11008_v59  ;;  %v10579_v56 = vor.u32 %v14988_v36, %v10576_v37  ;;  %v10771_v57 = vor.u32 %v15036_v39, %v10768_v41  ;;  %v15318_v58 = vld [vmem:[#allocation2 + $0x1054] sm:$0xf]  ;;  %v11896_v59 = vld [vmem:[#allocation2 + $0x1068] sm:$0xf0]  ;;  %v11248_v50 = vld [vmem:[#allocation2 + $0xb58] sm:$0xf0] }
 0x103   :  { %7723 = vmatpush.bf16.msrb.mxu0 %v10483_v19  ;;  %v15042_v19 = vld [vmem:[#allocation2 + $0x7b4] sm:$0xf]  ;;  %v11464_v37 = vld [vmem:[#allocation2 + $0xd08] sm:$0xf0]  ;;  %v11440_v53 = vld [vmem:[#allocation2 + $0xcd8] sm:$0xf0] }
 0x104   :  { %7736 = vmatpush.bf16.msrb.mxu1 %v10675_v25  ;;  %v15090_v25 = vld [vmem:[#allocation2 + $0x934] sm:$0xf]  ;;  %v10795_v35 = vor.u32 %v15042_v19, %v10792_v24  ;;  %v11680_v19 = vld [vmem:[#allocation2 + $0xeb8] sm:$0xf0]  ;;  %v15312_v24 = vld [vmem:[#allocation2 + $0x1024] sm:$0xf] }
 0x105   :  { %7749 = vmatpush.bf16.msrb.mxu2 %v10867_v27  ;;  %v10984_v27 = vld [vmem:[#allocation2 + $0x948] sm:$0xf0]  ;;  %v15258_v39 = vld [vmem:[#allocation2 + $0xe74] sm:$0xf] }
 0x106   :  { %7762 = vmatpush.bf16.msrb.mxu3 %v11059_v34  ;;  %v10603_v34 = vor.u32 %v14994_v6, %v10600_v17  ;;  %v10987_v40 = vor.u32 %v15090_v25, %v10984_v27  ;;  %v11899_v6 = vor.u32 %v15318_v58, %v11896_v59  ;;  %v15264_v17 = vld [vmem:[#allocation2 + $0xea4] sm:$0xf]  ;;  %v11872_v25 = vld [vmem:[#allocation2 + $0x1038] sm:$0xf0]  ;;  %v15306_v41 = vld [vmem:[#allocation2 + $0xff4] sm:$0xf] }
 0x107   :  { %7724 = vmatpush.bf16.msrb.mxu0 %v10459_v42  ;;  %v15084_v42 = vld [vmem:[#allocation2 + $0x904] sm:$0xf]  ;;  %v11683_v30 = vor.u32 %v15264_v17, %v11680_v19  ;;  %v11875_v36 = vor.u32 %v15312_v24, %v11872_v25  ;;  %v11824_v58 = vld [vmem:[#allocation2 + $0xfd8] sm:$0xf0]  ;;  %v11416_v17 = vld [vmem:[#allocation2 + $0xca8] sm:$0xf0] }
 0x108   :  { %7737 = vmatpush.bf16.msrb.mxu1 %v10651_v18  ;;  %v10960_v18 = vld [vmem:[#allocation2 + $0x918] sm:$0xf0]  ;;  %v15246_v19 = vld [vmem:[#allocation2 + $0xe14] sm:$0xf]  ;;  %v11608_v24 = vld [vmem:[#allocation2 + $0xe28] sm:$0xf0] }
 0x109   :  { %7750 = vmatpush.bf16.msrb.mxu2 %v10843_v43  ;;  %v7497_v43 = vpop.f32.mrf.mxu2  ;;  %v10963_v60 = vor.u32 %v15084_v42, %v10960_v18  ;;  %v11848_v42 = vld [vmem:[#allocation2 + $0x1008] sm:$0xf0]  ;;  %v15294_v25 = vld [vmem:[#allocation2 + $0xf94] sm:$0xf] }
 0x10a   :  { %7763 = vmatpush.bf16.msrb.mxu3 %v11035_v51  ;;  %v7510_v51 = vpop.f32.mrf.mxu3 }
 0x10b   :  { %7725 = vmatpush.bf16.msrb.mxu0 %v10435_v61  ;;  %v11323_v61 = vor.u32 %v15174_v44, %v11320_v45  ;;  %v15156_v45 = vld [vmem:[#allocation2 + $0xb44] sm:$0xf] }
 0x10c   :  { %7738 = vmatpush.bf16.msrb.mxu1 %v10627_v63  ;;  %v11707_v63 = vor.u32 %v15270_v54, %v11704_v55  ;;  %v15204_v51 = vld [vmem:[#allocation2 + $0xcc4] sm:$0xf]  ;;  %v11632_v55 = vld [vmem:[#allocation2 + $0xe58] sm:$0xf0] }
 0x10d   :  { %7751 = vmatpush.bf16.msrb.mxu2 %v10819_v0  ;;  %v15168_v0 = vld [vmem:[#allocation2 + $0xba4] sm:$0xf] }
 0x10e   :  { %7764 = vmatpush.bf16.msrb.mxu3 %v11011_v16  ;;  %v11488_v16 = vld [vmem:[#allocation2 + $0xd38] sm:$0xf0]  ;;  %v11299_v27 = vor.u32 %v15168_v0, %v11296_v1  ;;  %v15252_v54 = vld [vmem:[#allocation2 + $0xe44] sm:$0xf]  ;;  %v15150_v0 = vld [vmem:[#allocation2 + $0xb14] sm:$0xf] }
 0x10f   :  { %7726 = vmatpush.bf16.msrb.mxu0 %v10411_v28  ;;  %v11491_v28 = vor.u32 %v15216_v4, %v11488_v16  ;;  %v11224_v1 = vld [vmem:[#allocation2 + $0xb28] sm:$0xf0]  ;;  %v15198_v4 = vld [vmem:[#allocation2 + $0xc94] sm:$0xf] }
 0x110   :  { %7739 = vmatpush.bf16.msrb.mxu1 %v10603_v34  ;;  %v11272_v34 = vld [vmem:[#allocation2 + $0xb88] sm:$0xf0] }
 0x111   :  { %7752 = vmatpush.bf16.msrb.mxu2 %v10795_v35  ;;  %v15210_v35 = vld [vmem:[#allocation2 + $0xcf4] sm:$0xf]  ;;  %v11275_v18 = vor.u32 %v15162_v33, %v11272_v34  ;;  %v15144_v33 = vld [vmem:[#allocation2 + $0xae4] sm:$0xf]  ;;  %v11200_v34 = vld [vmem:[#allocation2 + $0xaf8] sm:$0xf0] }
 0x112   :  { %7765 = vmatpush.bf16.msrb.mxu3 %v10987_v40  ;;  %v11656_v40 = vld [vmem:[#allocation2 + $0xe88] sm:$0xf0]  ;;  %v11467_v43 = vor.u32 %v15210_v35, %v11464_v37  ;;  %v15192_v35 = vld [vmem:[#allocation2 + $0xc64] sm:$0xf] }
 0x113   :  { %7727 = vmatpush.bf16.msrb.mxu0 %v10387_v52  ;;  %v11659_v44 = vor.u32 %v15258_v39, %v11656_v40  ;;  %v11851_v52 = vor.u32 %v15306_v41, %v11848_v42  ;;  %v11392_v39 = vld [vmem:[#allocation2 + $0xc78] sm:$0xf0]  ;;  %v15240_v40 = vld [vmem:[#allocation2 + $0xde4] sm:$0xf] }
 0x114   :  { %7740 = vmatpush.bf16.msrb.mxu1 %v10579_v56  ;;  %v7521_v56 = vpop.f32.mrf.mxu0  ;;  %v11584_v41 = vld [vmem:[#allocation2 + $0xdf8] sm:$0xf0] }
 0x115   :  { %7753 = vmatpush.bf16.msrb.mxu2 %v10771_v57  ;;  %v15300_v57 = vld [vmem:[#allocation2 + $0xfc4] sm:$0xf]  ;;  %v7522_v59 = vadd.f32 %v7521_v56, %v16336_v62  ;;  %v11419_v62 = vor.u32 %v15198_v4, %v11416_v17  ;;  %v11176_v56 = vld [vmem:[#allocation2 + $0xac8] sm:$0xf0]  ;;  %v11152_v4 = vld [vmem:[#allocation2 + $0xa98] sm:$0xf0] }
 0x116   :  { %7766 = vmatpush.bf16.msrb.mxu3 %v10963_v60  ;;  %7728 = vmatmul.bf16.vlgmr.msrb.gmra.mxu0 %v16250_v22  ;;  %v11251_v60 = vor.u32 %v15156_v45, %v11248_v50  ;;  %v11203_v50 = vor.u32 %v15144_v33, %v11200_v34  ;;  %v15180_v17 = vld [vmem:[#allocation2 + $0xc04] sm:$0xf]  ;;  %v15366_v33 = vld [vmem:[#allocation2 + $0x11d4] sm:$0xf]  ;;  %v12088_v34 = vld [vmem:[#allocation2 + $0x11e8] sm:$0xf0] }
 0x117   :  { %7772 = vmatpush.bf16.msra.mxu0 %v11323_v61  ;;  %7741 = vmatmul.bf16.vlgmr.msrb.gmra.mxu1 %v16260_v31  ;;  %v7534_v61 = vpop.f32.mrf.mxu1 }
 0x118   :  { %7785 = vmatpush.bf16.msra.mxu1 %v11515_v23  ;;  %7754 = vmatmul.bf16.vlgmr.msrb.gmra.mxu2 %v16264_v38  ;;  %v11443_v23 = vor.u32 %v15204_v51, %v11440_v53  ;;  %v7535_v16 = vadd.f32 %v7534_v61, %v7522_v59  ;;  %v11395_v53 = vor.u32 %v15192_v35, %v11392_v39  ;;  %v11368_v59 = vld [vmem:[#allocation2 + $0xc48] sm:$0xf0]  ;;  %v15414_v35 = vld [vmem:[#allocation2 + $0x1354] sm:$0xf] }
 0x119   :  { %7798 = vmatpush.bf16.msra.mxu2 %v11707_v63  ;;  %7767 = vmatmul.bf16.vlgmr.msrb.gmra.mxu3 %v16258_v29  ;;  %v11635_v63 = vor.u32 %v15252_v54, %v11632_v55  ;;  %v11587_v54 = vor.u32 %v15240_v40, %v11584_v41  ;;  %v15138_v55 = vld [vmem:[#allocation2 + $0xab4] sm:$0xf]  ;;  %v11560_v61 = vld [vmem:[#allocation2 + $0xdc8] sm:$0xf0] }
 0x11a   :  { %7811 = vmatpush.bf16.msra.mxu3 %v11899_v6  ;;  %v11827_v6 = vor.u32 %v15300_v57, %v11824_v58  ;;  %v15186_v57 = vld [vmem:[#allocation2 + $0xc34] sm:$0xf]  ;;  %v12280_v39 = vld [vmem:[#allocation2 + $0x1368] sm:$0xf0] }
 0x11b   :  { %7773 = vmatpush.bf16.msra.mxu0 %v11299_v27  ;;  %v11800_v27 = vld [vmem:[#allocation2 + $0xfa8] sm:$0xf0]  ;;  %v7547_v37 = vpop.f32.mrf.mxu2  ;;  %v15462_v40 = vld [vmem:[#allocation2 + $0x14d4] sm:$0xf] }
 0x11c   :  { %7786 = vmatpush.bf16.msra.mxu1 %v11491_v28  ;;  %v11227_v28 = vor.u32 %v15150_v0, %v11224_v1  ;;  %v7548_v42 = vadd.f32 %v7547_v37, %v7535_v16  ;;  %v7523_v45 = vpop.f32.mrf.mxu0  ;;  %v11179_v0 = vor.u32 %v15138_v55, %v11176_v56  ;;  %v15132_v1 = vld [vmem:[#allocation2 + $0xa84] sm:$0xf]  ;;  %v12472_v41 = vld [vmem:[#allocation2 + $0x14e8] sm:$0xf0]  ;;  %v12064_v55 = vld [vmem:[#allocation2 + $0x11b8] sm:$0xf0] }
 0x11d   :  { %7799 = vmatpush.bf16.msra.mxu2 %v11683_v30  ;;  %v11611_v30 = vor.u32 %v15246_v19, %v11608_v24  ;;  %v11344_v19 = vld [vmem:[#allocation2 + $0xc18] sm:$0xf0]  ;;  %v15228_v24 = vld [vmem:[#allocation2 + $0xd84] sm:$0xf]  ;;  %v11155_v37 = vor.u32 %v15132_v1, %v11152_v4  ;;  %v15354_v4 = vld [vmem:[#allocation2 + $0x1174] sm:$0xf] }
 0x11e   :  { %7812 = vmatpush.bf16.msra.mxu3 %v11875_v36  ;;  %v11803_v36 = vor.u32 %v15294_v25, %v11800_v27  ;;  %v11536_v27 = vld [vmem:[#allocation2 + $0xd98] sm:$0xf0]  ;;  %v15408_v56 = vld [vmem:[#allocation2 + $0x1324] sm:$0xf] }
 0x11f   :  { %7774 = vmatpush.bf16.msra.mxu0 %v11275_v18  ;;  %v7560_v18 = vpop.f32.mrf.mxu3  ;;  %v7536_v51 = vpop.f32.mrf.mxu1 }
 0x120   :  { %7787 = vmatpush.bf16.msra.mxu1 %v11467_v43  ;;  %v15288_v43 = vld [vmem:[#allocation2 + $0xf64] sm:$0xf]  ;;  %v12283_v51 = vor.u32 %v15414_v35, %v12280_v39  ;;  %v12016_v35 = vld [vmem:[#allocation2 + $0x1158] sm:$0xf0] }
 0x121   :  { %7800 = vmatpush.bf16.msra.mxu2 %v11659_v44  ;;  %v11776_v44 = vld [vmem:[#allocation2 + $0xf78] sm:$0xf0] }
 0x122   :  { %7813 = vmatpush.bf16.msra.mxu3 %v11851_v52  ;;  %v16343_v52 = vadd.f32 %v7560_v18, %v7548_v42  ;;  %v11779_v58 = vor.u32 %v15288_v43, %v11776_v44  ;;  %v11347_v42 = vor.u32 %v15180_v17, %v11344_v19  ;;  %v11539_v18 = vor.u32 %v15228_v24, %v11536_v27  ;;  %v15510_v43 = vld [vmem:[#allocation2 + $0x1654] sm:$0xf]  ;;  %v12664_v44 = vld [vmem:[#allocation2 + $0x1668] sm:$0xf0]  ;;  %v12208_v39 = vld [vmem:[#allocation2 + $0x12d8] sm:$0xf0] }
 0x123   :  { %7775 = vmatpush.bf16.msra.mxu0 %v11251_v60  ;;  %v15234_v60 = vld [vmem:[#allocation2 + $0xdb4] sm:$0xf]  ;;  %v12232_v19 = vld [vmem:[#allocation2 + $0x1308] sm:$0xf0] }
 0x124   :  { %7788 = vmatpush.bf16.msra.mxu1 %v11443_v23  ;;  %v15282_v23 = vld [vmem:[#allocation2 + $0xf34] sm:$0xf]  ;;  %v11563_v16 = vor.u32 %v15234_v60, %v11560_v61  ;;  %v12448_v60 = vld [vmem:[#allocation2 + $0x14b8] sm:$0xf0]  ;;  %v15504_v61 = vld [vmem:[#allocation2 + $0x1624] sm:$0xf] }
 0x125   :  { %7801 = vmatpush.bf16.msra.mxu2 %v11635_v63  ;;  %v11752_v63 = vld [vmem:[#allocation2 + $0xf48] sm:$0xf0]  ;;  %v15450_v24 = vld [vmem:[#allocation2 + $0x1474] sm:$0xf] }
 0x126   :  { %7814 = vmatpush.bf16.msra.mxu3 %v11827_v6  ;;  %v11371_v6 = vor.u32 %v15186_v57, %v11368_v59  ;;  %v11755_v25 = vor.u32 %v15282_v23, %v11752_v63  ;;  %v12667_v57 = vor.u32 %v15510_v43, %v12664_v44  ;;  %v15456_v59 = vld [vmem:[#allocation2 + $0x14a4] sm:$0xf]  ;;  %v12640_v23 = vld [vmem:[#allocation2 + $0x1638] sm:$0xf0]  ;;  %v15498_v27 = vld [vmem:[#allocation2 + $0x15f4] sm:$0xf] }
 0x127   :  { %7776 = vmatpush.bf16.msra.mxu0 %v11227_v28  ;;  %v15276_v28 = vld [vmem:[#allocation2 + $0xf04] sm:$0xf]  ;;  %v12451_v1 = vor.u32 %v15456_v59, %v12448_v60  ;;  %v12643_v17 = vor.u32 %v15504_v61, %v12640_v23  ;;  %v12592_v43 = vld [vmem:[#allocation2 + $0x15d8] sm:$0xf0]  ;;  %v12184_v59 = vld [vmem:[#allocation2 + $0x12a8] sm:$0xf0] }
 0x128   :  { %7789 = vmatpush.bf16.msra.mxu1 %v11419_v62  ;;  %v11728_v62 = vld [vmem:[#allocation2 + $0xf18] sm:$0xf0]  ;;  %v15438_v60 = vld [vmem:[#allocation2 + $0x1414] sm:$0xf]  ;;  %v12376_v61 = vld [vmem:[#allocation2 + $0x1428] sm:$0xf0] }
 0x129   :  { %7802 = vmatpush.bf16.msra.mxu2 %v11611_v30  ;;  %v7549_v30 = vpop.f32.mrf.mxu2  ;;  %v11731_v45 = vor.u32 %v15276_v28, %v11728_v62  ;;  %v12616_v28 = vld [vmem:[#allocation2 + $0x1608] sm:$0xf0]  ;;  %v15486_v23 = vld [vmem:[#allocation2 + $0x1594] sm:$0xf] }
 0x12a   :  { %7815 = vmatpush.bf16.msra.mxu3 %v11803_v36  ;;  %v7562_v36 = vpop.f32.mrf.mxu3 }
 0x12b   :  { %7777 = vmatpush.bf16.msra.mxu0 %v11203_v50  ;;  %v12091_v50 = vor.u32 %v15366_v33, %v12088_v34  ;;  %v15348_v34 = vld [vmem:[#allocation2 + $0x1144] sm:$0xf] }
 0x12c   :  { %7790 = vmatpush.bf16.msra.mxu1 %v11395_v53  ;;  %v12475_v53 = vor.u32 %v15462_v40, %v12472_v41  ;;  %v15396_v36 = vld [vmem:[#allocation2 + $0x12c4] sm:$0xf]  ;;  %v12400_v41 = vld [vmem:[#allocation2 + $0x1458] sm:$0xf0] }
 0x12d   :  { %7803 = vmatpush.bf16.msra.mxu2 %v11587_v54  ;;  %v15360_v54 = vld [vmem:[#allocation2 + $0x11a4] sm:$0xf] }
 0x12e   :  { %7816 = vmatpush.bf16.msra.mxu3 %v11779_v58  ;;  %v12256_v58 = vld [vmem:[#allocation2 + $0x1338] sm:$0xf0]  ;;  %v12067_v63 = vor.u32 %v15360_v54, %v12064_v55  ;;  %v15444_v40 = vld [vmem:[#allocation2 + $0x1444] sm:$0xf]  ;;  %v15342_v54 = vld [vmem:[#allocation2 + $0x1114] sm:$0xf] }
 0x12f   :  { %7778 = vmatpush.bf16.msra.mxu0 %v11179_v0  ;;  %v12259_v0 = vor.u32 %v15408_v56, %v12256_v58  ;;  %v11992_v55 = vld [vmem:[#allocation2 + $0x1128] sm:$0xf0]  ;;  %v15390_v56 = vld [vmem:[#allocation2 + $0x1294] sm:$0xf] }
 0x130   :  { %7791 = vmatpush.bf16.msra.mxu1 %v11371_v6  ;;  %v12040_v6 = vld [vmem:[#allocation2 + $0x1188] sm:$0xf0] }
 0x131   :  { %7804 = vmatpush.bf16.msra.mxu2 %v11563_v16  ;;  %v15402_v16 = vld [vmem:[#allocation2 + $0x12f4] sm:$0xf]  ;;  %v12043_v62 = vor.u32 %v15354_v4, %v12040_v6  ;;  %v15336_v4 = vld [vmem:[#allocation2 + $0x10e4] sm:$0xf]  ;;  %v11968_v6 = vld [vmem:[#allocation2 + $0x10f8] sm:$0xf0] }
 0x132   :  { %7817 = vmatpush.bf16.msra.mxu3 %v11755_v25  ;;  %v12424_v25 = vld [vmem:[#allocation2 + $0x1488] sm:$0xf0]  ;;  %v12235_v30 = vor.u32 %v15402_v16, %v12232_v19  ;;  %v15384_v16 = vld [vmem:[#allocation2 + $0x1264] sm:$0xf] }
 0x133   :  { %7779 = vmatpush.bf16.msra.mxu0 %v11155_v37  ;;  %v12427_v33 = vor.u32 %v15450_v24, %v12424_v25  ;;  %v12619_v37 = vor.u32 %v15498_v27, %v12616_v28  ;;  %v12160_v24 = vld [vmem:[#allocation2 + $0x1278] sm:$0xf0]  ;;  %v15432_v25 = vld [vmem:[#allocation2 + $0x13e4] sm:$0xf] }
 0x134   :  { %7792 = vmatpush.bf16.msra.mxu1 %v11347_v42  ;;  %v7573_v42 = vpop.f32.mrf.mxu0  ;;  %v12352_v27 = vld [vmem:[#allocation2 + $0x13f8] sm:$0xf0] }
 0x135   :  { %7805 = vmatpush.bf16.msra.mxu2 %v11539_v18  ;;  %v15492_v18 = vld [vmem:[#allocation2 + $0x15c4] sm:$0xf]  ;;  %v7574_v44 = vadd.f32 %v7573_v42, %v16343_v52  ;;  %v12187_v52 = vor.u32 %v15390_v56, %v12184_v59  ;;  %v11944_v42 = vld [vmem:[#allocation2 + $0x10c8] sm:$0xf0]  ;;  %v11920_v56 = vld [vmem:[#allocation2 + $0x1098] sm:$0xf0] }
 0x136   :  { %7818 = vmatpush.bf16.msra.mxu3 %v11731_v45  ;;  %7780 = vmatmul.bf16.vlgmr.msra.gmra.mxu0 %v16262_v32  ;;  %v12019_v45 = vor.u32 %v15348_v34, %v12016_v35  ;;  %v11971_v35 = vor.u32 %v15336_v4, %v11968_v6  ;;  %v15372_v59 = vld [vmem:[#allocation2 + $0x1204] sm:$0xf]  ;;  %v15558_v4 = vld [vmem:[#allocation2 + $0x17d4] sm:$0xf]  ;;  %v12856_v6 = vld [vmem:[#allocation2 + $0x17e8] sm:$0xf0] }
 0x137   :  { %7824 = vmatpush.bf16.msrb.mxu0 %v12091_v50  ;;  %7793 = vmatmul.bf16.vlgmr.msra.gmra.mxu1 %v16273_v8  ;;  %v7586_v50 = vpop.f32.mrf.mxu1 }
 0x138   :  { %7837 = vmatpush.bf16.msrb.mxu1 %v12283_v51  ;;  %7806 = vmatmul.bf16.vlgmr.msra.gmra.mxu2 %v16277_v12  ;;  %v12211_v51 = vor.u32 %v15396_v36, %v12208_v39  ;;  %v7587_v58 = vadd.f32 %v7586_v50, %v7574_v44  ;;  %v12163_v39 = vor.u32 %v15384_v16, %v12160_v24  ;;  %v12136_v44 = vld [vmem:[#allocation2 + $0x1248] sm:$0xf0]  ;;  %v15606_v16 = vld [vmem:[#allocation2 + $0x1954] sm:$0xf] }
 0x139   :  { %7850 = vmatpush.bf16.msrb.mxu2 %v12475_v53  ;;  %7819 = vmatmul.bf16.vlgmr.msra.gmra.mxu3 %v16275_v11  ;;  %v12403_v53 = vor.u32 %v15444_v40, %v12400_v41  ;;  %v12355_v40 = vor.u32 %v15432_v25, %v12352_v27  ;;  %v15330_v41 = vld [vmem:[#allocation2 + $0x10b4] sm:$0xf]  ;;  %v12328_v50 = vld [vmem:[#allocation2 + $0x13c8] sm:$0xf0] }
 0x13a   :  { %7863 = vmatpush.bf16.msrb.mxu3 %v12667_v57  ;;  %v12595_v57 = vor.u32 %v15492_v18, %v12592_v43  ;;  %v15378_v18 = vld [vmem:[#allocation2 + $0x1234] sm:$0xf]  ;;  %v13048_v24 = vld [vmem:[#allocation2 + $0x1968] sm:$0xf0] }
 0x13b   :  { %7825 = vmatpush.bf16.msrb.mxu0 %v12067_v63  ;;  %v12568_v63 = vld [vmem:[#allocation2 + $0x15a8] sm:$0xf0]  ;;  %v7599_v19 = vpop.f32.mrf.mxu2  ;;  %v15654_v25 = vld [vmem:[#allocation2 + $0x1ad4] sm:$0xf] }
 0x13c   :  { %7838 = vmatpush.bf16.msrb.mxu1 %v12259_v0  ;;  %v11995_v0 = vor.u32 %v15342_v54, %v11992_v55  ;;  %v7600_v28 = vadd.f32 %v7599_v19, %v7587_v58  ;;  %v7575_v34 = vpop.f32.mrf.mxu0  ;;  %v11947_v54 = vor.u32 %v15330_v41, %v11944_v42  ;;  %v15324_v55 = vld [vmem:[#allocation2 + $0x1084] sm:$0xf]  ;;  %v13240_v27 = vld [vmem:[#allocation2 + $0x1ae8] sm:$0xf0]  ;;  %v12832_v41 = vld [vmem:[#allocation2 + $0x17b8] sm:$0xf0] }
 0x13d   :  { %7851 = vmatpush.bf16.msrb.mxu2 %v12451_v1  ;;  %v12379_v1 = vor.u32 %v15438_v60, %v12376_v61  ;;  %v12112_v60 = vld [vmem:[#allocation2 + $0x1218] sm:$0xf0]  ;;  %v15420_v61 = vld [vmem:[#allocation2 + $0x1384] sm:$0xf]  ;;  %v11923_v19 = vor.u32 %v15324_v55, %v11920_v56  ;;  %v15546_v56 = vld [vmem:[#allocation2 + $0x1774] sm:$0xf] }
 0x13e   :  { %7864 = vmatpush.bf16.msrb.mxu3 %v12643_v17  ;;  %v12571_v17 = vor.u32 %v15486_v23, %v12568_v63  ;;  %v12304_v63 = vld [vmem:[#allocation2 + $0x1398] sm:$0xf0]  ;;  %v15600_v42 = vld [vmem:[#allocation2 + $0x1924] sm:$0xf] }
 0x13f   :  { %7826 = vmatpush.bf16.msrb.mxu0 %v12043_v62  ;;  %v7612_v62 = vpop.f32.mrf.mxu3  ;;  %v7588_v36 = vpop.f32.mrf.mxu1 }
 0x140   :  { %7839 = vmatpush.bf16.msrb.mxu1 %v12235_v30  ;;  %v15480_v30 = vld [vmem:[#allocation2 + $0x1564] sm:$0xf]  ;;  %v13051_v36 = vor.u32 %v15606_v16, %v13048_v24  ;;  %v12784_v16 = vld [vmem:[#allocation2 + $0x1758] sm:$0xf0] }
 0x141   :  { %7852 = vmatpush.bf16.msrb.mxu2 %v12427_v33  ;;  %v12544_v33 = vld [vmem:[#allocation2 + $0x1578] sm:$0xf0] }
 0x142   :  { %7865 = vmatpush.bf16.msrb.mxu3 %v12619_v37  ;;  %v16350_v37 = vadd.f32 %v7612_v62, %v7600_v28  ;;  %v12547_v43 = vor.u32 %v15480_v30, %v12544_v33  ;;  %v12115_v28 = vor.u32 %v15372_v59, %v12112_v60  ;;  %v12307_v62 = vor.u32 %v15420_v61, %v12304_v63  ;;  %v15702_v30 = vld [vmem:[#allocation2 + $0x1c54] sm:$0xf]  ;;  %v13432_v33 = vld [vmem:[#allocation2 + $0x1c68] sm:$0xf0]  ;;  %v12976_v24 = vld [vmem:[#allocation2 + $0x18d8] sm:$0xf0] }
 0x143   :  { %7827 = vmatpush.bf16.msrb.mxu0 %v12019_v45  ;;  %v15426_v45 = vld [vmem:[#allocation2 + $0x13b4] sm:$0xf]  ;;  %v13000_v60 = vld [vmem:[#allocation2 + $0x1908] sm:$0xf0] }
 0x144   :  { %7840 = vmatpush.bf16.msrb.mxu1 %v12211_v51  ;;  %v15474_v51 = vld [vmem:[#allocation2 + $0x1534] sm:$0xf]  ;;  %v12331_v58 = vor.u32 %v15426_v45, %v12328_v50  ;;  %v13216_v45 = vld [vmem:[#allocation2 + $0x1ab8] sm:$0xf0]  ;;  %v15696_v50 = vld [vmem:[#allocation2 + $0x1c24] sm:$0xf] }
 0x145   :  { %7853 = vmatpush.bf16.msrb.mxu2 %v12403_v53  ;;  %v12520_v53 = vld [vmem:[#allocation2 + $0x1548] sm:$0xf0]  ;;  %v15642_v61 = vld [vmem:[#allocation2 + $0x1a74] sm:$0xf] }
 0x146   :  { %7866 = vmatpush.bf16.msrb.mxu3 %v12595_v57  ;;  %v12139_v57 = vor.u32 %v15378_v18, %v12136_v44  ;;  %v12523_v23 = vor.u32 %v15474_v51, %v12520_v53  ;;  %v13435_v18 = vor.u32 %v15702_v30, %v13432_v33  ;;  %v15648_v44 = vld [vmem:[#allocation2 + $0x1aa4] sm:$0xf]  ;;  %v13408_v51 = vld [vmem:[#allocation2 + $0x1c38] sm:$0xf0]  ;;  %v15690_v63 = vld [vmem:[#allocation2 + $0x1bf4] sm:$0xf] }
 0x147   :  { %7828 = vmatpush.bf16.msrb.mxu0 %v11995_v0  ;;  %v15468_v0 = vld [vmem:[#allocation2 + $0x1504] sm:$0xf]  ;;  %v13219_v55 = vor.u32 %v15648_v44, %v13216_v45  ;;  %v13411_v59 = vor.u32 %v15696_v50, %v13408_v51  ;;  %v13360_v30 = vld [vmem:[#allocation2 + $0x1bd8] sm:$0xf0]  ;;  %v12952_v44 = vld [vmem:[#allocation2 + $0x18a8] sm:$0xf0] }
 0x148   :  { %7841 = vmatpush.bf16.msrb.mxu1 %v12187_v52  ;;  %v12496_v52 = vld [vmem:[#allocation2 + $0x1518] sm:$0xf0]  ;;  %v15630_v45 = vld [vmem:[#allocation2 + $0x1a14] sm:$0xf]  ;;  %v13144_v50 = vld [vmem:[#allocation2 + $0x1a28] sm:$0xf0] }
 0x149   :  { %7854 = vmatpush.bf16.msrb.mxu2 %v12379_v1  ;;  %v7601_v1 = vpop.f32.mrf.mxu2  ;;  %v12499_v34 = vor.u32 %v15468_v0, %v12496_v52  ;;  %v13384_v0 = vld [vmem:[#allocation2 + $0x1c08] sm:$0xf0]  ;;  %v15678_v51 = vld [vmem:[#allocation2 + $0x1b94] sm:$0xf] }
 0x14a   :  { %7867 = vmatpush.bf16.msrb.mxu3 %v12571_v17  ;;  %v7614_v17 = vpop.f32.mrf.mxu3 }
 0x14b   :  { %7829 = vmatpush.bf16.msrb.mxu0 %v11971_v35  ;;  %v12859_v35 = vor.u32 %v15558_v4, %v12856_v6  ;;  %v15540_v6 = vld [vmem:[#allocation2 + $0x1744] sm:$0xf] }
 0x14c   :  { %7842 = vmatpush.bf16.msrb.mxu1 %v12163_v39  ;;  %v13243_v39 = vor.u32 %v15654_v25, %v13240_v27  ;;  %v15588_v17 = vld [vmem:[#allocation2 + $0x18c4] sm:$0xf]  ;;  %v13168_v27 = vld [vmem:[#allocation2 + $0x1a58] sm:$0xf0] }
 0x14d   :  { %7855 = vmatpush.bf16.msrb.mxu2 %v12355_v40  ;;  %v15552_v40 = vld [vmem:[#allocation2 + $0x17a4] sm:$0xf] }
 0x14e   :  { %7868 = vmatpush.bf16.msrb.mxu3 %v12547_v43  ;;  %v13024_v43 = vld [vmem:[#allocation2 + $0x1938] sm:$0xf0]  ;;  %v12835_v53 = vor.u32 %v15552_v40, %v12832_v41  ;;  %v15636_v25 = vld [vmem:[#allocation2 + $0x1a44] sm:$0xf]  ;;  %v15534_v40 = vld [vmem:[#allocation2 + $0x1714] sm:$0xf] }
 0x14f   :  { %7830 = vmatpush.bf16.msrb.mxu0 %v11947_v54  ;;  %v13027_v54 = vor.u32 %v15600_v42, %v13024_v43  ;;  %v12760_v41 = vld [vmem:[#allocation2 + $0x1728] sm:$0xf0]  ;;  %v15582_v42 = vld [vmem:[#allocation2 + $0x1894] sm:$0xf] }
 0x150   :  { %7843 = vmatpush.bf16.msrb.mxu1 %v12139_v57  ;;  %v12808_v57 = vld [vmem:[#allocation2 + $0x1788] sm:$0xf0] }
 0x151   :  { %7856 = vmatpush.bf16.msrb.mxu2 %v12331_v58  ;;  %v15594_v58 = vld [vmem:[#allocation2 + $0x18f4] sm:$0xf]  ;;  %v12811_v52 = vor.u32 %v15546_v56, %v12808_v57  ;;  %v15528_v56 = vld [vmem:[#allocation2 + $0x16e4] sm:$0xf]  ;;  %v12736_v57 = vld [vmem:[#allocation2 + $0x16f8] sm:$0xf0] }
 0x152   :  { %7869 = vmatpush.bf16.msrb.mxu3 %v12523_v23  ;;  %v13192_v23 = vld [vmem:[#allocation2 + $0x1a88] sm:$0xf0]  ;;  %v13003_v1 = vor.u32 %v15594_v58, %v13000_v60  ;;  %v15576_v58 = vld [vmem:[#allocation2 + $0x1864] sm:$0xf] }
 0x153   :  { %7831 = vmatpush.bf16.msrb.mxu0 %v11923_v19  ;;  %v13195_v4 = vor.u32 %v15642_v61, %v13192_v23  ;;  %v13387_v19 = vor.u32 %v15690_v63, %v13384_v0  ;;  %v12928_v61 = vld [vmem:[#allocation2 + $0x1878] sm:$0xf0]  ;;  %v15624_v23 = vld [vmem:[#allocation2 + $0x19e4] sm:$0xf] }
 0x154   :  { %7844 = vmatpush.bf16.msrb.mxu1 %v12115_v28  ;;  %v7625_v28 = vpop.f32.mrf.mxu0  ;;  %v13120_v63 = vld [vmem:[#allocation2 + $0x19f8] sm:$0xf0] }
 0x155   :  { %7857 = vmatpush.bf16.msrb.mxu2 %v12307_v62  ;;  %v15684_v62 = vld [vmem:[#allocation2 + $0x1bc4] sm:$0xf]  ;;  %v7626_v33 = vadd.f32 %v7625_v28, %v16350_v37  ;;  %v12955_v37 = vor.u32 %v15582_v42, %v12952_v44  ;;  %v12712_v28 = vld [vmem:[#allocation2 + $0x16c8] sm:$0xf0]  ;;  %v12688_v42 = vld [vmem:[#allocation2 + $0x1698] sm:$0xf0] }
 0x156   :  { %7870 = vmatpush.bf16.msrb.mxu3 %v12499_v34  ;;  %7832 = vmatmul.bf16.vlgmr.msrb.gmra.mxu0 %v16279_v15  ;;  %v12787_v34 = vor.u32 %v15540_v6, %v12784_v16  ;;  %v12739_v16 = vor.u32 %v15528_v56, %v12736_v57  ;;  %v15564_v44 = vld [vmem:[#allocation2 + $0x1804] sm:$0xf]  ;;  %v15750_v56 = vld [vmem:[#allocation2 + $0x1dd4] sm:$0xf]  ;;  %v13624_v57 = vld [vmem:[#allocation2 + $0x1de8] sm:$0xf0] }
 0x157   :  { %7876 = vmatpush.bf16.msra.mxu0 %v12859_v35  ;;  %7845 = vmatmul.bf16.vlgmr.msrb.gmra.mxu1 %v16285_v46  ;;  %v7638_v35 = vpop.f32.mrf.mxu1 }
 0x158   :  { %7889 = vmatpush.bf16.msra.mxu1 %v13051_v36  ;;  %7858 = vmatmul.bf16.vlgmr.msrb.gmra.mxu2 %v16289_v48  ;;  %v12979_v36 = vor.u32 %v15588_v17, %v12976_v24  ;;  %v7639_v43 = vadd.f32 %v7638_v35, %v7626_v33  ;;  %v12931_v24 = vor.u32 %v15576_v58, %v12928_v61  ;;  %v12904_v33 = vld [vmem:[#allocation2 + $0x1848] sm:$0xf0]  ;;  %v15798_v58 = vld [vmem:[#allocation2 + $0x1f54] sm:$0xf] }
 0x159   :  { %7902 = vmatpush.bf16.msra.mxu2 %v13243_v39  ;;  %7871 = vmatmul.bf16.vlgmr.msrb.gmra.mxu3 %v16287_v47  ;;  %v13171_v39 = vor.u32 %v15636_v25, %v13168_v27  ;;  %v13123_v25 = vor.u32 %v15624_v23, %v13120_v63  ;;  %v15522_v27 = vld [vmem:[#allocation2 + $0x16b4] sm:$0xf]  ;;  %v13096_v35 = vld [vmem:[#allocation2 + $0x19c8] sm:$0xf0] }
 0x15a   :  { %7915 = vmatpush.bf16.msra.mxu3 %v13435_v18  ;;  %v13363_v18 = vor.u32 %v15684_v62, %v13360_v30  ;;  %v15570_v62 = vld [vmem:[#allocation2 + $0x1834] sm:$0xf]  ;;  %v13816_v61 = vld [vmem:[#allocation2 + $0x1f68] sm:$0xf0] }
 0x15b   :  { %7877 = vmatpush.bf16.msra.mxu0 %v12835_v53  ;;  %v13336_v53 = vld [vmem:[#allocation2 + $0x1ba8] sm:$0xf0]  ;;  %v7651_v60 = vpop.f32.mrf.mxu2  ;;  %v15846_v23 = vld [vmem:[#allocation2 + $0x20d4] sm:$0xf] }
 0x15c   :  { %7890 = vmatpush.bf16.msra.mxu1 %v13027_v54  ;;  %v12763_v54 = vor.u32 %v15534_v40, %v12760_v41  ;;  %v7652_v0 = vadd.f32 %v7651_v60, %v7639_v43  ;;  %v7627_v6 = vpop.f32.mrf.mxu0  ;;  %v12715_v40 = vor.u32 %v15522_v27, %v12712_v28  ;;  %v15516_v41 = vld [vmem:[#allocation2 + $0x1684] sm:$0xf]  ;;  %v14008_v63 = vld [vmem:[#allocation2 + $0x20e8] sm:$0xf0]  ;;  %v13600_v27 = vld [vmem:[#allocation2 + $0x1db8] sm:$0xf0] }
 0x15d   :  { %7903 = vmatpush.bf16.msra.mxu2 %v13219_v55  ;;  %v13147_v55 = vor.u32 %v15630_v45, %v13144_v50  ;;  %v12880_v45 = vld [vmem:[#allocation2 + $0x1818] sm:$0xf0]  ;;  %v15612_v50 = vld [vmem:[#allocation2 + $0x1984] sm:$0xf]  ;;  %v12691_v60 = vor.u32 %v15516_v41, %v12688_v42  ;;  %v15738_v42 = vld [vmem:[#allocation2 + $0x1d74] sm:$0xf] }
 0x15e   :  { %7916 = vmatpush.bf16.msra.mxu3 %v13411_v59  ;;  %v13339_v59 = vor.u32 %v15678_v51, %v13336_v53  ;;  %v13072_v53 = vld [vmem:[#allocation2 + $0x1998] sm:$0xf0]  ;;  %v15792_v28 = vld [vmem:[#allocation2 + $0x1f24] sm:$0xf] }
 0x15f   :  { %7878 = vmatpush.bf16.msra.mxu0 %v12811_v52  ;;  %v7664_v52 = vpop.f32.mrf.mxu3  ;;  %v7640_v17 = vpop.f32.mrf.mxu1 }
 0x160   :  { %7891 = vmatpush.bf16.msra.mxu1 %v13003_v1  ;;  %v15672_v1 = vld [vmem:[#allocation2 + $0x1b64] sm:$0xf]  ;;  %v13819_v17 = vor.u32 %v15798_v58, %v13816_v61  ;;  %v13552_v58 = vld [vmem:[#allocation2 + $0x1d58] sm:$0xf0] }
 0x161   :  { %7904 = vmatpush.bf16.msra.mxu2 %v13195_v4  ;;  %v13312_v4 = vld [vmem:[#allocation2 + $0x1b78] sm:$0xf0] }
 0x162   :  { %7917 = vmatpush.bf16.msra.mxu3 %v13387_v19  ;;  %v16357_v19 = vadd.f32 %v7664_v52, %v7652_v0  ;;  %v13315_v30 = vor.u32 %v15672_v1, %v13312_v4  ;;  %v12883_v0 = vor.u32 %v15564_v44, %v12880_v45  ;;  %v13075_v52 = vor.u32 %v15612_v50, %v13072_v53  ;;  %v15894_v1 = vld [vmem:[#allocation2 + $0x2254] sm:$0xf]  ;;  %v14200_v4 = vld [vmem:[#allocation2 + $0x2268] sm:$0xf0]  ;;  %v13744_v61 = vld [vmem:[#allocation2 + $0x1ed8] sm:$0xf0] }
 0x163   :  { %7879 = vmatpush.bf16.msra.mxu0 %v12787_v34  ;;  %v15618_v34 = vld [vmem:[#allocation2 + $0x19b4] sm:$0xf]  ;;  %v13768_v45 = vld [vmem:[#allocation2 + $0x1f08] sm:$0xf0] }
 0x164   :  { %7892 = vmatpush.bf16.msra.mxu1 %v12979_v36  ;;  %v15666_v36 = vld [vmem:[#allocation2 + $0x1b34] sm:$0xf]  ;;  %v13099_v43 = vor.u32 %v15618_v34, %v13096_v35  ;;  %v13984_v34 = vld [vmem:[#allocation2 + $0x20b8] sm:$0xf0]  ;;  %v15888_v35 = vld [vmem:[#allocation2 + $0x2224] sm:$0xf] }
 0x165   :  { %7905 = vmatpush.bf16.msra.mxu2 %v13171_v39  ;;  %v13288_v39 = vld [vmem:[#allocation2 + $0x1b48] sm:$0xf0]  ;;  %v15834_v50 = vld [vmem:[#allocation2 + $0x2074] sm:$0xf] }
 0x166   :  { %7918 = vmatpush.bf16.msra.mxu3 %v13363_v18  ;;  %v12907_v18 = vor.u32 %v15570_v62, %v12904_v33  ;;  %v13291_v51 = vor.u32 %v15666_v36, %v13288_v39  ;;  %v14203_v62 = vor.u32 %v15894_v1, %v14200_v4  ;;  %v15840_v33 = vld [vmem:[#allocation2 + $0x20a4] sm:$0xf]  ;;  %v14176_v36 = vld [vmem:[#allocation2 + $0x2238] sm:$0xf0]  ;;  %v15882_v53 = vld [vmem:[#allocation2 + $0x21f4] sm:$0xf] }
 0x167   :  { %7880 = vmatpush.bf16.msra.mxu0 %v12763_v54  ;;  %v15660_v54 = vld [vmem:[#allocation2 + $0x1b04] sm:$0xf]  ;;  %v13987_v41 = vor.u32 %v15840_v33, %v13984_v34  ;;  %v14179_v44 = vor.u32 %v15888_v35, %v14176_v36  ;;  %v14128_v1 = vld [vmem:[#allocation2 + $0x21d8] sm:$0xf0]  ;;  %v13720_v34 = vld [vmem:[#allocation2 + $0x1ea8] sm:$0xf0] }
 0x168   :  { %7893 = vmatpush.bf16.msra.mxu1 %v12955_v37  ;;  %v13264_v37 = vld [vmem:[#allocation2 + $0x1b18] sm:$0xf0]  ;;  %v16054_v4 = vld [vmem:[#allocation5] sm:$0x3f]  ;;  %v15822_v35 = vld [vmem:[#allocation2 + $0x2014] sm:$0xf] }
 0x169   :  { %7906 = vmatpush.bf16.msra.mxu2 %v13147_v55  ;;  %v7653_v55 = vpop.f32.mrf.mxu2  ;;  %v13267_v6 = vor.u32 %v15660_v54, %v13264_v37  ;;  %v14152_v54 = vld [vmem:[#allocation2 + $0x2208] sm:$0xf0] }
 0x16a   :  { %7919 = vmatpush.bf16.msra.mxu3 %v13339_v59  ;;  %v7666_v59 = vpop.f32.mrf.mxu3  ;;  %v13912_v36 = vld [vmem:[#allocation2 + $0x2028] sm:$0xf0] }
 0x16b   :  { %7881 = vmatpush.bf16.msra.mxu0 %v12739_v16  ;;  %v13627_v16 = vor.u32 %v15750_v56, %v13624_v57  ;;  %v15732_v57 = vld [vmem:[#allocation2 + $0x1d44] sm:$0xf] }
 0x16c   :  { %7894 = vmatpush.bf16.msra.mxu1 %v12931_v24  ;;  %v14011_v24 = vor.u32 %v15846_v23, %v14008_v63  ;;  %v15780_v59 = vld [vmem:[#allocation2 + $0x1ec4] sm:$0xf]  ;;  %v13936_v63 = vld [vmem:[#allocation2 + $0x2058] sm:$0xf0] }
 0x16d   :  { %7907 = vmatpush.bf16.msra.mxu2 %v13123_v25  ;;  %v15744_v25 = vld [vmem:[#allocation2 + $0x1da4] sm:$0xf] }
 0x16e   :  { %7920 = vmatpush.bf16.msra.mxu3 %v13315_v30  ;;  %v13792_v30 = vld [vmem:[#allocation2 + $0x1f38] sm:$0xf0]  ;;  %v13603_v39 = vor.u32 %v15744_v25, %v13600_v27  ;;  %v15828_v23 = vld [vmem:[#allocation2 + $0x2044] sm:$0xf]  ;;  %v15726_v27 = vld [vmem:[#allocation2 + $0x1d14] sm:$0xf] }
 0x16f   :  { %7882 = vmatpush.bf16.msra.mxu0 %v12715_v40  ;;  %v13795_v40 = vor.u32 %v15792_v28, %v13792_v30  ;;  %v13939_v25 = vor.u32 %v15828_v23, %v13936_v63  ;;  %v13528_v28 = vld [vmem:[#allocation2 + $0x1d28] sm:$0xf0]  ;;  %v15714_v63 = vld [vmem:[#allocation2 + $0x1cb4] sm:$0xf] }
 0x170   :  { %7895 = vmatpush.bf16.msra.mxu1 %v12907_v18  ;;  %v13576_v18 = vld [vmem:[#allocation2 + $0x1d88] sm:$0xf0] }
 0x171   :  { %7908 = vmatpush.bf16.msra.mxu2 %v13099_v43  ;;  %v15786_v43 = vld [vmem:[#allocation2 + $0x1ef4] sm:$0xf]  ;;  %v13579_v37 = vor.u32 %v15738_v42, %v13576_v18  ;;  %v13915_v18 = vor.u32 %v15822_v35, %v13912_v36  ;;  %v15756_v36 = vld [vmem:[#allocation2 + $0x1e04] sm:$0xf] }
 0x172   :  { %7921 = vmatpush.bf16.msra.mxu3 %v13291_v51  ;;  %v13960_v51 = vld [vmem:[#allocation2 + $0x2088] sm:$0xf0]  ;;  %v13771_v55 = vor.u32 %v15786_v43, %v13768_v45  ;;  %v15720_v43 = vld [vmem:[#allocation2 + $0x1ce4] sm:$0xf] }
 0x173   :  { %7883 = vmatpush.bf16.msra.mxu0 %v12691_v60  ;;  %v13963_v56 = vor.u32 %v15834_v50, %v13960_v51  ;;  %v14155_v60 = vor.u32 %v15882_v53, %v14152_v54  ;;  %v15768_v45 = vld [vmem:[#allocation2 + $0x1e64] sm:$0xf]  ;;  %v13696_v51 = vld [vmem:[#allocation2 + $0x1e78] sm:$0xf0] }
 0x174   :  { %7896 = vmatpush.bf16.msra.mxu1 %v12883_v0  ;;  %v7677_v0 = vpop.f32.mrf.mxu0  ;;  %v7690_v30 = vpop.f32.mrf.mxu1  ;;  %v15816_v53 = vld [vmem:[#allocation2 + $0x1fe4] sm:$0xf]  ;;  %v13888_v54 = vld [vmem:[#allocation2 + $0x1ff8] sm:$0xf0] }
 0x175   :  { %7909 = vmatpush.bf16.msra.mxu2 %v13075_v52  ;;  %v15876_v52 = vld [vmem:[#allocation2 + $0x21c4] sm:$0xf]  ;;  %v13891_v23 = vor.u32 %v15816_v53, %v13888_v54  ;;  %v14584_v54 = vld [vmem:[#allocation2 + $0x2568] sm:$0xf0] }
 0x176   :  { %7922 = vmatpush.bf16.msra.mxu3 %v13267_v6  ;;  %7884 = vmatmul.bf16.vlgmr.msra.gmra.mxu0 %v16291_v49  ;;  %v1287_v6 = vperm.slane %v16054_v4, 1  ;;  %v14131_v33 = vor.u32 %v15876_v52, %v14128_v1  ;;  %v15762_v52 = vld [vmem:[#allocation2 + $0x1e34] sm:$0xf] }
 0x177   :  { %7928 = vmatpush.bf16.msrb.mxu0 %v13627_v16  ;;  %7897 = vmatmul.bf16.vlgmr.msra.gmra.mxu1 %v16300_v5  ;;  %v16364_v16 = vadd.f32 %v7677_v0, %v16357_v19  ;;  %v13531_v19 = vor.u32 %v15726_v27, %v13528_v28  ;;  %v13480_v0 = vld [vmem:[#allocation2 + $0x1cc8] sm:$0xf0]  ;;  %v15858_v27 = vld [vmem:[#allocation2 + $0x2134] sm:$0xf] }
 0x178   :  { %7941 = vmatpush.bf16.msrb.mxu1 %v13819_v17  ;;  %7910 = vmatmul.bf16.vlgmr.msra.gmra.mxu2 %v16304_v10  ;;  %v13555_v17 = vor.u32 %v15732_v57, %v13552_v58  ;;  %v14080_v57 = vld [vmem:[#allocation2 + $0x2178] sm:$0xf0]  ;;  %v14056_v28 = vld [vmem:[#allocation2 + $0x2148] sm:$0xf0] }
 0x179   :  { %7954 = vmatpush.bf16.msrb.mxu2 %v14011_v24  ;;  %7923 = vmatmul.bf16.vlgmr.msra.gmra.mxu3 %v16302_v9  ;;  %v13747_v24 = vor.u32 %v15780_v59, %v13744_v61  ;;  %v13699_v61 = vor.u32 %v15768_v45, %v13696_v51  ;;  %v15942_v45 = vld [vmem:[#allocation2 + $0x23d4] sm:$0xf] }
 0x17a   :  { %7967 = vmatpush.bf16.msrb.mxu3 %v14203_v62  ;;  %v15774_v62 = vld [vmem:[#allocation2 + $0x1e94] sm:$0xf] }
 0x17b   :  { %7929 = vmatpush.bf16.msrb.mxu0 %v13603_v39  ;;  %v15870_v39 = vld [vmem:[#allocation2 + $0x2194] sm:$0xf]  ;;  %v13723_v42 = vor.u32 %v15774_v62, %v13720_v34  ;;  %v13483_v62 = vor.u32 %v15714_v63, %v13480_v0  ;;  %v15936_v0 = vld [vmem:[#allocation2 + $0x23a4] sm:$0xf] }
 0x17c   :  { %7942 = vmatpush.bf16.msrb.mxu1 %v13795_v40  ;;  %v14104_v40 = vld [vmem:[#allocation2 + $0x21a8] sm:$0xf0]  ;;  %v7679_v59 = vpop.f32.mrf.mxu0  ;;  %v7692_v4 = vpop.f32.mrf.mxu1  ;;  %v15990_v51 = vld [vmem:[#allocation2 + $0x2554] sm:$0xf] }
 0x17d   :  { %7955 = vmatpush.bf16.msrb.mxu2 %v13987_v41  ;;  %v7691_v41 = vadd.f32 %v7690_v30, %v1287_v6  ;;  %v14107_v50 = vor.u32 %v15870_v39, %v14104_v40  ;;  %v15708_v30 = vld [vmem:[#allocation2 + $0x1c84] sm:$0xf]  ;;  %v13648_v39 = vld [vmem:[#allocation2 + $0x1e18] sm:$0xf0]  ;;  %v14890_v59 = vld [vmem:[#allocation2 + $0x2ec] sm:$0xf0] }
 0x17e   :  { %7968 = vmatpush.bf16.msrb.mxu3 %v14179_v44  ;;  %v13504_v44 = vld [vmem:[#allocation2 + $0x1cf8] sm:$0xf0]  ;;  %v15804_v40 = vld [vmem:[#allocation2 + $0x1f84] sm:$0xf] }
 0x17f   :  { %7930 = vmatpush.bf16.msrb.mxu0 %v13579_v37  ;;  %v7703_v37 = vpop.f32.mrf.mxu2  ;;  %v15984_v4 = vld [vmem:[#allocation2 + $0x2524] sm:$0xf] }
 0x180   :  { %7943 = vmatpush.bf16.msrb.mxu1 %v13771_v55  ;;  %v7716_v55 = vpop.f32.mrf.mxu3  ;;  %v7704_v58 = vadd.f32 %v7703_v37, %v7691_v41  ;;  %v14059_v41 = vor.u32 %v15858_v27, %v14056_v28  ;;  %v9982_v37 = vld [vmem:[#allocation2 + $0x158] sm:$0xf]  ;;  %v10150_v27 = vld [vmem:[#allocation2 + $0x2a8] sm:$0xf]  ;;  %v14884_v28 = vld [vmem:[#allocation2 + $0x2bc] sm:$0xf0] }
 0x181   :  { %7956 = vmatpush.bf16.msrb.mxu2 %v13963_v56  ;;  %v15864_v56 = vld [vmem:[#allocation2 + $0x2164] sm:$0xf] }
 0x182   :  { %7969 = vmatpush.bf16.msrb.mxu3 %v14155_v60  ;;  %v13507_v60 = vor.u32 %v15720_v43, %v13504_v44  ;;  %v16366_v1 = vadd.f32 %v7716_v55, %v7704_v58  ;;  %v14083_v6 = vor.u32 %v15864_v56, %v14080_v57  ;;  %v14842_v55 = vld [vmem:[#allocation2 + $0x16c] sm:$0xf0]  ;;  %v13651_v56 = vor.u32 %v15756_v36, %v13648_v39  ;;  %v10174_v58 = vld [vmem:[#allocation2 + $0x2d8] sm:$0xf]  ;;  %v15978_v36 = vld [vmem:[#allocation2 + $0x24f4] sm:$0xf] }
 0x183   :  { %7931 = vmatpush.bf16.msrb.mxu0 %v13555_v17  ;;  %v13672_v17 = vld [vmem:[#allocation2 + $0x1e48] sm:$0xf0]  ;;  %v9983_v63 = vor.u32 %v14842_v55, %v9982_v37  ;;  %v10151_v39 = vor.u32 %v14884_v28, %v10150_v27  ;;  %v14512_v37 = vld [vmem:[#allocation2 + $0x24d8] sm:$0xf0]  ;;  %v9910_v55 = vld [vmem:[#allocation2 + $0xc8] sm:$0xf] }
 0x184   :  { %7944 = vmatpush.bf16.msrb.mxu1 %v13747_v24  ;;  %v15810_v24 = vld [vmem:[#allocation2 + $0x1fb4] sm:$0xf]  ;;  %v13675_v34 = vor.u32 %v15762_v52, %v13672_v17  ;;  %v14368_v52 = vld [vmem:[#allocation2 + $0x23b8] sm:$0xf0]  ;;  %v14818_v27 = vld [vmem:[#allocation2 + $0xac] sm:$0xf0] }
 0x185   :  { %7957 = vmatpush.bf16.msrb.mxu2 %v13939_v25  ;;  %v13864_v25 = vld [vmem:[#allocation2 + $0x1fc8] sm:$0xf0]  ;;  %v14560_v17 = vld [vmem:[#allocation2 + $0x2538] sm:$0xf0]  ;;  %v10078_v28 = vld [vmem:[#allocation2 + $0x218] sm:$0xf] }
 0x186   :  { %7970 = vmatpush.bf16.msrb.mxu3 %v14131_v33  ;;  %v13456_v33 = vld [vmem:[#allocation2 + $0x1c98] sm:$0xf0]  ;;  %v13867_v35 = vor.u32 %v15810_v24, %v13864_v25  ;;  %v9958_v24 = vld [vmem:[#allocation2 + $0x128] sm:$0xf]  ;;  %v14836_v25 = vld [vmem:[#allocation2 + $0x13c] sm:$0xf0] }
 0x187   :  { %7932 = vmatpush.bf16.msrb.mxu0 %v13531_v19  ;;  %v13840_v19 = vld [vmem:[#allocation2 + $0x1f98] sm:$0xf0]  ;;  %v7705_v43 = vpop.f32.mrf.mxu2  ;;  %v13459_v53 = vor.u32 %v15708_v30, %v13456_v33  ;;  %v14563_v30 = vor.u32 %v15984_v4, %v14560_v17  ;;  %v9959_v33 = vor.u32 %v14836_v25, %v9958_v24  ;;  %v14488_v24 = vld [vmem:[#allocation2 + $0x24a8] sm:$0xf0]  ;;  %v9886_v25 = vld [vmem:[#allocation2 + $0x98] sm:$0xf] }
 0x188   :  { %7945 = vmatpush.bf16.msrb.mxu1 %v13723_v42  ;;  %v15852_v42 = vld [vmem:[#allocation2 + $0x2104] sm:$0xf]  ;;  %v7718_v44 = vpop.f32.mrf.mxu3  ;;  %v13843_v57 = vor.u32 %v15804_v40, %v13840_v19  ;;  %v14536_v40 = vld [vmem:[#allocation2 + $0x2508] sm:$0xf0]  ;;  %v14830_v19 = vld [vmem:[#allocation2 + $0x10c] sm:$0xf0] }
 0x189   :  { %7958 = vmatpush.bf16.msrb.mxu2 %v13915_v18  ;;  %v14032_v18 = vld [vmem:[#allocation2 + $0x2118] sm:$0xf0]  ;;  %v14539_v44 = vor.u32 %v15978_v36, %v14536_v40  ;;  %v15912_v36 = vld [vmem:[#allocation2 + $0x22e4] sm:$0xf] }
 0x18a   :  { %7971 = vmatpush.bf16.msrb.mxu3 %v14107_v50  ;;  %v14392_v50 = vld [vmem:[#allocation2 + $0x23e8] sm:$0xf0]  ;;  %v15960_v40 = vld [vmem:[#allocation2 + $0x2464] sm:$0xf] }
 0x18b   :  { %7933 = vmatpush.bf16.msrb.mxu0 %v13507_v60  ;;  %v14035_v60 = vor.u32 %v15852_v42, %v14032_v18  ;;  %v10126_v42 = vld [vmem:[#allocation2 + $0x278] sm:$0xf]  ;;  %v14878_v18 = vld [vmem:[#allocation2 + $0x28c] sm:$0xf0] }
 0x18c   :  { %7946 = vmatpush.bf16.msrb.mxu1 %v13699_v61  ;;  %v14395_v61 = vor.u32 %v15942_v45, %v14392_v50  ;;  %v15924_v50 = vld [vmem:[#allocation2 + $0x2344] sm:$0xf] }
 0x18d   :  { %7959 = vmatpush.bf16.msrb.mxu2 %v13891_v23  ;;  %v14587_v23 = vor.u32 %v15990_v51, %v14584_v54  ;;  %v14320_v51 = vld [vmem:[#allocation2 + $0x2358] sm:$0xf0]  ;;  %v10127_v54 = vor.u32 %v14878_v18, %v10126_v42  ;;  %v9862_v42 = vld [vmem:[#allocation2 + $0x68] sm:$0xf]  ;;  %v14812_v18 = vld [vmem:[#allocation2 + $0x7c] sm:$0xf0] }
 0x18e   :  { %7972 = vmatpush.bf16.msrb.mxu3 %v14083_v6  ;;  %v10175_v6 = vor.u32 %v14890_v59, %v10174_v58  ;;  %v14872_v58 = vld [vmem:[#allocation2 + $0x25c] sm:$0xf0]  ;;  %v14323_v59 = vor.u32 %v15924_v50, %v14320_v51 }
 0x18f   :  { %7934 = vmatpush.bf16.msrb.mxu0 %v13483_v62  ;;  %v14371_v62 = vor.u32 %v15936_v0, %v14368_v52  ;;  %v14296_v0 = vld [vmem:[#allocation2 + $0x2328] sm:$0xf0]  ;;  %v15966_v52 = vld [vmem:[#allocation2 + $0x2494] sm:$0xf]  ;;  %v14860_v50 = vld [vmem:[#allocation2 + $0x1fc] sm:$0xf0] }
 0x190   :  { %7947 = vmatpush.bf16.msrb.mxu1 %v13675_v34  ;;  %v15930_v34 = vld [vmem:[#allocation2 + $0x2374] sm:$0xf] }
 0x191   :  { %7960 = vmatpush.bf16.msrb.mxu2 %v13867_v35  ;;  %v14344_v35 = vld [vmem:[#allocation2 + $0x2388] sm:$0xf0] }
 0x192   :  { %7973 = vmatpush.bf16.msrb.mxu3 %v14059_v41  ;;  %v9934_v41 = vld [vmem:[#allocation2 + $0xf8] sm:$0xf]  ;;  %v14347_v43 = vor.u32 %v15930_v34, %v14344_v35  ;;  %v14491_v34 = vor.u32 %v15966_v52, %v14488_v24  ;;  %v9887_v35 = vor.u32 %v14818_v27, %v9886_v25  ;;  %v14854_v52 = vld [vmem:[#allocation2 + $0x1cc] sm:$0xf0]  ;;  %v15948_v27 = vld [vmem:[#allocation2 + $0x2404] sm:$0xf] }
 0x193   :  { %7935 = vmatpush.bf16.msrb.mxu0 %v13459_v53  ;;  %v9935_v45 = vor.u32 %v14830_v19, %v9934_v41  ;;  %v15972_v53 = vld [vmem:[#allocation2 + $0x24c4] sm:$0xf]  ;;  %v14464_v19 = vld [vmem:[#allocation2 + $0x2478] sm:$0xf0] }
 0x194   :  { %7948 = vmatpush.bf16.msrb.mxu1 %v13651_v56  ;;  %v14824_v56 = vld [vmem:[#allocation2 + $0xdc] sm:$0xf0] }
 0x195   :  { %7961 = vmatpush.bf16.msrb.mxu2 %v13843_v57  ;;  %v10102_v57 = vld [vmem:[#allocation2 + $0x248] sm:$0xf] }
 0x196   :  { %7974 = vmatpush.bf16.msrb.mxu3 %v14035_v60  ;;  %7936 = vmatmul.bf16.vlgmr.msrb.gmra.mxu0 %v16306_v13  ;;  %v7729_v60 = vpop.f32.mrf.mxu0  ;;  %v10103_v17 = vor.u32 %v14872_v58, %v10102_v57  ;;  %v14248_v57 = vld [vmem:[#allocation2 + $0x22c8] sm:$0xf0]  ;;  %v15954_v58 = vld [vmem:[#allocation2 + $0x2434] sm:$0xf] }
 0x197   :  { %7980 = vmatpush.bf16.msra.mxu0 %v14395_v61  ;;  %7949 = vmatmul.bf16.vlgmr.msrb.gmra.mxu1 %v16312_v2  ;;  %v14515_v61 = vor.u32 %v15972_v53, %v14512_v37  ;;  %v7730_v4 = vadd.f32 %v7729_v60, %v16366_v1  ;;  %v14467_v37 = vor.u32 %v15960_v40, %v14464_v19  ;;  %v10366_v40 = vld [vmem:[#allocation2 + $0x458] sm:$0xf] }
 0x198   :  { %7993 = vmatpush.bf16.msra.mxu1 %v14587_v23  ;;  %7962 = vmatmul.bf16.vlgmr.msrb.gmra.mxu2 %v16316_v7  ;;  %v9911_v23 = vor.u32 %v14824_v56, %v9910_v55  ;;  %v9863_v55 = vor.u32 %v14812_v18, %v9862_v42  ;;  %v15906_v56 = vld [vmem:[#allocation2 + $0x22b4] sm:$0xf]  ;;  %v14986_v42 = vld [vmem:[#allocation2 + $0x5ec] sm:$0xf0]  ;;  %v10750_v18 = vld [vmem:[#allocation2 + $0x758] sm:$0xf] }
 0x199   :  { %8006 = vmatpush.bf16.msra.mxu2 %v9983_v63  ;;  %7975 = vmatmul.bf16.vlgmr.msrb.gmra.mxu3 %v16314_v3  ;;  %v15918_v63 = vld [vmem:[#allocation2 + $0x2314] sm:$0xf] }
 0x19a   :  { %8019 = vmatpush.bf16.msra.mxu3 %v10175_v6  ;;  %v7742_v6 = vpop.f32.mrf.mxu1 }
 0x19b   :  { %7981 = vmatpush.bf16.msra.mxu0 %v14371_v62  ;;  %v14866_v62 = vld [vmem:[#allocation2 + $0x22c] sm:$0xf0]  ;;  %v7755_v41 = vpop.f32.mrf.mxu2 }
 0x19c   :  { %7994 = vmatpush.bf16.msra.mxu1 %v14563_v30  ;;  %v7743_v30 = vadd.f32 %v7742_v6, %v7730_v4  ;;  %v10079_v1 = vor.u32 %v14866_v62, %v10078_v28  ;;  %v14251_v4 = vor.u32 %v15906_v56, %v14248_v57  ;;  %v15900_v6 = vld [vmem:[#allocation2 + $0x2284] sm:$0xf]  ;;  %v14416_v28 = vld [vmem:[#allocation2 + $0x2418] sm:$0xf0]  ;;  %v9814_v62 = vld [vmem:[#allocation2 + $0x8] sm:$0xf] }
 0x19d   :  { %8007 = vmatpush.bf16.msra.mxu2 %v9959_v33  ;;  %v14299_v33 = vor.u32 %v15918_v63, %v14296_v0  ;;  %v14806_v63 = vld [vmem:[#allocation2 + $0x4c] sm:$0xf0]  ;;  %v10030_v0 = vld [vmem:[#allocation2 + $0x1b8] sm:$0xf]  ;;  %v10342_v57 = vld [vmem:[#allocation2 + $0x428] sm:$0xf] }
 0x19e   :  { %8020 = vmatpush.bf16.msra.mxu3 %v10151_v39  ;;  %v14272_v39 = vld [vmem:[#allocation2 + $0x22f8] sm:$0xf0] }
 0x19f   :  { %7982 = vmatpush.bf16.msra.mxu0 %v14347_v43  ;;  %v7756_v43 = vadd.f32 %v7755_v41, %v7743_v30  ;;  %v14275_v51 = vor.u32 %v15912_v36, %v14272_v39  ;;  %v14848_v36 = vld [vmem:[#allocation2 + $0x19c] sm:$0xf0]  ;;  %v14938_v41 = vld [vmem:[#allocation2 + $0x46c] sm:$0xf0] }
 0x1a0   :  { %7995 = vmatpush.bf16.msra.mxu1 %v14539_v44  ;;  %v7768_v44 = vpop.f32.mrf.mxu3 }
 0x1a1   :  { %8008 = vmatpush.bf16.msra.mxu2 %v9935_v45  ;;  %v10054_v45 = vld [vmem:[#allocation2 + $0x1e8] sm:$0xf]  ;;  %v16373_v53 = vadd.f32 %v7768_v44, %v7756_v43  ;;  %v15034_v43 = vld [vmem:[#allocation2 + $0x76c] sm:$0xf0]  ;;  %v14419_v44 = vor.u32 %v15948_v27, %v14416_v28  ;;  %v10510_v27 = vld [vmem:[#allocation2 + $0x578] sm:$0xf] }
 0x1a2   :  { %8021 = vmatpush.bf16.msra.mxu3 %v10127_v54  ;;  %v7731_v54 = vpop.f32.mrf.mxu0  ;;  %v10055_v60 = vor.u32 %v14860_v50, %v10054_v45  ;;  %v10942_v50 = vld [vmem:[#allocation2 + $0x8d8] sm:$0xf]  ;;  %v10751_v56 = vor.u32 %v15034_v43, %v10750_v18  ;;  %v14968_v43 = vld [vmem:[#allocation2 + $0x55c] sm:$0xf0] }
 0x1a3   :  { %7983 = vmatpush.bf16.msra.mxu0 %v14323_v59  ;;  %v7744_v59 = vpop.f32.mrf.mxu1  ;;  %v7757_v30 = vpop.f32.mrf.mxu2 }
 0x1a4   :  { %7996 = vmatpush.bf16.msra.mxu1 %v14515_v61  ;;  %v14440_v61 = vld [vmem:[#allocation2 + $0x2448] sm:$0xf0]  ;;  %v10534_v59 = vld [vmem:[#allocation2 + $0x5a8] sm:$0xf]  ;;  %v10702_v30 = vld [vmem:[#allocation2 + $0x6f8] sm:$0xf] }
 0x1a5   :  { %8009 = vmatpush.bf16.msra.mxu2 %v9911_v23  ;;  %v9838_v23 = vld [vmem:[#allocation2 + $0x38] sm:$0xf]  ;;  %v14443_v24 = vor.u32 %v15954_v58, %v14440_v61  ;;  %v14932_v58 = vld [vmem:[#allocation2 + $0x43c] sm:$0xf0] }
 0x1a6   :  { %8022 = vmatpush.bf16.msra.mxu3 %v10103_v17  ;;  %v14224_v17 = vld [vmem:[#allocation2 + $0x2298] sm:$0xf0]  ;;  %v9839_v25 = vor.u32 %v14806_v63, %v9838_v23  ;;  %v14980_v61 = vld [vmem:[#allocation2 + $0x5bc] sm:$0xf0]  ;;  %v10726_v23 = vld [vmem:[#allocation2 + $0x728] sm:$0xf] }
 0x1a7   :  { %7984 = vmatpush.bf16.msra.mxu0 %v14299_v33  ;;  %v10031_v33 = vor.u32 %v14854_v52, %v10030_v0  ;;  %v14227_v19 = vor.u32 %v15900_v6, %v14224_v17  ;;  %v15028_v63 = vld [vmem:[#allocation2 + $0x73c] sm:$0xf0]  ;;  %v10918_v0 = vld [vmem:[#allocation2 + $0x8a8] sm:$0xf]  ;;  %v10535_v6 = vor.u32 %v14980_v61, %v10534_v59  ;;  %v10270_v59 = vld [vmem:[#allocation2 + $0x398] sm:$0xf] }
 0x1a8   :  { %7997 = vmatpush.bf16.msra.mxu1 %v14491_v34  ;;  %v14800_v34 = vld [vmem:[#allocation2 + $0x1c] sm:$0xf0]  ;;  %v7770_v39 = vpop.f32.mrf.mxu3  ;;  %v10727_v17 = vor.u32 %v15028_v63, %v10726_v23  ;;  %v10462_v61 = vld [vmem:[#allocation2 + $0x518] sm:$0xf] }
 0x1a9   :  { %8010 = vmatpush.bf16.msra.mxu2 %v9887_v35  ;;  %v10006_v35 = vld [vmem:[#allocation2 + $0x188] sm:$0xf]  ;;  %v9815_v45 = vor.u32 %v14800_v34, %v9814_v62  ;;  %v15076_v52 = vld [vmem:[#allocation2 + $0x8bc] sm:$0xf0]  ;;  %v14974_v62 = vld [vmem:[#allocation2 + $0x58c] sm:$0xf0] }
 0x1aa   :  { %8023 = vmatpush.bf16.msra.mxu3 %v10079_v1  ;;  %v10558_v1 = vld [vmem:[#allocation2 + $0x5d8] sm:$0xf]  ;;  %v10007_v54 = vor.u32 %v14848_v36, %v10006_v35  ;;  %v10919_v28 = vor.u32 %v15076_v52, %v10918_v0  ;;  %v15070_v36 = vld [vmem:[#allocation2 + $0x88c] sm:$0xf0] }
 0x1ab   :  { %7985 = vmatpush.bf16.msra.mxu0 %v14275_v51  ;;  %v15082_v51 = vld [vmem:[#allocation2 + $0x8ec] sm:$0xf0]  ;;  %v16055_v34 = vld [vmem:[#allocation1] sm:$0xff] }
 0x1ac   :  { %7998 = vmatpush.bf16.msra.mxu1 %v14467_v37  ;;  %v10367_v37 = vor.u32 %v14938_v41, %v10366_v40  ;;  %v10894_v35 = vld [vmem:[#allocation2 + $0x878] sm:$0xf]  ;;  %v10511_v40 = vor.u32 %v14974_v62, %v10510_v27  ;;  %v14962_v0 = vld [vmem:[#allocation2 + $0x52c] sm:$0xf0]  ;;  %v10246_v27 = vld [vmem:[#allocation2 + $0x368] sm:$0xf] }
 0x1ad   :  { %8011 = vmatpush.bf16.msra.mxu2 %v9863_v55  ;;  %v10559_v55 = vor.u32 %v14986_v42, %v10558_v1  ;;  %v10294_v1 = vld [vmem:[#allocation2 + $0x3c8] sm:$0xf]  ;;  %v10895_v18 = vor.u32 %v15070_v36, %v10894_v35  ;;  %v10654_v52 = vld [vmem:[#allocation2 + $0x698] sm:$0xf]  ;;  %v15004_v36 = vld [vmem:[#allocation2 + $0x67c] sm:$0xf0] }
 0x1ae   :  { %8024 = vmatpush.bf16.msra.mxu3 %v10055_v60  ;;  %v10943_v60 = vor.u32 %v15082_v51, %v10942_v50  ;;  %v10486_v42 = vld [vmem:[#allocation2 + $0x548] sm:$0xf] }
 0x1af   :  { %7986 = vmatpush.bf16.msra.mxu0 %v14251_v4  ;;  %v10343_v4 = vor.u32 %v14932_v58, %v10342_v57  ;;  %v10870_v51 = vld [vmem:[#allocation2 + $0x848] sm:$0xf]  ;;  %v10487_v57 = vor.u32 %v14968_v43, %v10486_v42 }
 0x1b0   :  { %7999 = vmatpush.bf16.msra.mxu1 %v14443_v24  ;;  %v10318_v24 = vld [vmem:[#allocation2 + $0x3f8] sm:$0xf]  ;;  %v10438_v62 = vld [vmem:[#allocation2 + $0x4e8] sm:$0xf] }
 0x1b1   :  { %8012 = vmatpush.bf16.msra.mxu2 %v9839_v25  ;;  %v14926_v25 = vld [vmem:[#allocation2 + $0x40c] sm:$0xf0]  ;;  %v10630_v35 = vld [vmem:[#allocation2 + $0x668] sm:$0xf] }
 0x1b2   :  { %8025 = vmatpush.bf16.msra.mxu3 %v10031_v33  ;;  %v15022_v33 = vld [vmem:[#allocation2 + $0x70c] sm:$0xf0]  ;;  %v10319_v39 = vor.u32 %v14926_v25, %v10318_v24 }
 0x1b3   :  { %7987 = vmatpush.bf16.msra.mxu0 %v14227_v19  ;;  %v10703_v41 = vor.u32 %v15022_v33, %v10702_v30  ;;  %v14920_v19 = vld [vmem:[#allocation2 + $0x3dc] sm:$0xf0]  ;;  %v7781_v50 = vpop.f32.mrf.mxu0 }
 0x1b4   :  { %8000 = vmatpush.bf16.msra.mxu1 %v14419_v44  ;;  %v10678_v44 = vld [vmem:[#allocation2 + $0x6c8] sm:$0xf] }
 0x1b5   :  { %8013 = vmatpush.bf16.msra.mxu2 %v9815_v45  ;;  %v15016_v45 = vld [vmem:[#allocation2 + $0x6dc] sm:$0xf0] }
 0x1b6   :  { %8026 = vmatpush.bf16.msra.mxu3 %v10007_v54  ;;  %7988 = vmatmul.bf16.vlgmr.msra.gmra.mxu0 %v16318_v14  ;;  %v15064_v54 = vld [vmem:[#allocation2 + $0x85c] sm:$0xf0]  ;;  %v10679_v58 = vor.u32 %v15016_v45, %v10678_v44  ;;  %v10631_v45 = vor.u32 %v15004_v36, %v10630_v35  ;;  %v15178_v35 = vld [vmem:[#allocation2 + $0xbec] sm:$0xf0]  ;;  %v11518_v36 = vld [vmem:[#allocation2 + $0xd58] sm:$0xf] }
 0x1b7   :  { %8032 = vmatpush.bf16.msrb.mxu0 %v10367_v37  ;;  %8001 = vmatmul.bf16.vlgmr.msra.gmra.mxu1 %v16055_v34  ;;  %v7782_v37 = vadd.f32 %v7781_v50, %v16373_v53  ;;  %v10871_v23 = vor.u32 %v15064_v54, %v10870_v51  ;;  %v10463_v53 = vor.u32 %v14962_v0, %v10462_v61  ;;  %v14956_v34 = vld [vmem:[#allocation2 + $0x4fc] sm:$0xf0]  ;;  %v10222_v50 = vld [vmem:[#allocation2 + $0x338] sm:$0xf]  ;;  %v14902_v51 = vld [vmem:[#allocation2 + $0x34c] sm:$0xf0] }
 0x1b8   :  { %8045 = vmatpush.bf16.msrb.mxu1 %v10559_v55  ;;  %8014 = vmatmul.bf16.vlgmr.msra.gmra.mxu2 %v16248_v21  ;;  %v10295_v55 = vor.u32 %v14920_v19, %v10294_v1  ;;  %v15052_v1 = vld [vmem:[#allocation2 + $0x7fc] sm:$0xf0]  ;;  %v10439_v44 = vor.u32 %v14956_v34, %v10438_v62  ;;  %v10414_v54 = vld [vmem:[#allocation2 + $0x4b8] sm:$0xf]  ;;  %v10198_v61 = vld [vmem:[#allocation2 + $0x308] sm:$0xf] }
 0x1b9   :  { %8058 = vmatpush.bf16.msrb.mxu2 %v10751_v56  ;;  %8027 = vmatmul.bf16.vlgmr.msra.gmra.mxu3 %v16253_v26  ;;  %v7794_v56 = vpop.f32.mrf.mxu1  ;;  %v15130_v62 = vld [vmem:[#allocation2 + $0xa6c] sm:$0xf0] }
 0x1ba   :  { %8071 = vmatpush.bf16.msrb.mxu3 %v10943_v60  ;;  %v14914_v60 = vld [vmem:[#allocation2 + $0x3ac] sm:$0xf0]  ;;  %v7795_v63 = vadd.f32 %v7794_v56, %v7782_v37  ;;  %v10606_v56 = vld [vmem:[#allocation2 + $0x638] sm:$0xf] }
 0x1bb   :  { %8033 = vmatpush.bf16.msrb.mxu0 %v10343_v4  ;;  %v15010_v4 = vld [vmem:[#allocation2 + $0x6ac] sm:$0xf0]  ;;  %v10271_v24 = vor.u32 %v14914_v60, %v10270_v59  ;;  %v7807_v33 = vpop.f32.mrf.mxu2  ;;  %v7783_v19 = vpop.f32.mrf.mxu0  ;;  %v10223_v60 = vor.u32 %v14902_v51, %v10222_v50  ;;  %v11110_v50 = vld [vmem:[#allocation2 + $0xa28] sm:$0xf]  ;;  %v15124_v51 = vld [vmem:[#allocation2 + $0xa3c] sm:$0xf0] }
 0x1bc   :  { %8046 = vmatpush.bf16.msrb.mxu1 %v10535_v6  ;;  %v10846_v6 = vld [vmem:[#allocation2 + $0x818] sm:$0xf]  ;;  %v10655_v25 = vor.u32 %v15010_v4, %v10654_v52  ;;  %v15046_v59 = vld [vmem:[#allocation2 + $0x7cc] sm:$0xf0]  ;;  %v10390_v52 = vld [vmem:[#allocation2 + $0x488] sm:$0xf] }
 0x1bd   :  { %8059 = vmatpush.bf16.msrb.mxu2 %v10727_v17  ;;  %v15058_v17 = vld [vmem:[#allocation2 + $0x82c] sm:$0xf0]  ;;  %v14944_v4 = vld [vmem:[#allocation2 + $0x49c] sm:$0xf0] }
 0x1be   :  { %8072 = vmatpush.bf16.msrb.mxu3 %v10919_v28  ;;  %v14908_v28 = vld [vmem:[#allocation2 + $0x37c] sm:$0xf0]  ;;  %v10847_v30 = vor.u32 %v15058_v17, %v10846_v6  ;;  %v10582_v6 = vld [vmem:[#allocation2 + $0x608] sm:$0xf]  ;;  %v15274_v19 = vld [vmem:[#allocation2 + $0xeec] sm:$0xf0] }
 0x1bf   :  { %8034 = vmatpush.bf16.msrb.mxu0 %v10319_v39  ;;  %v7808_v39 = vadd.f32 %v7807_v33, %v7795_v63  ;;  %v10247_v42 = vor.u32 %v14908_v28, %v10246_v27  ;;  %v11134_v28 = vld [vmem:[#allocation2 + $0xa58] sm:$0xf] }
 0x1c0   :  { %8047 = vmatpush.bf16.msrb.mxu1 %v10511_v40  ;;  %v7820_v40 = vpop.f32.mrf.mxu3 }
 0x1c1   :  { %8060 = vmatpush.bf16.msrb.mxu2 %v10703_v41  ;;  %v10822_v41 = vld [vmem:[#allocation2 + $0x7e8] sm:$0xf]  ;;  %v16379_v43 = vadd.f32 %v7820_v40, %v7808_v39  ;;  %v15226_v39 = vld [vmem:[#allocation2 + $0xd6c] sm:$0xf0]  ;;  %v10391_v40 = vor.u32 %v14944_v4, %v10390_v52  ;;  %v11278_v52 = vld [vmem:[#allocation2 + $0xb78] sm:$0xf] }
 0x1c2   :  { %8073 = vmatpush.bf16.msrb.mxu3 %v10895_v18  ;;  %v7796_v18 = vpop.f32.mrf.mxu1  ;;  %v10823_v37 = vor.u32 %v15052_v1, %v10822_v41  ;;  %v11710_v1 = vld [vmem:[#allocation2 + $0xed8] sm:$0xf] }
 0x1c3   :  { %8035 = vmatpush.bf16.msrb.mxu0 %v10295_v55  ;;  %v14950_v55 = vld [vmem:[#allocation2 + $0x4cc] sm:$0xf0]  ;;  %v7809_v27 = vpop.f32.mrf.mxu2  ;;  %v11135_v18 = vor.u32 %v15130_v62, %v11134_v28 }
 0x1c4   :  { %8048 = vmatpush.bf16.msrb.mxu1 %v10487_v57  ;;  %v14998_v57 = vld [vmem:[#allocation2 + $0x64c] sm:$0xf0]  ;;  %v10415_v63 = vor.u32 %v14950_v55, %v10414_v54  ;;  %v11302_v54 = vld [vmem:[#allocation2 + $0xba8] sm:$0xf]  ;;  %v15172_v55 = vld [vmem:[#allocation2 + $0xbbc] sm:$0xf0] }
 0x1c5   :  { %8061 = vmatpush.bf16.msrb.mxu2 %v10679_v58  ;;  %v10798_v58 = vld [vmem:[#allocation2 + $0x7b8] sm:$0xf]  ;;  %v10607_v0 = vor.u32 %v14998_v57, %v10606_v56  ;;  %v11494_v56 = vld [vmem:[#allocation2 + $0xd28] sm:$0xf]  ;;  %v15220_v57 = vld [vmem:[#allocation2 + $0xd3c] sm:$0xf0] }
 0x1c6   :  { %8074 = vmatpush.bf16.msrb.mxu3 %v10871_v23  ;;  %v14896_v23 = vld [vmem:[#allocation2 + $0x31c] sm:$0xf0]  ;;  %v10799_v17 = vor.u32 %v15046_v59, %v10798_v58  ;;  %v11686_v58 = vld [vmem:[#allocation2 + $0xea8] sm:$0xf] }
 0x1c7   :  { %8036 = vmatpush.bf16.msrb.mxu0 %v10271_v24  ;;  %v14992_v24 = vld [vmem:[#allocation2 + $0x61c] sm:$0xf0]  ;;  %v10199_v34 = vor.u32 %v14896_v23, %v10198_v61  ;;  %v11303_v61 = vor.u32 %v15172_v55, %v11302_v54  ;;  %v11495_v23 = vor.u32 %v15220_v57, %v11494_v56  ;;  %v15106_v54 = vld [vmem:[#allocation2 + $0x9ac] sm:$0xf0] }
 0x1c8   :  { %8049 = vmatpush.bf16.msrb.mxu1 %v10463_v53  ;;  %v10774_v53 = vld [vmem:[#allocation2 + $0x788] sm:$0xf]  ;;  %v7822_v33 = vpop.f32.mrf.mxu3  ;;  %v10583_v41 = vor.u32 %v14992_v24, %v10582_v6  ;;  %v15268_v59 = vld [vmem:[#allocation2 + $0xebc] sm:$0xf0]  ;;  %v15166_v6 = vld [vmem:[#allocation2 + $0xb8c] sm:$0xf0] }
 0x1c9   :  { %8062 = vmatpush.bf16.msrb.mxu2 %v10655_v25  ;;  %v15040_v25 = vld [vmem:[#allocation2 + $0x79c] sm:$0xf0]  ;;  %v11687_v4 = vor.u32 %v15268_v59, %v11686_v58  ;;  %v15214_v24 = vld [vmem:[#allocation2 + $0xd0c] sm:$0xf0]  ;;  %v11279_v28 = vor.u32 %v15166_v6, %v11278_v52  ;;  %v11422_v58 = vld [vmem:[#allocation2 + $0xc98] sm:$0xf] }
 0x1ca   :  { %8075 = vmatpush.bf16.msrb.mxu3 %v10847_v30  ;;  %v11326_v30 = vld [vmem:[#allocation2 + $0xbd8] sm:$0xf]  ;;  %v15112_v33 = vld [vmem:[#allocation2 + $0x9dc] sm:$0xf0]  ;;  %v15154_v57 = vld [vmem:[#allocation2 + $0xb2c] sm:$0xf0] }
 0x1cb   :  { %8037 = vmatpush.bf16.msrb.mxu0 %v10247_v42  ;;  %v10775_v42 = vor.u32 %v15040_v25, %v10774_v53  ;;  %v11662_v53 = vld [vmem:[#allocation2 + $0xe78] sm:$0xf]  ;;  %v15262_v25 = vld [vmem:[#allocation2 + $0xe8c] sm:$0xf0]  ;;  %v15100_v52 = vld [vmem:[#allocation2 + $0x97c] sm:$0xf0] }
 0x1cc   :  { %8050 = vmatpush.bf16.msrb.mxu1 %v10439_v44  ;;  %v11327_v44 = vor.u32 %v15178_v35, %v11326_v30  ;;  %v11062_v30 = vld [vmem:[#allocation2 + $0x9c8] sm:$0xf]  ;;  %v11663_v35 = vor.u32 %v15262_v25, %v11662_v53  ;;  %v15202_v59 = vld [vmem:[#allocation2 + $0xcac] sm:$0xf0]  ;;  %v15196_v25 = vld [vmem:[#allocation2 + $0xc7c] sm:$0xf0] }
 0x1cd   :  { %8063 = vmatpush.bf16.msrb.mxu2 %v10631_v45  ;;  %v11519_v45 = vor.u32 %v15226_v39, %v11518_v36  ;;  %v15160_v36 = vld [vmem:[#allocation2 + $0xb5c] sm:$0xf0]  ;;  %v11446_v39 = vld [vmem:[#allocation2 + $0xcc8] sm:$0xf] }
 0x1ce   :  { %8076 = vmatpush.bf16.msrb.mxu3 %v10823_v37  ;;  %v11711_v37 = vor.u32 %v15274_v19, %v11710_v1  ;;  %v11638_v1 = vld [vmem:[#allocation2 + $0xe48] sm:$0xf]  ;;  %v15256_v19 = vld [vmem:[#allocation2 + $0xe5c] sm:$0xf0] }
 0x1cf   :  { %8038 = vmatpush.bf16.msrb.mxu0 %v10223_v60  ;;  %v11111_v60 = vor.u32 %v15124_v51, %v11110_v50  ;;  %v11038_v51 = vld [vmem:[#allocation2 + $0x998] sm:$0xf]  ;;  %v11639_v55 = vor.u32 %v15256_v19, %v11638_v1  ;;  %v11398_v53 = vld [vmem:[#allocation2 + $0xc68] sm:$0xf]  ;;  %v15094_v1 = vld [vmem:[#allocation2 + $0x94c] sm:$0xf0] }
 0x1d0   :  { %8051 = vmatpush.bf16.msrb.mxu1 %v10415_v63  ;;  %v11086_v63 = vld [vmem:[#allocation2 + $0x9f8] sm:$0xf] }
 0x1d1   :  { %8064 = vmatpush.bf16.msrb.mxu2 %v10607_v0  ;;  %v15118_v0 = vld [vmem:[#allocation2 + $0xa0c] sm:$0xf0]  ;;  %v11182_v19 = vld [vmem:[#allocation2 + $0xab8] sm:$0xf] }
 0x1d2   :  { %8077 = vmatpush.bf16.msrb.mxu3 %v10799_v17  ;;  %v11470_v17 = vld [vmem:[#allocation2 + $0xcf8] sm:$0xf]  ;;  %v11087_v27 = vor.u32 %v15118_v0, %v11086_v63  ;;  %v11423_v63 = vor.u32 %v15202_v59, %v11422_v58  ;;  %v11014_v0 = vld [vmem:[#allocation2 + $0x968] sm:$0xf]  ;;  %v15136_v59 = vld [vmem:[#allocation2 + $0xa9c] sm:$0xf0] }
 0x1d3   :  { %8039 = vmatpush.bf16.msrb.mxu0 %v10199_v34  ;;  %v11471_v62 = vor.u32 %v15214_v24, %v11470_v17  ;;  %v11254_v34 = vld [vmem:[#allocation2 + $0xb48] sm:$0xf]  ;;  %v15148_v24 = vld [vmem:[#allocation2 + $0xafc] sm:$0xf0] }
 0x1d4   :  { %8052 = vmatpush.bf16.msrb.mxu1 %v10391_v40  ;;  %v15208_v40 = vld [vmem:[#allocation2 + $0xcdc] sm:$0xf0]  ;;  %v11158_v58 = vld [vmem:[#allocation2 + $0xa88] sm:$0xf] }
 0x1d5   :  { %8065 = vmatpush.bf16.msrb.mxu2 %v10583_v41  ;;  %v7833_v41 = vpop.f32.mrf.mxu0  ;;  %v11447_v50 = vor.u32 %v15208_v40, %v11446_v39  ;;  %v11399_v40 = vor.u32 %v15196_v25, %v11398_v53  ;;  %v15370_v53 = vld [vmem:[#allocation2 + $0x11ec] sm:$0xf0]  ;;  %v12286_v25 = vld [vmem:[#allocation2 + $0x1358] sm:$0xf] }
 0x1d6   :  { %8078 = vmatpush.bf16.msrb.mxu3 %v10775_v42  ;;  %8040 = vmatmul.bf16.vlgmr.msrb.gmra.mxu0 %v16246_v20  ;;  %v7834_v42 = vadd.f32 %v7833_v41, %v16379_v43  ;;  %v10990_v41 = vld [vmem:[#allocation2 + $0x938] sm:$0xf] }
 0x1d7   :  { %8084 = vmatpush.bf16.msra.mxu0 %v11135_v18  ;;  %8053 = vmatmul.bf16.vlgmr.msrb.gmra.mxu1 %v16250_v22  ;;  %v11063_v18 = vor.u32 %v15112_v33, %v11062_v30  ;;  %v15244_v30 = vld [vmem:[#allocation2 + $0xdfc] sm:$0xf0] }
 0x1d8   :  { %8097 = vmatpush.bf16.msra.mxu1 %v11327_v44  ;;  %8066 = vmatmul.bf16.vlgmr.msrb.gmra.mxu2 %v16260_v31  ;;  %v7846_v44 = vpop.f32.mrf.mxu1 }
 0x1d9   :  { %8110 = vmatpush.bf16.msra.mxu2 %v11519_v45  ;;  %8079 = vmatmul.bf16.vlgmr.msrb.gmra.mxu3 %v16264_v38  ;;  %v11255_v45 = vor.u32 %v15160_v36, %v11254_v34  ;;  %v7847_v56 = vadd.f32 %v7846_v44, %v7834_v42  ;;  %v11015_v34 = vor.u32 %v15100_v52, %v11014_v0  ;;  %v11374_v44 = vld [vmem:[#allocation2 + $0xc38] sm:$0xf] }
 0x1da   :  { %8123 = vmatpush.bf16.msra.mxu3 %v11711_v37  ;;  %v11230_v37 = vld [vmem:[#allocation2 + $0xb18] sm:$0xf] }
 0x1db   :  { %8085 = vmatpush.bf16.msra.mxu0 %v11111_v60  ;;  %v11614_v60 = vld [vmem:[#allocation2 + $0xe18] sm:$0xf]  ;;  %v11231_v43 = vor.u32 %v15154_v57, %v11230_v37  ;;  %v7859_v17 = vpop.f32.mrf.mxu2  ;;  %v10966_v37 = vld [vmem:[#allocation2 + $0x908] sm:$0xf] }
 0x1dc   :  { %8098 = vmatpush.bf16.msra.mxu1 %v11303_v61  ;;  %v15250_v61 = vld [vmem:[#allocation2 + $0xe2c] sm:$0xf0]  ;;  %v11902_v52 = vld [vmem:[#allocation2 + $0x1058] sm:$0xf] }
 0x1dd   :  { %8111 = vmatpush.bf16.msra.mxu2 %v11495_v23  ;;  %v11039_v23 = vor.u32 %v15106_v54, %v11038_v51  ;;  %v11615_v6 = vor.u32 %v15250_v61, %v11614_v60  ;;  %v7835_v33 = vpop.f32.mrf.mxu0  ;;  %v15238_v51 = vld [vmem:[#allocation2 + $0xdcc] sm:$0xf0]  ;;  %v10991_v54 = vor.u32 %v15094_v1, %v10990_v41  ;;  %v11350_v60 = vld [vmem:[#allocation2 + $0xc08] sm:$0xf]  ;;  %v15316_v1 = vld [vmem:[#allocation2 + $0x103c] sm:$0xf0] }
 0x1de   :  { %8124 = vmatpush.bf16.msra.mxu3 %v11687_v4  ;;  %v11206_v4 = vld [vmem:[#allocation2 + $0xae8] sm:$0xf]  ;;  %v15466_v33 = vld [vmem:[#allocation2 + $0x14ec] sm:$0xf0] }
 0x1df   :  { %8086 = vmatpush.bf16.msra.mxu0 %v11087_v27  ;;  %v7860_v27 = vadd.f32 %v7859_v17, %v7847_v56  ;;  %v11207_v39 = vor.u32 %v15148_v24, %v11206_v4  ;;  %v15322_v4 = vld [vmem:[#allocation2 + $0x106c] sm:$0xf0]  ;;  %v11878_v41 = vld [vmem:[#allocation2 + $0x1028] sm:$0xf] }
 0x1e0   :  { %8099 = vmatpush.bf16.msra.mxu1 %v11279_v28  ;;  %v7872_v28 = vpop.f32.mrf.mxu3 }
 0x1e1   :  { %8112 = vmatpush.bf16.msra.mxu2 %v11471_v62  ;;  %v11590_v62 = vld [vmem:[#allocation2 + $0xde8] sm:$0xf]  ;;  %v16386_v36 = vadd.f32 %v7872_v28, %v7860_v27  ;;  %v15418_v27 = vld [vmem:[#allocation2 + $0x136c] sm:$0xf0]  ;;  %v11159_v28 = vor.u32 %v15136_v59, %v11158_v58  ;;  %v12046_v58 = vld [vmem:[#allocation2 + $0x1178] sm:$0xf] }
 0x1e2   :  { %8125 = vmatpush.bf16.msra.mxu3 %v11663_v35  ;;  %v7848_v35 = vpop.f32.mrf.mxu1  ;;  %v11591_v42 = vor.u32 %v15244_v30, %v11590_v62  ;;  %v12478_v30 = vld [vmem:[#allocation2 + $0x14d8] sm:$0xf] }
 0x1e3   :  { %8087 = vmatpush.bf16.msra.mxu0 %v11063_v18  ;;  %v15142_v18 = vld [vmem:[#allocation2 + $0xacc] sm:$0xf0]  ;;  %v7861_v0 = vpop.f32.mrf.mxu2  ;;  %v11903_v35 = vor.u32 %v15322_v4, %v11902_v52 }
 0x1e4   :  { %8100 = vmatpush.bf16.msra.mxu1 %v11255_v45  ;;  %v15190_v45 = vld [vmem:[#allocation2 + $0xc4c] sm:$0xf0]  ;;  %v11183_v56 = vor.u32 %v15142_v18, %v11182_v19  ;;  %v12070_v19 = vld [vmem:[#allocation2 + $0x11a8] sm:$0xf]  ;;  %v15364_v18 = vld [vmem:[#allocation2 + $0x11bc] sm:$0xf0] }
 0x1e5   :  { %8113 = vmatpush.bf16.msra.mxu2 %v11447_v50  ;;  %v11566_v50 = vld [vmem:[#allocation2 + $0xdb8] sm:$0xf]  ;;  %v11375_v57 = vor.u32 %v15190_v45, %v11374_v44  ;;  %v12262_v44 = vld [vmem:[#allocation2 + $0x1328] sm:$0xf]  ;;  %v15412_v45 = vld [vmem:[#allocation2 + $0x133c] sm:$0xf0] }
 0x1e6   :  { %8126 = vmatpush.bf16.msra.mxu3 %v11639_v55  ;;  %v15088_v55 = vld [vmem:[#allocation2 + $0x91c] sm:$0xf0]  ;;  %v11567_v61 = vor.u32 %v15238_v51, %v11566_v50  ;;  %v12454_v50 = vld [vmem:[#allocation2 + $0x14a8] sm:$0xf] }
 0x1e7   :  { %8088 = vmatpush.bf16.msra.mxu0 %v11039_v23  ;;  %v15184_v23 = vld [vmem:[#allocation2 + $0xc1c] sm:$0xf0]  ;;  %v10967_v24 = vor.u32 %v15088_v55, %v10966_v37  ;;  %v12071_v37 = vor.u32 %v15364_v18, %v12070_v19  ;;  %v12263_v55 = vor.u32 %v15412_v45, %v12262_v44  ;;  %v15298_v19 = vld [vmem:[#allocation2 + $0xfac] sm:$0xf0] }
 0x1e8   :  { %8101 = vmatpush.bf16.msra.mxu1 %v11231_v43  ;;  %v11542_v43 = vld [vmem:[#allocation2 + $0xd88] sm:$0xf]  ;;  %v7874_v17 = vpop.f32.mrf.mxu3  ;;  %v11351_v62 = vor.u32 %v15184_v23, %v11350_v60  ;;  %v15460_v51 = vld [vmem:[#allocation2 + $0x14bc] sm:$0xf0]  ;;  %v15358_v60 = vld [vmem:[#allocation2 + $0x118c] sm:$0xf0] }
 0x1e9   :  { %8114 = vmatpush.bf16.msra.mxu2 %v11423_v63  ;;  %v15232_v63 = vld [vmem:[#allocation2 + $0xd9c] sm:$0xf0]  ;;  %v12455_v59 = vor.u32 %v15460_v51, %v12454_v50  ;;  %v15406_v23 = vld [vmem:[#allocation2 + $0x130c] sm:$0xf0]  ;;  %v12047_v52 = vor.u32 %v15358_v60, %v12046_v58  ;;  %v12190_v50 = vld [vmem:[#allocation2 + $0x1298] sm:$0xf] }
 0x1ea   :  { %8127 = vmatpush.bf16.msra.mxu3 %v11615_v6  ;;  %v12094_v6 = vld [vmem:[#allocation2 + $0x11d8] sm:$0xf]  ;;  %v15304_v17 = vld [vmem:[#allocation2 + $0xfdc] sm:$0xf0]  ;;  %v15346_v45 = vld [vmem:[#allocation2 + $0x112c] sm:$0xf0] }
 0x1eb   :  { %8089 = vmatpush.bf16.msra.mxu0 %v11015_v34  ;;  %v11543_v34 = vor.u32 %v15232_v63, %v11542_v43  ;;  %v12430_v43 = vld [vmem:[#allocation2 + $0x1478] sm:$0xf]  ;;  %v15454_v63 = vld [vmem:[#allocation2 + $0x148c] sm:$0xf0]  ;;  %v15292_v58 = vld [vmem:[#allocation2 + $0xf7c] sm:$0xf0] }
 0x1ec   :  { %8102 = vmatpush.bf16.msra.mxu1 %v11207_v39  ;;  %v12095_v39 = vor.u32 %v15370_v53, %v12094_v6  ;;  %v11830_v6 = vld [vmem:[#allocation2 + $0xfc8] sm:$0xf]  ;;  %v12431_v53 = vor.u32 %v15454_v63, %v12430_v43  ;;  %v15394_v51 = vld [vmem:[#allocation2 + $0x12ac] sm:$0xf0]  ;;  %v15388_v63 = vld [vmem:[#allocation2 + $0x127c] sm:$0xf0] }
 0x1ed   :  { %8115 = vmatpush.bf16.msra.mxu2 %v11399_v40  ;;  %v12287_v40 = vor.u32 %v15418_v27, %v12286_v25  ;;  %v15352_v25 = vld [vmem:[#allocation2 + $0x115c] sm:$0xf0]  ;;  %v12214_v27 = vld [vmem:[#allocation2 + $0x12c8] sm:$0xf] }
 0x1ee   :  { %8128 = vmatpush.bf16.msra.mxu3 %v11591_v42  ;;  %v12479_v42 = vor.u32 %v15466_v33, %v12478_v30  ;;  %v12406_v30 = vld [vmem:[#allocation2 + $0x1448] sm:$0xf]  ;;  %v15448_v33 = vld [vmem:[#allocation2 + $0x145c] sm:$0xf0] }
 0x1ef   :  { %8090 = vmatpush.bf16.msra.mxu0 %v10991_v54  ;;  %v11879_v54 = vor.u32 %v15316_v1, %v11878_v41  ;;  %v11806_v1 = vld [vmem:[#allocation2 + $0xf98] sm:$0xf]  ;;  %v12407_v18 = vor.u32 %v15448_v33, %v12406_v30  ;;  %v12166_v43 = vld [vmem:[#allocation2 + $0x1268] sm:$0xf]  ;;  %v15286_v30 = vld [vmem:[#allocation2 + $0xf4c] sm:$0xf0] }
 0x1f0   :  { %8103 = vmatpush.bf16.msra.mxu1 %v11183_v56  ;;  %v11854_v56 = vld [vmem:[#allocation2 + $0xff8] sm:$0xf] }
 0x1f1   :  { %8116 = vmatpush.bf16.msra.mxu2 %v11375_v57  ;;  %v15310_v57 = vld [vmem:[#allocation2 + $0x100c] sm:$0xf0]  ;;  %v11950_v33 = vld [vmem:[#allocation2 + $0x10b8] sm:$0xf] }
 0x1f2   :  { %8129 = vmatpush.bf16.msra.mxu3 %v11567_v61  ;;  %v12238_v61 = vld [vmem:[#allocation2 + $0x12f8] sm:$0xf]  ;;  %v11855_v0 = vor.u32 %v15310_v57, %v11854_v56  ;;  %v12191_v56 = vor.u32 %v15394_v51, %v12190_v50  ;;  %v11782_v57 = vld [vmem:[#allocation2 + $0xf68] sm:$0xf]  ;;  %v15328_v51 = vld [vmem:[#allocation2 + $0x109c] sm:$0xf0] }
 0x1f3   :  { %8091 = vmatpush.bf16.msra.mxu0 %v10967_v24  ;;  %v12239_v4 = vor.u32 %v15406_v23, %v12238_v61  ;;  %v12022_v24 = vld [vmem:[#allocation2 + $0x1148] sm:$0xf]  ;;  %v15340_v23 = vld [vmem:[#allocation2 + $0x10fc] sm:$0xf0] }
 0x1f4   :  { %8104 = vmatpush.bf16.msra.mxu1 %v11159_v28  ;;  %v15400_v28 = vld [vmem:[#allocation2 + $0x12dc] sm:$0xf0]  ;;  %v11926_v50 = vld [vmem:[#allocation2 + $0x1088] sm:$0xf] }
 0x1f5   :  { %8117 = vmatpush.bf16.msra.mxu2 %v11351_v62  ;;  %v7885_v62 = vpop.f32.mrf.mxu0  ;;  %v12215_v41 = vor.u32 %v15400_v28, %v12214_v27  ;;  %v12167_v28 = vor.u32 %v15388_v63, %v12166_v43  ;;  %v15562_v43 = vld [vmem:[#allocation2 + $0x17ec] sm:$0xf0]  ;;  %v13054_v63 = vld [vmem:[#allocation2 + $0x1958] sm:$0xf] }
 0x1f6   :  { %8130 = vmatpush.bf16.msra.mxu3 %v11543_v34  ;;  %8092 = vmatmul.bf16.vlgmr.msra.gmra.mxu0 %v16258_v29  ;;  %v7886_v34 = vadd.f32 %v7885_v62, %v16386_v36  ;;  %v11758_v62 = vld [vmem:[#allocation2 + $0xf38] sm:$0xf] }
 0x1f7   :  { %8136 = vmatpush.bf16.msrb.mxu0 %v11903_v35  ;;  %8105 = vmatmul.bf16.vlgmr.msra.gmra.mxu1 %v16262_v32  ;;  %v11831_v35 = vor.u32 %v15304_v17, %v11830_v6  ;;  %v15436_v6 = vld [vmem:[#allocation2 + $0x13fc] sm:$0xf0] }
 0x1f8   :  { %8149 = vmatpush.bf16.msrb.mxu1 %v12095_v39  ;;  %8118 = vmatmul.bf16.vlgmr.msra.gmra.mxu2 %v16273_v8  ;;  %v7898_v39 = vpop.f32.mrf.mxu1 }
 0x1f9   :  { %8162 = vmatpush.bf16.msrb.mxu2 %v12287_v40  ;;  %8131 = vmatmul.bf16.vlgmr.msra.gmra.mxu3 %v16277_v12  ;;  %v12023_v40 = vor.u32 %v15352_v25, %v12022_v24  ;;  %v7899_v44 = vadd.f32 %v7898_v39, %v7886_v34  ;;  %v11783_v24 = vor.u32 %v15292_v58, %v11782_v57  ;;  %v12142_v39 = vld [vmem:[#allocation2 + $0x1238] sm:$0xf] }
 0x1fa   :  { %8175 = vmatpush.bf16.msrb.mxu3 %v12479_v42  ;;  %v11998_v42 = vld [vmem:[#allocation2 + $0x1118] sm:$0xf] }
 0x1fb   :  { %8137 = vmatpush.bf16.msrb.mxu0 %v11879_v54  ;;  %v12382_v54 = vld [vmem:[#allocation2 + $0x1418] sm:$0xf]  ;;  %v11999_v36 = vor.u32 %v15346_v45, %v11998_v42  ;;  %v7911_v61 = vpop.f32.mrf.mxu2  ;;  %v11734_v42 = vld [vmem:[#allocation2 + $0xf08] sm:$0xf] }
 0x1fc   :  { %8150 = vmatpush.bf16.msrb.mxu1 %v12071_v37  ;;  %v15442_v37 = vld [vmem:[#allocation2 + $0x142c] sm:$0xf0]  ;;  %v12670_v58 = vld [vmem:[#allocation2 + $0x1658] sm:$0xf] }
 0x1fd   :  { %8163 = vmatpush.bf16.msrb.mxu2 %v12263_v55  ;;  %v11807_v55 = vor.u32 %v15298_v19, %v11806_v1  ;;  %v12383_v60 = vor.u32 %v15442_v37, %v12382_v54  ;;  %v7887_v17 = vpop.f32.mrf.mxu0  ;;  %v15430_v1 = vld [vmem:[#allocation2 + $0x13cc] sm:$0xf0]  ;;  %v11759_v19 = vor.u32 %v15286_v30, %v11758_v62  ;;  %v12118_v54 = vld [vmem:[#allocation2 + $0x1208] sm:$0xf]  ;;  %v15508_v30 = vld [vmem:[#allocation2 + $0x163c] sm:$0xf0] }
 0x1fe   :  { %8176 = vmatpush.bf16.msrb.mxu3 %v12455_v59  ;;  %v11974_v59 = vld [vmem:[#allocation2 + $0x10e8] sm:$0xf]  ;;  %v15658_v17 = vld [vmem:[#allocation2 + $0x1aec] sm:$0xf0] }
 0x1ff   :  { %8138 = vmatpush.bf16.msrb.mxu0 %v11855_v0  ;;  %v7912_v0 = vadd.f32 %v7911_v61, %v7899_v44  ;;  %v11975_v27 = vor.u32 %v15340_v23, %v11974_v59  ;;  %v15514_v59 = vld [vmem:[#allocation2 + $0x166c] sm:$0xf0]  ;;  %v12646_v62 = vld [vmem:[#allocation2 + $0x1628] sm:$0xf] }
 0x200   :  { %8151 = vmatpush.bf16.msrb.mxu1 %v12047_v52  ;;  %v7924_v52 = vpop.f32.mrf.mxu3 }
 0x201   :  { %8164 = vmatpush.bf16.msrb.mxu2 %v12239_v4  ;;  %v12358_v4 = vld [vmem:[#allocation2 + $0x13e8] sm:$0xf]  ;;  %v16393_v25 = vadd.f32 %v7924_v52, %v7912_v0  ;;  %v15610_v0 = vld [vmem:[#allocation2 + $0x196c] sm:$0xf0]  ;;  %v11927_v52 = vor.u32 %v15328_v51, %v11926_v50  ;;  %v12814_v50 = vld [vmem:[#allocation2 + $0x1778] sm:$0xf] }
 0x202   :  { %8177 = vmatpush.bf16.msrb.mxu3 %v12431_v53  ;;  %v7900_v53 = vpop.f32.mrf.mxu1  ;;  %v12359_v34 = vor.u32 %v15436_v6, %v12358_v4  ;;  %v13246_v6 = vld [vmem:[#allocation2 + $0x1ad8] sm:$0xf] }
 0x203   :  { %8139 = vmatpush.bf16.msrb.mxu0 %v11831_v35  ;;  %v15334_v35 = vld [vmem:[#allocation2 + $0x10cc] sm:$0xf0]  ;;  %v7913_v57 = vpop.f32.mrf.mxu2  ;;  %v12671_v53 = vor.u32 %v15514_v59, %v12670_v58 }
 0x204   :  { %8152 = vmatpush.bf16.msrb.mxu1 %v12023_v40  ;;  %v15382_v40 = vld [vmem:[#allocation2 + $0x124c] sm:$0xf0]  ;;  %v11951_v44 = vor.u32 %v15334_v35, %v11950_v33  ;;  %v12838_v33 = vld [vmem:[#allocation2 + $0x17a8] sm:$0xf]  ;;  %v15556_v35 = vld [vmem:[#allocation2 + $0x17bc] sm:$0xf0] }
 0x205   :  { %8165 = vmatpush.bf16.msrb.mxu2 %v12215_v41  ;;  %v12334_v41 = vld [vmem:[#allocation2 + $0x13b8] sm:$0xf]  ;;  %v12143_v45 = vor.u32 %v15382_v40, %v12142_v39  ;;  %v13030_v39 = vld [vmem:[#allocation2 + $0x1928] sm:$0xf]  ;;  %v15604_v40 = vld [vmem:[#allocation2 + $0x193c] sm:$0xf0] }
 0x206   :  { %8178 = vmatpush.bf16.msrb.mxu3 %v12407_v18  ;;  %v15280_v18 = vld [vmem:[#allocation2 + $0xf1c] sm:$0xf0]  ;;  %v12335_v37 = vor.u32 %v15430_v1, %v12334_v41  ;;  %v13222_v41 = vld [vmem:[#allocation2 + $0x1aa8] sm:$0xf] }
 0x207   :  { %8140 = vmatpush.bf16.msrb.mxu0 %v11807_v55  ;;  %v15376_v55 = vld [vmem:[#allocation2 + $0x121c] sm:$0xf0]  ;;  %v11735_v23 = vor.u32 %v15280_v18, %v11734_v42  ;;  %v12839_v42 = vor.u32 %v15556_v35, %v12838_v33  ;;  %v13031_v18 = vor.u32 %v15604_v40, %v13030_v39  ;;  %v15490_v33 = vld [vmem:[#allocation2 + $0x15ac] sm:$0xf0] }
 0x208   :  { %8153 = vmatpush.bf16.msrb.mxu1 %v11999_v36  ;;  %v12310_v36 = vld [vmem:[#allocation2 + $0x1388] sm:$0xf]  ;;  %v7926_v61 = vpop.f32.mrf.mxu3  ;;  %v12119_v4 = vor.u32 %v15376_v55, %v12118_v54  ;;  %v15652_v1 = vld [vmem:[#allocation2 + $0x1abc] sm:$0xf0]  ;;  %v15550_v54 = vld [vmem:[#allocation2 + $0x178c] sm:$0xf0] }
 0x209   :  { %8166 = vmatpush.bf16.msrb.mxu2 %v12191_v56  ;;  %v15424_v56 = vld [vmem:[#allocation2 + $0x139c] sm:$0xf0]  ;;  %v13223_v51 = vor.u32 %v15652_v1, %v13222_v41  ;;  %v15598_v55 = vld [vmem:[#allocation2 + $0x190c] sm:$0xf0]  ;;  %v12815_v58 = vor.u32 %v15550_v54, %v12814_v50  ;;  %v12958_v41 = vld [vmem:[#allocation2 + $0x1898] sm:$0xf] }
 0x20a   :  { %8179 = vmatpush.bf16.msrb.mxu3 %v12383_v60  ;;  %v12862_v60 = vld [vmem:[#allocation2 + $0x17d8] sm:$0xf]  ;;  %v15496_v61 = vld [vmem:[#allocation2 + $0x15dc] sm:$0xf0]  ;;  %v15538_v40 = vld [vmem:[#allocation2 + $0x172c] sm:$0xf0] }
 0x20b   :  { %8141 = vmatpush.bf16.msrb.mxu0 %v11783_v24  ;;  %v12311_v24 = vor.u32 %v15424_v56, %v12310_v36  ;;  %v13198_v36 = vld [vmem:[#allocation2 + $0x1a78] sm:$0xf]  ;;  %v15646_v56 = vld [vmem:[#allocation2 + $0x1a8c] sm:$0xf0]  ;;  %v15484_v50 = vld [vmem:[#allocation2 + $0x157c] sm:$0xf0] }
 0x20c   :  { %8154 = vmatpush.bf16.msrb.mxu1 %v11975_v27  ;;  %v12863_v27 = vor.u32 %v15562_v43, %v12862_v60  ;;  %v12598_v60 = vld [vmem:[#allocation2 + $0x15c8] sm:$0xf]  ;;  %v13199_v43 = vor.u32 %v15646_v56, %v13198_v36  ;;  %v15586_v1 = vld [vmem:[#allocation2 + $0x18ac] sm:$0xf0]  ;;  %v15580_v56 = vld [vmem:[#allocation2 + $0x187c] sm:$0xf0] }
 0x20d   :  { %8167 = vmatpush.bf16.msrb.mxu2 %v12167_v28  ;;  %v13055_v28 = vor.u32 %v15610_v0, %v13054_v63  ;;  %v15544_v63 = vld [vmem:[#allocation2 + $0x175c] sm:$0xf0]  ;;  %v12982_v0 = vld [vmem:[#allocation2 + $0x18c8] sm:$0xf] }
 0x20e   :  { %8180 = vmatpush.bf16.msrb.mxu3 %v12359_v34  ;;  %v13247_v34 = vor.u32 %v15658_v17, %v13246_v6  ;;  %v13174_v6 = vld [vmem:[#allocation2 + $0x1a48] sm:$0xf]  ;;  %v15640_v17 = vld [vmem:[#allocation2 + $0x1a5c] sm:$0xf0] }
 0x20f   :  { %8142 = vmatpush.bf16.msrb.mxu0 %v11759_v19  ;;  %v12647_v19 = vor.u32 %v15508_v30, %v12646_v62  ;;  %v12574_v30 = vld [vmem:[#allocation2 + $0x1598] sm:$0xf]  ;;  %v13175_v35 = vor.u32 %v15640_v17, %v13174_v6  ;;  %v12934_v36 = vld [vmem:[#allocation2 + $0x1868] sm:$0xf]  ;;  %v15478_v6 = vld [vmem:[#allocation2 + $0x154c] sm:$0xf0] }
 0x210   :  { %8155 = vmatpush.bf16.msrb.mxu1 %v11951_v44  ;;  %v12622_v44 = vld [vmem:[#allocation2 + $0x15f8] sm:$0xf] }
 0x211   :  { %8168 = vmatpush.bf16.msrb.mxu2 %v12143_v45  ;;  %v15502_v45 = vld [vmem:[#allocation2 + $0x160c] sm:$0xf0]  ;;  %v12718_v17 = vld [vmem:[#allocation2 + $0x16b8] sm:$0xf] }
 0x212   :  { %8181 = vmatpush.bf16.msrb.mxu3 %v12335_v37  ;;  %v13006_v37 = vld [vmem:[#allocation2 + $0x18f8] sm:$0xf]  ;;  %v12623_v57 = vor.u32 %v15502_v45, %v12622_v44  ;;  %v12959_v44 = vor.u32 %v15586_v1, %v12958_v41  ;;  %v12550_v45 = vld [vmem:[#allocation2 + $0x1568] sm:$0xf]  ;;  %v15520_v1 = vld [vmem:[#allocation2 + $0x169c] sm:$0xf0] }
 0x213   :  { %8143 = vmatpush.bf16.msrb.mxu0 %v11735_v23  ;;  %v13007_v59 = vor.u32 %v15598_v55, %v13006_v37  ;;  %v12790_v23 = vld [vmem:[#allocation2 + $0x1748] sm:$0xf]  ;;  %v15532_v55 = vld [vmem:[#allocation2 + $0x16fc] sm:$0xf0] }
 0x214   :  { %8156 = vmatpush.bf16.msrb.mxu1 %v11927_v52  ;;  %v15592_v52 = vld [vmem:[#allocation2 + $0x18dc] sm:$0xf0]  ;;  %v12694_v41 = vld [vmem:[#allocation2 + $0x1688] sm:$0xf] }
 0x215   :  { %8169 = vmatpush.bf16.msrb.mxu2 %v12119_v4  ;;  %v7937_v4 = vpop.f32.mrf.mxu0  ;;  %v12983_v62 = vor.u32 %v15592_v52, %v12982_v0  ;;  %v12935_v52 = vor.u32 %v15580_v56, %v12934_v36  ;;  %v15754_v36 = vld [vmem:[#allocation2 + $0x1dec] sm:$0xf0]  ;;  %v13822_v56 = vld [vmem:[#allocation2 + $0x1f58] sm:$0xf] }
 0x216   :  { %8182 = vmatpush.bf16.msrb.mxu3 %v12311_v24  ;;  %8144 = vmatmul.bf16.vlgmr.msrb.gmra.mxu0 %v16275_v11  ;;  %v7938_v24 = vadd.f32 %v7937_v4, %v16393_v25  ;;  %v12526_v4 = vld [vmem:[#allocation2 + $0x1538] sm:$0xf] }
 0x217   :  { %8188 = vmatpush.bf16.msra.mxu0 %v12671_v53  ;;  %8157 = vmatmul.bf16.vlgmr.msrb.gmra.mxu1 %v16279_v15  ;;  %v12599_v53 = vor.u32 %v15496_v61, %v12598_v60  ;;  %v15628_v60 = vld [vmem:[#allocation2 + $0x19fc] sm:$0xf0] }
 0x218   :  { %8201 = vmatpush.bf16.msra.mxu1 %v12863_v27  ;;  %8170 = vmatmul.bf16.vlgmr.msrb.gmra.mxu2 %v16285_v46  ;;  %v7950_v27 = vpop.f32.mrf.mxu1 }
 0x219   :  { %8214 = vmatpush.bf16.msra.mxu2 %v13055_v28  ;;  %8183 = vmatmul.bf16.vlgmr.msrb.gmra.mxu3 %v16289_v48  ;;  %v12791_v28 = vor.u32 %v15544_v63, %v12790_v23  ;;  %v7951_v39 = vadd.f32 %v7950_v27, %v7938_v24  ;;  %v12551_v23 = vor.u32 %v15484_v50, %v12550_v45  ;;  %v12910_v27 = vld [vmem:[#allocation2 + $0x1838] sm:$0xf] }
 0x21a   :  { %8227 = vmatpush.bf16.msra.mxu3 %v13247_v34  ;;  %v12766_v34 = vld [vmem:[#allocation2 + $0x1718] sm:$0xf] }
 0x21b   :  { %8189 = vmatpush.bf16.msra.mxu0 %v12647_v19  ;;  %v13150_v19 = vld [vmem:[#allocation2 + $0x1a18] sm:$0xf]  ;;  %v12767_v25 = vor.u32 %v15538_v40, %v12766_v34  ;;  %v7963_v37 = vpop.f32.mrf.mxu2  ;;  %v12502_v34 = vld [vmem:[#allocation2 + $0x1508] sm:$0xf] }
 0x21c   :  { %8202 = vmatpush.bf16.msra.mxu1 %v12839_v42  ;;  %v15634_v42 = vld [vmem:[#allocation2 + $0x1a2c] sm:$0xf0]  ;;  %v13438_v50 = vld [vmem:[#allocation2 + $0x1c58] sm:$0xf] }
 0x21d   :  { %8215 = vmatpush.bf16.msra.mxu2 %v13031_v18  ;;  %v12575_v18 = vor.u32 %v15490_v33, %v12574_v30  ;;  %v13151_v54 = vor.u32 %v15634_v42, %v13150_v19  ;;  %v7939_v61 = vpop.f32.mrf.mxu0  ;;  %v15622_v30 = vld [vmem:[#allocation2 + $0x19cc] sm:$0xf0]  ;;  %v12527_v33 = vor.u32 %v15478_v6, %v12526_v4  ;;  %v12886_v19 = vld [vmem:[#allocation2 + $0x1808] sm:$0xf]  ;;  %v15700_v6 = vld [vmem:[#allocation2 + $0x1c3c] sm:$0xf0] }
 0x21e   :  { %8228 = vmatpush.bf16.msra.mxu3 %v13223_v51  ;;  %v12742_v51 = vld [vmem:[#allocation2 + $0x16e8] sm:$0xf]  ;;  %v15850_v61 = vld [vmem:[#allocation2 + $0x20ec] sm:$0xf0] }
 0x21f   :  { %8190 = vmatpush.bf16.msra.mxu0 %v12623_v57  ;;  %v7964_v57 = vadd.f32 %v7963_v37, %v7951_v39  ;;  %v12743_v0 = vor.u32 %v15532_v55, %v12742_v51  ;;  %v15706_v51 = vld [vmem:[#allocation2 + $0x1c6c] sm:$0xf0]  ;;  %v13414_v4 = vld [vmem:[#allocation2 + $0x1c28] sm:$0xf] }
 0x220   :  { %8203 = vmatpush.bf16.msra.mxu1 %v12815_v58  ;;  %v7976_v58 = vpop.f32.mrf.mxu3 }
 0x221   :  { %8216 = vmatpush.bf16.msra.mxu2 %v13007_v59  ;;  %v13126_v59 = vld [vmem:[#allocation2 + $0x19e8] sm:$0xf]  ;;  %v16400_v63 = vadd.f32 %v7976_v58, %v7964_v57  ;;  %v15802_v57 = vld [vmem:[#allocation2 + $0x1f6c] sm:$0xf0]  ;;  %v12695_v58 = vor.u32 %v15520_v1, %v12694_v41  ;;  %v13582_v41 = vld [vmem:[#allocation2 + $0x1d78] sm:$0xf] }
 0x222   :  { %8229 = vmatpush.bf16.msra.mxu3 %v13199_v43  ;;  %v7952_v43 = vpop.f32.mrf.mxu1  ;;  %v13127_v24 = vor.u32 %v15628_v60, %v13126_v59  ;;  %v14014_v60 = vld [vmem:[#allocation2 + $0x20d8] sm:$0xf] }
 0x223   :  { %8191 = vmatpush.bf16.msra.mxu0 %v12599_v53  ;;  %v15526_v53 = vld [vmem:[#allocation2 + $0x16cc] sm:$0xf0]  ;;  %v7965_v45 = vpop.f32.mrf.mxu2  ;;  %v13439_v43 = vor.u32 %v15706_v51, %v13438_v50 }
 0x224   :  { %8204 = vmatpush.bf16.msra.mxu1 %v12791_v28  ;;  %v15574_v28 = vld [vmem:[#allocation2 + $0x184c] sm:$0xf0]  ;;  %v12719_v39 = vor.u32 %v15526_v53, %v12718_v17  ;;  %v13606_v17 = vld [vmem:[#allocation2 + $0x1da8] sm:$0xf]  ;;  %v15748_v53 = vld [vmem:[#allocation2 + $0x1dbc] sm:$0xf0] }
 0x225   :  { %8217 = vmatpush.bf16.msra.mxu2 %v12983_v62  ;;  %v13102_v62 = vld [vmem:[#allocation2 + $0x19b8] sm:$0xf]  ;;  %v12911_v40 = vor.u32 %v15574_v28, %v12910_v27  ;;  %v13798_v27 = vld [vmem:[#allocation2 + $0x1f28] sm:$0xf]  ;;  %v15796_v28 = vld [vmem:[#allocation2 + $0x1f3c] sm:$0xf0] }
 0x226   :  { %8230 = vmatpush.bf16.msra.mxu3 %v13175_v35  ;;  %v15472_v35 = vld [vmem:[#allocation2 + $0x151c] sm:$0xf0]  ;;  %v13103_v42 = vor.u32 %v15622_v30, %v13102_v62  ;;  %v13990_v62 = vld [vmem:[#allocation2 + $0x20a8] sm:$0xf] }
 0x227   :  { %8192 = vmatpush.bf16.msra.mxu0 %v12575_v18  ;;  %v15568_v18 = vld [vmem:[#allocation2 + $0x181c] sm:$0xf0]  ;;  %v12503_v55 = vor.u32 %v15472_v35, %v12502_v34  ;;  %v13607_v34 = vor.u32 %v15748_v53, %v13606_v17  ;;  %v13799_v35 = vor.u32 %v15796_v28, %v13798_v27  ;;  %v15682_v17 = vld [vmem:[#allocation2 + $0x1bac] sm:$0xf0] }
 0x228   :  { %8205 = vmatpush.bf16.msra.mxu1 %v12767_v25  ;;  %v13078_v25 = vld [vmem:[#allocation2 + $0x1988] sm:$0xf]  ;;  %v7978_v37 = vpop.f32.mrf.mxu3  ;;  %v12887_v59 = vor.u32 %v15568_v18, %v12886_v19  ;;  %v15844_v30 = vld [vmem:[#allocation2 + $0x20bc] sm:$0xf0]  ;;  %v15742_v19 = vld [vmem:[#allocation2 + $0x1d8c] sm:$0xf0] }
 0x229   :  { %8218 = vmatpush.bf16.msra.mxu2 %v12959_v44  ;;  %v15616_v44 = vld [vmem:[#allocation2 + $0x199c] sm:$0xf0]  ;;  %v13991_v1 = vor.u32 %v15844_v30, %v13990_v62  ;;  %v15790_v18 = vld [vmem:[#allocation2 + $0x1f0c] sm:$0xf0]  ;;  %v13583_v50 = vor.u32 %v15742_v19, %v13582_v41  ;;  %v13726_v62 = vld [vmem:[#allocation2 + $0x1e98] sm:$0xf] }
 0x22a   :  { %8231 = vmatpush.bf16.msra.mxu3 %v13151_v54  ;;  %v13630_v54 = vld [vmem:[#allocation2 + $0x1dd8] sm:$0xf]  ;;  %v15688_v37 = vld [vmem:[#allocation2 + $0x1bdc] sm:$0xf0]  ;;  %v15730_v28 = vld [vmem:[#allocation2 + $0x1d2c] sm:$0xf0] }
 0x22b   :  { %8193 = vmatpush.bf16.msra.mxu0 %v12551_v23  ;;  %v13079_v23 = vor.u32 %v15616_v44, %v13078_v25  ;;  %v13966_v25 = vld [vmem:[#allocation2 + $0x2078] sm:$0xf]  ;;  %v15838_v44 = vld [vmem:[#allocation2 + $0x208c] sm:$0xf0]  ;;  %v15676_v41 = vld [vmem:[#allocation2 + $0x1b7c] sm:$0xf0] }
 0x22c   :  { %8206 = vmatpush.bf16.msra.mxu1 %v12743_v0  ;;  %v13631_v0 = vor.u32 %v15754_v36, %v13630_v54  ;;  %v13366_v54 = vld [vmem:[#allocation2 + $0x1bc8] sm:$0xf]  ;;  %v13967_v36 = vor.u32 %v15838_v44, %v13966_v25  ;;  %v15778_v30 = vld [vmem:[#allocation2 + $0x1eac] sm:$0xf0]  ;;  %v15772_v25 = vld [vmem:[#allocation2 + $0x1e7c] sm:$0xf0] }
 0x22d   :  { %8219 = vmatpush.bf16.msra.mxu2 %v12935_v52  ;;  %v13823_v52 = vor.u32 %v15802_v57, %v13822_v56  ;;  %v15736_v56 = vld [vmem:[#allocation2 + $0x1d5c] sm:$0xf0]  ;;  %v13750_v57 = vld [vmem:[#allocation2 + $0x1ec8] sm:$0xf] }
 0x22e   :  { %8232 = vmatpush.bf16.msra.mxu3 %v13127_v24  ;;  %v14015_v24 = vor.u32 %v15850_v61, %v14014_v60  ;;  %v13942_v60 = vld [vmem:[#allocation2 + $0x2048] sm:$0xf]  ;;  %v15832_v61 = vld [vmem:[#allocation2 + $0x205c] sm:$0xf0] }
 0x22f   :  { %8194 = vmatpush.bf16.msra.mxu0 %v12527_v33  ;;  %v13415_v33 = vor.u32 %v15700_v6, %v13414_v4  ;;  %v13342_v6 = vld [vmem:[#allocation2 + $0x1b98] sm:$0xf]  ;;  %v13943_v53 = vor.u32 %v15832_v61, %v13942_v60  ;;  %v13894_v44 = vld [vmem:[#allocation2 + $0x1fe8] sm:$0xf] }
 0x230   :  { %8207 = vmatpush.bf16.msra.mxu1 %v12719_v39  ;;  %v13390_v39 = vld [vmem:[#allocation2 + $0x1bf8] sm:$0xf] }
 0x231   :  { %8220 = vmatpush.bf16.msra.mxu2 %v12911_v40  ;;  %v15694_v40 = vld [vmem:[#allocation2 + $0x1c0c] sm:$0xf0]  ;;  %v13486_v60 = vld [vmem:[#allocation2 + $0x1cb8] sm:$0xf] }
 0x232   :  { %8233 = vmatpush.bf16.msra.mxu3 %v13103_v42  ;;  %v13774_v42 = vld [vmem:[#allocation2 + $0x1ef8] sm:$0xf]  ;;  %v13391_v45 = vor.u32 %v15694_v40, %v13390_v39  ;;  %v13727_v39 = vor.u32 %v15778_v30, %v13726_v62  ;;  %v13318_v40 = vld [vmem:[#allocation2 + $0x1b68] sm:$0xf] }
 0x233   :  { %8195 = vmatpush.bf16.msra.mxu0 %v12503_v55  ;;  %v13775_v51 = vor.u32 %v15790_v18, %v13774_v42  ;;  %v13558_v55 = vld [vmem:[#allocation2 + $0x1d48] sm:$0xf]  ;;  %v15724_v42 = vld [vmem:[#allocation2 + $0x1cfc] sm:$0xf0] }
 0x234   :  { %8208 = vmatpush.bf16.msra.mxu1 %v12695_v58  ;;  %v15784_v58 = vld [vmem:[#allocation2 + $0x1edc] sm:$0xf0]  ;;  %v13702_v18 = vld [vmem:[#allocation2 + $0x1e68] sm:$0xf] }
 0x235   :  { %8221 = vmatpush.bf16.msra.mxu2 %v12887_v59  ;;  %v7989_v59 = vpop.f32.mrf.mxu0  ;;  %v13751_v4 = vor.u32 %v15784_v58, %v13750_v57  ;;  %v13703_v57 = vor.u32 %v15772_v25, %v13702_v18  ;;  %v13294_v58 = vld [vmem:[#allocation2 + $0x1b38] sm:$0xf] }
 0x236   :  { %8234 = vmatpush.bf16.msra.mxu3 %v13079_v23  ;;  %8196 = vmatmul.bf16.vlgmr.msra.gmra.mxu0 %v16287_v47  ;;  %v7990_v23 = vadd.f32 %v7989_v59, %v16400_v63  ;;  %v13343_v63 = vor.u32 %v15682_v17, %v13342_v6  ;;  %v15670_v59 = vld [vmem:[#allocation2 + $0x1b4c] sm:$0xf0]  ;;  %v13870_v6 = vld [vmem:[#allocation2 + $0x1fb8] sm:$0xf] }
 0x237   :  { %8240 = vmatpush.bf16.msrb.mxu0 %v13439_v43  ;;  %8209 = vmatmul.bf16.vlgmr.msra.gmra.mxu1 %v16291_v49  ;;  %v13367_v43 = vor.u32 %v15688_v37, %v13366_v54  ;;  %v16056_v37 = vld [vmem:[#allocation5] sm:$0x3f]  ;;  %v15814_v17 = vld [vmem:[#allocation2 + $0x1fcc] sm:$0xf0]  ;;  %v14398_v18 = vld [vmem:[#allocation2 + $0x23d8] sm:$0xf] }
 0x238   :  { %8253 = vmatpush.bf16.msrb.mxu1 %v13631_v0  ;;  %8222 = vmatmul.bf16.vlgmr.msra.gmra.mxu2 %v16300_v5  ;;  %v8002_v0 = vpop.f32.mrf.mxu1 }
 0x239   :  { %8266 = vmatpush.bf16.msrb.mxu2 %v13823_v52  ;;  %8235 = vmatmul.bf16.vlgmr.msra.gmra.mxu3 %v16304_v10  ;;  %v13559_v52 = vor.u32 %v15736_v56, %v13558_v55  ;;  %v16407_v27 = vadd.f32 %v8002_v0, %v7990_v23  ;;  %v1288_v55 = vperm.slane %v16056_v37, 2  ;;  %v13678_v0 = vld [vmem:[#allocation2 + $0x1e38] sm:$0xf] }
 0x23a   :  { %8279 = vmatpush.bf16.msrb.mxu3 %v14015_v24  ;;  %v13534_v24 = vld [vmem:[#allocation2 + $0x1d18] sm:$0xf] }
 0x23b   :  { %8241 = vmatpush.bf16.msrb.mxu0 %v13415_v33  ;;  %v13918_v33 = vld [vmem:[#allocation2 + $0x2018] sm:$0xf] }
 0x23c   :  { %8254 = vmatpush.bf16.msrb.mxu1 %v13607_v34  ;;  %v15826_v34 = vld [vmem:[#allocation2 + $0x202c] sm:$0xf0]  ;;  %v8028_v61 = vpop.f32.mrf.mxu3 }
 0x23d   :  { %8267 = vmatpush.bf16.msrb.mxu2 %v13799_v35  ;;  %v13535_v35 = vor.u32 %v15730_v28, %v13534_v24  ;;  %v13919_v19 = vor.u32 %v15826_v34, %v13918_v33  ;;  %v13295_v24 = vor.u32 %v15670_v59, %v13294_v58  ;;  %v15664_v28 = vld [vmem:[#allocation2 + $0x1b1c] sm:$0xf0]  ;;  %v13462_v34 = vld [vmem:[#allocation2 + $0x1c88] sm:$0xf] }
 0x23e   :  { %8280 = vmatpush.bf16.msrb.mxu3 %v13991_v1  ;;  %v13510_v1 = vld [vmem:[#allocation2 + $0x1ce8] sm:$0xf] }
 0x23f   :  { %8242 = vmatpush.bf16.msrb.mxu0 %v13391_v45  ;;  %v15820_v45 = vld [vmem:[#allocation2 + $0x1ffc] sm:$0xf0]  ;;  %v13511_v56 = vor.u32 %v15724_v42, %v13510_v1  ;;  %v15898_v42 = vld [vmem:[#allocation2 + $0x226c] sm:$0xf0] }
 0x240   :  { %8255 = vmatpush.bf16.msrb.mxu1 %v13583_v50  ;;  %v7991_v50 = vpop.f32.mrf.mxu0  ;;  %v8004_v54 = vpop.f32.mrf.mxu1  ;;  %v13895_v23 = vor.u32 %v15820_v45, %v13894_v44  ;;  %v15808_v1 = vld [vmem:[#allocation2 + $0x1f9c] sm:$0xf0]  ;;  %v15946_v44 = vld [vmem:[#allocation2 + $0x23ec] sm:$0xf0]  ;;  %v14590_v45 = vld [vmem:[#allocation2 + $0x2558] sm:$0xf] }
 0x241   :  { %8268 = vmatpush.bf16.msrb.mxu2 %v13775_v51  ;;  %v13319_v51 = vor.u32 %v15676_v41, %v13318_v40  ;;  %v15760_v40 = vld [vmem:[#allocation2 + $0x1e1c] sm:$0xf0]  ;;  %v13846_v41 = vld [vmem:[#allocation2 + $0x1f88] sm:$0xf]  ;;  %v15994_v50 = vld [vmem:[#allocation2 + $0x256c] sm:$0xf0]  ;;  %v14399_v59 = vor.u32 %v15946_v44, %v14398_v18 }
 0x242   :  { %8281 = vmatpush.bf16.msrb.mxu3 %v13967_v36  ;;  %v8015_v36 = vpop.f32.mrf.mxu2  ;;  %v14134_v44 = vld [vmem:[#allocation2 + $0x21c8] sm:$0xf] }
 0x243   :  { %8243 = vmatpush.bf16.msrb.mxu0 %v13367_v43  ;;  %v15718_v43 = vld [vmem:[#allocation2 + $0x1ccc] sm:$0xf0] }
 0x244   :  { %8256 = vmatpush.bf16.msrb.mxu1 %v13559_v52  ;;  %v15766_v52 = vld [vmem:[#allocation2 + $0x1e4c] sm:$0xf0]  ;;  %v13487_v30 = vor.u32 %v15718_v43, %v13486_v60  ;;  %v14591_v60 = vor.u32 %v15994_v50, %v14590_v45  ;;  %v14374_v43 = vld [vmem:[#allocation2 + $0x23a8] sm:$0xf]  ;;  %v15880_v45 = vld [vmem:[#allocation2 + $0x21dc] sm:$0xf0] }
 0x245   :  { %8269 = vmatpush.bf16.msrb.mxu2 %v13751_v4  ;;  %v8016_v4 = vadd.f32 %v8015_v36, %v1288_v55  ;;  %v13679_v33 = vor.u32 %v15766_v52, %v13678_v0  ;;  %v14839_v55 = vld [vmem:[#allocation2 + $0x15c] sm:$0xf]  ;;  %v9984_v36 = vld [vmem:[#allocation2 + $0x170] sm:$0xf0]  ;;  %v15940_v52 = vld [vmem:[#allocation2 + $0x23bc] sm:$0xf0] }
 0x246   :  { %8282 = vmatpush.bf16.msrb.mxu3 %v13943_v53  ;;  %v13270_v53 = vld [vmem:[#allocation2 + $0x1b08] sm:$0xf]  ;;  %v9987_v0 = vor.u32 %v14839_v55, %v9984_v36  ;;  %v15976_v55 = vld [vmem:[#allocation2 + $0x24dc] sm:$0xf0]  ;;  %v14821_v36 = vld [vmem:[#allocation2 + $0xcc] sm:$0xf] }
 0x247   :  { %8244 = vmatpush.bf16.msrb.mxu0 %v13343_v63  ;;  %v16409_v62 = vadd.f32 %v8028_v61, %v8016_v4  ;;  %v15712_v63 = vld [vmem:[#allocation2 + $0x1c9c] sm:$0xf0]  ;;  %v13271_v25 = vor.u32 %v15664_v28, %v13270_v53  ;;  %v14182_v61 = vld [vmem:[#allocation2 + $0x2228] sm:$0xf]  ;;  %v14375_v28 = vor.u32 %v15940_v52, %v14374_v43  ;;  %v14302_v43 = vld [vmem:[#allocation2 + $0x2318] sm:$0xf] }
 0x248   :  { %8257 = vmatpush.bf16.msrb.mxu1 %v13535_v35  ;;  %v13654_v35 = vld [vmem:[#allocation2 + $0x1e08] sm:$0xf]  ;;  %v13463_v54 = vor.u32 %v15712_v63, %v13462_v34  ;;  %v15886_v34 = vld [vmem:[#allocation2 + $0x220c] sm:$0xf0]  ;;  %v14350_v63 = vld [vmem:[#allocation2 + $0x2378] sm:$0xf] }
 0x249   :  { %8270 = vmatpush.bf16.msrb.mxu2 %v13727_v39  ;;  %v13871_v39 = vor.u32 %v15814_v17, %v13870_v6  ;;  %v13655_v37 = vor.u32 %v15760_v40, %v13654_v35  ;;  %v14566_v4 = vld [vmem:[#allocation2 + $0x2528] sm:$0xf]  ;;  %v15988_v6 = vld [vmem:[#allocation2 + $0x253c] sm:$0xf0]  ;;  %v14833_v17 = vld [vmem:[#allocation2 + $0x12c] sm:$0xf] }
 0x24a   :  { %8283 = vmatpush.bf16.msrb.mxu3 %v13919_v19  ;;  %v14206_v19 = vld [vmem:[#allocation2 + $0x2258] sm:$0xf]  ;;  %v14326_v50 = vld [vmem:[#allocation2 + $0x2348] sm:$0xf] }
 0x24b   :  { %8245 = vmatpush.bf16.msrb.mxu0 %v13319_v51  ;;  %v8017_v51 = vpop.f32.mrf.mxu2  ;;  %v14207_v58 = vor.u32 %v15898_v42, %v14206_v19  ;;  %v14542_v40 = vld [vmem:[#allocation2 + $0x24f8] sm:$0xf]  ;;  %v9936_v19 = vld [vmem:[#allocation2 + $0x110] sm:$0xf0] }
 0x24c   :  { %8258 = vmatpush.bf16.msrb.mxu1 %v13511_v56  ;;  %v8030_v56 = vpop.f32.mrf.mxu3 }
 0x24d   :  { %8271 = vmatpush.bf16.msrb.mxu2 %v13703_v57  ;;  %v13847_v57 = vor.u32 %v15808_v1, %v13846_v41  ;;  %v15982_v41 = vld [vmem:[#allocation2 + $0x250c] sm:$0xf0]  ;;  %v14827_v1 = vld [vmem:[#allocation2 + $0xfc] sm:$0xf]  ;;  %v9912_v56 = vld [vmem:[#allocation2 + $0xe0] sm:$0xf0] }
 0x24e   :  { %8284 = vmatpush.bf16.msrb.mxu3 %v13895_v23  ;;  %v15892_v23 = vld [vmem:[#allocation2 + $0x223c] sm:$0xf0]  ;;  %v9939_v51 = vor.u32 %v14827_v1, %v9936_v19  ;;  %v14470_v19 = vld [vmem:[#allocation2 + $0x2468] sm:$0xf] }
 0x24f   :  { %8246 = vmatpush.bf16.msrb.mxu0 %v13295_v24  ;;  %v9960_v24 = vld [vmem:[#allocation2 + $0x140] sm:$0xf0]  ;;  %v14183_v53 = vor.u32 %v15892_v23, %v14182_v61  ;;  %v14110_v61 = vld [vmem:[#allocation2 + $0x2198] sm:$0xf]  ;;  %v15874_v23 = vld [vmem:[#allocation2 + $0x21ac] sm:$0xf0] }
 0x250   :  { %8259 = vmatpush.bf16.msrb.mxu1 %v13487_v30  ;;  %v14567_v30 = vor.u32 %v15988_v6, %v14566_v4  ;;  %v9963_v35 = vor.u32 %v14833_v17, %v9960_v24  ;;  %v9915_v4 = vor.u32 %v14821_v36, %v9912_v56  ;;  %v15922_v6 = vld [vmem:[#allocation2 + $0x232c] sm:$0xf0]  ;;  %v14494_v17 = vld [vmem:[#allocation2 + $0x2498] sm:$0xf]  ;;  %v15916_v1 = vld [vmem:[#allocation2 + $0x22fc] sm:$0xf0] }
 0x251   :  { %8272 = vmatpush.bf16.msrb.mxu2 %v13679_v33  ;;  %v14158_v33 = vld [vmem:[#allocation2 + $0x21f8] sm:$0xf]  ;;  %v15970_v24 = vld [vmem:[#allocation2 + $0x24ac] sm:$0xf0] }
 0x252   :  { %8285 = vmatpush.bf16.msrb.mxu3 %v13871_v39  ;;  %v15934_v39 = vld [vmem:[#allocation2 + $0x238c] sm:$0xf0]  ;;  %v14159_v42 = vor.u32 %v15886_v34, %v14158_v33  ;;  %v14111_v33 = vor.u32 %v15874_v23, %v14110_v61  ;;  %v14303_v34 = vor.u32 %v15922_v6, %v14302_v43  ;;  %v14062_v36 = vld [vmem:[#allocation2 + $0x2138] sm:$0xf]  ;;  %v14803_v43 = vld [vmem:[#allocation2 + $0x3c] sm:$0xf] }
 0x253   :  { %8247 = vmatpush.bf16.msrb.mxu0 %v13271_v25  ;;  %v14351_v18 = vor.u32 %v15934_v39, %v14350_v63  ;;  %v14543_v25 = vor.u32 %v15982_v41, %v14542_v40  ;;  %v14495_v63 = vor.u32 %v15970_v24, %v14494_v17  ;;  %v15868_v39 = vld [vmem:[#allocation2 + $0x217c] sm:$0xf0]  ;;  %v14278_v40 = vld [vmem:[#allocation2 + $0x22e8] sm:$0xf]  ;;  %v15862_v56 = vld [vmem:[#allocation2 + $0x214c] sm:$0xf0] }
 0x254   :  { %8260 = vmatpush.bf16.msrb.mxu1 %v13463_v54  ;;  %v15928_v54 = vld [vmem:[#allocation2 + $0x235c] sm:$0xf0]  ;;  %v8054_v52 = vpop.f32.mrf.mxu1  ;;  %v14446_v61 = vld [vmem:[#allocation2 + $0x2438] sm:$0xf]  ;;  %v15958_v23 = vld [vmem:[#allocation2 + $0x244c] sm:$0xf0] }
 0x255   :  { %8273 = vmatpush.bf16.msrb.mxu2 %v13655_v37  ;;  %v14518_v37 = vld [vmem:[#allocation2 + $0x24c8] sm:$0xf]  ;;  %v15856_v6 = vld [vmem:[#allocation2 + $0x211c] sm:$0xf0]  ;;  %v14447_v24 = vor.u32 %v15958_v23, %v14446_v61  ;;  %v10344_v61 = vld [vmem:[#allocation2 + $0x440] sm:$0xf0] }
 0x256   :  { %8286 = vmatpush.bf16.msrb.mxu3 %v13847_v57  ;;  %8248 = vmatmul.bf16.vlgmr.msrb.gmra.mxu0 %v16302_v9  ;;  %v14135_v57 = vor.u32 %v15880_v45, %v14134_v44  ;;  %v14809_v44 = vld [vmem:[#allocation2 + $0x6c] sm:$0xf]  ;;  %v9864_v45 = vld [vmem:[#allocation2 + $0x80] sm:$0xf0] }
 0x257   :  { %8292 = vmatpush.bf16.msra.mxu0 %v14207_v58  ;;  %8261 = vmatmul.bf16.vlgmr.msrb.gmra.mxu1 %v16306_v13  ;;  %v8041_v58 = vpop.f32.mrf.mxu0  ;;  %v14977_v23 = vld [vmem:[#allocation2 + $0x5ac] sm:$0xf] }
 0x258   :  { %8305 = vmatpush.bf16.msra.mxu1 %v14399_v59  ;;  %8274 = vmatmul.bf16.vlgmr.msrb.gmra.mxu2 %v16312_v2  ;;  %v14327_v59 = vor.u32 %v15928_v54, %v14326_v50 }
 0x259   :  { %8318 = vmatpush.bf16.msra.mxu2 %v14591_v60  ;;  %8287 = vmatmul.bf16.vlgmr.msrb.gmra.mxu3 %v16316_v7  ;;  %v14519_v60 = vor.u32 %v15976_v55, %v14518_v37  ;;  %v14279_v37 = vor.u32 %v15916_v1, %v14278_v40  ;;  %v14935_v1 = vld [vmem:[#allocation2 + $0x45c] sm:$0xf] }
 0x25a   :  { %8331 = vmatpush.bf16.msra.mxu3 %v9987_v0  ;;  %v8042_v0 = vadd.f32 %v8041_v58, %v16409_v62 }
 0x25b   :  { %8293 = vmatpush.bf16.msra.mxu0 %v14183_v53  ;;  %v14815_v53 = vld [vmem:[#allocation2 + $0x9c] sm:$0xf]  ;;  %v8067_v41 = vpop.f32.mrf.mxu2 }
 0x25c   :  { %8306 = vmatpush.bf16.msra.mxu1 %v14375_v28  ;;  %v9888_v28 = vld [vmem:[#allocation2 + $0xb0] sm:$0xf0]  ;;  %v8056_v58 = vpop.f32.mrf.mxu1 }
 0x25d   :  { %8319 = vmatpush.bf16.msra.mxu2 %v14567_v30  ;;  %v8055_v30 = vadd.f32 %v8054_v52, %v8042_v0  ;;  %v9891_v62 = vor.u32 %v14815_v53, %v9888_v28  ;;  %v9840_v0 = vld [vmem:[#allocation2 + $0x50] sm:$0xf0]  ;;  %v14063_v52 = vor.u32 %v15862_v56, %v14062_v36  ;;  %v14230_v53 = vld [vmem:[#allocation2 + $0x2288] sm:$0xf]  ;;  %v15904_v28 = vld [vmem:[#allocation2 + $0x229c] sm:$0xf0] }
 0x25e   :  { %8332 = vmatpush.bf16.msra.mxu3 %v9963_v35  ;;  %v14086_v35 = vld [vmem:[#allocation2 + $0x2168] sm:$0xf]  ;;  %v10152_v58 = vld [vmem:[#allocation2 + $0x2c0] sm:$0xf0] }
 0x25f   :  { %8294 = vmatpush.bf16.msra.mxu0 %v14159_v42  ;;  %v15964_v42 = vld [vmem:[#allocation2 + $0x247c] sm:$0xf0]  ;;  %v14087_v50 = vor.u32 %v15868_v39, %v14086_v35  ;;  %v8043_v54 = vpop.f32.mrf.mxu0  ;;  %v14797_v35 = vld [vmem:[#allocation2 + $0xc] sm:$0xf]  ;;  %v9816_v39 = vld [vmem:[#allocation2 + $0x20] sm:$0xf0] }
 0x260   :  { %8307 = vmatpush.bf16.msra.mxu1 %v14351_v18  ;;  %v8068_v18 = vadd.f32 %v8067_v41, %v8055_v30  ;;  %v14471_v55 = vor.u32 %v15964_v42, %v14470_v19  ;;  %v14422_v30 = vld [vmem:[#allocation2 + $0x2408] sm:$0xf]  ;;  %v14887_v41 = vld [vmem:[#allocation2 + $0x2dc] sm:$0xf]  ;;  %v10368_v42 = vld [vmem:[#allocation2 + $0x470] sm:$0xf0] }
 0x261   :  { %8320 = vmatpush.bf16.msra.mxu2 %v14543_v25  ;;  %v8080_v25 = vpop.f32.mrf.mxu3  ;;  %v10752_v54 = vld [vmem:[#allocation2 + $0x770] sm:$0xf0]  ;;  %v10371_v36 = vor.u32 %v14935_v1, %v10368_v42  ;;  %v10104_v42 = vld [vmem:[#allocation2 + $0x260] sm:$0xf0] }
 0x262   :  { %8333 = vmatpush.bf16.msra.mxu3 %v9939_v51  ;;  %v16416_v51 = vadd.f32 %v8080_v25, %v8068_v18  ;;  %v14983_v18 = vld [vmem:[#allocation2 + $0x5dc] sm:$0xf]  ;;  %v10560_v25 = vld [vmem:[#allocation2 + $0x5f0] sm:$0xf0] }
 0x263   :  { %8295 = vmatpush.bf16.msra.mxu0 %v14135_v57  ;;  %v14254_v57 = vld [vmem:[#allocation2 + $0x22b8] sm:$0xf]  ;;  %v10563_v56 = vor.u32 %v14983_v18, %v10560_v25  ;;  %v14917_v18 = vld [vmem:[#allocation2 + $0x3cc] sm:$0xf] }
 0x264   :  { %8308 = vmatpush.bf16.msra.mxu1 %v14327_v59  ;;  %v9867_v59 = vor.u32 %v14809_v44, %v9864_v45  ;;  %v14231_v44 = vor.u32 %v15904_v28, %v14230_v53  ;;  %v10128_v53 = vld [vmem:[#allocation2 + $0x290] sm:$0xf0]  ;;  %v14923_v28 = vld [vmem:[#allocation2 + $0x3fc] sm:$0xf] }
 0x265   :  { %8321 = vmatpush.bf16.msra.mxu2 %v14519_v60  ;;  %v15910_v60 = vld [vmem:[#allocation2 + $0x22cc] sm:$0xf0] }
 0x266   :  { %8334 = vmatpush.bf16.msra.mxu3 %v9915_v4  ;;  %v14038_v4 = vld [vmem:[#allocation2 + $0x2108] sm:$0xf]  ;;  %v14255_v17 = vor.u32 %v15910_v60, %v14254_v57  ;;  %v14881_v57 = vld [vmem:[#allocation2 + $0x2ac] sm:$0xf] }
 0x267   :  { %8296 = vmatpush.bf16.msra.mxu0 %v14111_v33  ;;  %v8069_v33 = vpop.f32.mrf.mxu2  ;;  %v14039_v19 = vor.u32 %v15856_v6, %v14038_v4  ;;  %v10155_v4 = vor.u32 %v14881_v57, %v10152_v58  ;;  %v14863_v58 = vld [vmem:[#allocation2 + $0x21c] sm:$0xf] }
 0x268   :  { %8309 = vmatpush.bf16.msra.mxu1 %v14303_v34  ;;  %v9843_v34 = vor.u32 %v14803_v43, %v9840_v0  ;;  %v10536_v43 = vld [vmem:[#allocation2 + $0x5c0] sm:$0xf0]  ;;  %v15025_v0 = vld [vmem:[#allocation2 + $0x72c] sm:$0xf]  ;;  %v10320_v33 = vld [vmem:[#allocation2 + $0x410] sm:$0xf0] }
 0x269   :  { %8322 = vmatpush.bf16.msra.mxu2 %v14495_v63  ;;  %v15952_v63 = vld [vmem:[#allocation2 + $0x241c] sm:$0xf0]  ;;  %v8082_v40 = vpop.f32.mrf.mxu3 }
 0x26a   :  { %8335 = vmatpush.bf16.msra.mxu3 %v9891_v62  ;;  %v10176_v62 = vld [vmem:[#allocation2 + $0x2f0] sm:$0xf0]  ;;  %v14423_v45 = vor.u32 %v15952_v63, %v14422_v30 }
 0x26b   :  { %8297 = vmatpush.bf16.msra.mxu0 %v14087_v50  ;;  %v15031_v50 = vld [vmem:[#allocation2 + $0x75c] sm:$0xf]  ;;  %v10512_v63 = vld [vmem:[#allocation2 + $0x590] sm:$0xf0] }
 0x26c   :  { %8310 = vmatpush.bf16.msra.mxu1 %v14279_v37  ;;  %v9819_v37 = vor.u32 %v14797_v35, %v9816_v39  ;;  %v10755_v60 = vor.u32 %v15031_v50, %v10752_v54  ;;  %v16057_v35 = vld [vmem:[#allocation1] sm:$0xff]  ;;  %v10704_v40 = vld [vmem:[#allocation2 + $0x710] sm:$0xf0]  ;;  %v10488_v50 = vld [vmem:[#allocation2 + $0x560] sm:$0xf0] }
 0x26d   :  { %8323 = vmatpush.bf16.msra.mxu2 %v14471_v55  ;;  %v10179_v55 = vor.u32 %v14887_v41, %v10176_v62  ;;  %v15019_v39 = vld [vmem:[#allocation2 + $0x6fc] sm:$0xf]  ;;  %v10323_v62 = vor.u32 %v14923_v28, %v10320_v33  ;;  %v15013_v54 = vld [vmem:[#allocation2 + $0x6cc] sm:$0xf] }
 0x26e   :  { %8336 = vmatpush.bf16.msra.mxu3 %v9867_v59  ;;  %v14929_v59 = vld [vmem:[#allocation2 + $0x42c] sm:$0xf]  ;;  %v10707_v25 = vor.u32 %v15019_v39, %v10704_v40  ;;  %v10248_v39 = vld [vmem:[#allocation2 + $0x380] sm:$0xf0] }
 0x26f   :  { %8298 = vmatpush.bf16.msra.mxu0 %v14063_v52  ;;  %v10728_v52 = vld [vmem:[#allocation2 + $0x740] sm:$0xf0]  ;;  %v10347_v6 = vor.u32 %v14929_v59, %v10344_v61  ;;  %v10080_v59 = vld [vmem:[#allocation2 + $0x230] sm:$0xf0]  ;;  %v14857_v33 = vld [vmem:[#allocation2 + $0x1ec] sm:$0xf] }
 0x270   :  { %8311 = vmatpush.bf16.msra.mxu1 %v14255_v17  ;;  %v10539_v17 = vor.u32 %v14977_v23, %v10536_v43  ;;  %v10731_v30 = vor.u32 %v15025_v0, %v10728_v52  ;;  %v10272_v0 = vld [vmem:[#allocation2 + $0x3b0] sm:$0xf0]  ;;  %v14959_v52 = vld [vmem:[#allocation2 + $0x51c] sm:$0xf]  ;;  %v14953_v40 = vld [vmem:[#allocation2 + $0x4ec] sm:$0xf] }
 0x271   :  { %8324 = vmatpush.bf16.msra.mxu2 %v14447_v24  ;;  %v14875_v24 = vld [vmem:[#allocation2 + $0x27c] sm:$0xf] }
 0x272   :  { %8337 = vmatpush.bf16.msra.mxu3 %v9843_v34  ;;  %v14971_v34 = vld [vmem:[#allocation2 + $0x57c] sm:$0xf]  ;;  %v10131_v41 = vor.u32 %v14875_v24, %v10128_v53  ;;  %v10083_v53 = vor.u32 %v14863_v58, %v10080_v59  ;;  %v10416_v59 = vld [vmem:[#allocation2 + $0x4d0] sm:$0xf0] }
 0x273   :  { %8299 = vmatpush.bf16.msra.mxu0 %v14039_v19  ;;  %v10515_v1 = vor.u32 %v14971_v34, %v10512_v63  ;;  %v14869_v19 = vld [vmem:[#allocation2 + $0x24c] sm:$0xf]  ;;  %v10056_v34 = vld [vmem:[#allocation2 + $0x200] sm:$0xf0]  ;;  %v14947_v58 = vld [vmem:[#allocation2 + $0x4bc] sm:$0xf] }
 0x274   :  { %8312 = vmatpush.bf16.msra.mxu1 %v14231_v44  ;;  %v10296_v44 = vld [vmem:[#allocation2 + $0x3e0] sm:$0xf0]  ;;  %v8106_v23 = vpop.f32.mrf.mxu1  ;;  %v14905_v63 = vld [vmem:[#allocation2 + $0x36c] sm:$0xf] }
 0x275   :  { %8325 = vmatpush.bf16.msra.mxu2 %v14423_v45  ;;  %v14965_v45 = vld [vmem:[#allocation2 + $0x54c] sm:$0xf] }
 0x276   :  { %8338 = vmatpush.bf16.msra.mxu3 %v9819_v37  ;;  %8300 = vmatmul.bf16.vlgmr.msra.gmra.mxu0 %v16314_v3  ;;  %v10680_v37 = vld [vmem:[#allocation2 + $0x6e0] sm:$0xf0]  ;;  %v10491_v57 = vor.u32 %v14965_v45, %v10488_v50  ;;  %v10251_v45 = vor.u32 %v14905_v63, %v10248_v39  ;;  %v15127_v39 = vld [vmem:[#allocation2 + $0xa5c] sm:$0xf] }
 0x277   :  { %8344 = vmatpush.bf16.msrb.mxu0 %v10179_v55  ;;  %8313 = vmatmul.bf16.vlgmr.msra.gmra.mxu1 %v16318_v14  ;;  %v10107_v55 = vor.u32 %v14869_v19, %v10104_v42  ;;  %v10683_v43 = vor.u32 %v15013_v54, %v10680_v37  ;;  %v15001_v19 = vld [vmem:[#allocation2 + $0x66c] sm:$0xf]  ;;  %v10632_v42 = vld [vmem:[#allocation2 + $0x680] sm:$0xf0]  ;;  %v14851_v54 = vld [vmem:[#allocation2 + $0x1bc] sm:$0xf] }
 0x278   :  { %8357 = vmatpush.bf16.msrb.mxu1 %v10371_v36  ;;  %8326 = vmatmul.bf16.vlgmr.msra.gmra.mxu2 %v16057_v35  ;;  %v8093_v36 = vpop.f32.mrf.mxu0  ;;  %v10032_v37 = vld [vmem:[#allocation2 + $0x1d0] sm:$0xf0] }
 0x279   :  { %8370 = vmatpush.bf16.msrb.mxu2 %v10563_v56  ;;  %8339 = vmatmul.bf16.vlgmr.msra.gmra.mxu3 %v16248_v21  ;;  %v10299_v56 = vor.u32 %v14917_v18, %v10296_v44  ;;  %v8094_v61 = vadd.f32 %v8093_v36, %v16416_v51  ;;  %v10059_v18 = vor.u32 %v14857_v33, %v10056_v34  ;;  %v14989_v33 = vld [vmem:[#allocation2 + $0x60c] sm:$0xf]  ;;  %v10584_v34 = vld [vmem:[#allocation2 + $0x620] sm:$0xf0] }
 0x27a   :  { %8383 = vmatpush.bf16.msrb.mxu3 %v10755_v60  ;;  %v14911_v60 = vld [vmem:[#allocation2 + $0x39c] sm:$0xf] }
 0x27b   :  { %8345 = vmatpush.bf16.msrb.mxu0 %v10155_v4  ;;  %v10464_v4 = vld [vmem:[#allocation2 + $0x530] sm:$0xf0]  ;;  %v8107_v24 = vadd.f32 %v8106_v23, %v8094_v61  ;;  %v10275_v28 = vor.u32 %v14911_v60, %v10272_v0  ;;  %v8119_v35 = vpop.f32.mrf.mxu2  ;;  %v14995_v60 = vld [vmem:[#allocation2 + $0x63c] sm:$0xf]  ;;  %v10035_v23 = vor.u32 %v14851_v54, %v10032_v37  ;;  %v10008_v0 = vld [vmem:[#allocation2 + $0x1a0] sm:$0xf0] }
 0x27c   :  { %8358 = vmatpush.bf16.msrb.mxu1 %v10347_v6  ;;  %v15007_v6 = vld [vmem:[#allocation2 + $0x69c] sm:$0xf]  ;;  %v8108_v36 = vpop.f32.mrf.mxu1  ;;  %v10608_v61 = vld [vmem:[#allocation2 + $0x650] sm:$0xf0] }
 0x27d   :  { %8371 = vmatpush.bf16.msrb.mxu2 %v10539_v17  ;;  %v10656_v17 = vld [vmem:[#allocation2 + $0x6b0] sm:$0xf0]  ;;  %v10920_v36 = vld [vmem:[#allocation2 + $0x8c0] sm:$0xf0] }
 0x27e   :  { %8384 = vmatpush.bf16.msrb.mxu3 %v10731_v30  ;;  %v10467_v30 = vor.u32 %v14959_v52, %v10464_v4  ;;  %v10659_v51 = vor.u32 %v15007_v6, %v10656_v17  ;;  %v10419_v4 = vor.u32 %v14947_v58, %v10416_v59  ;;  %v14893_v6 = vld [vmem:[#allocation2 + $0x30c] sm:$0xf]  ;;  %v10200_v17 = vld [vmem:[#allocation2 + $0x320] sm:$0xf0] }
 0x27f   :  { %8346 = vmatpush.bf16.msrb.mxu0 %v10131_v41  ;;  %v10440_v41 = vld [vmem:[#allocation2 + $0x500] sm:$0xf0]  ;;  %v15169_v59 = vld [vmem:[#allocation2 + $0xbac] sm:$0xf] }
 0x280   :  { %8359 = vmatpush.bf16.msrb.mxu1 %v10323_v62  ;;  %v8120_v62 = vadd.f32 %v8119_v35, %v8107_v24  ;;  %v8095_v44 = vpop.f32.mrf.mxu0  ;;  %v10443_v50 = vor.u32 %v14953_v40, %v10440_v41  ;;  %v14941_v24 = vld [vmem:[#allocation2 + $0x48c] sm:$0xf]  ;;  %v15079_v35 = vld [vmem:[#allocation2 + $0x8dc] sm:$0xf]  ;;  %v11136_v41 = vld [vmem:[#allocation2 + $0xa70] sm:$0xf0] }
 0x281   :  { %8372 = vmatpush.bf16.msrb.mxu2 %v10515_v1  ;;  %v8132_v1 = vpop.f32.mrf.mxu3  ;;  %v11520_v44 = vld [vmem:[#allocation2 + $0xd70] sm:$0xf0]  ;;  %v11139_v54 = vor.u32 %v15127_v39, %v11136_v41  ;;  %v11112_v58 = vld [vmem:[#allocation2 + $0xa40] sm:$0xf0]  ;;  %v15061_v39 = vld [vmem:[#allocation2 + $0x84c] sm:$0xf] }
 0x282   :  { %8385 = vmatpush.bf16.msrb.mxu3 %v10707_v25  ;;  %v16422_v25 = vadd.f32 %v8132_v1, %v8120_v62  ;;  %v15175_v62 = vld [vmem:[#allocation2 + $0xbdc] sm:$0xf]  ;;  %v11328_v1 = vld [vmem:[#allocation2 + $0xbf0] sm:$0xf0]  ;;  %v15109_v41 = vld [vmem:[#allocation2 + $0x9cc] sm:$0xf] }
 0x283   :  { %8347 = vmatpush.bf16.msrb.mxu0 %v10107_v55  ;;  %v14899_v55 = vld [vmem:[#allocation2 + $0x33c] sm:$0xf]  ;;  %v11331_v37 = vor.u32 %v15175_v62, %v11328_v1  ;;  %v11064_v1 = vld [vmem:[#allocation2 + $0x9e0] sm:$0xf0] }
 0x284   :  { %8360 = vmatpush.bf16.msrb.mxu1 %v10299_v56  ;;  %v10635_v56 = vor.u32 %v15001_v19, %v10632_v42  ;;  %v10203_v19 = vor.u32 %v14893_v6, %v10200_v17  ;;  %v10896_v6 = vld [vmem:[#allocation2 + $0x890] sm:$0xf0]  ;;  %v15115_v17 = vld [vmem:[#allocation2 + $0x9fc] sm:$0xf] }
 0x285   :  { %8373 = vmatpush.bf16.msrb.mxu2 %v10491_v57  ;;  %v10224_v57 = vld [vmem:[#allocation2 + $0x350] sm:$0xf0] }
 0x286   :  { %8386 = vmatpush.bf16.msrb.mxu3 %v10683_v43  ;;  %v14845_v43 = vld [vmem:[#allocation2 + $0x18c] sm:$0xf]  ;;  %v10227_v52 = vor.u32 %v14899_v55, %v10224_v57 }
 0x287   :  { %8348 = vmatpush.bf16.msrb.mxu0 %v10083_v53  ;;  %v8121_v53 = vpop.f32.mrf.mxu2  ;;  %v10011_v40 = vor.u32 %v14845_v43, %v10008_v0  ;;  %v15073_v55 = vld [vmem:[#allocation2 + $0x8ac] sm:$0xf] }
 0x288   :  { %8361 = vmatpush.bf16.msrb.mxu1 %v10275_v28  ;;  %v10611_v28 = vor.u32 %v14995_v60, %v10608_v61  ;;  %v11304_v60 = vld [vmem:[#allocation2 + $0xbc0] sm:$0xf0]  ;;  %v15217_v61 = vld [vmem:[#allocation2 + $0xd2c] sm:$0xf]  ;;  %v10923_v43 = vor.u32 %v15073_v55, %v10920_v36  ;;  %v11088_v53 = vld [vmem:[#allocation2 + $0xa10] sm:$0xf0]  ;;  %v11067_v55 = vor.u32 %v15109_v41, %v11064_v1 }
 0x289   :  { %8374 = vmatpush.bf16.msrb.mxu2 %v10467_v30  ;;  %v10392_v30 = vld [vmem:[#allocation2 + $0x4a0] sm:$0xf0]  ;;  %v8134_v63 = vpop.f32.mrf.mxu3 }
 0x28a   :  { %8387 = vmatpush.bf16.msrb.mxu3 %v10659_v51  ;;  %v10944_v51 = vld [vmem:[#allocation2 + $0x8f0] sm:$0xf0]  ;;  %v10395_v42 = vor.u32 %v14941_v24, %v10392_v30 }
 0x28b   :  { %8349 = vmatpush.bf16.msrb.mxu0 %v10059_v18  ;;  %v15223_v18 = vld [vmem:[#allocation2 + $0xd5c] sm:$0xf]  ;;  %v11280_v30 = vld [vmem:[#allocation2 + $0xb90] sm:$0xf0] }
 0x28c   :  { %8362 = vmatpush.bf16.msrb.mxu1 %v10251_v45  ;;  %v10587_v45 = vor.u32 %v14989_v33, %v10584_v34  ;;  %v11523_v57 = vor.u32 %v15223_v18, %v11520_v44  ;;  %v15211_v33 = vld [vmem:[#allocation2 + $0xcfc] sm:$0xf]  ;;  %v11472_v34 = vld [vmem:[#allocation2 + $0xd10] sm:$0xf0]  ;;  %v15205_v44 = vld [vmem:[#allocation2 + $0xccc] sm:$0xf] }
 0x28d   :  { %8375 = vmatpush.bf16.msrb.mxu2 %v10443_v50  ;;  %v10947_v50 = vor.u32 %v15079_v35, %v10944_v51  ;;  %v11091_v35 = vor.u32 %v15115_v17, %v11088_v53  ;;  %v11475_v62 = vor.u32 %v15211_v33, %v11472_v34  ;;  %v15049_v17 = vld [vmem:[#allocation2 + $0x7ec] sm:$0xf]  ;;  %v11016_v33 = vld [vmem:[#allocation2 + $0x980] sm:$0xf0] }
 0x28e   :  { %8388 = vmatpush.bf16.msrb.mxu3 %v10635_v56  ;;  %v15121_v56 = vld [vmem:[#allocation2 + $0xa2c] sm:$0xf] }
 0x28f   :  { %8350 = vmatpush.bf16.msrb.mxu0 %v10035_v23  ;;  %v11496_v23 = vld [vmem:[#allocation2 + $0xd40] sm:$0xf0]  ;;  %v11115_v0 = vor.u32 %v15121_v56, %v11112_v58  ;;  %v15055_v56 = vld [vmem:[#allocation2 + $0x81c] sm:$0xf]  ;;  %v15097_v53 = vld [vmem:[#allocation2 + $0x96c] sm:$0xf] }
 0x290   :  { %8363 = vmatpush.bf16.msrb.mxu1 %v10227_v52  ;;  %v11307_v52 = vor.u32 %v15169_v59, %v11304_v60  ;;  %v11499_v24 = vor.u32 %v15217_v61, %v11496_v23  ;;  %v15103_v58 = vld [vmem:[#allocation2 + $0x99c] sm:$0xf]  ;;  %v11040_v61 = vld [vmem:[#allocation2 + $0x9b0] sm:$0xf0]  ;;  %v15145_v34 = vld [vmem:[#allocation2 + $0xaec] sm:$0xf] }
 0x291   :  { %8376 = vmatpush.bf16.msrb.mxu2 %v10419_v4  ;;  %v15067_v4 = vld [vmem:[#allocation2 + $0x87c] sm:$0xf] }
 0x292   :  { %8389 = vmatpush.bf16.msrb.mxu3 %v10611_v28  ;;  %v15163_v28 = vld [vmem:[#allocation2 + $0xb7c] sm:$0xf]  ;;  %v10899_v63 = vor.u32 %v15067_v4, %v10896_v6 }
 0x293   :  { %8351 = vmatpush.bf16.msrb.mxu0 %v10011_v40  ;;  %v11283_v51 = vor.u32 %v15163_v28, %v11280_v30  ;;  %v10872_v40 = vld [vmem:[#allocation2 + $0x860] sm:$0xf0]  ;;  %v8145_v18 = vpop.f32.mrf.mxu0  ;;  %v15151_v23 = vld [vmem:[#allocation2 + $0xb1c] sm:$0xf] }
 0x294   :  { %8364 = vmatpush.bf16.msrb.mxu1 %v10203_v19  ;;  %v15157_v19 = vld [vmem:[#allocation2 + $0xb4c] sm:$0xf] }
 0x295   :  { %8377 = vmatpush.bf16.msrb.mxu2 %v10395_v42  ;;  %v11256_v42 = vld [vmem:[#allocation2 + $0xb60] sm:$0xf0] }
 0x296   :  { %8390 = vmatpush.bf16.msrb.mxu3 %v10587_v45  ;;  %8352 = vmatmul.bf16.vlgmr.msrb.gmra.mxu0 %v16253_v26  ;;  %v11448_v45 = vld [vmem:[#allocation2 + $0xce0] sm:$0xf0]  ;;  %v11259_v36 = vor.u32 %v15157_v19, %v11256_v42  ;;  %v11019_v42 = vor.u32 %v15097_v53, %v11016_v33  ;;  %v15271_v53 = vld [vmem:[#allocation2 + $0xedc] sm:$0xf] }
 0x297   :  { %8396 = vmatpush.bf16.msra.mxu0 %v10947_v50  ;;  %8365 = vmatmul.bf16.vlgmr.msrb.gmra.mxu1 %v16246_v20  ;;  %v8146_v50 = vadd.f32 %v8145_v18, %v16422_v25  ;;  %v11451_v59 = vor.u32 %v15205_v44, %v11448_v45  ;;  %v11043_v25 = vor.u32 %v15103_v58, %v11040_v61  ;;  %v15043_v44 = vld [vmem:[#allocation2 + $0x7bc] sm:$0xf]  ;;  %v10800_v45 = vld [vmem:[#allocation2 + $0x7d0] sm:$0xf0] }
 0x298   :  { %8409 = vmatpush.bf16.msra.mxu1 %v11139_v54  ;;  %8378 = vmatmul.bf16.vlgmr.msrb.gmra.mxu2 %v16250_v22  ;;  %v10875_v54 = vor.u32 %v15061_v39, %v10872_v40  ;;  %v15193_v39 = vld [vmem:[#allocation2 + $0xc6c] sm:$0xf]  ;;  %v11400_v40 = vld [vmem:[#allocation2 + $0xc80] sm:$0xf0]  ;;  %v10803_v58 = vor.u32 %v15043_v44, %v10800_v45 }
 0x299   :  { %8422 = vmatpush.bf16.msra.mxu2 %v11331_v37  ;;  %8391 = vmatmul.bf16.vlgmr.msrb.gmra.mxu3 %v16260_v31  ;;  %v8158_v37 = vpop.f32.mrf.mxu1  ;;  %v15265_v45 = vld [vmem:[#allocation2 + $0xeac] sm:$0xf] }
 0x29a   :  { %8435 = vmatpush.bf16.msra.mxu3 %v11523_v57  ;;  %v10848_v57 = vld [vmem:[#allocation2 + $0x830] sm:$0xf0]  ;;  %v8159_v60 = vadd.f32 %v8158_v37, %v8146_v50  ;;  %v15091_v50 = vld [vmem:[#allocation2 + $0x93c] sm:$0xf] }
 0x29b   :  { %8397 = vmatpush.bf16.msra.mxu0 %v10923_v43  ;;  %v11232_v43 = vld [vmem:[#allocation2 + $0xb30] sm:$0xf0]  ;;  %v10851_v4 = vor.u32 %v15055_v56, %v10848_v57  ;;  %v8171_v30 = vpop.f32.mrf.mxu2  ;;  %v8147_v41 = vpop.f32.mrf.mxu0  ;;  %v15187_v56 = vld [vmem:[#allocation2 + $0xc3c] sm:$0xf] }
 0x29c   :  { %8410 = vmatpush.bf16.msra.mxu1 %v11115_v0  ;;  %v15199_v0 = vld [vmem:[#allocation2 + $0xc9c] sm:$0xf]  ;;  %v11235_v6 = vor.u32 %v15151_v23, %v11232_v43  ;;  %v10992_v37 = vld [vmem:[#allocation2 + $0x950] sm:$0xf0]  ;;  %v15085_v43 = vld [vmem:[#allocation2 + $0x90c] sm:$0xf] }
 0x29d   :  { %8423 = vmatpush.bf16.msra.mxu2 %v11307_v52  ;;  %v11424_v52 = vld [vmem:[#allocation2 + $0xcb0] sm:$0xf0]  ;;  %v10995_v61 = vor.u32 %v15091_v50, %v10992_v37  ;;  %v15415_v41 = vld [vmem:[#allocation2 + $0x135c] sm:$0xf]  ;;  %v11688_v50 = vld [vmem:[#allocation2 + $0xec0] sm:$0xf0] }
 0x29e   :  { %8436 = vmatpush.bf16.msra.mxu3 %v11499_v24  ;;  %v10824_v24 = vld [vmem:[#allocation2 + $0x800] sm:$0xf0]  ;;  %v11427_v28 = vor.u32 %v15199_v0, %v11424_v52  ;;  %v11376_v57 = vld [vmem:[#allocation2 + $0xc50] sm:$0xf0]  ;;  %v15133_v52 = vld [vmem:[#allocation2 + $0xa8c] sm:$0xf] }
 0x29f   :  { %8398 = vmatpush.bf16.msra.mxu0 %v10899_v63  ;;  %v11208_v63 = vld [vmem:[#allocation2 + $0xb00] sm:$0xf0] }
 0x2a0   :  { %8411 = vmatpush.bf16.msra.mxu1 %v11091_v35  ;;  %v8172_v35 = vadd.f32 %v8171_v30, %v8159_v60  ;;  %v11211_v18 = vor.u32 %v15145_v34, %v11208_v63  ;;  %v10776_v60 = vld [vmem:[#allocation2 + $0x7a0] sm:$0xf0]  ;;  %v15319_v30 = vld [vmem:[#allocation2 + $0x105c] sm:$0xf]  ;;  %v11904_v63 = vld [vmem:[#allocation2 + $0x1070] sm:$0xf0] }
 0x2a1   :  { %8424 = vmatpush.bf16.msra.mxu2 %v11283_v51  ;;  %v8184_v51 = vpop.f32.mrf.mxu3  ;;  %v8160_v1 = vpop.f32.mrf.mxu1  ;;  %v10968_v0 = vld [vmem:[#allocation2 + $0x920] sm:$0xf0] }
 0x2a2   :  { %8437 = vmatpush.bf16.msra.mxu3 %v11475_v62  ;;  %v10827_v62 = vor.u32 %v15049_v17, %v10824_v24  ;;  %v16429_v19 = vadd.f32 %v8184_v51, %v8172_v35  ;;  %v11352_v17 = vld [vmem:[#allocation2 + $0xc20] sm:$0xf0]  ;;  %v15367_v35 = vld [vmem:[#allocation2 + $0x11dc] sm:$0xf]  ;;  %v12096_v51 = vld [vmem:[#allocation2 + $0x11f0] sm:$0xf0] }
 0x2a3   :  { %8399 = vmatpush.bf16.msra.mxu0 %v10875_v54  ;;  %v11403_v54 = vor.u32 %v15193_v39, %v11400_v40  ;;  %v8173_v24 = vpop.f32.mrf.mxu2  ;;  %v10971_v39 = vor.u32 %v15085_v43, %v10968_v0  ;;  %v12099_v44 = vor.u32 %v15367_v35, %v12096_v51  ;;  %v11664_v43 = vld [vmem:[#allocation2 + $0xe90] sm:$0xf0]  ;;  %v15307_v0 = vld [vmem:[#allocation2 + $0xffc] sm:$0xf]  ;;  %v11832_v51 = vld [vmem:[#allocation2 + $0xfe0] sm:$0xf0] }
 0x2a4   :  { %8412 = vmatpush.bf16.msra.mxu1 %v11067_v55  ;;  %v15139_v55 = vld [vmem:[#allocation2 + $0xabc] sm:$0xf]  ;;  %v12240_v24 = vld [vmem:[#allocation2 + $0x1310] sm:$0xf0] }
 0x2a5   :  { %8425 = vmatpush.bf16.msra.mxu2 %v11259_v36  ;;  %v11184_v36 = vld [vmem:[#allocation2 + $0xad0] sm:$0xf0] }
 0x2a6   :  { %8438 = vmatpush.bf16.msra.mxu3 %v11451_v59  ;;  %v15037_v59 = vld [vmem:[#allocation2 + $0x78c] sm:$0xf]  ;;  %v11187_v23 = vor.u32 %v15139_v55, %v11184_v36  ;;  %v11880_v55 = vld [vmem:[#allocation2 + $0x1040] sm:$0xf0] }
 0x2a7   :  { %8400 = vmatpush.bf16.msra.mxu0 %v10851_v4  ;;  %v11379_v4 = vor.u32 %v15187_v56, %v11376_v57  ;;  %v10779_v34 = vor.u32 %v15037_v59, %v10776_v60  ;;  %v15361_v36 = vld [vmem:[#allocation2 + $0x11ac] sm:$0xf]  ;;  %v12072_v56 = vld [vmem:[#allocation2 + $0x11c0] sm:$0xf0]  ;;  %v11691_v59 = vor.u32 %v15265_v45, %v11688_v50 }
 0x2a8   :  { %8413 = vmatpush.bf16.msra.mxu1 %v11043_v25  ;;  %v11160_v25 = vld [vmem:[#allocation2 + $0xaa0] sm:$0xf0]  ;;  %v15409_v57 = vld [vmem:[#allocation2 + $0x132c] sm:$0xf] }
 0x2a9   :  { %8426 = vmatpush.bf16.msra.mxu2 %v11235_v6  ;;  %v15181_v6 = vld [vmem:[#allocation2 + $0xc0c] sm:$0xf]  ;;  %v8186_v33 = vpop.f32.mrf.mxu3  ;;  %v11163_v40 = vor.u32 %v15133_v52, %v11160_v25  ;;  %v15355_v25 = vld [vmem:[#allocation2 + $0x117c] sm:$0xf] }
 0x2aa   :  { %8439 = vmatpush.bf16.msra.mxu3 %v11427_v28  ;;  %v11712_v28 = vld [vmem:[#allocation2 + $0xef0] sm:$0xf0]  ;;  %v11355_v1 = vor.u32 %v15181_v6, %v11352_v17  ;;  %v15403_v17 = vld [vmem:[#allocation2 + $0x12fc] sm:$0xf]  ;;  %v15253_v33 = vld [vmem:[#allocation2 + $0xe4c] sm:$0xf] }
 0x2ab   :  { %8401 = vmatpush.bf16.msra.mxu0 %v10827_v62  ;;  %v12288_v62 = vld [vmem:[#allocation2 + $0x1370] sm:$0xf0]  ;;  %v12243_v35 = vor.u32 %v15403_v17, %v12240_v24  ;;  %v11784_v17 = vld [vmem:[#allocation2 + $0xf80] sm:$0xf0]  ;;  %v15337_v24 = vld [vmem:[#allocation2 + $0x10ec] sm:$0xf] }
 0x2ac   :  { %8414 = vmatpush.bf16.msra.mxu1 %v11019_v42  ;;  %v11715_v42 = vor.u32 %v15271_v53, %v11712_v28  ;;  %v12291_v37 = vor.u32 %v15415_v41, %v12288_v62  ;;  %v12048_v6 = vld [vmem:[#allocation2 + $0x1190] sm:$0xf0]  ;;  %v15397_v62 = vld [vmem:[#allocation2 + $0x12cc] sm:$0xf] }
 0x2ad   :  { %8427 = vmatpush.bf16.msra.mxu2 %v11211_v18  ;;  %v11907_v18 = vor.u32 %v15319_v30, %v11904_v63  ;;  %v12051_v30 = vor.u32 %v15355_v25, %v12048_v6  ;;  %v15301_v63 = vld [vmem:[#allocation2 + $0xfcc] sm:$0xf] }
 0x2ae   :  { %8440 = vmatpush.bf16.msra.mxu3 %v11403_v54  ;;  %v15313_v54 = vld [vmem:[#allocation2 + $0x102c] sm:$0xf]  ;;  %v11835_v45 = vor.u32 %v15301_v63, %v11832_v51 }
 0x2af   :  { %8402 = vmatpush.bf16.msra.mxu0 %v10803_v58  ;;  %v12264_v58 = vld [vmem:[#allocation2 + $0x1340] sm:$0xf0]  ;;  %v11883_v60 = vor.u32 %v15313_v54, %v11880_v55  ;;  %v15247_v54 = vld [vmem:[#allocation2 + $0xe1c] sm:$0xf] }
 0x2b0   :  { %8415 = vmatpush.bf16.msra.mxu1 %v10995_v61  ;;  %v12075_v61 = vor.u32 %v15361_v36, %v12072_v56  ;;  %v12267_v52 = vor.u32 %v15409_v57, %v12264_v58  ;;  %v15295_v55 = vld [vmem:[#allocation2 + $0xf9c] sm:$0xf]  ;;  %v11808_v57 = vld [vmem:[#allocation2 + $0xfb0] sm:$0xf0] }
 0x2b1   :  { %8428 = vmatpush.bf16.msra.mxu2 %v11187_v23  ;;  %v15259_v23 = vld [vmem:[#allocation2 + $0xe7c] sm:$0xf] }
 0x2b2   :  { %8441 = vmatpush.bf16.msra.mxu3 %v11379_v4  ;;  %v11856_v4 = vld [vmem:[#allocation2 + $0x1010] sm:$0xf0]  ;;  %v11667_v53 = vor.u32 %v15259_v23, %v11664_v43  ;;  %v15343_v58 = vld [vmem:[#allocation2 + $0x111c] sm:$0xf] }
 0x2b3   :  { %8403 = vmatpush.bf16.msra.mxu0 %v10779_v34  ;;  %v11859_v28 = vor.u32 %v15307_v0, %v11856_v4  ;;  %v11640_v34 = vld [vmem:[#allocation2 + $0xe60] sm:$0xf0]  ;;  %v8197_v41 = vpop.f32.mrf.mxu0  ;;  %v15241_v0 = vld [vmem:[#allocation2 + $0xdec] sm:$0xf] }
 0x2b4   :  { %8416 = vmatpush.bf16.msra.mxu1 %v10971_v39  ;;  %v15349_v39 = vld [vmem:[#allocation2 + $0x114c] sm:$0xf] }
 0x2b5   :  { %8429 = vmatpush.bf16.msra.mxu2 %v11163_v40  ;;  %v12024_v40 = vld [vmem:[#allocation2 + $0x1160] sm:$0xf0]  ;;  %v15289_v4 = vld [vmem:[#allocation2 + $0xf6c] sm:$0xf] }
 0x2b6   :  { %8442 = vmatpush.bf16.msra.mxu3 %v11355_v1  ;;  %8404 = vmatmul.bf16.vlgmr.msra.gmra.mxu0 %v16264_v38  ;;  %v12216_v1 = vld [vmem:[#allocation2 + $0x12e0] sm:$0xf0]  ;;  %v12027_v50 = vor.u32 %v15349_v39, %v12024_v40  ;;  %v11787_v40 = vor.u32 %v15289_v4, %v11784_v17  ;;  %v15463_v4 = vld [vmem:[#allocation2 + $0x14dc] sm:$0xf] }
 0x2b7   :  { %8448 = vmatpush.bf16.msrb.mxu0 %v11715_v42  ;;  %8417 = vmatmul.bf16.vlgmr.msra.gmra.mxu1 %v16258_v29  ;;  %v8198_v42 = vadd.f32 %v8197_v41, %v16429_v19  ;;  %v12219_v36 = vor.u32 %v15397_v62, %v12216_v1  ;;  %v11811_v19 = vor.u32 %v15295_v55, %v11808_v57  ;;  %v15235_v62 = vld [vmem:[#allocation2 + $0xdbc] sm:$0xf]  ;;  %v11568_v1 = vld [vmem:[#allocation2 + $0xdd0] sm:$0xf0] }
 0x2b8   :  { %8461 = vmatpush.bf16.msrb.mxu1 %v11907_v18  ;;  %8430 = vmatmul.bf16.vlgmr.msra.gmra.mxu2 %v16262_v32  ;;  %v11643_v18 = vor.u32 %v15253_v33, %v11640_v34  ;;  %v15385_v33 = vld [vmem:[#allocation2 + $0x126c] sm:$0xf]  ;;  %v12168_v34 = vld [vmem:[#allocation2 + $0x1280] sm:$0xf0]  ;;  %v11571_v55 = vor.u32 %v15235_v62, %v11568_v1 }
 0x2b9   :  { %8474 = vmatpush.bf16.msrb.mxu2 %v12099_v44  ;;  %8443 = vmatmul.bf16.vlgmr.msra.gmra.mxu3 %v16273_v8  ;;  %v8210_v44 = vpop.f32.mrf.mxu1  ;;  %v15457_v1 = vld [vmem:[#allocation2 + $0x14ac] sm:$0xf] }
 0x2ba   :  { %8487 = vmatpush.bf16.msrb.mxu3 %v12291_v37  ;;  %v11616_v37 = vld [vmem:[#allocation2 + $0xe30] sm:$0xf0]  ;;  %v8211_v56 = vadd.f32 %v8210_v44, %v8198_v42  ;;  %v15283_v42 = vld [vmem:[#allocation2 + $0xf3c] sm:$0xf] }
 0x2bb   :  { %8449 = vmatpush.bf16.msrb.mxu0 %v11691_v59  ;;  %v12000_v59 = vld [vmem:[#allocation2 + $0x1130] sm:$0xf0]  ;;  %v11619_v23 = vor.u32 %v15247_v54, %v11616_v37  ;;  %v8223_v6 = vpop.f32.mrf.mxu2  ;;  %v8199_v63 = vpop.f32.mrf.mxu0  ;;  %v15379_v54 = vld [vmem:[#allocation2 + $0x123c] sm:$0xf] }
 0x2bc   :  { %8462 = vmatpush.bf16.msrb.mxu1 %v11883_v60  ;;  %v15391_v60 = vld [vmem:[#allocation2 + $0x129c] sm:$0xf]  ;;  %v12003_v43 = vor.u32 %v15343_v58, %v12000_v59  ;;  %v11760_v44 = vld [vmem:[#allocation2 + $0xf50] sm:$0xf0]  ;;  %v15277_v59 = vld [vmem:[#allocation2 + $0xf0c] sm:$0xf] }
 0x2bd   :  { %8475 = vmatpush.bf16.msrb.mxu2 %v12075_v61  ;;  %v12192_v61 = vld [vmem:[#allocation2 + $0x12b0] sm:$0xf0]  ;;  %v11763_v57 = vor.u32 %v15283_v42, %v11760_v44  ;;  %v15607_v63 = vld [vmem:[#allocation2 + $0x195c] sm:$0xf]  ;;  %v12456_v42 = vld [vmem:[#allocation2 + $0x14c0] sm:$0xf0] }
 0x2be   :  { %8488 = vmatpush.bf16.msrb.mxu3 %v12267_v52  ;;  %v11592_v52 = vld [vmem:[#allocation2 + $0xe00] sm:$0xf0]  ;;  %v12195_v25 = vor.u32 %v15391_v60, %v12192_v61  ;;  %v12144_v37 = vld [vmem:[#allocation2 + $0x1250] sm:$0xf0]  ;;  %v15325_v61 = vld [vmem:[#allocation2 + $0x108c] sm:$0xf] }
 0x2bf   :  { %8450 = vmatpush.bf16.msrb.mxu0 %v11667_v53  ;;  %v11976_v53 = vld [vmem:[#allocation2 + $0x1100] sm:$0xf0] }
 0x2c0   :  { %8463 = vmatpush.bf16.msrb.mxu1 %v11859_v28  ;;  %v8224_v28 = vadd.f32 %v8223_v6, %v8211_v56  ;;  %v11979_v41 = vor.u32 %v15337_v24, %v11976_v53  ;;  %v11544_v56 = vld [vmem:[#allocation2 + $0xda0] sm:$0xf0]  ;;  %v15511_v6 = vld [vmem:[#allocation2 + $0x165c] sm:$0xf]  ;;  %v12672_v53 = vld [vmem:[#allocation2 + $0x1670] sm:$0xf0] }
 0x2c1   :  { %8476 = vmatpush.bf16.msrb.mxu2 %v12051_v30  ;;  %v8236_v30 = vpop.f32.mrf.mxu3  ;;  %v8212_v51 = vpop.f32.mrf.mxu1  ;;  %v11736_v60 = vld [vmem:[#allocation2 + $0xf20] sm:$0xf0] }
 0x2c2   :  { %8489 = vmatpush.bf16.msrb.mxu3 %v12243_v35  ;;  %v11595_v35 = vor.u32 %v15241_v0, %v11592_v52  ;;  %v16436_v39 = vadd.f32 %v8236_v30, %v8224_v28  ;;  %v12120_v0 = vld [vmem:[#allocation2 + $0x1220] sm:$0xf0]  ;;  %v15559_v28 = vld [vmem:[#allocation2 + $0x17dc] sm:$0xf]  ;;  %v12864_v30 = vld [vmem:[#allocation2 + $0x17f0] sm:$0xf0] }
 0x2c3   :  { %8451 = vmatpush.bf16.msrb.mxu0 %v11643_v18  ;;  %v12171_v18 = vor.u32 %v15385_v33, %v12168_v34  ;;  %v8225_v52 = vpop.f32.mrf.mxu2  ;;  %v11739_v33 = vor.u32 %v15277_v59, %v11736_v60  ;;  %v12867_v62 = vor.u32 %v15559_v28, %v12864_v30  ;;  %v12432_v59 = vld [vmem:[#allocation2 + $0x1490] sm:$0xf0]  ;;  %v15499_v60 = vld [vmem:[#allocation2 + $0x15fc] sm:$0xf]  ;;  %v12600_v30 = vld [vmem:[#allocation2 + $0x15e0] sm:$0xf0] }
 0x2c4   :  { %8464 = vmatpush.bf16.msrb.mxu1 %v11835_v45  ;;  %v15331_v45 = vld [vmem:[#allocation2 + $0x10bc] sm:$0xf]  ;;  %v13008_v52 = vld [vmem:[#allocation2 + $0x1910] sm:$0xf0] }
 0x2c5   :  { %8477 = vmatpush.bf16.msrb.mxu2 %v12027_v50  ;;  %v11952_v50 = vld [vmem:[#allocation2 + $0x10d0] sm:$0xf0] }
 0x2c6   :  { %8490 = vmatpush.bf16.msrb.mxu3 %v12219_v36  ;;  %v15229_v36 = vld [vmem:[#allocation2 + $0xd8c] sm:$0xf]  ;;  %v11955_v58 = vor.u32 %v15331_v45, %v11952_v50  ;;  %v12648_v45 = vld [vmem:[#allocation2 + $0x1640] sm:$0xf0] }
 0x2c7   :  { %8452 = vmatpush.bf16.msrb.mxu0 %v11619_v23  ;;  %v12147_v23 = vor.u32 %v15379_v54, %v12144_v37  ;;  %v11547_v24 = vor.u32 %v15229_v36, %v11544_v56  ;;  %v15553_v50 = vld [vmem:[#allocation2 + $0x17ac] sm:$0xf]  ;;  %v12840_v54 = vld [vmem:[#allocation2 + $0x17c0] sm:$0xf0]  ;;  %v12459_v36 = vor.u32 %v15457_v1, %v12456_v42 }
 0x2c8   :  { %8465 = vmatpush.bf16.msrb.mxu1 %v11811_v19  ;;  %v11928_v19 = vld [vmem:[#allocation2 + $0x10a0] sm:$0xf0]  ;;  %v15601_v37 = vld [vmem:[#allocation2 + $0x192c] sm:$0xf] }
 0x2c9   :  { %8478 = vmatpush.bf16.msrb.mxu2 %v12003_v43  ;;  %v15373_v43 = vld [vmem:[#allocation2 + $0x120c] sm:$0xf]  ;;  %v8238_v17 = vpop.f32.mrf.mxu3  ;;  %v11931_v34 = vor.u32 %v15325_v61, %v11928_v19  ;;  %v15547_v19 = vld [vmem:[#allocation2 + $0x177c] sm:$0xf] }
 0x2ca   :  { %8491 = vmatpush.bf16.msrb.mxu3 %v12195_v25  ;;  %v12480_v25 = vld [vmem:[#allocation2 + $0x14f0] sm:$0xf0]  ;;  %v12123_v51 = vor.u32 %v15373_v43, %v12120_v0  ;;  %v15595_v0 = vld [vmem:[#allocation2 + $0x18fc] sm:$0xf]  ;;  %v15445_v17 = vld [vmem:[#allocation2 + $0x144c] sm:$0xf] }
 0x2cb   :  { %8453 = vmatpush.bf16.msrb.mxu0 %v11595_v35  ;;  %v13056_v35 = vld [vmem:[#allocation2 + $0x1970] sm:$0xf0]  ;;  %v13011_v28 = vor.u32 %v15595_v0, %v13008_v52  ;;  %v12552_v0 = vld [vmem:[#allocation2 + $0x1580] sm:$0xf0]  ;;  %v15529_v52 = vld [vmem:[#allocation2 + $0x16ec] sm:$0xf] }
 0x2cc   :  { %8466 = vmatpush.bf16.msrb.mxu1 %v11787_v40  ;;  %v12483_v40 = vor.u32 %v15463_v4, %v12480_v25  ;;  %v13059_v44 = vor.u32 %v15607_v63, %v13056_v35  ;;  %v12816_v43 = vld [vmem:[#allocation2 + $0x1790] sm:$0xf0]  ;;  %v15589_v35 = vld [vmem:[#allocation2 + $0x18cc] sm:$0xf] }
 0x2cd   :  { %8479 = vmatpush.bf16.msrb.mxu2 %v11979_v41  ;;  %v12675_v41 = vor.u32 %v15511_v6, %v12672_v53  ;;  %v12819_v6 = vor.u32 %v15547_v19, %v12816_v43  ;;  %v15493_v53 = vld [vmem:[#allocation2 + $0x15cc] sm:$0xf] }
 0x2ce   :  { %8492 = vmatpush.bf16.msrb.mxu3 %v12171_v18  ;;  %v15505_v18 = vld [vmem:[#allocation2 + $0x162c] sm:$0xf]  ;;  %v12603_v1 = vor.u32 %v15493_v53, %v12600_v30 }
 0x2cf   :  { %8454 = vmatpush.bf16.msrb.mxu0 %v11571_v55  ;;  %v13032_v55 = vld [vmem:[#allocation2 + $0x1940] sm:$0xf0]  ;;  %v12651_v56 = vor.u32 %v15505_v18, %v12648_v45  ;;  %v15439_v18 = vld [vmem:[#allocation2 + $0x141c] sm:$0xf] }
 0x2d0   :  { %8467 = vmatpush.bf16.msrb.mxu1 %v11763_v57  ;;  %v12843_v57 = vor.u32 %v15553_v50, %v12840_v54  ;;  %v13035_v61 = vor.u32 %v15601_v37, %v13032_v55  ;;  %v15487_v45 = vld [vmem:[#allocation2 + $0x159c] sm:$0xf]  ;;  %v12576_v37 = vld [vmem:[#allocation2 + $0x15b0] sm:$0xf0] }
 0x2d1   :  { %8480 = vmatpush.bf16.msrb.mxu2 %v11955_v58  ;;  %v15451_v58 = vld [vmem:[#allocation2 + $0x147c] sm:$0xf] }
 0x2d2   :  { %8493 = vmatpush.bf16.msrb.mxu3 %v12147_v23  ;;  %v12624_v23 = vld [vmem:[#allocation2 + $0x1610] sm:$0xf0]  ;;  %v12435_v4 = vor.u32 %v15451_v58, %v12432_v59  ;;  %v15535_v55 = vld [vmem:[#allocation2 + $0x171c] sm:$0xf] }
 0x2d3   :  { %8455 = vmatpush.bf16.msrb.mxu0 %v11547_v24  ;;  %v12627_v25 = vor.u32 %v15499_v60, %v12624_v23  ;;  %v12408_v24 = vld [vmem:[#allocation2 + $0x1460] sm:$0xf0]  ;;  %v8249_v63 = vpop.f32.mrf.mxu0  ;;  %v15433_v60 = vld [vmem:[#allocation2 + $0x13ec] sm:$0xf] }
 0x2d4   :  { %8468 = vmatpush.bf16.msrb.mxu1 %v11739_v33  ;;  %v15541_v33 = vld [vmem:[#allocation2 + $0x174c] sm:$0xf] }
 0x2d5   :  { %8481 = vmatpush.bf16.msrb.mxu2 %v11931_v34  ;;  %v12792_v34 = vld [vmem:[#allocation2 + $0x1760] sm:$0xf0]  ;;  %v15481_v23 = vld [vmem:[#allocation2 + $0x156c] sm:$0xf] }
 0x2d6   :  { %8494 = vmatpush.bf16.msrb.mxu3 %v12123_v51  ;;  %8456 = vmatmul.bf16.vlgmr.msrb.gmra.mxu0 %v16277_v12  ;;  %v12984_v51 = vld [vmem:[#allocation2 + $0x18e0] sm:$0xf0]  ;;  %v12795_v42 = vor.u32 %v15541_v33, %v12792_v34  ;;  %v12555_v34 = vor.u32 %v15481_v23, %v12552_v0  ;;  %v15655_v23 = vld [vmem:[#allocation2 + $0x1adc] sm:$0xf] }
 0x2d7   :  { %8500 = vmatpush.bf16.msra.mxu0 %v12483_v40  ;;  %8469 = vmatmul.bf16.vlgmr.msrb.gmra.mxu1 %v16275_v11  ;;  %v8250_v40 = vadd.f32 %v8249_v63, %v16436_v39  ;;  %v12987_v50 = vor.u32 %v15589_v35, %v12984_v51  ;;  %v12579_v39 = vor.u32 %v15487_v45, %v12576_v37  ;;  %v15427_v35 = vld [vmem:[#allocation2 + $0x13bc] sm:$0xf]  ;;  %v12336_v51 = vld [vmem:[#allocation2 + $0x13d0] sm:$0xf0] }
 0x2d8   :  { %8513 = vmatpush.bf16.msra.mxu1 %v12675_v41  ;;  %8482 = vmatmul.bf16.vlgmr.msrb.gmra.mxu2 %v16279_v15  ;;  %v12411_v41 = vor.u32 %v15445_v17, %v12408_v24  ;;  %v15577_v17 = vld [vmem:[#allocation2 + $0x186c] sm:$0xf]  ;;  %v12936_v24 = vld [vmem:[#allocation2 + $0x1880] sm:$0xf0]  ;;  %v12339_v45 = vor.u32 %v15427_v35, %v12336_v51 }
 0x2d9   :  { %8526 = vmatpush.bf16.msra.mxu2 %v12867_v62  ;;  %8495 = vmatmul.bf16.vlgmr.msrb.gmra.mxu3 %v16285_v46  ;;  %v8262_v62 = vpop.f32.mrf.mxu1  ;;  %v15649_v51 = vld [vmem:[#allocation2 + $0x1aac] sm:$0xf] }
 0x2da   :  { %8539 = vmatpush.bf16.msra.mxu3 %v13059_v44  ;;  %v12384_v44 = vld [vmem:[#allocation2 + $0x1430] sm:$0xf0]  ;;  %v8263_v54 = vadd.f32 %v8262_v62, %v8250_v40  ;;  %v15475_v40 = vld [vmem:[#allocation2 + $0x153c] sm:$0xf] }
 0x2db   :  { %8501 = vmatpush.bf16.msra.mxu0 %v12459_v36  ;;  %v12768_v36 = vld [vmem:[#allocation2 + $0x1730] sm:$0xf0]  ;;  %v12387_v58 = vor.u32 %v15439_v18, %v12384_v44  ;;  %v8275_v43 = vpop.f32.mrf.mxu2  ;;  %v8251_v53 = vpop.f32.mrf.mxu0  ;;  %v15571_v18 = vld [vmem:[#allocation2 + $0x183c] sm:$0xf] }
 0x2dc   :  { %8514 = vmatpush.bf16.msra.mxu1 %v12651_v56  ;;  %v15583_v56 = vld [vmem:[#allocation2 + $0x189c] sm:$0xf]  ;;  %v12771_v59 = vor.u32 %v15535_v55, %v12768_v36  ;;  %v12528_v62 = vld [vmem:[#allocation2 + $0x1550] sm:$0xf0]  ;;  %v15469_v36 = vld [vmem:[#allocation2 + $0x150c] sm:$0xf] }
 0x2dd   :  { %8527 = vmatpush.bf16.msra.mxu2 %v12843_v57  ;;  %v12960_v57 = vld [vmem:[#allocation2 + $0x18b0] sm:$0xf0]  ;;  %v12531_v37 = vor.u32 %v15475_v40, %v12528_v62  ;;  %v15799_v53 = vld [vmem:[#allocation2 + $0x1f5c] sm:$0xf]  ;;  %v13224_v40 = vld [vmem:[#allocation2 + $0x1ac0] sm:$0xf0] }
 0x2de   :  { %8540 = vmatpush.bf16.msra.mxu3 %v13035_v61  ;;  %v12360_v61 = vld [vmem:[#allocation2 + $0x1400] sm:$0xf0]  ;;  %v12963_v19 = vor.u32 %v15583_v56, %v12960_v57  ;;  %v12912_v44 = vld [vmem:[#allocation2 + $0x1850] sm:$0xf0]  ;;  %v15517_v57 = vld [vmem:[#allocation2 + $0x168c] sm:$0xf] }
 0x2df   :  { %8502 = vmatpush.bf16.msra.mxu0 %v12435_v4  ;;  %v12744_v4 = vld [vmem:[#allocation2 + $0x1700] sm:$0xf0] }
 0x2e0   :  { %8515 = vmatpush.bf16.msra.mxu1 %v12627_v25  ;;  %v8276_v25 = vadd.f32 %v8275_v43, %v8263_v54  ;;  %v12747_v63 = vor.u32 %v15529_v52, %v12744_v4  ;;  %v12312_v54 = vld [vmem:[#allocation2 + $0x13a0] sm:$0xf0]  ;;  %v15703_v43 = vld [vmem:[#allocation2 + $0x1c5c] sm:$0xf]  ;;  %v13440_v4 = vld [vmem:[#allocation2 + $0x1c70] sm:$0xf0] }
 0x2e1   :  { %8528 = vmatpush.bf16.msra.mxu2 %v12819_v6  ;;  %v8288_v6 = vpop.f32.mrf.mxu3  ;;  %v8264_v30 = vpop.f32.mrf.mxu1  ;;  %v12504_v56 = vld [vmem:[#allocation2 + $0x1520] sm:$0xf0] }
 0x2e2   :  { %8541 = vmatpush.bf16.msra.mxu3 %v13011_v28  ;;  %v12363_v28 = vor.u32 %v15433_v60, %v12360_v61  ;;  %v16443_v33 = vadd.f32 %v8288_v6, %v8276_v25  ;;  %v12888_v60 = vld [vmem:[#allocation2 + $0x1820] sm:$0xf0]  ;;  %v15751_v25 = vld [vmem:[#allocation2 + $0x1ddc] sm:$0xf]  ;;  %v13632_v6 = vld [vmem:[#allocation2 + $0x1df0] sm:$0xf0] }
 0x2e3   :  { %8503 = vmatpush.bf16.msra.mxu0 %v12411_v41  ;;  %v12939_v41 = vor.u32 %v15577_v17, %v12936_v24  ;;  %v8277_v61 = vpop.f32.mrf.mxu2  ;;  %v12507_v17 = vor.u32 %v15469_v36, %v12504_v56  ;;  %v13635_v35 = vor.u32 %v15751_v25, %v13632_v6  ;;  %v13200_v36 = vld [vmem:[#allocation2 + $0x1a90] sm:$0xf0]  ;;  %v15691_v56 = vld [vmem:[#allocation2 + $0x1bfc] sm:$0xf]  ;;  %v13368_v6 = vld [vmem:[#allocation2 + $0x1be0] sm:$0xf0] }
 0x2e4   :  { %8516 = vmatpush.bf16.msra.mxu1 %v12603_v1  ;;  %v15523_v1 = vld [vmem:[#allocation2 + $0x16bc] sm:$0xf]  ;;  %v13776_v61 = vld [vmem:[#allocation2 + $0x1f10] sm:$0xf0] }
 0x2e5   :  { %8529 = vmatpush.bf16.msra.mxu2 %v12795_v42  ;;  %v12720_v42 = vld [vmem:[#allocation2 + $0x16d0] sm:$0xf0] }
 0x2e6   :  { %8542 = vmatpush.bf16.msra.mxu3 %v12987_v50  ;;  %v15421_v50 = vld [vmem:[#allocation2 + $0x138c] sm:$0xf]  ;;  %v12723_v55 = vor.u32 %v15523_v1, %v12720_v42  ;;  %v13416_v1 = vld [vmem:[#allocation2 + $0x1c40] sm:$0xf0] }
 0x2e7   :  { %8504 = vmatpush.bf16.msra.mxu0 %v12387_v58  ;;  %v12915_v58 = vor.u32 %v15571_v18, %v12912_v44  ;;  %v12315_v52 = vor.u32 %v15421_v50, %v12312_v54  ;;  %v15745_v42 = vld [vmem:[#allocation2 + $0x1dac] sm:$0xf]  ;;  %v13608_v18 = vld [vmem:[#allocation2 + $0x1dc0] sm:$0xf0]  ;;  %v13227_v50 = vor.u32 %v15649_v51, %v13224_v40 }
 0x2e8   :  { %8517 = vmatpush.bf16.msra.mxu1 %v12579_v39  ;;  %v12696_v39 = vld [vmem:[#allocation2 + $0x16a0] sm:$0xf0]  ;;  %v15793_v44 = vld [vmem:[#allocation2 + $0x1f2c] sm:$0xf] }
 0x2e9   :  { %8530 = vmatpush.bf16.msra.mxu2 %v12771_v59  ;;  %v15565_v59 = vld [vmem:[#allocation2 + $0x180c] sm:$0xf]  ;;  %v8290_v0 = vpop.f32.mrf.mxu3  ;;  %v12699_v24 = vor.u32 %v15517_v57, %v12696_v39  ;;  %v15739_v39 = vld [vmem:[#allocation2 + $0x1d7c] sm:$0xf] }
 0x2ea   :  { %8543 = vmatpush.bf16.msra.mxu3 %v12963_v19  ;;  %v13248_v19 = vld [vmem:[#allocation2 + $0x1af0] sm:$0xf0]  ;;  %v12891_v30 = vor.u32 %v15565_v59, %v12888_v60  ;;  %v15787_v60 = vld [vmem:[#allocation2 + $0x1efc] sm:$0xf]  ;;  %v15637_v0 = vld [vmem:[#allocation2 + $0x1a4c] sm:$0xf] }
 0x2eb   :  { %8505 = vmatpush.bf16.msra.mxu0 %v12363_v28  ;;  %v13824_v28 = vld [vmem:[#allocation2 + $0x1f70] sm:$0xf0]  ;;  %v13779_v25 = vor.u32 %v15787_v60, %v13776_v61  ;;  %v13320_v60 = vld [vmem:[#allocation2 + $0x1b80] sm:$0xf0]  ;;  %v15721_v61 = vld [vmem:[#allocation2 + $0x1cec] sm:$0xf] }
 0x2ec   :  { %8518 = vmatpush.bf16.msra.mxu1 %v12555_v34  ;;  %v13251_v34 = vor.u32 %v15655_v23, %v13248_v19  ;;  %v13827_v62 = vor.u32 %v15799_v53, %v13824_v28  ;;  %v13584_v59 = vld [vmem:[#allocation2 + $0x1d90] sm:$0xf0]  ;;  %v15781_v28 = vld [vmem:[#allocation2 + $0x1ecc] sm:$0xf] }
 0x2ed   :  { %8531 = vmatpush.bf16.msra.mxu2 %v12747_v63  ;;  %v13443_v63 = vor.u32 %v15703_v43, %v13440_v4  ;;  %v13587_v43 = vor.u32 %v15739_v39, %v13584_v59  ;;  %v15685_v4 = vld [vmem:[#allocation2 + $0x1bcc] sm:$0xf] }
 0x2ee   :  { %8544 = vmatpush.bf16.msra.mxu3 %v12939_v41  ;;  %v15697_v41 = vld [vmem:[#allocation2 + $0x1c2c] sm:$0xf]  ;;  %v13371_v51 = vor.u32 %v15685_v4, %v13368_v6 }
 0x2ef   :  { %8506 = vmatpush.bf16.msra.mxu0 %v12339_v45  ;;  %v13800_v45 = vld [vmem:[#allocation2 + $0x1f40] sm:$0xf0]  ;;  %v13419_v54 = vor.u32 %v15697_v41, %v13416_v1  ;;  %v15631_v41 = vld [vmem:[#allocation2 + $0x1a1c] sm:$0xf] }
 0x2f0   :  { %8519 = vmatpush.bf16.msra.mxu1 %v12531_v37  ;;  %v13611_v37 = vor.u32 %v15745_v42, %v13608_v18  ;;  %v13803_v57 = vor.u32 %v15793_v44, %v13800_v45  ;;  %v15679_v1 = vld [vmem:[#allocation2 + $0x1b9c] sm:$0xf]  ;;  %v13344_v44 = vld [vmem:[#allocation2 + $0x1bb0] sm:$0xf0] }
 0x2f1   :  { %8532 = vmatpush.bf16.msra.mxu2 %v12723_v55  ;;  %v15643_v55 = vld [vmem:[#allocation2 + $0x1a7c] sm:$0xf] }
 0x2f2   :  { %8545 = vmatpush.bf16.msra.mxu3 %v12915_v58  ;;  %v13392_v58 = vld [vmem:[#allocation2 + $0x1c10] sm:$0xf0]  ;;  %v13203_v23 = vor.u32 %v15643_v55, %v13200_v36  ;;  %v15727_v45 = vld [vmem:[#allocation2 + $0x1d1c] sm:$0xf] }
 0x2f3   :  { %8507 = vmatpush.bf16.msra.mxu0 %v12315_v52  ;;  %v13395_v19 = vor.u32 %v15691_v56, %v13392_v58  ;;  %v13176_v52 = vld [vmem:[#allocation2 + $0x1a60] sm:$0xf0]  ;;  %v8301_v53 = vpop.f32.mrf.mxu0  ;;  %v15625_v56 = vld [vmem:[#allocation2 + $0x19ec] sm:$0xf] }
 0x2f4   :  { %8520 = vmatpush.bf16.msra.mxu1 %v12507_v17  ;;  %v15733_v17 = vld [vmem:[#allocation2 + $0x1d4c] sm:$0xf] }
 0x2f5   :  { %8533 = vmatpush.bf16.msra.mxu2 %v12699_v24  ;;  %v13560_v24 = vld [vmem:[#allocation2 + $0x1d60] sm:$0xf0]  ;;  %v15673_v58 = vld [vmem:[#allocation2 + $0x1b6c] sm:$0xf] }
 0x2f6   :  { %8546 = vmatpush.bf16.msra.mxu3 %v12891_v30  ;;  %8508 = vmatmul.bf16.vlgmr.msra.gmra.mxu0 %v16289_v48  ;;  %v13752_v30 = vld [vmem:[#allocation2 + $0x1ee0] sm:$0xf0]  ;;  %v13563_v40 = vor.u32 %v15733_v17, %v13560_v24  ;;  %v13323_v17 = vor.u32 %v15673_v58, %v13320_v60  ;;  %v14016_v58 = vld [vmem:[#allocation2 + $0x20f0] sm:$0xf0] }
 0x2f7   :  { %8552 = vmatpush.bf16.msrb.mxu0 %v13251_v34  ;;  %8521 = vmatmul.bf16.vlgmr.msra.gmra.mxu1 %v16287_v47  ;;  %v8302_v34 = vadd.f32 %v8301_v53, %v16443_v33  ;;  %v13755_v42 = vor.u32 %v15781_v28, %v13752_v30  ;;  %v13347_v33 = vor.u32 %v15679_v1, %v13344_v44  ;;  %v15619_v53 = vld [vmem:[#allocation2 + $0x19bc] sm:$0xf]  ;;  %v13104_v28 = vld [vmem:[#allocation2 + $0x19d0] sm:$0xf0]  ;;  %v15613_v1 = vld [vmem:[#allocation2 + $0x198c] sm:$0xf] }
 0x2f8   :  { %8565 = vmatpush.bf16.msrb.mxu1 %v13443_v63  ;;  %8534 = vmatmul.bf16.vlgmr.msra.gmra.mxu2 %v16291_v49  ;;  %v13179_v63 = vor.u32 %v15637_v0, %v13176_v52  ;;  %v13704_v0 = vld [vmem:[#allocation2 + $0x1e80] sm:$0xf0]  ;;  %v15667_v30 = vld [vmem:[#allocation2 + $0x1b3c] sm:$0xf]  ;;  %v14208_v60 = vld [vmem:[#allocation2 + $0x2270] sm:$0xf0] }
 0x2f9   :  { %8578 = vmatpush.bf16.msrb.mxu2 %v13635_v35  ;;  %8547 = vmatmul.bf16.vlgmr.msra.gmra.mxu3 %v16300_v5  ;;  %v8314_v35 = vpop.f32.mrf.mxu1 }
 0x2fa   :  { %8591 = vmatpush.bf16.msrb.mxu3 %v13827_v62  ;;  %v13152_v62 = vld [vmem:[#allocation2 + $0x1a30] sm:$0xf0]  ;;  %v8315_v18 = vadd.f32 %v8314_v35, %v8302_v34  ;;  %v15715_v35 = vld [vmem:[#allocation2 + $0x1cbc] sm:$0xf] }
 0x2fb   :  { %8553 = vmatpush.bf16.msrb.mxu0 %v13227_v50  ;;  %v13536_v50 = vld [vmem:[#allocation2 + $0x1d30] sm:$0xf0]  ;;  %v13155_v55 = vor.u32 %v15631_v41, %v13152_v62  ;;  %v8327_v59 = vpop.f32.mrf.mxu2  ;;  %v8303_v52 = vpop.f32.mrf.mxu0  ;;  %v13107_v62 = vor.u32 %v15619_v53, %v13104_v28 }
 0x2fc   :  { %8566 = vmatpush.bf16.msrb.mxu1 %v13419_v54  ;;  %v15775_v54 = vld [vmem:[#allocation2 + $0x1e9c] sm:$0xf]  ;;  %v13539_v36 = vor.u32 %v15727_v45, %v13536_v50  ;;  %v16452_v6 = vpop.f32.mrf.mxu3  ;;  %v13680_v41 = vld [vmem:[#allocation2 + $0x1e50] sm:$0xf0]  ;;  %v15661_v45 = vld [vmem:[#allocation2 + $0x1b0c] sm:$0xf] }
 0x2fd   :  { %8579 = vmatpush.bf16.msrb.mxu2 %v13611_v37  ;;  %v13728_v37 = vld [vmem:[#allocation2 + $0x1eb0] sm:$0xf0]  ;;  %v13272_v50 = vld [vmem:[#allocation2 + $0x1b20] sm:$0xf0] }
 0x2fe   :  { %8592 = vmatpush.bf16.msrb.mxu3 %v13803_v57  ;;  %v13128_v57 = vld [vmem:[#allocation2 + $0x1a00] sm:$0xf0]  ;;  %v13731_v39 = vor.u32 %v15775_v54, %v13728_v37  ;;  %v15709_v54 = vld [vmem:[#allocation2 + $0x1c8c] sm:$0xf] }
 0x2ff   :  { %8554 = vmatpush.bf16.msrb.mxu0 %v13203_v23  ;;  %v13512_v23 = vld [vmem:[#allocation2 + $0x1d00] sm:$0xf0]  ;;  %v13131_v4 = vor.u32 %v15625_v56, %v13128_v57  ;;  %v15847_v57 = vld [vmem:[#allocation2 + $0x20dc] sm:$0xf] }
 0x300   :  { %8567 = vmatpush.bf16.msrb.mxu1 %v13395_v19  ;;  %v16450_v19 = vadd.f32 %v8327_v59, %v8315_v18  ;;  %v13515_v24 = vor.u32 %v15721_v61, %v13512_v23  ;;  %v15943_v61 = vld [vmem:[#allocation2 + $0x23dc] sm:$0xf]  ;;  %v14400_v23 = vld [vmem:[#allocation2 + $0x23f0] sm:$0xf0] }
 0x301   :  { %8580 = vmatpush.bf16.msrb.mxu2 %v13587_v43  ;;  %v15769_v43 = vld [vmem:[#allocation2 + $0x1e6c] sm:$0xf]  ;;  %v14403_v28 = vor.u32 %v15943_v61, %v14400_v23 }
 0x302   :  { %8593 = vmatpush.bf16.msrb.mxu3 %v13779_v25  ;;  %v8316_v25 = vpop.f32.mrf.mxu1  ;;  %v13707_v34 = vor.u32 %v15769_v43, %v13704_v0  ;;  %v13275_v0 = vor.u32 %v15661_v45, %v13272_v50  ;;  %v13968_v50 = vld [vmem:[#allocation2 + $0x2090] sm:$0xf0]  ;;  %v15829_v23 = vld [vmem:[#allocation2 + $0x204c] sm:$0xf] }
 0x303   :  { %8555 = vmatpush.bf16.msrb.mxu0 %v13179_v63  ;;  %v13296_v63 = vld [vmem:[#allocation2 + $0x1b50] sm:$0xf0]  ;;  %v8329_v56 = vpop.f32.mrf.mxu2 }
 0x304   :  { %8568 = vmatpush.bf16.msrb.mxu1 %v13371_v51  ;;  %v13488_v51 = vld [vmem:[#allocation2 + $0x1cd0] sm:$0xf0]  ;;  %v13299_v18 = vor.u32 %v15667_v30, %v13296_v63  ;;  %v8342_v43 = vpop.f32.mrf.mxu3  ;;  %v15841_v30 = vld [vmem:[#allocation2 + $0x20ac] sm:$0xf]  ;;  %v15931_v56 = vld [vmem:[#allocation2 + $0x237c] sm:$0xf] }
 0x305   :  { %8581 = vmatpush.bf16.msrb.mxu2 %v13563_v40  ;;  %v15763_v40 = vld [vmem:[#allocation2 + $0x1e3c] sm:$0xf]  ;;  %v13491_v44 = vor.u32 %v15715_v35, %v13488_v51  ;;  %v14592_v25 = vld [vmem:[#allocation2 + $0x2570] sm:$0xf0]  ;;  %v15889_v63 = vld [vmem:[#allocation2 + $0x222c] sm:$0xf] }
 0x306   :  { %8594 = vmatpush.bf16.msrb.mxu3 %v13755_v42  ;;  %v13080_v42 = vld [vmem:[#allocation2 + $0x19a0] sm:$0xf0]  ;;  %v13683_v37 = vor.u32 %v15763_v40, %v13680_v41  ;;  %v15937_v40 = vld [vmem:[#allocation2 + $0x23ac] sm:$0xf] }
 0x307   :  { %8556 = vmatpush.bf16.msrb.mxu0 %v13155_v55  ;;  %v13464_v55 = vld [vmem:[#allocation2 + $0x1ca0] sm:$0xf0]  ;;  %v13083_v59 = vor.u32 %v15613_v1, %v13080_v42 }
 0x308   :  { %8569 = vmatpush.bf16.msrb.mxu1 %v13347_v33  ;;  %v15757_v33 = vld [vmem:[#allocation2 + $0x1e0c] sm:$0xf]  ;;  %v13467_v52 = vor.u32 %v15709_v54, %v13464_v55  ;;  %v14184_v51 = vld [vmem:[#allocation2 + $0x2240] sm:$0xf0]  ;;  %v15883_v54 = vld [vmem:[#allocation2 + $0x21fc] sm:$0xf] }
 0x309   :  { %8582 = vmatpush.bf16.msrb.mxu2 %v13539_v36  ;;  %v13656_v36 = vld [vmem:[#allocation2 + $0x1e20] sm:$0xf0] }
 0x30a   :  { %8595 = vmatpush.bf16.msrb.mxu3 %v13731_v39  ;;  %v15895_v39 = vld [vmem:[#allocation2 + $0x225c] sm:$0xf]  ;;  %v14376_v41 = vld [vmem:[#allocation2 + $0x23c0] sm:$0xf0] }
 0x30b   :  { %8557 = vmatpush.bf16.msrb.mxu0 %v13131_v4  ;;  %v15991_v4 = vld [vmem:[#allocation2 + $0x255c] sm:$0xf]  ;;  %v14211_v53 = vor.u32 %v15895_v39, %v14208_v60  ;;  %v14568_v1 = vld [vmem:[#allocation2 + $0x2540] sm:$0xf0]  ;;  %v14379_v45 = vor.u32 %v15937_v40, %v14376_v41  ;;  %v14544_v39 = vld [vmem:[#allocation2 + $0x2510] sm:$0xf0] }
 0x30c   :  { %8570 = vmatpush.bf16.msrb.mxu1 %v13323_v17  ;;  %v13659_v17 = vor.u32 %v15757_v33, %v13656_v36  ;;  %v14595_v35 = vor.u32 %v15991_v4, %v14592_v25  ;;  %v14160_v36 = vld [vmem:[#allocation2 + $0x2210] sm:$0xf0]  ;;  %v13944_v43 = vld [vmem:[#allocation2 + $0x2060] sm:$0xf0]  ;;  %v15871_v41 = vld [vmem:[#allocation2 + $0x219c] sm:$0xf] }
 0x30d   :  { %8583 = vmatpush.bf16.msrb.mxu2 %v13515_v24  ;;  %v14019_v24 = vor.u32 %v15847_v57, %v14016_v58  ;;  %v14352_v57 = vld [vmem:[#allocation2 + $0x2390] sm:$0xf0]  ;;  %v15979_v58 = vld [vmem:[#allocation2 + $0x24fc] sm:$0xf]  ;;  %v14163_v60 = vor.u32 %v15883_v54, %v14160_v36  ;;  %v14136_v25 = vld [vmem:[#allocation2 + $0x21e0] sm:$0xf0] }
 0x30e   :  { %8596 = vmatpush.bf16.msrb.mxu3 %v13707_v34  ;;  %v13992_v34 = vld [vmem:[#allocation2 + $0x20c0] sm:$0xf0]  ;;  %v14355_v61 = vor.u32 %v15931_v56, %v14352_v57  ;;  %v14547_v4 = vor.u32 %v15979_v58, %v14544_v39  ;;  %v13920_v40 = vld [vmem:[#allocation2 + $0x2030] sm:$0xf0]  ;;  %v15817_v36 = vld [vmem:[#allocation2 + $0x1fec] sm:$0xf] }
 0x30f   :  { %8558 = vmatpush.bf16.msrb.mxu0 %v13107_v62  ;;  %v15985_v62 = vld [vmem:[#allocation2 + $0x252c] sm:$0xf]  ;;  %v13995_v42 = vor.u32 %v15841_v30, %v13992_v34  ;;  %v13947_v30 = vor.u32 %v15829_v23, %v13944_v43  ;;  %v13896_v56 = vld [vmem:[#allocation2 + $0x2000] sm:$0xf0] }
 0x310   :  { %8571 = vmatpush.bf16.msrb.mxu1 %v13299_v18  ;;  %v15835_v18 = vld [vmem:[#allocation2 + $0x207c] sm:$0xf]  ;;  %v14571_v33 = vor.u32 %v15985_v62, %v14568_v1  ;;  %v15865_v57 = vld [vmem:[#allocation2 + $0x216c] sm:$0xf] }
 0x311   :  { %8584 = vmatpush.bf16.msrb.mxu2 %v13491_v44  ;;  %v14187_v44 = vor.u32 %v15889_v63, %v14184_v51  ;;  %v15823_v51 = vld [vmem:[#allocation2 + $0x201c] sm:$0xf] }
 0x312   :  { %8597 = vmatpush.bf16.msrb.mxu3 %v13683_v37  ;;  %v16058_v37 = vld [vmem:[#allocation5] sm:$0x3f] }
 0x313   :  { %8559 = vmatpush.bf16.msrb.mxu0 %v13083_v59  ;;  %v1289_v55 = vperm.slane %v16058_v37, 3  ;;  %v13971_v59 = vor.u32 %v15835_v18, %v13968_v50  ;;  %v8353_v34 = vpop.f32.mrf.mxu0  ;;  %v15919_v18 = vld [vmem:[#allocation2 + $0x231c] sm:$0xf]  ;;  %v14496_v50 = vld [vmem:[#allocation2 + $0x24b0] sm:$0xf0]  ;;  %v13923_v37 = vor.u32 %v15823_v51, %v13920_v40 }
 0x314   :  { %8572 = vmatpush.bf16.msrb.mxu1 %v13275_v0  ;;  %v15877_v0 = vld [vmem:[#allocation2 + $0x21cc] sm:$0xf]  ;;  %v8366_v1 = vpop.f32.mrf.mxu1  ;;  %v14064_v51 = vld [vmem:[#allocation2 + $0x2150] sm:$0xf0]  ;;  %v15907_v40 = vld [vmem:[#allocation2 + $0x22bc] sm:$0xf] }
 0x315   :  { %8585 = vmatpush.bf16.msrb.mxu2 %v13467_v52  ;;  %v8341_v52 = vadd.f32 %v16452_v6, %v1289_v55  ;;  %v14139_v63 = vor.u32 %v15877_v0, %v14136_v25  ;;  %v15961_v0 = vld [vmem:[#allocation2 + $0x246c] sm:$0xf] }
 0x316   :  { %8598 = vmatpush.bf16.msrb.mxu3 %v13659_v17  ;;  %8560 = vmatmul.bf16.vlgmr.msrb.gmra.mxu0 %v16304_v10  ;;  %v15925_v17 = vld [vmem:[#allocation2 + $0x234c] sm:$0xf] }
 0x317   :  { %8604 = vmatpush.bf16.msra.mxu0 %v14019_v24  ;;  %8573 = vmatmul.bf16.vlgmr.msrb.gmra.mxu1 %v16302_v9  ;;  %v14328_v24 = vld [vmem:[#allocation2 + $0x2360] sm:$0xf0]  ;;  %v8354_v62 = vadd.f32 %v8353_v34, %v8341_v52  ;;  %v15859_v34 = vld [vmem:[#allocation2 + $0x213c] sm:$0xf] }
 0x318   :  { %8617 = vmatpush.bf16.msra.mxu1 %v14211_v53  ;;  %8586 = vmatmul.bf16.vlgmr.msrb.gmra.mxu2 %v16306_v13  ;;  %v15973_v53 = vld [vmem:[#allocation2 + $0x24cc] sm:$0xf]  ;;  %v14472_v52 = vld [vmem:[#allocation2 + $0x2480] sm:$0xf0] }
 0x319   :  { %8630 = vmatpush.bf16.msra.mxu2 %v14403_v28  ;;  %8599 = vmatmul.bf16.vlgmr.msrb.gmra.mxu3 %v16312_v2  ;;  %v14520_v28 = vld [vmem:[#allocation2 + $0x24e0] sm:$0xf0]  ;;  %v8367_v54 = vadd.f32 %v8366_v1, %v8354_v62  ;;  %v15955_v62 = vld [vmem:[#allocation2 + $0x243c] sm:$0xf]  ;;  %v14448_v1 = vld [vmem:[#allocation2 + $0x2450] sm:$0xf0] }
 0x31a   :  { %8643 = vmatpush.bf16.msra.mxu3 %v14595_v35  ;;  %v14331_v35 = vor.u32 %v15925_v17, %v14328_v24  ;;  %v14523_v6 = vor.u32 %v15973_v53, %v14520_v28  ;;  %v15811_v28 = vld [vmem:[#allocation2 + $0x1fbc] sm:$0xf] }
 0x31b   :  { %8605 = vmatpush.bf16.msra.mxu0 %v13995_v42  ;;  %v14112_v42 = vld [vmem:[#allocation2 + $0x21b0] sm:$0xf0]  ;;  %v8379_v58 = vpop.f32.mrf.mxu2  ;;  %v8355_v17 = vpop.f32.mrf.mxu0 }
 0x31c   :  { %8618 = vmatpush.bf16.msra.mxu1 %v14187_v44  ;;  %v14304_v44 = vld [vmem:[#allocation2 + $0x2330] sm:$0xf0]  ;;  %v14115_v55 = vor.u32 %v15871_v41, %v14112_v42  ;;  %v8380_v23 = vadd.f32 %v8379_v58, %v8367_v54  ;;  %v8392_v43 = vpop.f32.mrf.mxu3  ;;  %v15805_v42 = vld [vmem:[#allocation2 + $0x1f8c] sm:$0xf]  ;;  %v14040_v54 = vld [vmem:[#allocation2 + $0x2120] sm:$0xf0] }
 0x31d   :  { %8631 = vmatpush.bf16.msra.mxu2 %v14379_v45  ;;  %v15967_v45 = vld [vmem:[#allocation2 + $0x249c] sm:$0xf]  ;;  %v14256_v41 = vld [vmem:[#allocation2 + $0x22d0] sm:$0xf0]  ;;  %v10566_v17 = vld [vmem:[#allocation2 + $0x5e0] sm:$0xf] }
 0x31e   :  { %8644 = vmatpush.bf16.msra.mxu3 %v14571_v33  ;;  %v14307_v33 = vor.u32 %v15919_v18, %v14304_v44  ;;  %v14499_v39 = vor.u32 %v15967_v45, %v14496_v50  ;;  %v16459_v25 = vadd.f32 %v8392_v43, %v8380_v23  ;;  %v13848_v18 = vld [vmem:[#allocation2 + $0x1fa0] sm:$0xf0]  ;;  %v14067_v44 = vor.u32 %v15859_v34, %v14064_v51  ;;  %v15853_v50 = vld [vmem:[#allocation2 + $0x210c] sm:$0xf]  ;;  %v14891_v23 = vld [vmem:[#allocation2 + $0x2f4] sm:$0xf0] }
 0x31f   :  { %8606 = vmatpush.bf16.msra.mxu0 %v13971_v59  ;;  %v14088_v59 = vld [vmem:[#allocation2 + $0x2180] sm:$0xf0]  ;;  %v14259_v45 = vor.u32 %v15907_v40, %v14256_v41  ;;  %v10374_v43 = vld [vmem:[#allocation2 + $0x460] sm:$0xf]  ;;  %v10158_v51 = vld [vmem:[#allocation2 + $0x2b0] sm:$0xf] }
 0x320   :  { %8619 = vmatpush.bf16.msra.mxu1 %v14163_v60  ;;  %v15913_v60 = vld [vmem:[#allocation2 + $0x22ec] sm:$0xf]  ;;  %v14091_v24 = vor.u32 %v15865_v57, %v14088_v59  ;;  %v14424_v57 = vld [vmem:[#allocation2 + $0x2420] sm:$0xf0]  ;;  %v14843_v59 = vld [vmem:[#allocation2 + $0x174] sm:$0xf0] }
 0x321   :  { %8632 = vmatpush.bf16.msra.mxu2 %v14355_v61  ;;  %v14280_v61 = vld [vmem:[#allocation2 + $0x2300] sm:$0xf0]  ;;  %v14885_v41 = vld [vmem:[#allocation2 + $0x2c4] sm:$0xf0] }
 0x322   :  { %8645 = vmatpush.bf16.msra.mxu3 %v14547_v4  ;;  %v13899_v4 = vor.u32 %v15817_v36, %v13896_v56  ;;  %v14283_v53 = vor.u32 %v15913_v60, %v14280_v61  ;;  %v14232_v36 = vld [vmem:[#allocation2 + $0x22a0] sm:$0xf0]  ;;  %v15949_v56 = vld [vmem:[#allocation2 + $0x240c] sm:$0xf]  ;;  %v10182_v60 = vld [vmem:[#allocation2 + $0x2e0] sm:$0xf]  ;;  %v13851_v61 = vor.u32 %v15805_v42, %v13848_v18 }
 0x323   :  { %8607 = vmatpush.bf16.msra.mxu0 %v13947_v30  ;;  %v13872_v30 = vld [vmem:[#allocation2 + $0x1fd0] sm:$0xf0]  ;;  %v14981_v42 = vld [vmem:[#allocation2 + $0x5c4] sm:$0xf0] }
 0x324   :  { %8620 = vmatpush.bf16.msra.mxu1 %v14139_v63  ;;  %v8368_v63 = vpop.f32.mrf.mxu1  ;;  %v8394_v58 = vpop.f32.mrf.mxu3 }
 0x325   :  { %8633 = vmatpush.bf16.msra.mxu2 %v14331_v35  ;;  %v14475_v35 = vor.u32 %v15961_v0, %v14472_v52  ;;  %v14939_v0 = vld [vmem:[#allocation2 + $0x474] sm:$0xf0]  ;;  %v14043_v52 = vor.u32 %v15853_v50, %v14040_v54  ;;  %v9966_v63 = vld [vmem:[#allocation2 + $0x130] sm:$0xf]  ;;  %v9942_v50 = vld [vmem:[#allocation2 + $0x100] sm:$0xf] }
 0x326   :  { %8646 = vmatpush.bf16.msra.mxu3 %v14523_v6  ;;  %v13875_v6 = vor.u32 %v15811_v28, %v13872_v30  ;;  %v10183_v30 = vor.u32 %v14891_v23, %v10182_v60  ;;  %v10375_v34 = vor.u32 %v14939_v0, %v10374_v43  ;;  %v14831_v54 = vld [vmem:[#allocation2 + $0x114] sm:$0xf0]  ;;  %v9918_v23 = vld [vmem:[#allocation2 + $0xd0] sm:$0xf]  ;;  %v14825_v43 = vld [vmem:[#allocation2 + $0xe4] sm:$0xf0] }
 0x327   :  { %8608 = vmatpush.bf16.msra.mxu0 %v13923_v37  ;;  %v15901_v37 = vld [vmem:[#allocation2 + $0x228c] sm:$0xf]  ;;  %v14975_v58 = vld [vmem:[#allocation2 + $0x594] sm:$0xf0]  ;;  %v10110_v0 = vld [vmem:[#allocation2 + $0x250] sm:$0xf] }
 0x328   :  { %8621 = vmatpush.bf16.msra.mxu1 %v14115_v55  ;;  %v8381_v55 = vpop.f32.mrf.mxu2 }
 0x329   :  { %8634 = vmatpush.bf16.msra.mxu2 %v14307_v33  ;;  %v14451_v33 = vor.u32 %v15955_v62, %v14448_v1  ;;  %v10350_v62 = vld [vmem:[#allocation2 + $0x430] sm:$0xf]  ;;  %v14933_v1 = vld [vmem:[#allocation2 + $0x444] sm:$0xf0] }
 0x32a   :  { %8647 = vmatpush.bf16.msra.mxu3 %v14499_v39  ;;  %v9990_v39 = vld [vmem:[#allocation2 + $0x160] sm:$0xf] }
 0x32b   :  { %8609 = vmatpush.bf16.msra.mxu0 %v13899_v4  ;;  %v14235_v4 = vor.u32 %v15901_v37, %v14232_v36  ;;  %v9991_v28 = vor.u32 %v14843_v59, %v9990_v39  ;;  %v10134_v37 = vld [vmem:[#allocation2 + $0x280] sm:$0xf]  ;;  %v16059_v39 = vld [vmem:[#allocation1] sm:$0xff]  ;;  %v9943_v59 = vor.u32 %v14831_v54, %v9942_v50 }
 0x32c   :  { %8622 = vmatpush.bf16.msra.mxu1 %v14091_v24  ;;  %v14987_v24 = vld [vmem:[#allocation2 + $0x5f4] sm:$0xf0]  ;;  %v10326_v36 = vld [vmem:[#allocation2 + $0x400] sm:$0xf] }
 0x32d   :  { %8635 = vmatpush.bf16.msra.mxu2 %v14283_v53  ;;  %v14427_v53 = vor.u32 %v15949_v56, %v14424_v57  ;;  %v10567_v40 = vor.u32 %v14987_v24, %v10566_v17  ;;  %v14927_v56 = vld [vmem:[#allocation2 + $0x414] sm:$0xf0]  ;;  %v10518_v57 = vld [vmem:[#allocation2 + $0x580] sm:$0xf]  ;;  %v10302_v17 = vld [vmem:[#allocation2 + $0x3d0] sm:$0xf] }
 0x32e   :  { %8648 = vmatpush.bf16.msra.mxu3 %v14475_v35  ;;  %v14837_v35 = vld [vmem:[#allocation2 + $0x144] sm:$0xf0]  ;;  %v14963_v50 = vld [vmem:[#allocation2 + $0x534] sm:$0xf0] }
 0x32f   :  { %8610 = vmatpush.bf16.msra.mxu0 %v13875_v6  ;;  %v10542_v6 = vld [vmem:[#allocation2 + $0x5b0] sm:$0xf]  ;;  %v9967_v18 = vor.u32 %v14837_v35, %v9966_v63  ;;  %v14921_v24 = vld [vmem:[#allocation2 + $0x3e4] sm:$0xf0] }
 0x330   :  { %8623 = vmatpush.bf16.msra.mxu1 %v14067_v44  ;;  %v10159_v44 = vor.u32 %v14885_v41, %v10158_v51  ;;  %v10543_v55 = vor.u32 %v14981_v42, %v10542_v6  ;;  %v10303_v35 = vor.u32 %v14921_v24, %v10302_v17  ;;  %v9894_v51 = vld [vmem:[#allocation2 + $0xa0] sm:$0xf]  ;;  %v14867_v42 = vld [vmem:[#allocation2 + $0x234] sm:$0xf0] }
 0x331   :  { %8636 = vmatpush.bf16.msra.mxu2 %v14259_v45  ;;  %v10351_v45 = vor.u32 %v14933_v1, %v10350_v62  ;;  %v10086_v41 = vld [vmem:[#allocation2 + $0x220] sm:$0xf] }
 0x332   :  { %8649 = vmatpush.bf16.msra.mxu3 %v14451_v33  ;;  %v14879_v33 = vld [vmem:[#allocation2 + $0x294] sm:$0xf0] }
 0x333   :  { %8611 = vmatpush.bf16.msra.mxu0 %v13851_v61  ;;  %v10135_v60 = vor.u32 %v14879_v33, %v10134_v37  ;;  %v10327_v61 = vor.u32 %v14927_v56, %v10326_v36  ;;  %v9870_v36 = vld [vmem:[#allocation2 + $0x70] sm:$0xf]  ;;  %v14813_v56 = vld [vmem:[#allocation2 + $0x84] sm:$0xf0] }
 0x334   :  { %8624 = vmatpush.bf16.msra.mxu1 %v14043_v52  ;;  %v10519_v52 = vor.u32 %v14975_v58, %v10518_v57  ;;  %v8418_v1 = vpop.f32.mrf.mxu1  ;;  %v10062_v57 = vld [vmem:[#allocation2 + $0x1f0] sm:$0xf] }
 0x335   :  { %8637 = vmatpush.bf16.msra.mxu2 %v14235_v4  ;;  %v14873_v4 = vld [vmem:[#allocation2 + $0x264] sm:$0xf0] }
 0x336   :  { %8650 = vmatpush.bf16.msra.mxu3 %v14427_v53  ;;  %8612 = vmatmul.bf16.vlgmr.msra.gmra.mxu0 %v16316_v7  ;;  %v10494_v53 = vld [vmem:[#allocation2 + $0x550] sm:$0xf]  ;;  %v10111_v63 = vor.u32 %v14873_v4, %v10110_v0  ;;  %v14957_v0 = vld [vmem:[#allocation2 + $0x504] sm:$0xf0] }
 0x337   :  { %8656 = vmatpush.bf16.msrb.mxu0 %v9991_v28  ;;  %8625 = vmatmul.bf16.vlgmr.msra.gmra.mxu1 %v16314_v3  ;;  %v14969_v28 = vld [vmem:[#allocation2 + $0x564] sm:$0xf0] }
 0x338   :  { %8669 = vmatpush.bf16.msrb.mxu1 %v10183_v30  ;;  %8638 = vmatmul.bf16.vlgmr.msra.gmra.mxu2 %v16318_v14  ;;  %v9919_v30 = vor.u32 %v14825_v43, %v9918_v23  ;;  %v10495_v6 = vor.u32 %v14969_v28, %v10494_v53  ;;  %v10446_v43 = vld [vmem:[#allocation2 + $0x4f0] sm:$0xf]  ;;  %v9846_v28 = vld [vmem:[#allocation2 + $0x40] sm:$0xf] }
 0x339   :  { %8682 = vmatpush.bf16.msrb.mxu2 %v10375_v34  ;;  %8651 = vmatmul.bf16.vlgmr.msra.gmra.mxu3 %v16059_v39  ;;  %v8405_v34 = vpop.f32.mrf.mxu0  ;;  %v14861_v39 = vld [vmem:[#allocation2 + $0x204] sm:$0xf0] }
 0x33a   :  { %8695 = vmatpush.bf16.msrb.mxu3 %v10567_v40  ;;  %v14819_v40 = vld [vmem:[#allocation2 + $0xb4] sm:$0xf0]  ;;  %v8406_v62 = vadd.f32 %v8405_v34, %v16459_v25  ;;  %v10063_v24 = vor.u32 %v14861_v39, %v10062_v57  ;;  %v10038_v34 = vld [vmem:[#allocation2 + $0x1c0] sm:$0xf]  ;;  %v14945_v57 = vld [vmem:[#allocation2 + $0x4a4] sm:$0xf0] }
 0x33b   :  { %8657 = vmatpush.bf16.msrb.mxu0 %v9967_v18  ;;  %v10278_v18 = vld [vmem:[#allocation2 + $0x3a0] sm:$0xf]  ;;  %v9895_v37 = vor.u32 %v14819_v40, %v9894_v51  ;;  %v8431_v58 = vpop.f32.mrf.mxu2  ;;  %v14855_v51 = vld [vmem:[#allocation2 + $0x1d4] sm:$0xf0] }
 0x33c   :  { %8670 = vmatpush.bf16.msrb.mxu1 %v10159_v44  ;;  %v14915_v44 = vld [vmem:[#allocation2 + $0x3b4] sm:$0xf0]  ;;  %v8419_v54 = vadd.f32 %v8418_v1, %v8406_v62  ;;  %v8444_v23 = vpop.f32.mrf.mxu3  ;;  %v10230_v40 = vld [vmem:[#allocation2 + $0x340] sm:$0xf] }
 0x33d   :  { %8683 = vmatpush.bf16.msrb.mxu2 %v10351_v45  ;;  %v10470_v45 = vld [vmem:[#allocation2 + $0x520] sm:$0xf]  ;;  %v10279_v33 = vor.u32 %v14915_v44, %v10278_v18  ;;  %v14951_v1 = vld [vmem:[#allocation2 + $0x4d4] sm:$0xf0]  ;;  %v14801_v18 = vld [vmem:[#allocation2 + $0x24] sm:$0xf0]  ;;  %v10039_v44 = vor.u32 %v14855_v51, %v10038_v34 }
 0x33e   :  { %8696 = vmatpush.bf16.msrb.mxu3 %v10543_v55  ;;  %v10087_v55 = vor.u32 %v14867_v42, %v10086_v41  ;;  %v10471_v25 = vor.u32 %v14963_v50, %v10470_v45  ;;  %v14903_v41 = vld [vmem:[#allocation2 + $0x354] sm:$0xf0]  ;;  %v10422_v62 = vld [vmem:[#allocation2 + $0x4c0] sm:$0xf]  ;;  %v9822_v42 = vld [vmem:[#allocation2 + $0x10] sm:$0xf] }
 0x33f   :  { %8658 = vmatpush.bf16.msrb.mxu0 %v9943_v59  ;;  %v10254_v59 = vld [vmem:[#allocation2 + $0x370] sm:$0xf]  ;;  %v10231_v45 = vor.u32 %v14903_v41, %v10230_v40  ;;  %v15035_v39 = vld [vmem:[#allocation2 + $0x774] sm:$0xf0]  ;;  %v15077_v41 = vld [vmem:[#allocation2 + $0x8c4] sm:$0xf0] }
 0x340   :  { %8671 = vmatpush.bf16.msrb.mxu1 %v10135_v60  ;;  %v14909_v60 = vld [vmem:[#allocation2 + $0x384] sm:$0xf0]  ;;  %v10014_v50 = vld [vmem:[#allocation2 + $0x190] sm:$0xf] }
 0x341   :  { %8684 = vmatpush.bf16.msrb.mxu2 %v10327_v61  ;;  %v8432_v61 = vadd.f32 %v8431_v58, %v8419_v54  ;;  %v8407_v17 = vpop.f32.mrf.mxu0  ;;  %v10255_v53 = vor.u32 %v14909_v60, %v10254_v59  ;;  %v14849_v54 = vld [vmem:[#allocation2 + $0x1a4] sm:$0xf0]  ;;  %v10950_v59 = vld [vmem:[#allocation2 + $0x8e0] sm:$0xf]  ;;  %v9823_v60 = vor.u32 %v14801_v18, %v9822_v42  ;;  %v10926_v51 = vld [vmem:[#allocation2 + $0x8b0] sm:$0xf] }
 0x342   :  { %8697 = vmatpush.bf16.msrb.mxu3 %v10519_v52  ;;  %v9871_v52 = vor.u32 %v14813_v56, %v9870_v36  ;;  %v14897_v36 = vld [vmem:[#allocation2 + $0x324] sm:$0xf0]  ;;  %v10398_v56 = vld [vmem:[#allocation2 + $0x490] sm:$0xf]  ;;  %v11334_v17 = vld [vmem:[#allocation2 + $0xbe0] sm:$0xf] }
 0x343   :  { %8659 = vmatpush.bf16.msrb.mxu0 %v9919_v30  ;;  %v16465_v4 = vadd.f32 %v8444_v23, %v8432_v61  ;;  %v14807_v30 = vld [vmem:[#allocation2 + $0x54] sm:$0xf0]  ;;  %v11142_v23 = vld [vmem:[#allocation2 + $0xa60] sm:$0xf]  ;;  %v15173_v42 = vld [vmem:[#allocation2 + $0xbc4] sm:$0xf0] }
 0x344   :  { %8672 = vmatpush.bf16.msrb.mxu1 %v10111_v63  ;;  %v8420_v63 = vpop.f32.mrf.mxu1  ;;  %v8446_v58 = vpop.f32.mrf.mxu3  ;;  %v15083_v61 = vld [vmem:[#allocation2 + $0x8f4] sm:$0xf0] }
 0x345   :  { %8685 = vmatpush.bf16.msrb.mxu2 %v10303_v35  ;;  %v10447_v35 = vor.u32 %v14957_v0, %v10446_v43  ;;  %v15131_v43 = vld [vmem:[#allocation2 + $0xa74] sm:$0xf0]  ;;  %v10015_v0 = vor.u32 %v14849_v54, %v10014_v50  ;;  %v10734_v63 = vld [vmem:[#allocation2 + $0x730] sm:$0xf]  ;;  %v10710_v50 = vld [vmem:[#allocation2 + $0x700] sm:$0xf] }
 0x346   :  { %8698 = vmatpush.bf16.msrb.mxu3 %v10495_v6  ;;  %v9847_v6 = vor.u32 %v14807_v30, %v9846_v28  ;;  %v10951_v30 = vor.u32 %v15083_v61, %v10950_v59  ;;  %v11143_v34 = vor.u32 %v15131_v43, %v11142_v23  ;;  %v15023_v54 = vld [vmem:[#allocation2 + $0x714] sm:$0xf0]  ;;  %v15017_v61 = vld [vmem:[#allocation2 + $0x6e4] sm:$0xf0]  ;;  %v10878_v23 = vld [vmem:[#allocation2 + $0x850] sm:$0xf] }
 0x347   :  { %8660 = vmatpush.bf16.msrb.mxu0 %v9895_v37  ;;  %v10206_v37 = vld [vmem:[#allocation2 + $0x310] sm:$0xf]  ;;  %v15167_v58 = vld [vmem:[#allocation2 + $0xb94] sm:$0xf0] }
 0x348   :  { %8673 = vmatpush.bf16.msrb.mxu1 %v10087_v55  ;;  %v8433_v55 = vpop.f32.mrf.mxu2 }
 0x349   :  { %8686 = vmatpush.bf16.msrb.mxu2 %v10279_v33  ;;  %v10423_v33 = vor.u32 %v14951_v1, %v10422_v62  ;;  %v11118_v62 = vld [vmem:[#allocation2 + $0xa30] sm:$0xf]  ;;  %v15125_v1 = vld [vmem:[#allocation2 + $0xa44] sm:$0xf0] }
 0x34a   :  { %8699 = vmatpush.bf16.msrb.mxu3 %v10471_v25  ;;  %v10758_v25 = vld [vmem:[#allocation2 + $0x760] sm:$0xf] }
 0x34b   :  { %8661 = vmatpush.bf16.msrb.mxu0 %v9871_v52  ;;  %v10207_v52 = vor.u32 %v14897_v36, %v10206_v37  ;;  %v10759_v28 = vor.u32 %v15035_v39, %v10758_v25  ;;  %v10902_v37 = vld [vmem:[#allocation2 + $0x880] sm:$0xf]  ;;  %v10711_v25 = vor.u32 %v15023_v54, %v10710_v50  ;;  %v15155_v50 = vld [vmem:[#allocation2 + $0xb34] sm:$0xf0] }
 0x34c   :  { %8674 = vmatpush.bf16.msrb.mxu1 %v10063_v24  ;;  %v15179_v24 = vld [vmem:[#allocation2 + $0xbf4] sm:$0xf0]  ;;  %v11094_v36 = vld [vmem:[#allocation2 + $0xa00] sm:$0xf] }
 0x34d   :  { %8687 = vmatpush.bf16.msrb.mxu2 %v10255_v53  ;;  %v10399_v53 = vor.u32 %v14945_v57, %v10398_v56  ;;  %v11335_v40 = vor.u32 %v15179_v24, %v11334_v17  ;;  %v15119_v56 = vld [vmem:[#allocation2 + $0xa14] sm:$0xf0]  ;;  %v11286_v57 = vld [vmem:[#allocation2 + $0xb80] sm:$0xf]  ;;  %v15113_v17 = vld [vmem:[#allocation2 + $0x9e4] sm:$0xf0] }
 0x34e   :  { %8700 = vmatpush.bf16.msrb.mxu3 %v10447_v35  ;;  %v15029_v35 = vld [vmem:[#allocation2 + $0x744] sm:$0xf0]  ;;  %v11095_v59 = vor.u32 %v15119_v56, %v11094_v36  ;;  %v11287_v43 = vor.u32 %v15167_v58, %v11286_v57  ;;  %v10830_v36 = vld [vmem:[#allocation2 + $0x7f0] sm:$0xf] }
 0x34f   :  { %8662 = vmatpush.bf16.msrb.mxu0 %v9847_v6  ;;  %v11310_v6 = vld [vmem:[#allocation2 + $0xbb0] sm:$0xf]  ;;  %v10735_v18 = vor.u32 %v15029_v35, %v10734_v63  ;;  %v15053_v58 = vld [vmem:[#allocation2 + $0x804] sm:$0xf0] }
 0x350   :  { %8675 = vmatpush.bf16.msrb.mxu1 %v10039_v44  ;;  %v10927_v44 = vor.u32 %v15077_v41, %v10926_v51  ;;  %v11311_v55 = vor.u32 %v15173_v42, %v11310_v6  ;;  %v15011_v41 = vld [vmem:[#allocation2 + $0x6b4] sm:$0xf0] }
 0x351   :  { %8688 = vmatpush.bf16.msrb.mxu2 %v10231_v45  ;;  %v11119_v45 = vor.u32 %v15125_v1, %v11118_v62  ;;  %v10854_v62 = vld [vmem:[#allocation2 + $0x820] sm:$0xf]  ;;  %v15059_v42 = vld [vmem:[#allocation2 + $0x834] sm:$0xf0] }
 0x352   :  { %8701 = vmatpush.bf16.msrb.mxu3 %v10423_v33  ;;  %v15071_v33 = vld [vmem:[#allocation2 + $0x894] sm:$0xf0] }
 0x353   :  { %8663 = vmatpush.bf16.msrb.mxu0 %v9823_v60  ;;  %v10903_v39 = vor.u32 %v15071_v33, %v10902_v37  ;;  %v10686_v60 = vld [vmem:[#allocation2 + $0x6d0] sm:$0xf]  ;;  %v8457_v24 = vpop.f32.mrf.mxu0  ;;  %v15005_v33 = vld [vmem:[#allocation2 + $0x684] sm:$0xf0] }
 0x354   :  { %8676 = vmatpush.bf16.msrb.mxu1 %v10015_v0  ;;  %v15065_v0 = vld [vmem:[#allocation2 + $0x864] sm:$0xf0]  ;;  %v8470_v63 = vpop.f32.mrf.mxu1 }
 0x355   :  { %8689 = vmatpush.bf16.msrb.mxu2 %v10207_v52  ;;  %v11070_v52 = vld [vmem:[#allocation2 + $0x9d0] sm:$0xf]  ;;  %v10879_v35 = vor.u32 %v15065_v0, %v10878_v23  ;;  %v15149_v23 = vld [vmem:[#allocation2 + $0xb04] sm:$0xf0] }
 0x356   :  { %8702 = vmatpush.bf16.msrb.mxu3 %v10399_v53  ;;  %8664 = vmatmul.bf16.vlgmr.msrb.gmra.mxu0 %v16248_v21  ;;  %v11262_v53 = vld [vmem:[#allocation2 + $0xb50] sm:$0xf]  ;;  %v11071_v51 = vor.u32 %v15113_v17, %v11070_v52 }
 0x357   :  { %8708 = vmatpush.bf16.msra.mxu0 %v10759_v28  ;;  %8677 = vmatmul.bf16.vlgmr.msrb.gmra.mxu1 %v16253_v26  ;;  %v15161_v28 = vld [vmem:[#allocation2 + $0xb64] sm:$0xf0] }
 0x358   :  { %8721 = vmatpush.bf16.msra.mxu1 %v10951_v30  ;;  %8690 = vmatmul.bf16.vlgmr.msrb.gmra.mxu2 %v16246_v20  ;;  %v8458_v30 = vadd.f32 %v8457_v24, %v16465_v4  ;;  %v11263_v1 = vor.u32 %v15161_v28, %v11262_v53  ;;  %v10855_v4 = vor.u32 %v15059_v42, %v10854_v62  ;;  %v10614_v28 = vld [vmem:[#allocation2 + $0x640] sm:$0xf]  ;;  %v15143_v62 = vld [vmem:[#allocation2 + $0xad4] sm:$0xf0]  ;;  %v14993_v42 = vld [vmem:[#allocation2 + $0x624] sm:$0xf0] }
 0x359   :  { %8734 = vmatpush.bf16.msra.mxu2 %v11143_v34  ;;  %8703 = vmatmul.bf16.vlgmr.msrb.gmra.mxu3 %v16250_v22  ;;  %v10687_v34 = vor.u32 %v15017_v61, %v10686_v60  ;;  %v11214_v61 = vld [vmem:[#allocation2 + $0xaf0] sm:$0xf]  ;;  %v10831_v24 = vor.u32 %v15053_v58, %v10830_v36  ;;  %v11718_v58 = vld [vmem:[#allocation2 + $0xee0] sm:$0xf] }
 0x35a   :  { %8747 = vmatpush.bf16.msra.mxu3 %v11335_v40  ;;  %v10662_v40 = vld [vmem:[#allocation2 + $0x6a0] sm:$0xf]  ;;  %v8471_v6 = vadd.f32 %v8470_v63, %v8458_v30  ;;  %v14999_v30 = vld [vmem:[#allocation2 + $0x654] sm:$0xf0]  ;;  %v11215_v63 = vor.u32 %v15149_v23, %v11214_v61 }
 0x35b   :  { %8709 = vmatpush.bf16.msra.mxu0 %v10735_v18  ;;  %v11046_v18 = vld [vmem:[#allocation2 + $0x9a0] sm:$0xf]  ;;  %v10663_v54 = vor.u32 %v15011_v41, %v10662_v40  ;;  %v8483_v57 = vpop.f32.mrf.mxu2  ;;  %v15095_v40 = vld [vmem:[#allocation2 + $0x954] sm:$0xf0] }
 0x35c   :  { %8722 = vmatpush.bf16.msra.mxu1 %v10927_v44  ;;  %v15107_v44 = vld [vmem:[#allocation2 + $0x9b4] sm:$0xf0]  ;;  %v8496_v60 = vpop.f32.mrf.mxu3  ;;  %v8472_v52 = vpop.f32.mrf.mxu1  ;;  %v11190_v41 = vld [vmem:[#allocation2 + $0xac0] sm:$0xf] }
 0x35d   :  { %8735 = vmatpush.bf16.msra.mxu2 %v11119_v45  ;;  %v11238_v45 = vld [vmem:[#allocation2 + $0xb20] sm:$0xf]  ;;  %v11047_v37 = vor.u32 %v15107_v44, %v11046_v18  ;;  %v15323_v61 = vld [vmem:[#allocation2 + $0x1074] sm:$0xf0] }
 0x35e   :  { %8748 = vmatpush.bf16.msra.mxu3 %v11311_v55  ;;  %v10638_v55 = vld [vmem:[#allocation2 + $0x670] sm:$0xf]  ;;  %v11239_v56 = vor.u32 %v15155_v50, %v11238_v45  ;;  %v15041_v50 = vld [vmem:[#allocation2 + $0x7a4] sm:$0xf0]  ;;  %v15371_v52 = vld [vmem:[#allocation2 + $0x11f4] sm:$0xf0] }
 0x35f   :  { %8710 = vmatpush.bf16.msra.mxu0 %v10711_v25  ;;  %v11022_v25 = vld [vmem:[#allocation2 + $0x970] sm:$0xf]  ;;  %v10639_v0 = vor.u32 %v15005_v33, %v10638_v55  ;;  %v15137_v33 = vld [vmem:[#allocation2 + $0xaa4] sm:$0xf0] }
 0x360   :  { %8723 = vmatpush.bf16.msra.mxu1 %v10903_v39  ;;  %v15101_v39 = vld [vmem:[#allocation2 + $0x984] sm:$0xf0]  ;;  %v10782_v45 = vld [vmem:[#allocation2 + $0x790] sm:$0xf] }
 0x361   :  { %8736 = vmatpush.bf16.msra.mxu2 %v11095_v59  ;;  %v8484_v59 = vadd.f32 %v8483_v57, %v8471_v6  ;;  %v11023_v53 = vor.u32 %v15101_v39, %v11022_v25  ;;  %v10590_v6 = vld [vmem:[#allocation2 + $0x610] sm:$0xf]  ;;  %v15227_v57 = vld [vmem:[#allocation2 + $0xd74] sm:$0xf0]  ;;  %v10783_v23 = vor.u32 %v15041_v50, %v10782_v45  ;;  %v11478_v45 = vld [vmem:[#allocation2 + $0xd00] sm:$0xf] }
 0x362   :  { %8749 = vmatpush.bf16.msra.mxu3 %v11287_v43  ;;  %v8459_v43 = vpop.f32.mrf.mxu0  ;;  %v11166_v55 = vld [vmem:[#allocation2 + $0xa90] sm:$0xf]  ;;  %v10591_v39 = vor.u32 %v14993_v42, %v10590_v6  ;;  %v15365_v6 = vld [vmem:[#allocation2 + $0x11c4] sm:$0xf0]  ;;  %v15215_v50 = vld [vmem:[#allocation2 + $0xd14] sm:$0xf0] }
 0x363   :  { %8711 = vmatpush.bf16.msra.mxu0 %v10687_v34  ;;  %v16472_v17 = vadd.f32 %v8496_v60, %v8484_v59  ;;  %v10806_v34 = vld [vmem:[#allocation2 + $0x7c0] sm:$0xf]  ;;  %v8485_v36 = vpop.f32.mrf.mxu2  ;;  %v15275_v59 = vld [vmem:[#allocation2 + $0xef4] sm:$0xf0] }
 0x364   :  { %8724 = vmatpush.bf16.msra.mxu1 %v10879_v35  ;;  %v15047_v35 = vld [vmem:[#allocation2 + $0x7d4] sm:$0xf0]  ;;  %v8498_v25 = vpop.f32.mrf.mxu3  ;;  %v11910_v60 = vld [vmem:[#allocation2 + $0x1060] sm:$0xf] }
 0x365   :  { %8737 = vmatpush.bf16.msra.mxu2 %v11071_v51  ;;  %v10998_v51 = vld [vmem:[#allocation2 + $0x940] sm:$0xf]  ;;  %v10807_v18 = vor.u32 %v15047_v35, %v10806_v34  ;;  %v11502_v34 = vld [vmem:[#allocation2 + $0xd30] sm:$0xf] }
 0x366   :  { %8750 = vmatpush.bf16.msra.mxu3 %v11263_v1  ;;  %v10615_v1 = vor.u32 %v14999_v30, %v10614_v28  ;;  %v10999_v44 = vor.u32 %v15095_v40, %v10998_v51  ;;  %v11719_v28 = vor.u32 %v15275_v59, %v11718_v58  ;;  %v11911_v30 = vor.u32 %v15323_v61, %v11910_v60  ;;  %v11694_v35 = vld [vmem:[#allocation2 + $0xeb0] sm:$0xf]  ;;  %v15269_v40 = vld [vmem:[#allocation2 + $0xec4] sm:$0xf0]  ;;  %v12054_v36 = vld [vmem:[#allocation2 + $0x1180] sm:$0xf] }
 0x367   :  { %8712 = vmatpush.bf16.msra.mxu0 %v10663_v54  ;;  %v10974_v54 = vld [vmem:[#allocation2 + $0x910] sm:$0xf]  ;;  %v15209_v59 = vld [vmem:[#allocation2 + $0xce4] sm:$0xf0] }
 0x368   :  { %8725 = vmatpush.bf16.msra.mxu1 %v10855_v4  ;;  %v11191_v4 = vor.u32 %v15143_v62, %v11190_v41  ;;  %v11886_v41 = vld [vmem:[#allocation2 + $0x1030] sm:$0xf]  ;;  %v15317_v62 = vld [vmem:[#allocation2 + $0x1044] sm:$0xf0] }
 0x369   :  { %8738 = vmatpush.bf16.msra.mxu2 %v11047_v37  ;;  %v15089_v37 = vld [vmem:[#allocation2 + $0x924] sm:$0xf0]  ;;  %v11646_v60 = vld [vmem:[#allocation2 + $0xe50] sm:$0xf] }
 0x36a   :  { %8751 = vmatpush.bf16.msra.mxu3 %v11239_v56  ;;  %v11526_v56 = vld [vmem:[#allocation2 + $0xd60] sm:$0xf]  ;;  %v10975_v43 = vor.u32 %v15089_v37, %v10974_v54  ;;  %v15263_v37 = vld [vmem:[#allocation2 + $0xe94] sm:$0xf0] }
 0x36b   :  { %8713 = vmatpush.bf16.msra.mxu0 %v10639_v0  ;;  %v12102_v0 = vld [vmem:[#allocation2 + $0x11e0] sm:$0xf] }
 0x36c   :  { %8726 = vmatpush.bf16.msra.mxu1 %v10831_v24  ;;  %v11167_v24 = vor.u32 %v15137_v33, %v11166_v55  ;;  %v12103_v51 = vor.u32 %v15371_v52, %v12102_v0  ;;  %v11670_v54 = vld [vmem:[#allocation2 + $0xe80] sm:$0xf]  ;;  %v15311_v33 = vld [vmem:[#allocation2 + $0x1014] sm:$0xf0]  ;;  %v15305_v0 = vld [vmem:[#allocation2 + $0xfe4] sm:$0xf0] }
 0x36d   :  { %8739 = vmatpush.bf16.msra.mxu2 %v11023_v53  ;;  %v11527_v53 = vor.u32 %v15227_v57, %v11526_v56  ;;  %v11862_v55 = vld [vmem:[#allocation2 + $0x1000] sm:$0xf]  ;;  %v15359_v56 = vld [vmem:[#allocation2 + $0x1194] sm:$0xf0]  ;;  %v11479_v57 = vor.u32 %v15215_v50, %v11478_v45  ;;  %v11671_v58 = vor.u32 %v15263_v37, %v11670_v54  ;;  %v15197_v37 = vld [vmem:[#allocation2 + $0xc84] sm:$0xf0] }
 0x36e   :  { %8752 = vmatpush.bf16.msra.mxu3 %v11215_v63  ;;  %v15221_v63 = vld [vmem:[#allocation2 + $0xd44] sm:$0xf0]  ;;  %v11863_v25 = vor.u32 %v15311_v33, %v11862_v55  ;;  %v12055_v61 = vor.u32 %v15359_v56, %v12054_v36  ;;  %v15347_v45 = vld [vmem:[#allocation2 + $0x1134] sm:$0xf0]  ;;  %v11598_v55 = vld [vmem:[#allocation2 + $0xdf0] sm:$0xf] }
 0x36f   :  { %8714 = vmatpush.bf16.msra.mxu0 %v10615_v1  ;;  %v12078_v1 = vld [vmem:[#allocation2 + $0x11b0] sm:$0xf]  ;;  %v11503_v42 = vor.u32 %v15221_v63, %v11502_v34  ;;  %v15245_v56 = vld [vmem:[#allocation2 + $0xe04] sm:$0xf0] }
 0x370   :  { %8727 = vmatpush.bf16.msra.mxu1 %v10807_v18  ;;  %v11695_v18 = vor.u32 %v15269_v40, %v11694_v35  ;;  %v15203_v40 = vld [vmem:[#allocation2 + $0xcb4] sm:$0xf0] }
 0x371   :  { %8740 = vmatpush.bf16.msra.mxu2 %v10999_v44  ;;  %v11887_v44 = vor.u32 %v15317_v62, %v11886_v41  ;;  %v11622_v41 = vld [vmem:[#allocation2 + $0xe20] sm:$0xf] }
 0x372   :  { %8753 = vmatpush.bf16.msra.mxu3 %v11191_v4  ;;  %v12079_v4 = vor.u32 %v15365_v6, %v12078_v1  ;;  %v15251_v6 = vld [vmem:[#allocation2 + $0xe34] sm:$0xf0] }
 0x373   :  { %8715 = vmatpush.bf16.msra.mxu0 %v10591_v39  ;;  %v11454_v39 = vld [vmem:[#allocation2 + $0xcd0] sm:$0xf]  ;;  %v8509_v52 = vpop.f32.mrf.mxu0 }
 0x374   :  { %8728 = vmatpush.bf16.msra.mxu1 %v10783_v23  ;;  %v15257_v23 = vld [vmem:[#allocation2 + $0xe64] sm:$0xf0]  ;;  %v8522_v34 = vpop.f32.mrf.mxu1 }
 0x375   :  { %8741 = vmatpush.bf16.msra.mxu2 %v10975_v43  ;;  %v11838_v43 = vld [vmem:[#allocation2 + $0xfd0] sm:$0xf]  ;;  %v11647_v63 = vor.u32 %v15257_v23, %v11646_v60  ;;  %v15341_v60 = vld [vmem:[#allocation2 + $0x1104] sm:$0xf0] }
 0x376   :  { %8754 = vmatpush.bf16.msra.mxu3 %v11167_v24  ;;  %8716 = vmatmul.bf16.vlgmr.msra.gmra.mxu0 %v16260_v31  ;;  %v12030_v24 = vld [vmem:[#allocation2 + $0x1150] sm:$0xf]  ;;  %v11839_v35 = vor.u32 %v15305_v0, %v11838_v43 }
 0x377   :  { %8760 = vmatpush.bf16.msrb.mxu0 %v11527_v53  ;;  %8729 = vmatmul.bf16.vlgmr.msra.gmra.mxu1 %v16264_v38  ;;  %v15353_v53 = vld [vmem:[#allocation2 + $0x1164] sm:$0xf0] }
 0x378   :  { %8773 = vmatpush.bf16.msrb.mxu1 %v11719_v28  ;;  %8742 = vmatmul.bf16.vlgmr.msra.gmra.mxu2 %v16258_v29  ;;  %v8510_v28 = vadd.f32 %v8509_v52, %v16472_v17  ;;  %v12031_v62 = vor.u32 %v15353_v53, %v12030_v24  ;;  %v11623_v17 = vor.u32 %v15251_v6, %v11622_v41  ;;  %v11382_v53 = vld [vmem:[#allocation2 + $0xc40] sm:$0xf]  ;;  %v15335_v41 = vld [vmem:[#allocation2 + $0x10d4] sm:$0xf0]  ;;  %v15185_v6 = vld [vmem:[#allocation2 + $0xc24] sm:$0xf0] }
 0x379   :  { %8786 = vmatpush.bf16.msrb.mxu2 %v11911_v30  ;;  %8755 = vmatmul.bf16.vlgmr.msra.gmra.mxu3 %v16262_v32  ;;  %v11455_v30 = vor.u32 %v15209_v59, %v11454_v39  ;;  %v11982_v59 = vld [vmem:[#allocation2 + $0x10f0] sm:$0xf]  ;;  %v11599_v52 = vor.u32 %v15245_v56, %v11598_v55  ;;  %v12486_v56 = vld [vmem:[#allocation2 + $0x14e0] sm:$0xf] }
 0x37a   :  { %8799 = vmatpush.bf16.msrb.mxu3 %v12103_v51  ;;  %v11430_v51 = vld [vmem:[#allocation2 + $0xca0] sm:$0xf]  ;;  %v8523_v1 = vadd.f32 %v8522_v34, %v8510_v28  ;;  %v15191_v28 = vld [vmem:[#allocation2 + $0xc54] sm:$0xf0]  ;;  %v11983_v34 = vor.u32 %v15341_v60, %v11982_v59 }
 0x37b   :  { %8761 = vmatpush.bf16.msrb.mxu0 %v11503_v42  ;;  %v11814_v42 = vld [vmem:[#allocation2 + $0xfa0] sm:$0xf]  ;;  %v11431_v50 = vor.u32 %v15203_v40, %v11430_v51  ;;  %v8535_v36 = vpop.f32.mrf.mxu2  ;;  %v15287_v51 = vld [vmem:[#allocation2 + $0xf54] sm:$0xf0] }
 0x37c   :  { %8774 = vmatpush.bf16.msrb.mxu1 %v11695_v18  ;;  %v15299_v18 = vld [vmem:[#allocation2 + $0xfb4] sm:$0xf0]  ;;  %v8548_v39 = vpop.f32.mrf.mxu3  ;;  %v8524_v43 = vpop.f32.mrf.mxu1  ;;  %v11958_v40 = vld [vmem:[#allocation2 + $0x10c0] sm:$0xf] }
 0x37d   :  { %8787 = vmatpush.bf16.msrb.mxu2 %v11887_v44  ;;  %v12006_v44 = vld [vmem:[#allocation2 + $0x1120] sm:$0xf]  ;;  %v11815_v54 = vor.u32 %v15299_v18, %v11814_v42  ;;  %v15515_v59 = vld [vmem:[#allocation2 + $0x1674] sm:$0xf0] }
 0x37e   :  { %8800 = vmatpush.bf16.msrb.mxu3 %v12079_v4  ;;  %v11406_v4 = vld [vmem:[#allocation2 + $0xc70] sm:$0xf]  ;;  %v12007_v33 = vor.u32 %v15347_v45, %v12006_v44  ;;  %v15233_v45 = vld [vmem:[#allocation2 + $0xda4] sm:$0xf0]  ;;  %v15563_v43 = vld [vmem:[#allocation2 + $0x17f4] sm:$0xf0] }
 0x37f   :  { %8762 = vmatpush.bf16.msrb.mxu0 %v11479_v57  ;;  %v11790_v57 = vld [vmem:[#allocation2 + $0xf70] sm:$0xf]  ;;  %v11407_v23 = vor.u32 %v15197_v37, %v11406_v4  ;;  %v15329_v37 = vld [vmem:[#allocation2 + $0x10a4] sm:$0xf0] }
 0x380   :  { %8775 = vmatpush.bf16.msrb.mxu1 %v11671_v58  ;;  %v15293_v58 = vld [vmem:[#allocation2 + $0xf84] sm:$0xf0]  ;;  %v11550_v44 = vld [vmem:[#allocation2 + $0xd90] sm:$0xf] }
 0x381   :  { %8788 = vmatpush.bf16.msrb.mxu2 %v11863_v25  ;;  %v8536_v25 = vadd.f32 %v8535_v36, %v8523_v1  ;;  %v11791_v24 = vor.u32 %v15293_v58, %v11790_v57  ;;  %v11358_v1 = vld [vmem:[#allocation2 + $0xc10] sm:$0xf]  ;;  %v15419_v36 = vld [vmem:[#allocation2 + $0x1374] sm:$0xf0]  ;;  %v11551_v60 = vor.u32 %v15233_v45, %v11550_v44  ;;  %v12246_v44 = vld [vmem:[#allocation2 + $0x1300] sm:$0xf] }
 0x382   :  { %8801 = vmatpush.bf16.msrb.mxu3 %v12055_v61  ;;  %v8511_v61 = vpop.f32.mrf.mxu0  ;;  %v11934_v4 = vld [vmem:[#allocation2 + $0x1090] sm:$0xf]  ;;  %v11359_v58 = vor.u32 %v15185_v6, %v11358_v1  ;;  %v15557_v1 = vld [vmem:[#allocation2 + $0x17c4] sm:$0xf0]  ;;  %v15407_v45 = vld [vmem:[#allocation2 + $0x1314] sm:$0xf0] }
 0x383   :  { %8763 = vmatpush.bf16.msrb.mxu0 %v11455_v30  ;;  %v16479_v0 = vadd.f32 %v8548_v39, %v8536_v25  ;;  %v11574_v30 = vld [vmem:[#allocation2 + $0xdc0] sm:$0xf]  ;;  %v8537_v55 = vpop.f32.mrf.mxu2  ;;  %v15467_v25 = vld [vmem:[#allocation2 + $0x14f4] sm:$0xf0] }
 0x384   :  { %8776 = vmatpush.bf16.msrb.mxu1 %v11647_v63  ;;  %v15239_v63 = vld [vmem:[#allocation2 + $0xdd4] sm:$0xf0]  ;;  %v8550_v57 = vpop.f32.mrf.mxu3  ;;  %v12678_v39 = vld [vmem:[#allocation2 + $0x1660] sm:$0xf] }
 0x385   :  { %8789 = vmatpush.bf16.msrb.mxu2 %v11839_v35  ;;  %v11766_v35 = vld [vmem:[#allocation2 + $0xf40] sm:$0xf]  ;;  %v11575_v42 = vor.u32 %v15239_v63, %v11574_v30  ;;  %v12270_v30 = vld [vmem:[#allocation2 + $0x1330] sm:$0xf] }
 0x386   :  { %8802 = vmatpush.bf16.msrb.mxu3 %v12031_v62  ;;  %v11383_v62 = vor.u32 %v15191_v28, %v11382_v53  ;;  %v11767_v18 = vor.u32 %v15287_v51, %v11766_v35  ;;  %v12487_v53 = vor.u32 %v15467_v25, %v12486_v56  ;;  %v12679_v28 = vor.u32 %v15515_v59, %v12678_v39  ;;  %v12462_v63 = vld [vmem:[#allocation2 + $0x14b0] sm:$0xf]  ;;  %v15461_v51 = vld [vmem:[#allocation2 + $0x14c4] sm:$0xf0]  ;;  %v12822_v55 = vld [vmem:[#allocation2 + $0x1780] sm:$0xf] }
 0x387   :  { %8764 = vmatpush.bf16.msrb.mxu0 %v11431_v50  ;;  %v11742_v50 = vld [vmem:[#allocation2 + $0xf10] sm:$0xf]  ;;  %v15401_v25 = vld [vmem:[#allocation2 + $0x12e4] sm:$0xf0] }
 0x388   :  { %8777 = vmatpush.bf16.msrb.mxu1 %v11623_v17  ;;  %v11959_v17 = vor.u32 %v15335_v41, %v11958_v40  ;;  %v12654_v40 = vld [vmem:[#allocation2 + $0x1630] sm:$0xf]  ;;  %v15509_v41 = vld [vmem:[#allocation2 + $0x1644] sm:$0xf0] }
 0x389   :  { %8790 = vmatpush.bf16.msrb.mxu2 %v11815_v54  ;;  %v15281_v54 = vld [vmem:[#allocation2 + $0xf24] sm:$0xf0]  ;;  %v12414_v39 = vld [vmem:[#allocation2 + $0x1450] sm:$0xf] }
 0x38a   :  { %8803 = vmatpush.bf16.msrb.mxu3 %v12007_v33  ;;  %v12294_v33 = vld [vmem:[#allocation2 + $0x1360] sm:$0xf]  ;;  %v11743_v61 = vor.u32 %v15281_v54, %v11742_v50  ;;  %v15455_v54 = vld [vmem:[#allocation2 + $0x1494] sm:$0xf0] }
 0x38b   :  { %8765 = vmatpush.bf16.msrb.mxu0 %v11407_v23  ;;  %v12870_v23 = vld [vmem:[#allocation2 + $0x17e0] sm:$0xf] }
 0x38c   :  { %8778 = vmatpush.bf16.msrb.mxu1 %v11599_v52  ;;  %v11935_v52 = vor.u32 %v15329_v37, %v11934_v4  ;;  %v12871_v35 = vor.u32 %v15563_v43, %v12870_v23  ;;  %v12438_v50 = vld [vmem:[#allocation2 + $0x1480] sm:$0xf]  ;;  %v15503_v37 = vld [vmem:[#allocation2 + $0x1614] sm:$0xf0]  ;;  %v15497_v23 = vld [vmem:[#allocation2 + $0x15e4] sm:$0xf0] }
 0x38d   :  { %8791 = vmatpush.bf16.msrb.mxu2 %v11791_v24  ;;  %v12295_v24 = vor.u32 %v15419_v36, %v12294_v33  ;;  %v12630_v4 = vld [vmem:[#allocation2 + $0x1600] sm:$0xf]  ;;  %v15551_v33 = vld [vmem:[#allocation2 + $0x1794] sm:$0xf0]  ;;  %v12247_v36 = vor.u32 %v15407_v45, %v12246_v44  ;;  %v12439_v56 = vor.u32 %v15455_v54, %v12438_v50  ;;  %v15389_v54 = vld [vmem:[#allocation2 + $0x1284] sm:$0xf0] }
 0x38e   :  { %8804 = vmatpush.bf16.msrb.mxu3 %v11983_v34  ;;  %v15413_v34 = vld [vmem:[#allocation2 + $0x1344] sm:$0xf0]  ;;  %v12631_v57 = vor.u32 %v15503_v37, %v12630_v4  ;;  %v12823_v59 = vor.u32 %v15551_v33, %v12822_v55  ;;  %v15539_v44 = vld [vmem:[#allocation2 + $0x1734] sm:$0xf0]  ;;  %v12366_v4 = vld [vmem:[#allocation2 + $0x13f0] sm:$0xf] }
 0x38f   :  { %8766 = vmatpush.bf16.msrb.mxu0 %v11383_v62  ;;  %v12846_v62 = vld [vmem:[#allocation2 + $0x17b0] sm:$0xf]  ;;  %v12271_v6 = vor.u32 %v15413_v34, %v12270_v30  ;;  %v15437_v33 = vld [vmem:[#allocation2 + $0x1404] sm:$0xf0] }
 0x390   :  { %8779 = vmatpush.bf16.msrb.mxu1 %v11575_v42  ;;  %v12463_v42 = vor.u32 %v15461_v51, %v12462_v63  ;;  %v15395_v51 = vld [vmem:[#allocation2 + $0x12b4] sm:$0xf0] }
 0x391   :  { %8792 = vmatpush.bf16.msrb.mxu2 %v11767_v18  ;;  %v12655_v18 = vor.u32 %v15509_v41, %v12654_v40  ;;  %v12390_v40 = vld [vmem:[#allocation2 + $0x1420] sm:$0xf] }
 0x392   :  { %8805 = vmatpush.bf16.msrb.mxu3 %v11959_v17  ;;  %v12847_v17 = vor.u32 %v15557_v1, %v12846_v62  ;;  %v15443_v1 = vld [vmem:[#allocation2 + $0x1434] sm:$0xf0] }
 0x393   :  { %8767 = vmatpush.bf16.msrb.mxu0 %v11359_v58  ;;  %v12222_v58 = vld [vmem:[#allocation2 + $0x12d0] sm:$0xf]  ;;  %v8561_v43 = vpop.f32.mrf.mxu0 }
 0x394   :  { %8780 = vmatpush.bf16.msrb.mxu1 %v11551_v60  ;;  %v15449_v60 = vld [vmem:[#allocation2 + $0x1464] sm:$0xf0]  ;;  %v8574_v30 = vpop.f32.mrf.mxu1 }
 0x395   :  { %8793 = vmatpush.bf16.msrb.mxu2 %v11743_v61  ;;  %v12606_v61 = vld [vmem:[#allocation2 + $0x15d0] sm:$0xf]  ;;  %v12415_v34 = vor.u32 %v15449_v60, %v12414_v39  ;;  %v15533_v39 = vld [vmem:[#allocation2 + $0x1704] sm:$0xf0] }
 0x396   :  { %8806 = vmatpush.bf16.msrb.mxu3 %v11935_v52  ;;  %8768 = vmatmul.bf16.vlgmr.msrb.gmra.mxu0 %v16273_v8  ;;  %v12798_v52 = vld [vmem:[#allocation2 + $0x1750] sm:$0xf]  ;;  %v12607_v63 = vor.u32 %v15497_v23, %v12606_v61 }
 0x397   :  { %8812 = vmatpush.bf16.msra.mxu0 %v12295_v24  ;;  %8781 = vmatmul.bf16.vlgmr.msrb.gmra.mxu1 %v16277_v12  ;;  %v15545_v24 = vld [vmem:[#allocation2 + $0x1764] sm:$0xf0] }
 0x398   :  { %8825 = vmatpush.bf16.msra.mxu1 %v12487_v53  ;;  %8794 = vmatmul.bf16.vlgmr.msrb.gmra.mxu2 %v16275_v11  ;;  %v8562_v53 = vadd.f32 %v8561_v43, %v16479_v0  ;;  %v12799_v41 = vor.u32 %v15545_v24, %v12798_v52  ;;  %v12391_v0 = vor.u32 %v15443_v1, %v12390_v40  ;;  %v12150_v24 = vld [vmem:[#allocation2 + $0x1240] sm:$0xf]  ;;  %v15527_v40 = vld [vmem:[#allocation2 + $0x16d4] sm:$0xf0]  ;;  %v15377_v1 = vld [vmem:[#allocation2 + $0x1224] sm:$0xf0] }
 0x399   :  { %8838 = vmatpush.bf16.msra.mxu2 %v12679_v28  ;;  %8807 = vmatmul.bf16.vlgmr.msrb.gmra.mxu3 %v16279_v15  ;;  %v12223_v28 = vor.u32 %v15401_v25, %v12222_v58  ;;  %v12750_v25 = vld [vmem:[#allocation2 + $0x16f0] sm:$0xf]  ;;  %v12367_v43 = vor.u32 %v15437_v33, %v12366_v4  ;;  %v13254_v33 = vld [vmem:[#allocation2 + $0x1ae0] sm:$0xf] }
 0x39a   :  { %8851 = vmatpush.bf16.msra.mxu3 %v12871_v35  ;;  %v12198_v35 = vld [vmem:[#allocation2 + $0x12a0] sm:$0xf]  ;;  %v8575_v62 = vadd.f32 %v8574_v30, %v8562_v53  ;;  %v15383_v53 = vld [vmem:[#allocation2 + $0x1254] sm:$0xf0]  ;;  %v12751_v30 = vor.u32 %v15533_v39, %v12750_v25 }
 0x39b   :  { %8813 = vmatpush.bf16.msra.mxu0 %v12271_v6  ;;  %v12582_v6 = vld [vmem:[#allocation2 + $0x15a0] sm:$0xf]  ;;  %v12199_v45 = vor.u32 %v15395_v51, %v12198_v35  ;;  %v8587_v55 = vpop.f32.mrf.mxu2  ;;  %v15479_v35 = vld [vmem:[#allocation2 + $0x1554] sm:$0xf0] }
 0x39c   :  { %8826 = vmatpush.bf16.msra.mxu1 %v12463_v42  ;;  %v15491_v42 = vld [vmem:[#allocation2 + $0x15b4] sm:$0xf0]  ;;  %v8600_v58 = vpop.f32.mrf.mxu3  ;;  %v8576_v61 = vpop.f32.mrf.mxu1  ;;  %v12726_v51 = vld [vmem:[#allocation2 + $0x16c0] sm:$0xf] }
 0x39d   :  { %8839 = vmatpush.bf16.msra.mxu2 %v12655_v18  ;;  %v12774_v18 = vld [vmem:[#allocation2 + $0x1720] sm:$0xf]  ;;  %v12583_v50 = vor.u32 %v15491_v42, %v12582_v6  ;;  %v15707_v25 = vld [vmem:[#allocation2 + $0x1c74] sm:$0xf0] }
 0x39e   :  { %8852 = vmatpush.bf16.msra.mxu3 %v12847_v17  ;;  %v12174_v17 = vld [vmem:[#allocation2 + $0x1270] sm:$0xf]  ;;  %v12775_v37 = vor.u32 %v15539_v44, %v12774_v18  ;;  %v15425_v44 = vld [vmem:[#allocation2 + $0x13a4] sm:$0xf0]  ;;  %v15755_v61 = vld [vmem:[#allocation2 + $0x1df4] sm:$0xf0] }
 0x39f   :  { %8814 = vmatpush.bf16.msra.mxu0 %v12247_v36  ;;  %v12558_v36 = vld [vmem:[#allocation2 + $0x1570] sm:$0xf]  ;;  %v12175_v60 = vor.u32 %v15389_v54, %v12174_v17  ;;  %v15521_v54 = vld [vmem:[#allocation2 + $0x16a4] sm:$0xf0] }
 0x3a0   :  { %8827 = vmatpush.bf16.msra.mxu1 %v12439_v56  ;;  %v15485_v56 = vld [vmem:[#allocation2 + $0x1584] sm:$0xf0]  ;;  %v12318_v18 = vld [vmem:[#allocation2 + $0x1390] sm:$0xf] }
 0x3a1   :  { %8840 = vmatpush.bf16.msra.mxu2 %v12631_v57  ;;  %v8588_v57 = vadd.f32 %v8587_v55, %v8575_v62  ;;  %v12559_v52 = vor.u32 %v15485_v56, %v12558_v36  ;;  %v12126_v62 = vld [vmem:[#allocation2 + $0x1210] sm:$0xf]  ;;  %v15611_v55 = vld [vmem:[#allocation2 + $0x1974] sm:$0xf0]  ;;  %v12319_v39 = vor.u32 %v15425_v44, %v12318_v18  ;;  %v13014_v18 = vld [vmem:[#allocation2 + $0x1900] sm:$0xf] }
 0x3a2   :  { %8853 = vmatpush.bf16.msra.mxu3 %v12823_v59  ;;  %v8563_v59 = vpop.f32.mrf.mxu0  ;;  %v12702_v17 = vld [vmem:[#allocation2 + $0x1690] sm:$0xf]  ;;  %v12127_v56 = vor.u32 %v15377_v1, %v12126_v62  ;;  %v15749_v62 = vld [vmem:[#allocation2 + $0x1dc4] sm:$0xf0]  ;;  %v15599_v44 = vld [vmem:[#allocation2 + $0x1914] sm:$0xf0] }
 0x3a3   :  { %8815 = vmatpush.bf16.msra.mxu0 %v12223_v28  ;;  %v16486_v23 = vadd.f32 %v8600_v58, %v8588_v57  ;;  %v12342_v28 = vld [vmem:[#allocation2 + $0x13c0] sm:$0xf]  ;;  %v8589_v4 = vpop.f32.mrf.mxu2  ;;  %v15659_v57 = vld [vmem:[#allocation2 + $0x1af4] sm:$0xf0] }
 0x3a4   :  { %8828 = vmatpush.bf16.msra.mxu1 %v12415_v34  ;;  %v15431_v34 = vld [vmem:[#allocation2 + $0x13d4] sm:$0xf0]  ;;  %v8602_v36 = vpop.f32.mrf.mxu3  ;;  %v13446_v58 = vld [vmem:[#allocation2 + $0x1c60] sm:$0xf] }
 0x3a5   :  { %8841 = vmatpush.bf16.msra.mxu2 %v12607_v63  ;;  %v12534_v63 = vld [vmem:[#allocation2 + $0x1540] sm:$0xf]  ;;  %v12343_v6 = vor.u32 %v15431_v34, %v12342_v28  ;;  %v13038_v28 = vld [vmem:[#allocation2 + $0x1930] sm:$0xf] }
 0x3a6   :  { %8854 = vmatpush.bf16.msra.mxu3 %v12799_v41  ;;  %v12151_v41 = vor.u32 %v15383_v53, %v12150_v24  ;;  %v12535_v42 = vor.u32 %v15479_v35, %v12534_v63  ;;  %v13255_v24 = vor.u32 %v15659_v57, %v13254_v33  ;;  %v13447_v53 = vor.u32 %v15707_v25, %v13446_v58  ;;  %v13230_v34 = vld [vmem:[#allocation2 + $0x1ab0] sm:$0xf]  ;;  %v15653_v35 = vld [vmem:[#allocation2 + $0x1ac4] sm:$0xf0]  ;;  %v13590_v4 = vld [vmem:[#allocation2 + $0x1d80] sm:$0xf] }
 0x3a7   :  { %8816 = vmatpush.bf16.msra.mxu0 %v12199_v45  ;;  %v12510_v45 = vld [vmem:[#allocation2 + $0x1510] sm:$0xf]  ;;  %v15593_v57 = vld [vmem:[#allocation2 + $0x18e4] sm:$0xf0] }
 0x3a8   :  { %8829 = vmatpush.bf16.msra.mxu1 %v12391_v0  ;;  %v12727_v0 = vor.u32 %v15527_v40, %v12726_v51  ;;  %v13422_v51 = vld [vmem:[#allocation2 + $0x1c30] sm:$0xf]  ;;  %v15701_v40 = vld [vmem:[#allocation2 + $0x1c44] sm:$0xf0] }
 0x3a9   :  { %8842 = vmatpush.bf16.msra.mxu2 %v12583_v50  ;;  %v15473_v50 = vld [vmem:[#allocation2 + $0x1524] sm:$0xf0]  ;;  %v13182_v58 = vld [vmem:[#allocation2 + $0x1a50] sm:$0xf] }
 0x3aa   :  { %8855 = vmatpush.bf16.msra.mxu3 %v12775_v37  ;;  %v13062_v37 = vld [vmem:[#allocation2 + $0x1960] sm:$0xf]  ;;  %v12511_v59 = vor.u32 %v15473_v50, %v12510_v45  ;;  %v15647_v50 = vld [vmem:[#allocation2 + $0x1a94] sm:$0xf0] }
 0x3ab   :  { %8817 = vmatpush.bf16.msra.mxu0 %v12175_v60  ;;  %v13638_v60 = vld [vmem:[#allocation2 + $0x1de0] sm:$0xf] }
 0x3ac   :  { %8830 = vmatpush.bf16.msra.mxu1 %v12367_v43  ;;  %v12703_v43 = vor.u32 %v15521_v54, %v12702_v17  ;;  %v13639_v63 = vor.u32 %v15755_v61, %v13638_v60  ;;  %v13206_v45 = vld [vmem:[#allocation2 + $0x1a80] sm:$0xf]  ;;  %v15695_v54 = vld [vmem:[#allocation2 + $0x1c14] sm:$0xf0]  ;;  %v15689_v60 = vld [vmem:[#allocation2 + $0x1be4] sm:$0xf0] }
 0x3ad   :  { %8843 = vmatpush.bf16.msra.mxu2 %v12559_v52  ;;  %v13063_v52 = vor.u32 %v15611_v55, %v13062_v37  ;;  %v13398_v17 = vld [vmem:[#allocation2 + $0x1c00] sm:$0xf]  ;;  %v15743_v37 = vld [vmem:[#allocation2 + $0x1d94] sm:$0xf0]  ;;  %v13015_v55 = vor.u32 %v15599_v44, %v13014_v18  ;;  %v13207_v33 = vor.u32 %v15647_v50, %v13206_v45  ;;  %v15581_v50 = vld [vmem:[#allocation2 + $0x1884] sm:$0xf0] }
 0x3ae   :  { %8856 = vmatpush.bf16.msra.mxu3 %v12751_v30  ;;  %v15605_v30 = vld [vmem:[#allocation2 + $0x1944] sm:$0xf0]  ;;  %v13399_v36 = vor.u32 %v15695_v54, %v13398_v17  ;;  %v13591_v25 = vor.u32 %v15743_v37, %v13590_v4  ;;  %v15731_v18 = vld [vmem:[#allocation2 + $0x1d34] sm:$0xf0]  ;;  %v13134_v17 = vld [vmem:[#allocation2 + $0x19f0] sm:$0xf] }
 0x3af   :  { %8818 = vmatpush.bf16.msra.mxu0 %v12151_v41  ;;  %v13614_v41 = vld [vmem:[#allocation2 + $0x1db0] sm:$0xf]  ;;  %v13039_v1 = vor.u32 %v15605_v30, %v13038_v28  ;;  %v15629_v37 = vld [vmem:[#allocation2 + $0x1a04] sm:$0xf0] }
 0x3b0   :  { %8831 = vmatpush.bf16.msra.mxu1 %v12343_v6  ;;  %v13231_v6 = vor.u32 %v15653_v35, %v13230_v34  ;;  %v15587_v35 = vld [vmem:[#allocation2 + $0x18b4] sm:$0xf0] }
 0x3b1   :  { %8844 = vmatpush.bf16.msra.mxu2 %v12535_v42  ;;  %v13423_v42 = vor.u32 %v15701_v40, %v13422_v51  ;;  %v13158_v51 = vld [vmem:[#allocation2 + $0x1a20] sm:$0xf] }
 0x3b2   :  { %8857 = vmatpush.bf16.msra.mxu3 %v12727_v0  ;;  %v13615_v0 = vor.u32 %v15749_v62, %v13614_v41  ;;  %v15635_v62 = vld [vmem:[#allocation2 + $0x1a34] sm:$0xf0] }
 0x3b3   :  { %8819 = vmatpush.bf16.msra.mxu0 %v12127_v56  ;;  %v12990_v56 = vld [vmem:[#allocation2 + $0x18d0] sm:$0xf]  ;;  %v8613_v61 = vpop.f32.mrf.mxu0 }
 0x3b4   :  { %8832 = vmatpush.bf16.msra.mxu1 %v12319_v39  ;;  %v15641_v39 = vld [vmem:[#allocation2 + $0x1a64] sm:$0xf0]  ;;  %v8626_v28 = vpop.f32.mrf.mxu1 }
 0x3b5   :  { %8845 = vmatpush.bf16.msra.mxu2 %v12511_v59  ;;  %v13374_v59 = vld [vmem:[#allocation2 + $0x1bd0] sm:$0xf]  ;;  %v13183_v30 = vor.u32 %v15641_v39, %v13182_v58  ;;  %v15725_v58 = vld [vmem:[#allocation2 + $0x1d04] sm:$0xf0] }
 0x3b6   :  { %8858 = vmatpush.bf16.msra.mxu3 %v12703_v43  ;;  %8820 = vmatmul.bf16.vlgmr.msra.gmra.mxu0 %v16285_v46  ;;  %v13566_v43 = vld [vmem:[#allocation2 + $0x1d50] sm:$0xf]  ;;  %v13375_v34 = vor.u32 %v15689_v60, %v13374_v59 }
 0x3b7   :  { %8864 = vmatpush.bf16.msrb.mxu0 %v13063_v52  ;;  %8833 = vmatmul.bf16.vlgmr.msra.gmra.mxu1 %v16289_v48  ;;  %v15737_v52 = vld [vmem:[#allocation2 + $0x1d64] sm:$0xf0] }
 0x3b8   :  { %8877 = vmatpush.bf16.msrb.mxu1 %v13255_v24  ;;  %8846 = vmatmul.bf16.vlgmr.msra.gmra.mxu2 %v16287_v47  ;;  %v8614_v24 = vadd.f32 %v8613_v61, %v16486_v23  ;;  %v13567_v40 = vor.u32 %v15737_v52, %v13566_v43  ;;  %v13159_v23 = vor.u32 %v15635_v62, %v13158_v51  ;;  %v12918_v52 = vld [vmem:[#allocation2 + $0x1840] sm:$0xf]  ;;  %v15719_v51 = vld [vmem:[#allocation2 + $0x1cd4] sm:$0xf0]  ;;  %v15569_v62 = vld [vmem:[#allocation2 + $0x1824] sm:$0xf0] }
 0x3b9   :  { %8890 = vmatpush.bf16.msrb.mxu2 %v13447_v53  ;;  %8859 = vmatmul.bf16.vlgmr.msra.gmra.mxu3 %v16291_v49  ;;  %v12991_v53 = vor.u32 %v15593_v57, %v12990_v56  ;;  %v13518_v57 = vld [vmem:[#allocation2 + $0x1cf0] sm:$0xf]  ;;  %v13135_v61 = vor.u32 %v15629_v37, %v13134_v17  ;;  %v14022_v37 = vld [vmem:[#allocation2 + $0x20e0] sm:$0xf] }
 0x3ba   :  { %8903 = vmatpush.bf16.msrb.mxu3 %v13639_v63  ;;  %v12966_v63 = vld [vmem:[#allocation2 + $0x18a0] sm:$0xf]  ;;  %v8627_v41 = vadd.f32 %v8626_v28, %v8614_v24  ;;  %v15575_v24 = vld [vmem:[#allocation2 + $0x1854] sm:$0xf0]  ;;  %v13519_v28 = vor.u32 %v15725_v58, %v13518_v57 }
 0x3bb   :  { %8865 = vmatpush.bf16.msrb.mxu0 %v13039_v1  ;;  %v13350_v1 = vld [vmem:[#allocation2 + $0x1ba0] sm:$0xf]  ;;  %v12967_v44 = vor.u32 %v15587_v35, %v12966_v63  ;;  %v8639_v4 = vpop.f32.mrf.mxu2  ;;  %v15671_v63 = vld [vmem:[#allocation2 + $0x1b54] sm:$0xf0] }
 0x3bc   :  { %8878 = vmatpush.bf16.msrb.mxu1 %v13231_v6  ;;  %v15683_v6 = vld [vmem:[#allocation2 + $0x1bb4] sm:$0xf0]  ;;  %v8652_v56 = vpop.f32.mrf.mxu3  ;;  %v8628_v59 = vpop.f32.mrf.mxu1  ;;  %v13494_v35 = vld [vmem:[#allocation2 + $0x1cc0] sm:$0xf] }
 0x3bd   :  { %8891 = vmatpush.bf16.msrb.mxu2 %v13423_v42  ;;  %v13542_v42 = vld [vmem:[#allocation2 + $0x1d20] sm:$0xf]  ;;  %v13351_v45 = vor.u32 %v15683_v6, %v13350_v1  ;;  %v15899_v57 = vld [vmem:[#allocation2 + $0x2274] sm:$0xf0] }
 0x3be   :  { %8904 = vmatpush.bf16.msrb.mxu3 %v13615_v0  ;;  %v12942_v0 = vld [vmem:[#allocation2 + $0x1870] sm:$0xf]  ;;  %v13543_v54 = vor.u32 %v15731_v18, %v13542_v42  ;;  %v15617_v18 = vld [vmem:[#allocation2 + $0x19a4] sm:$0xf0]  ;;  %v15947_v59 = vld [vmem:[#allocation2 + $0x23f4] sm:$0xf0] }
 0x3bf   :  { %8866 = vmatpush.bf16.msrb.mxu0 %v13015_v55  ;;  %v13326_v55 = vld [vmem:[#allocation2 + $0x1b70] sm:$0xf]  ;;  %v12943_v39 = vor.u32 %v15581_v50, %v12942_v0  ;;  %v15713_v50 = vld [vmem:[#allocation2 + $0x1ca4] sm:$0xf0] }
 0x3c0   :  { %8879 = vmatpush.bf16.msrb.mxu1 %v13207_v33  ;;  %v15677_v33 = vld [vmem:[#allocation2 + $0x1b84] sm:$0xf0]  ;;  %v13086_v42 = vld [vmem:[#allocation2 + $0x1990] sm:$0xf] }
 0x3c1   :  { %8892 = vmatpush.bf16.msrb.mxu2 %v13399_v36  ;;  %v8640_v36 = vadd.f32 %v8639_v4, %v8627_v41  ;;  %v13327_v43 = vor.u32 %v15677_v33, %v13326_v55  ;;  %v12894_v41 = vld [vmem:[#allocation2 + $0x1810] sm:$0xf]  ;;  %v15803_v4 = vld [vmem:[#allocation2 + $0x1f74] sm:$0xf0]  ;;  %v13087_v58 = vor.u32 %v15617_v18, %v13086_v42  ;;  %v13782_v42 = vld [vmem:[#allocation2 + $0x1f00] sm:$0xf] }
 0x3c2   :  { %8905 = vmatpush.bf16.msrb.mxu3 %v13591_v25  ;;  %v8615_v25 = vpop.f32.mrf.mxu0  ;;  %v13470_v0 = vld [vmem:[#allocation2 + $0x1c90] sm:$0xf]  ;;  %v12895_v33 = vor.u32 %v15569_v62, %v12894_v41  ;;  %v15941_v41 = vld [vmem:[#allocation2 + $0x23c4] sm:$0xf0]  ;;  %v15791_v18 = vld [vmem:[#allocation2 + $0x1f14] sm:$0xf0] }
 0x3c3   :  { %8867 = vmatpush.bf16.msrb.mxu0 %v12991_v53  ;;  %v16493_v60 = vadd.f32 %v8652_v56, %v8640_v36  ;;  %v13110_v53 = vld [vmem:[#allocation2 + $0x19c0] sm:$0xf]  ;;  %v8641_v17 = vpop.f32.mrf.mxu2  ;;  %v15851_v36 = vld [vmem:[#allocation2 + $0x20f4] sm:$0xf0] }
 0x3c4   :  { %8880 = vmatpush.bf16.msrb.mxu1 %v13183_v30  ;;  %v15623_v30 = vld [vmem:[#allocation2 + $0x19d4] sm:$0xf0]  ;;  %v8654_v55 = vpop.f32.mrf.mxu3  ;;  %v14214_v56 = vld [vmem:[#allocation2 + $0x2260] sm:$0xf] }
 0x3c5   :  { %8893 = vmatpush.bf16.msrb.mxu2 %v13375_v34  ;;  %v13302_v34 = vld [vmem:[#allocation2 + $0x1b40] sm:$0xf]  ;;  %v13111_v1 = vor.u32 %v15623_v30, %v13110_v53  ;;  %v13806_v53 = vld [vmem:[#allocation2 + $0x1f30] sm:$0xf] }
 0x3c6   :  { %8906 = vmatpush.bf16.msrb.mxu3 %v13567_v40  ;;  %v12919_v40 = vor.u32 %v15575_v24, %v12918_v52  ;;  %v13303_v6 = vor.u32 %v15671_v63, %v13302_v34  ;;  %v14023_v52 = vor.u32 %v15851_v36, %v14022_v37  ;;  %v14215_v24 = vor.u32 %v15899_v57, %v14214_v56  ;;  %v13998_v30 = vld [vmem:[#allocation2 + $0x20b0] sm:$0xf]  ;;  %v15845_v63 = vld [vmem:[#allocation2 + $0x20c4] sm:$0xf0]  ;;  %v14358_v17 = vld [vmem:[#allocation2 + $0x2380] sm:$0xf] }
 0x3c7   :  { %8868 = vmatpush.bf16.msrb.mxu0 %v12967_v44  ;;  %v13278_v44 = vld [vmem:[#allocation2 + $0x1b10] sm:$0xf]  ;;  %v15785_v36 = vld [vmem:[#allocation2 + $0x1ee4] sm:$0xf0]  ;;  %v16060_v57 = vld [vmem:[#allocation5] sm:$0x3f] }
 0x3c8   :  { %8881 = vmatpush.bf16.msrb.mxu1 %v13159_v23  ;;  %v13495_v23 = vor.u32 %v15719_v51, %v13494_v35  ;;  %v14190_v35 = vld [vmem:[#allocation2 + $0x2230] sm:$0xf]  ;;  %v15893_v51 = vld [vmem:[#allocation2 + $0x2244] sm:$0xf0] }
 0x3c9   :  { %8894 = vmatpush.bf16.msrb.mxu2 %v13351_v45  ;;  %v15665_v45 = vld [vmem:[#allocation2 + $0x1b24] sm:$0xf0]  ;;  %v13758_v37 = vld [vmem:[#allocation2 + $0x1ed0] sm:$0xf] }
 0x3ca   :  { %8907 = vmatpush.bf16.msrb.mxu3 %v13543_v54  ;;  %v13830_v54 = vld [vmem:[#allocation2 + $0x1f60] sm:$0xf]  ;;  %v13279_v25 = vor.u32 %v15665_v45, %v13278_v44  ;;  %v15839_v45 = vld [vmem:[#allocation2 + $0x2094] sm:$0xf0]  ;;  %v13950_v56 = vld [vmem:[#allocation2 + $0x2050] sm:$0xf] }
 0x3cb   :  { %8869 = vmatpush.bf16.msrb.mxu0 %v12943_v39  ;;  %v14406_v39 = vld [vmem:[#allocation2 + $0x23e0] sm:$0xf] }
 0x3cc   :  { %8882 = vmatpush.bf16.msrb.mxu1 %v13135_v61  ;;  %v13471_v61 = vor.u32 %v15713_v50, %v13470_v0  ;;  %v14407_v34 = vor.u32 %v15947_v59, %v14406_v39  ;;  %v13974_v44 = vld [vmem:[#allocation2 + $0x2080] sm:$0xf]  ;;  %v15887_v50 = vld [vmem:[#allocation2 + $0x2214] sm:$0xf0]  ;;  %v15833_v39 = vld [vmem:[#allocation2 + $0x2064] sm:$0xf0] }
 0x3cd   :  { %8895 = vmatpush.bf16.msrb.mxu2 %v13327_v43  ;;  %v13831_v43 = vor.u32 %v15803_v4, %v13830_v54  ;;  %v14166_v0 = vld [vmem:[#allocation2 + $0x2200] sm:$0xf]  ;;  %v15935_v54 = vld [vmem:[#allocation2 + $0x2394] sm:$0xf0]  ;;  %v13783_v4 = vor.u32 %v15791_v18, %v13782_v42  ;;  %v13975_v55 = vor.u32 %v15839_v45, %v13974_v44  ;;  %v14142_v59 = vld [vmem:[#allocation2 + $0x21d0] sm:$0xf] }
 0x3ce   :  { %8908 = vmatpush.bf16.msrb.mxu3 %v13519_v28  ;;  %v15797_v28 = vld [vmem:[#allocation2 + $0x1f44] sm:$0xf0]  ;;  %v14310_v42 = vld [vmem:[#allocation2 + $0x2320] sm:$0xf]  ;;  %v15923_v18 = vld [vmem:[#allocation2 + $0x2334] sm:$0xf0] }
 0x3cf   :  { %8870 = vmatpush.bf16.msrb.mxu0 %v12919_v40  ;;  %v14382_v40 = vld [vmem:[#allocation2 + $0x23b0] sm:$0xf]  ;;  %v13807_v62 = vor.u32 %v15797_v28, %v13806_v53  ;;  %v13951_v28 = vor.u32 %v15833_v39, %v13950_v56 }
 0x3d0   :  { %8883 = vmatpush.bf16.msrb.mxu1 %v13111_v1  ;;  %v13999_v1 = vor.u32 %v15845_v63, %v13998_v30  ;;  %v15779_v63 = vld [vmem:[#allocation2 + $0x1eb4] sm:$0xf0] }
 0x3d1   :  { %8896 = vmatpush.bf16.msrb.mxu2 %v13303_v6  ;;  %v14191_v6 = vor.u32 %v15893_v51, %v14190_v35  ;;  %v13926_v35 = vld [vmem:[#allocation2 + $0x2020] sm:$0xf] }
 0x3d2   :  { %8909 = vmatpush.bf16.msrb.mxu3 %v13495_v23  ;;  %v14383_v23 = vor.u32 %v15941_v41, %v14382_v40 }
 0x3d3   :  { %8871 = vmatpush.bf16.msrb.mxu0 %v12895_v33  ;;  %v14167_v33 = vor.u32 %v15887_v50, %v14166_v0  ;;  %v8665_v53 = vpop.f32.mrf.mxu0  ;;  %v13710_v50 = vld [vmem:[#allocation2 + $0x1e70] sm:$0xf] }
 0x3d4   :  { %8884 = vmatpush.bf16.msrb.mxu1 %v13087_v58  ;;  %v1290_v58 = vperm.slane %v16060_v57, 4  ;;  %v8678_v40 = vpop.f32.mrf.mxu1 }
 0x3d5   :  { %8897 = vmatpush.bf16.msrb.mxu2 %v13279_v25  ;;  %v14359_v25 = vor.u32 %v15935_v54, %v14358_v17  ;;  %v15773_v17 = vld [vmem:[#allocation2 + $0x1e84] sm:$0xf0]  ;;  %v13902_v54 = vld [vmem:[#allocation2 + $0x1ff0] sm:$0xf] }
 0x3d6   :  { %8910 = vmatpush.bf16.msrb.mxu3 %v13471_v61  ;;  %8872 = vmatmul.bf16.vlgmr.msrb.gmra.mxu0 %v16300_v5  ;;  %v15881_v61 = vld [vmem:[#allocation2 + $0x21e4] sm:$0xf0]  ;;  %v8666_v51 = vadd.f32 %v8665_v53, %v1290_v58  ;;  %v14286_v58 = vld [vmem:[#allocation2 + $0x22f0] sm:$0xf]  ;;  %v13711_v39 = vor.u32 %v15773_v17, %v13710_v50  ;;  %v15767_v53 = vld [vmem:[#allocation2 + $0x1e54] sm:$0xf0] }
 0x3d7   :  { %8916 = vmatpush.bf16.msra.mxu0 %v13831_v43  ;;  %8885 = vmatmul.bf16.vlgmr.msrb.gmra.mxu1 %v16304_v10  ;;  %v14334_v43 = vld [vmem:[#allocation2 + $0x2350] sm:$0xf]  ;;  %v14143_v30 = vor.u32 %v15881_v61, %v14142_v59  ;;  %v15857_v17 = vld [vmem:[#allocation2 + $0x2124] sm:$0xf0] }
 0x3d8   :  { %8929 = vmatpush.bf16.msra.mxu1 %v14023_v52  ;;  %8898 = vmatmul.bf16.vlgmr.msrb.gmra.mxu2 %v16302_v9  ;;  %v15929_v52 = vld [vmem:[#allocation2 + $0x2364] sm:$0xf0]  ;;  %v8679_v44 = vadd.f32 %v8678_v40, %v8666_v51  ;;  %v15863_v51 = vld [vmem:[#allocation2 + $0x2154] sm:$0xf0]  ;;  %v14262_v40 = vld [vmem:[#allocation2 + $0x22c0] sm:$0xf] }
 0x3d9   :  { %8942 = vmatpush.bf16.msra.mxu2 %v14215_v24  ;;  %8911 = vmatmul.bf16.vlgmr.msrb.gmra.mxu3 %v16306_v13  ;;  %v13759_v24 = vor.u32 %v15785_v36, %v13758_v37  ;;  %v14335_v41 = vor.u32 %v15929_v52, %v14334_v43  ;;  %v14311_v37 = vor.u32 %v15923_v18, %v14310_v42  ;;  %v15869_v36 = vld [vmem:[#allocation2 + $0x2184] sm:$0xf0] }
 0x3da   :  { %8955 = vmatpush.bf16.msra.mxu3 %v14407_v34  ;;  %v13734_v34 = vld [vmem:[#allocation2 + $0x1ea0] sm:$0xf] }
 0x3db   :  { %8917 = vmatpush.bf16.msra.mxu0 %v13807_v62  ;;  %v15827_v62 = vld [vmem:[#allocation2 + $0x2034] sm:$0xf0]  ;;  %v8667_v61 = vpop.f32.mrf.mxu0 }
 0x3dc   :  { %8930 = vmatpush.bf16.msra.mxu1 %v13999_v1  ;;  %v14118_v1 = vld [vmem:[#allocation2 + $0x21a0] sm:$0xf]  ;;  %v13927_v45 = vor.u32 %v15827_v62, %v13926_v35  ;;  %v8704_v57 = vpop.f32.mrf.mxu3 }
 0x3dd   :  { %8943 = vmatpush.bf16.msra.mxu2 %v14191_v6  ;;  %v15875_v6 = vld [vmem:[#allocation2 + $0x21b4] sm:$0xf0]  ;;  %v14070_v35 = vld [vmem:[#allocation2 + $0x2140] sm:$0xf] }
 0x3de   :  { %8956 = vmatpush.bf16.msra.mxu3 %v14383_v23  ;;  %v13735_v23 = vor.u32 %v15779_v63, %v13734_v34  ;;  %v14119_v0 = vor.u32 %v15875_v6, %v14118_v1  ;;  %v15815_v63 = vld [vmem:[#allocation2 + $0x1fd4] sm:$0xf0]  ;;  %v13662_v1 = vld [vmem:[#allocation2 + $0x1e10] sm:$0xf]  ;;  %v15761_v6 = vld [vmem:[#allocation2 + $0x1e24] sm:$0xf0]  ;;  %v14071_v18 = vor.u32 %v15863_v51, %v14070_v35 }
 0x3df   :  { %8918 = vmatpush.bf16.msra.mxu0 %v13783_v4  ;;  %v8691_v4 = vpop.f32.mrf.mxu2  ;;  %v14834_v35 = vld [vmem:[#allocation2 + $0x134] sm:$0xf] }
 0x3e0   :  { %8931 = vmatpush.bf16.msra.mxu1 %v13975_v55  ;;  %v15821_v55 = vld [vmem:[#allocation2 + $0x2004] sm:$0xf0]  ;;  %v8692_v56 = vadd.f32 %v8691_v4, %v8679_v44  ;;  %v13854_v44 = vld [vmem:[#allocation2 + $0x1f90] sm:$0xf] }
 0x3e1   :  { %8944 = vmatpush.bf16.msra.mxu2 %v14167_v33  ;;  %v14094_v33 = vld [vmem:[#allocation2 + $0x2170] sm:$0xf]  ;;  %v13903_v43 = vor.u32 %v15821_v55, %v13902_v54  ;;  %v15905_v4 = vld [vmem:[#allocation2 + $0x22a4] sm:$0xf0]  ;;  %v14598_v55 = vld [vmem:[#allocation2 + $0x2560] sm:$0xf] }
 0x3e2   :  { %8957 = vmatpush.bf16.msra.mxu3 %v14359_v25  ;;  %v15917_v25 = vld [vmem:[#allocation2 + $0x2304] sm:$0xf0]  ;;  %v16499_v59 = vadd.f32 %v8704_v57, %v8692_v56  ;;  %v14095_v52 = vor.u32 %v15869_v36, %v14094_v33  ;;  %v14238_v54 = vld [vmem:[#allocation2 + $0x2290] sm:$0xf]  ;;  %v15995_v33 = vld [vmem:[#allocation2 + $0x2574] sm:$0xf0]  ;;  %v13663_v56 = vor.u32 %v15761_v6, %v13662_v1 }
 0x3e3   :  { %8919 = vmatpush.bf16.msra.mxu0 %v13759_v24  ;;  %v13686_v24 = vld [vmem:[#allocation2 + $0x1e40] sm:$0xf]  ;;  %v14287_v34 = vor.u32 %v15917_v25, %v14286_v58  ;;  %v14840_v36 = vld [vmem:[#allocation2 + $0x164] sm:$0xf]  ;;  %v9992_v57 = vld [vmem:[#allocation2 + $0x178] sm:$0xf0] }
 0x3e4   :  { %8932 = vmatpush.bf16.msra.mxu1 %v13951_v28  ;;  %v13878_v28 = vld [vmem:[#allocation2 + $0x1fc0] sm:$0xf]  ;;  %v13687_v62 = vor.u32 %v15767_v53, %v13686_v24  ;;  %v14888_v58 = vld [vmem:[#allocation2 + $0x2e4] sm:$0xf]  ;;  %v10184_v25 = vld [vmem:[#allocation2 + $0x2f8] sm:$0xf0]  ;;  %v14239_v24 = vor.u32 %v15905_v4, %v14238_v54  ;;  %v14599_v53 = vor.u32 %v15995_v33, %v14598_v55 }
 0x3e5   :  { %8945 = vmatpush.bf16.msra.mxu2 %v14143_v30  ;;  %v8680_v30 = vpop.f32.mrf.mxu1  ;;  %v13879_v42 = vor.u32 %v15815_v63, %v13878_v28  ;;  %v9995_v28 = vor.u32 %v14840_v36, %v9992_v57  ;;  %v15989_v63 = vld [vmem:[#allocation2 + $0x2544] sm:$0xf0]  ;;  %v14930_v1 = vld [vmem:[#allocation2 + $0x434] sm:$0xf]  ;;  %v10352_v6 = vld [vmem:[#allocation2 + $0x448] sm:$0xf0] }
 0x3e6   :  { %8958 = vmatpush.bf16.msra.mxu3 %v14335_v41  ;;  %v15911_v41 = vld [vmem:[#allocation2 + $0x22d4] sm:$0xf0]  ;;  %v10187_v30 = vor.u32 %v14888_v58, %v10184_v25  ;;  %v14876_v54 = vld [vmem:[#allocation2 + $0x284] sm:$0xf]  ;;  %v10136_v4 = vld [vmem:[#allocation2 + $0x298] sm:$0xf0] }
 0x3e7   :  { %8920 = vmatpush.bf16.msra.mxu0 %v13735_v23  ;;  %v15809_v23 = vld [vmem:[#allocation2 + $0x1fa4] sm:$0xf0]  ;;  %v14263_v50 = vor.u32 %v15911_v41, %v14262_v40  ;;  %v9968_v40 = vld [vmem:[#allocation2 + $0x148] sm:$0xf0]  ;;  %v14882_v41 = vld [vmem:[#allocation2 + $0x2b4] sm:$0xf] }
 0x3e8   :  { %8933 = vmatpush.bf16.msra.mxu1 %v13927_v45  ;;  %v14046_v45 = vld [vmem:[#allocation2 + $0x2110] sm:$0xf]  ;;  %v10328_v55 = vld [vmem:[#allocation2 + $0x418] sm:$0xf0]  ;;  %v15977_v58 = vld [vmem:[#allocation2 + $0x24e4] sm:$0xf0] }
 0x3e9   :  { %8946 = vmatpush.bf16.msra.mxu2 %v14119_v0  ;;  %v8693_v0 = vpop.f32.mrf.mxu2  ;;  %v14047_v61 = vor.u32 %v15857_v17, %v14046_v45  ;;  %v15983_v45 = vld [vmem:[#allocation2 + $0x2514] sm:$0xf0]  ;;  %v9944_v17 = vld [vmem:[#allocation2 + $0x118] sm:$0xf0]  ;;  %v14526_v57 = vld [vmem:[#allocation2 + $0x24d0] sm:$0xf] }
 0x3ea   :  { %8959 = vmatpush.bf16.msra.mxu3 %v14311_v37  ;;  %v8706_v37 = vpop.f32.mrf.mxu3  ;;  %v14828_v0 = vld [vmem:[#allocation2 + $0x104] sm:$0xf]  ;;  %v14822_v25 = vld [vmem:[#allocation2 + $0xd4] sm:$0xf] }
 0x3eb   :  { %8921 = vmatpush.bf16.msra.mxu0 %v13711_v39  ;;  %v13855_v39 = vor.u32 %v15809_v23, %v13854_v44  ;;  %v14550_v23 = vld [vmem:[#allocation2 + $0x2500] sm:$0xf]  ;;  %v14924_v37 = vld [vmem:[#allocation2 + $0x404] sm:$0xf]  ;;  %v9947_v36 = vor.u32 %v14828_v0, %v9944_v17 }
 0x3ec   :  { %8934 = vmatpush.bf16.msra.mxu1 %v13903_v43  ;;  %v14936_v43 = vld [vmem:[#allocation2 + $0x464] sm:$0xf]  ;;  %v14551_v33 = vor.u32 %v15983_v45, %v14550_v23  ;;  %v10280_v23 = vld [vmem:[#allocation2 + $0x3b8] sm:$0xf0] }
 0x3ed   :  { %8947 = vmatpush.bf16.msra.mxu2 %v14095_v52  ;;  %v10376_v52 = vld [vmem:[#allocation2 + $0x478] sm:$0xf0] }
 0x3ee   :  { %8960 = vmatpush.bf16.msra.mxu3 %v14287_v34  ;;  %v14574_v34 = vld [vmem:[#allocation2 + $0x2530] sm:$0xf]  ;;  %v10379_v51 = vor.u32 %v14936_v43, %v10376_v52  ;;  %v14870_v43 = vld [vmem:[#allocation2 + $0x254] sm:$0xf]  ;;  %v10112_v52 = vld [vmem:[#allocation2 + $0x268] sm:$0xf0] }
 0x3ef   :  { %8922 = vmatpush.bf16.msra.mxu0 %v13687_v62  ;;  %v10160_v62 = vld [vmem:[#allocation2 + $0x2c8] sm:$0xf0] }
 0x3f0   :  { %8935 = vmatpush.bf16.msra.mxu1 %v13879_v42  ;;  %v14575_v42 = vor.u32 %v15989_v63, %v14574_v34  ;;  %v10163_v44 = vor.u32 %v14882_v41, %v10160_v62  ;;  %v10115_v63 = vor.u32 %v14870_v43, %v10112_v52 }
 0x3f1   :  { %8948 = vmatpush.bf16.msra.mxu2 %v14071_v18  ;;  %v9971_v18 = vor.u32 %v14834_v35, %v9968_v40  ;;  %v14502_v35 = vld [vmem:[#allocation2 + $0x24a0] sm:$0xf]  ;;  %v14816_v40 = vld [vmem:[#allocation2 + $0xa4] sm:$0xf] }
 0x3f2   :  { %8961 = vmatpush.bf16.msra.mxu3 %v14263_v50  ;;  %v10355_v50 = vor.u32 %v14930_v1, %v10352_v6  ;;  %v9896_v6 = vld [vmem:[#allocation2 + $0xb8] sm:$0xf0] }
 0x3f3   :  { %8923 = vmatpush.bf16.msra.mxu0 %v13663_v56  ;;  %v10139_v56 = vor.u32 %v14876_v54, %v10136_v4  ;;  %v14478_v54 = vld [vmem:[#allocation2 + $0x2470] sm:$0xf]  ;;  %v15965_v4 = vld [vmem:[#allocation2 + $0x2484] sm:$0xf0] }
 0x3f4   :  { %8936 = vmatpush.bf16.msra.mxu1 %v13855_v39  ;;  %v10331_v39 = vor.u32 %v14924_v37, %v10328_v55  ;;  %v8730_v62 = vpop.f32.mrf.mxu1  ;;  %v14810_v37 = vld [vmem:[#allocation2 + $0x74] sm:$0xf] }
 0x3f5   :  { %8949 = vmatpush.bf16.msra.mxu2 %v14047_v61  ;;  %v9920_v61 = vld [vmem:[#allocation2 + $0xe8] sm:$0xf0] }
 0x3f6   :  { %8962 = vmatpush.bf16.msra.mxu3 %v14239_v24  ;;  %8924 = vmatmul.bf16.vlgmr.msra.gmra.mxu0 %v16312_v2  ;;  %v14918_v24 = vld [vmem:[#allocation2 + $0x3d4] sm:$0xf]  ;;  %v9923_v34 = vor.u32 %v14822_v25, %v9920_v61  ;;  %v14479_v61 = vor.u32 %v15965_v4, %v14478_v54  ;;  %v10016_v4 = vld [vmem:[#allocation2 + $0x1a8] sm:$0xf0] }
 0x3f7   :  { %8968 = vmatpush.bf16.msrb.mxu0 %v14599_v53  ;;  %8937 = vmatmul.bf16.vlgmr.msra.gmra.mxu1 %v16316_v7  ;;  %v10304_v53 = vld [vmem:[#allocation2 + $0x3e8] sm:$0xf0]  ;;  %v14906_v25 = vld [vmem:[#allocation2 + $0x374] sm:$0xf] }
 0x3f8   :  { %8981 = vmatpush.bf16.msrb.mxu1 %v9995_v28  ;;  %8950 = vmatmul.bf16.vlgmr.msra.gmra.mxu2 %v16314_v3  ;;  %v14527_v28 = vor.u32 %v15977_v58, %v14526_v57  ;;  %v10307_v1 = vor.u32 %v14918_v24, %v10304_v53 }
 0x3f9   :  { %8994 = vmatpush.bf16.msrb.mxu2 %v10187_v30  ;;  %8963 = vmatmul.bf16.vlgmr.msra.gmra.mxu3 %v16318_v14  ;;  %v8717_v30 = vpop.f32.mrf.mxu0 }
 0x3fa   :  { %9007 = vmatpush.bf16.msrb.mxu3 %v10379_v51  ;;  %v15971_v51 = vld [vmem:[#allocation2 + $0x24b4] sm:$0xf0]  ;;  %v8718_v41 = vadd.f32 %v8717_v30, %v16499_v59 }
 0x3fb   :  { %8969 = vmatpush.bf16.msrb.mxu0 %v14575_v42  ;;  %v14864_v42 = vld [vmem:[#allocation2 + $0x224] sm:$0xf]  ;;  %v14503_v0 = vor.u32 %v15971_v51, %v14502_v35  ;;  %v8743_v55 = vpop.f32.mrf.mxu2  ;;  %v15959_v30 = vld [vmem:[#allocation2 + $0x2454] sm:$0xf0]  ;;  %v9848_v51 = vld [vmem:[#allocation2 + $0x58] sm:$0xf0] }
 0x3fc   :  { %8982 = vmatpush.bf16.msrb.mxu1 %v9971_v18  ;;  %v10088_v18 = vld [vmem:[#allocation2 + $0x238] sm:$0xf0]  ;;  %v8731_v45 = vadd.f32 %v8730_v62, %v8718_v41  ;;  %v8756_v58 = vpop.f32.mrf.mxu3  ;;  %v14900_v62 = vld [vmem:[#allocation2 + $0x344] sm:$0xf] }
 0x3fd   :  { %8995 = vmatpush.bf16.msrb.mxu2 %v10163_v44  ;;  %v14912_v44 = vld [vmem:[#allocation2 + $0x3a4] sm:$0xf]  ;;  %v10091_v17 = vor.u32 %v14864_v42, %v10088_v18  ;;  %v10040_v41 = vld [vmem:[#allocation2 + $0x1d8] sm:$0xf0]  ;;  %v14430_v42 = vld [vmem:[#allocation2 + $0x2410] sm:$0xf] }
 0x3fe   :  { %9008 = vmatpush.bf16.msrb.mxu3 %v10355_v50  ;;  %v9899_v50 = vor.u32 %v14816_v40, %v9896_v6  ;;  %v10283_v59 = vor.u32 %v14912_v44, %v10280_v23  ;;  %v8744_v57 = vadd.f32 %v8743_v55, %v8731_v45  ;;  %v14852_v40 = vld [vmem:[#allocation2 + $0x1c4] sm:$0xf]  ;;  %v15953_v18 = vld [vmem:[#allocation2 + $0x2424] sm:$0xf0]  ;;  %v14798_v45 = vld [vmem:[#allocation2 + $0x14] sm:$0xf] }
 0x3ff   :  { %8970 = vmatpush.bf16.msrb.mxu0 %v14551_v33  ;;  %v9872_v33 = vld [vmem:[#allocation2 + $0x88] sm:$0xf0]  ;;  %v10043_v23 = vor.u32 %v14852_v40, %v10040_v41  ;;  %v15026_v40 = vld [vmem:[#allocation2 + $0x734] sm:$0xf] }
 0x400   :  { %8983 = vmatpush.bf16.msrb.mxu1 %v9947_v36  ;;  %v14858_v36 = vld [vmem:[#allocation2 + $0x1f4] sm:$0xf]  ;;  %v16506_v43 = vadd.f32 %v8756_v58, %v8744_v57  ;;  %v9875_v24 = vor.u32 %v14810_v37, %v9872_v33  ;;  %v10208_v55 = vld [vmem:[#allocation2 + $0x328] sm:$0xf0]  ;;  %v14984_v33 = vld [vmem:[#allocation2 + $0x5e4] sm:$0xf]  ;;  %v14431_v57 = vor.u32 %v15953_v18, %v14430_v42 }
 0x401   :  { %8996 = vmatpush.bf16.msrb.mxu2 %v10139_v56  ;;  %v10064_v56 = vld [vmem:[#allocation2 + $0x208] sm:$0xf0]  ;;  %v8719_v52 = vpop.f32.mrf.mxu0  ;;  %v14894_v37 = vld [vmem:[#allocation2 + $0x314] sm:$0xf]  ;;  %v10760_v58 = vld [vmem:[#allocation2 + $0x778] sm:$0xf0] }
 0x402   :  { %9009 = vmatpush.bf16.msrb.mxu3 %v10331_v39  ;;  %v10256_v39 = vld [vmem:[#allocation2 + $0x388] sm:$0xf0]  ;;  %v10067_v53 = vor.u32 %v14858_v36, %v10064_v56  ;;  %v10568_v36 = vld [vmem:[#allocation2 + $0x5f8] sm:$0xf0]  ;;  %v15032_v56 = vld [vmem:[#allocation2 + $0x764] sm:$0xf] }
 0x403   :  { %8971 = vmatpush.bf16.msrb.mxu0 %v14527_v28  ;;  %v14454_v28 = vld [vmem:[#allocation2 + $0x2440] sm:$0xf]  ;;  %v10259_v35 = vor.u32 %v14906_v25, %v10256_v39  ;;  %v15080_v25 = vld [vmem:[#allocation2 + $0x8e4] sm:$0xf]  ;;  %v10952_v39 = vld [vmem:[#allocation2 + $0x8f8] sm:$0xf0] }
 0x404   :  { %8984 = vmatpush.bf16.msrb.mxu1 %v9923_v34  ;;  %v14804_v34 = vld [vmem:[#allocation2 + $0x44] sm:$0xf]  ;;  %v14455_v6 = vor.u32 %v15959_v30, %v14454_v28  ;;  %v10211_v28 = vor.u32 %v14894_v37, %v10208_v55  ;;  %v10571_v30 = vor.u32 %v14984_v33, %v10568_v36  ;;  %v15122_v42 = vld [vmem:[#allocation2 + $0xa34] sm:$0xf]  ;;  %v11120_v18 = vld [vmem:[#allocation2 + $0xa48] sm:$0xf0] }
 0x405   :  { %8997 = vmatpush.bf16.msrb.mxu2 %v10115_v63  ;;  %v8732_v63 = vpop.f32.mrf.mxu1  ;;  %v9851_v44 = vor.u32 %v14804_v34, %v9848_v51  ;;  %v10763_v34 = vor.u32 %v15032_v56, %v10760_v58  ;;  %v10544_v51 = vld [vmem:[#allocation2 + $0x5c8] sm:$0xf0]  ;;  %v10712_v37 = vld [vmem:[#allocation2 + $0x718] sm:$0xf0]  ;;  %v15068_v55 = vld [vmem:[#allocation2 + $0x884] sm:$0xf] }
 0x406   :  { %9010 = vmatpush.bf16.msrb.mxu3 %v10307_v1  ;;  %v10232_v1 = vld [vmem:[#allocation2 + $0x358] sm:$0xf0]  ;;  %v10955_v63 = vor.u32 %v15080_v25, %v10952_v39  ;;  %v15116_v33 = vld [vmem:[#allocation2 + $0xa04] sm:$0xf]  ;;  %v14966_v25 = vld [vmem:[#allocation2 + $0x554] sm:$0xf] }
 0x407   :  { %8972 = vmatpush.bf16.msrb.mxu0 %v14503_v0  ;;  %v9824_v0 = vld [vmem:[#allocation2 + $0x28] sm:$0xf0]  ;;  %v10235_v54 = vor.u32 %v14900_v62, %v10232_v1  ;;  %v15074_v1 = vld [vmem:[#allocation2 + $0x8b4] sm:$0xf]  ;;  %v11096_v36 = vld [vmem:[#allocation2 + $0xa18] sm:$0xf0] }
 0x408   :  { %8985 = vmatpush.bf16.msrb.mxu1 %v9899_v50  ;;  %v14846_v50 = vld [vmem:[#allocation2 + $0x194] sm:$0xf]  ;;  %v10736_v62 = vld [vmem:[#allocation2 + $0x748] sm:$0xf0] }
 0x409   :  { %8998 = vmatpush.bf16.msrb.mxu2 %v10091_v17  ;;  %v8745_v17 = vpop.f32.mrf.mxu2  ;;  %v10019_v52 = vor.u32 %v14846_v50, %v10016_v4  ;;  %v10520_v50 = vld [vmem:[#allocation2 + $0x598] sm:$0xf0]  ;;  %v11123_v4 = vor.u32 %v15122_v42, %v11120_v18  ;;  %v10496_v39 = vld [vmem:[#allocation2 + $0x568] sm:$0xf0]  ;;  %v15056_v18 = vld [vmem:[#allocation2 + $0x824] sm:$0xf] }
 0x40a   :  { %9011 = vmatpush.bf16.msrb.mxu3 %v10283_v59  ;;  %v8758_v59 = vpop.f32.mrf.mxu3  ;;  %v15020_v17 = vld [vmem:[#allocation2 + $0x704] sm:$0xf]  ;;  %v10664_v42 = vld [vmem:[#allocation2 + $0x6b8] sm:$0xf0] }
 0x40b   :  { %8973 = vmatpush.bf16.msrb.mxu0 %v14479_v61  ;;  %v9827_v61 = vor.u32 %v14798_v45, %v9824_v0  ;;  %v14972_v0 = vld [vmem:[#allocation2 + $0x584] sm:$0xf]  ;;  %v10904_v59 = vld [vmem:[#allocation2 + $0x898] sm:$0xf0] }
 0x40c   :  { %8986 = vmatpush.bf16.msrb.mxu1 %v9875_v24  ;;  %v15128_v24 = vld [vmem:[#allocation2 + $0xa64] sm:$0xf]  ;;  %v10523_v56 = vor.u32 %v14972_v0, %v10520_v50  ;;  %v10907_v58 = vor.u32 %v15068_v55, %v10904_v59  ;;  %v10640_v59 = vld [vmem:[#allocation2 + $0x688] sm:$0xf0] }
 0x40d   :  { %8999 = vmatpush.bf16.msrb.mxu2 %v10067_v53  ;;  %v11144_v53 = vld [vmem:[#allocation2 + $0xa78] sm:$0xf0] }
 0x40e   :  { %9012 = vmatpush.bf16.msrb.mxu3 %v10259_v35  ;;  %v14978_v35 = vld [vmem:[#allocation2 + $0x5b4] sm:$0xf]  ;;  %v11147_v41 = vor.u32 %v15128_v24, %v11144_v53  ;;  %v10688_v24 = vld [vmem:[#allocation2 + $0x6e8] sm:$0xf0] }
 0x40f   :  { %8974 = vmatpush.bf16.msrb.mxu0 %v14455_v6  ;;  %v10928_v6 = vld [vmem:[#allocation2 + $0x8c8] sm:$0xf0]  ;;  %v15062_v53 = vld [vmem:[#allocation2 + $0x854] sm:$0xf] }
 0x410   :  { %8987 = vmatpush.bf16.msrb.mxu1 %v9851_v44  ;;  %v10547_v44 = vor.u32 %v14978_v35, %v10544_v51  ;;  %v10931_v45 = vor.u32 %v15074_v1, %v10928_v6 }
 0x411   :  { %9000 = vmatpush.bf16.msrb.mxu2 %v10043_v23  ;;  %v10739_v23 = vor.u32 %v15026_v40, %v10736_v62  ;;  %v14960_v40 = vld [vmem:[#allocation2 + $0x524] sm:$0xf] }
 0x412   :  { %9013 = vmatpush.bf16.msrb.mxu3 %v10235_v54  ;;  %v16061_v54 = vld [vmem:[#allocation1] sm:$0xff]  ;;  %v15008_v62 = vld [vmem:[#allocation2 + $0x6a4] sm:$0xf] }
 0x413   :  { %8975 = vmatpush.bf16.msrb.mxu0 %v14431_v57  ;;  %v10715_v57 = vor.u32 %v15020_v17, %v10712_v37  ;;  %v14954_v17 = vld [vmem:[#allocation2 + $0x4f4] sm:$0xf] }
 0x414   :  { %8988 = vmatpush.bf16.msrb.mxu1 %v9827_v61  ;;  %v15014_v61 = vld [vmem:[#allocation2 + $0x6d4] sm:$0xf] }
 0x415   :  { %9001 = vmatpush.bf16.msrb.mxu2 %v10019_v52  ;;  %v11099_v52 = vor.u32 %v15116_v33, %v11096_v36  ;;  %v10691_v35 = vor.u32 %v15014_v61, %v10688_v24  ;;  %v15050_v33 = vld [vmem:[#allocation2 + $0x7f4] sm:$0xf]  ;;  %v10832_v36 = vld [vmem:[#allocation2 + $0x808] sm:$0xf0] }
 0x416   :  { %9014 = vmatpush.bf16.msrb.mxu3 %v10211_v28  ;;  %8976 = vmatmul.bf16.vlgmr.msrb.gmra.mxu0 %v16061_v54  ;;  %v10880_v28 = vld [vmem:[#allocation2 + $0x868] sm:$0xf0] }
 0x417   :  { %9020 = vmatpush.bf16.msra.mxu0 %v10571_v30  ;;  %8989 = vmatmul.bf16.vlgmr.msrb.gmra.mxu1 %v16248_v21  ;;  %v8769_v30 = vpop.f32.mrf.mxu0  ;;  %v8782_v21 = vpop.f32.mrf.mxu1  ;;  %v10883_v51 = vor.u32 %v15062_v53, %v10880_v28  ;;  %v10448_v54 = vld [vmem:[#allocation2 + $0x508] sm:$0xf0]  ;;  %v10835_v28 = vor.u32 %v15050_v33, %v10832_v36  ;;  %v11528_v33 = vld [vmem:[#allocation2 + $0xd78] sm:$0xf0]  ;;  %v15272_v36 = vld [vmem:[#allocation2 + $0xee4] sm:$0xf] }
 0x418   :  { %9033 = vmatpush.bf16.msra.mxu1 %v10763_v34  ;;  %9002 = vmatmul.bf16.vlgmr.msrb.gmra.mxu2 %v16253_v26  ;;  %v15110_v26 = vld [vmem:[#allocation2 + $0x9d4] sm:$0xf]  ;;  %v11072_v34 = vld [vmem:[#allocation2 + $0x9e8] sm:$0xf0]  ;;  %v10451_v61 = vor.u32 %v14954_v17, %v10448_v54  ;;  %v15176_v54 = vld [vmem:[#allocation2 + $0xbe4] sm:$0xf] }
 0x419   :  { %9046 = vmatpush.bf16.msra.mxu2 %v10955_v63  ;;  %9015 = vmatmul.bf16.vlgmr.msrb.gmra.mxu3 %v16246_v20  ;;  %v8770_v20 = vadd.f32 %v8769_v30, %v16506_v43  ;;  %v10499_v63 = vor.u32 %v14966_v25, %v10496_v39  ;;  %v11075_v1 = vor.u32 %v15110_v26, %v11072_v34  ;;  %v11024_v25 = vld [vmem:[#allocation2 + $0x988] sm:$0xf0]  ;;  %v14948_v30 = vld [vmem:[#allocation2 + $0x4c4] sm:$0xf]  ;;  %v10424_v26 = vld [vmem:[#allocation2 + $0x4d8] sm:$0xf0] }
 0x41a   :  { %9059 = vmatpush.bf16.msra.mxu3 %v11147_v41  ;;  %v10472_v41 = vld [vmem:[#allocation2 + $0x538] sm:$0xf0]  ;;  %v10667_v43 = vor.u32 %v15008_v62, %v10664_v42  ;;  %v14996_v34 = vld [vmem:[#allocation2 + $0x644] sm:$0xf]  ;;  %v14942_v62 = vld [vmem:[#allocation2 + $0x494] sm:$0xf] }
 0x41b   :  { %9021 = vmatpush.bf16.msra.mxu0 %v10547_v44  ;;  %v8783_v6 = vadd.f32 %v8782_v21, %v8770_v20  ;;  %v10856_v44 = vld [vmem:[#allocation2 + $0x838] sm:$0xf0]  ;;  %v10475_v0 = vor.u32 %v14960_v40, %v10472_v41  ;;  %v8795_v55 = vpop.f32.mrf.mxu2  ;;  %v15044_v21 = vld [vmem:[#allocation2 + $0x7c4] sm:$0xf]  ;;  %v10427_v41 = vor.u32 %v14948_v30, %v10424_v26  ;;  %v15170_v30 = vld [vmem:[#allocation2 + $0xbb4] sm:$0xf] }
 0x41c   :  { %9034 = vmatpush.bf16.msra.mxu1 %v10739_v23  ;;  %v15104_v23 = vld [vmem:[#allocation2 + $0x9a4] sm:$0xf]  ;;  %v10859_v50 = vor.u32 %v15056_v18, %v10856_v44  ;;  %v11000_v40 = vld [vmem:[#allocation2 + $0x958] sm:$0xf0]  ;;  %v14990_v18 = vld [vmem:[#allocation2 + $0x614] sm:$0xf] }
 0x41d   :  { %9047 = vmatpush.bf16.msra.mxu2 %v10931_v45  ;;  %v11048_v45 = vld [vmem:[#allocation2 + $0x9b8] sm:$0xf0]  ;;  %v10592_v44 = vld [vmem:[#allocation2 + $0x628] sm:$0xf0] }
 0x41e   :  { %9060 = vmatpush.bf16.msra.mxu3 %v11123_v4  ;;  %v15002_v4 = vld [vmem:[#allocation2 + $0x674] sm:$0xf]  ;;  %v11051_v37 = vor.u32 %v15104_v23, %v11048_v45  ;;  %v11312_v26 = vld [vmem:[#allocation2 + $0xbc8] sm:$0xf0] }
 0x41f   :  { %9022 = vmatpush.bf16.msra.mxu0 %v10523_v56  ;;  %v8796_v56 = vadd.f32 %v8795_v55, %v8783_v6  ;;  %v8771_v39 = vpop.f32.mrf.mxu0  ;;  %v10643_v53 = vor.u32 %v15002_v4, %v10640_v59  ;;  %v15038_v23 = vld [vmem:[#allocation2 + $0x794] sm:$0xf]  ;;  %v11336_v4 = vld [vmem:[#allocation2 + $0xbf8] sm:$0xf0] }
 0x420   :  { %9035 = vmatpush.bf16.msra.mxu1 %v10715_v57  ;;  %v8808_v57 = vpop.f32.mrf.mxu3  ;;  %v11912_v39 = vld [vmem:[#allocation2 + $0x1078] sm:$0xf0] }
 0x421   :  { %9048 = vmatpush.bf16.msra.mxu2 %v10907_v58  ;;  %v15098_v58 = vld [vmem:[#allocation2 + $0x974] sm:$0xf]  ;;  %v16512_v24 = vadd.f32 %v8808_v57, %v8796_v56  ;;  %v11720_v56 = vld [vmem:[#allocation2 + $0xef8] sm:$0xf0]  ;;  %v10595_v57 = vor.u32 %v14990_v18, %v10592_v44  ;;  %v15212_v18 = vld [vmem:[#allocation2 + $0xd04] sm:$0xf] }
 0x422   :  { %9061 = vmatpush.bf16.msra.mxu3 %v11099_v52  ;;  %v8784_v52 = vpop.f32.mrf.mxu1  ;;  %v11027_v20 = vor.u32 %v15098_v58, %v11024_v25  ;;  %v15320_v25 = vld [vmem:[#allocation2 + $0x1064] sm:$0xf] }
 0x423   :  { %9023 = vmatpush.bf16.msra.mxu0 %v10499_v63  ;;  %v10616_v63 = vld [vmem:[#allocation2 + $0x658] sm:$0xf0]  ;;  %v8797_v17 = vpop.f32.mrf.mxu2  ;;  %v11339_v52 = vor.u32 %v15176_v54, %v11336_v4 }
 0x424   :  { %9036 = vmatpush.bf16.msra.mxu1 %v10691_v35  ;;  %v10808_v35 = vld [vmem:[#allocation2 + $0x7d8] sm:$0xf0]  ;;  %v10619_v6 = vor.u32 %v14996_v34, %v10616_v63  ;;  %v15218_v34 = vld [vmem:[#allocation2 + $0xd34] sm:$0xf]  ;;  %v11504_v63 = vld [vmem:[#allocation2 + $0xd48] sm:$0xf0] }
 0x425   :  { %9049 = vmatpush.bf16.msra.mxu2 %v10883_v51  ;;  %v15092_v51 = vld [vmem:[#allocation2 + $0x944] sm:$0xf]  ;;  %v10811_v42 = vor.u32 %v15044_v21, %v10808_v35  ;;  %v15266_v21 = vld [vmem:[#allocation2 + $0xeb4] sm:$0xf]  ;;  %v11696_v35 = vld [vmem:[#allocation2 + $0xec8] sm:$0xf0] }
 0x426   :  { %9062 = vmatpush.bf16.msra.mxu3 %v11075_v1  ;;  %v10400_v1 = vld [vmem:[#allocation2 + $0x4a8] sm:$0xf0]  ;;  %v11003_v45 = vor.u32 %v15092_v51, %v11000_v40  ;;  %v15314_v51 = vld [vmem:[#allocation2 + $0x1034] sm:$0xf] }
 0x427   :  { %9024 = vmatpush.bf16.msra.mxu0 %v10475_v0  ;;  %v10784_v0 = vld [vmem:[#allocation2 + $0x7a8] sm:$0xf0]  ;;  %v10403_v59 = vor.u32 %v14942_v62, %v10400_v1  ;;  %v11507_v62 = vor.u32 %v15218_v34, %v11504_v63  ;;  %v11699_v1 = vor.u32 %v15266_v21, %v11696_v35  ;;  %v11432_v34 = vld [vmem:[#allocation2 + $0xcb8] sm:$0xf0]  ;;  %v15296_v21 = vld [vmem:[#allocation2 + $0xfa4] sm:$0xf] }
 0x428   :  { %9037 = vmatpush.bf16.msra.mxu1 %v10667_v43  ;;  %v15086_v43 = vld [vmem:[#allocation2 + $0x914] sm:$0xf]  ;;  %v8810_v55 = vpop.f32.mrf.mxu3  ;;  %v10787_v58 = vor.u32 %v15038_v23, %v10784_v0  ;;  %v11888_v40 = vld [vmem:[#allocation2 + $0x1048] sm:$0xf0]  ;;  %v11480_v23 = vld [vmem:[#allocation2 + $0xd18] sm:$0xf0] }
 0x429   :  { %9050 = vmatpush.bf16.msra.mxu2 %v10859_v50  ;;  %v10976_v50 = vld [vmem:[#allocation2 + $0x928] sm:$0xf0]  ;;  %v11891_v44 = vor.u32 %v15314_v51, %v11888_v40  ;;  %v11672_v0 = vld [vmem:[#allocation2 + $0xe98] sm:$0xf0]  ;;  %v11483_v54 = vor.u32 %v15212_v18, %v11480_v23 }
 0x42a   :  { %9063 = vmatpush.bf16.msra.mxu3 %v11051_v37  ;;  %v15224_v37 = vld [vmem:[#allocation2 + $0xd64] sm:$0xf]  ;;  %v11264_v55 = vld [vmem:[#allocation2 + $0xb68] sm:$0xf0]  ;;  %v11624_v63 = vld [vmem:[#allocation2 + $0xe38] sm:$0xf0] }
 0x42b   :  { %9025 = vmatpush.bf16.msra.mxu0 %v10451_v61  ;;  %v10979_v61 = vor.u32 %v15086_v43, %v10976_v50  ;;  %v15308_v43 = vld [vmem:[#allocation2 + $0x1004] sm:$0xf]  ;;  %v11864_v50 = vld [vmem:[#allocation2 + $0x1018] sm:$0xf0]  ;;  %v11408_v18 = vld [vmem:[#allocation2 + $0xc88] sm:$0xf0] }
 0x42c   :  { %9038 = vmatpush.bf16.msra.mxu1 %v10643_v53  ;;  %v11531_v53 = vor.u32 %v15224_v37, %v11528_v33  ;;  %v15158_v37 = vld [vmem:[#allocation2 + $0xb54] sm:$0xf]  ;;  %v11456_v33 = vld [vmem:[#allocation2 + $0xce8] sm:$0xf0]  ;;  %v11816_v35 = vld [vmem:[#allocation2 + $0xfb8] sm:$0xf0] }
 0x42d   :  { %9051 = vmatpush.bf16.msra.mxu2 %v10835_v28  ;;  %v11723_v28 = vor.u32 %v15272_v36, %v11720_v56  ;;  %v15254_v36 = vld [vmem:[#allocation2 + $0xe54] sm:$0xf]  ;;  %v11600_v23 = vld [vmem:[#allocation2 + $0xe08] sm:$0xf0] }
 0x42e   :  { %9064 = vmatpush.bf16.msra.mxu3 %v11027_v20  ;;  %v11915_v20 = vor.u32 %v15320_v25, %v11912_v39  ;;  %v11267_v25 = vor.u32 %v15158_v37, %v11264_v55 }
 0x42f   :  { %9026 = vmatpush.bf16.msra.mxu0 %v10427_v41  ;;  %v11315_v41 = vor.u32 %v15170_v30, %v11312_v26 }
 0x430   :  { %9039 = vmatpush.bf16.msra.mxu1 %v10619_v6  ;;  %v15164_v6 = vld [vmem:[#allocation2 + $0xb84] sm:$0xf] }
 0x431   :  { %9052 = vmatpush.bf16.msra.mxu2 %v10811_v42  ;;  %v11288_v42 = vld [vmem:[#allocation2 + $0xb98] sm:$0xf0] }
 0x432   :  { %9065 = vmatpush.bf16.msra.mxu3 %v11003_v45  ;;  %v15260_v45 = vld [vmem:[#allocation2 + $0xe84] sm:$0xf]  ;;  %v11291_v17 = vor.u32 %v15164_v6, %v11288_v42  ;;  %v11819_v6 = vor.u32 %v15296_v21, %v11816_v35  ;;  %v11744_v21 = vld [vmem:[#allocation2 + $0xf28] sm:$0xf0] }
 0x433   :  { %9027 = vmatpush.bf16.msra.mxu0 %v10403_v59  ;;  %v11675_v4 = vor.u32 %v15260_v45, %v11672_v0  ;;  %v11867_v59 = vor.u32 %v15308_v43, %v11864_v50  ;;  %v8821_v56 = vpop.f32.mrf.mxu0  ;;  %v15290_v43 = vld [vmem:[#allocation2 + $0xf74] sm:$0xf]  ;;  %v11792_v50 = vld [vmem:[#allocation2 + $0xf88] sm:$0xf0] }
 0x434   :  { %9040 = vmatpush.bf16.msra.mxu1 %v10595_v57  ;;  %v11840_v57 = vld [vmem:[#allocation2 + $0xfe8] sm:$0xf0] }
 0x435   :  { %9053 = vmatpush.bf16.msra.mxu2 %v10787_v58  ;;  %v8822_v58 = vadd.f32 %v8821_v56, %v16512_v24  ;;  %v11384_v56 = vld [vmem:[#allocation2 + $0xc58] sm:$0xf0] }
 0x436   :  { %9066 = vmatpush.bf16.msra.mxu3 %v10979_v61  ;;  %9028 = vmatmul.bf16.vlgmr.msra.gmra.mxu0 %v16250_v22  ;;  %v11648_v22 = vld [vmem:[#allocation2 + $0xe68] sm:$0xf0] }
 0x437   :  { %9072 = vmatpush.bf16.msrb.mxu0 %v11339_v52  ;;  %9041 = vmatmul.bf16.vlgmr.msra.gmra.mxu1 %v16260_v31  ;;  %v8834_v31 = vpop.f32.mrf.mxu1  ;;  %v11651_v61 = vor.u32 %v15254_v36, %v11648_v22  ;;  %v15152_v52 = vld [vmem:[#allocation2 + $0xb24] sm:$0xf]  ;;  %v11795_v22 = vor.u32 %v15290_v43, %v11792_v50 }
 0x438   :  { %9085 = vmatpush.bf16.msrb.mxu1 %v11531_v53  ;;  %9054 = vmatmul.bf16.vlgmr.msra.gmra.mxu2 %v16264_v38  ;;  %v15206_v38 = vld [vmem:[#allocation2 + $0xcd4] sm:$0xf]  ;;  %v11240_v53 = vld [vmem:[#allocation2 + $0xb38] sm:$0xf0]  ;;  %v8835_v26 = vadd.f32 %v8834_v31, %v8822_v58  ;;  %v15188_v36 = vld [vmem:[#allocation2 + $0xc44] sm:$0xf] }
 0x439   :  { %9098 = vmatpush.bf16.msrb.mxu2 %v11723_v28  ;;  %9067 = vmatmul.bf16.vlgmr.msra.gmra.mxu3 %v16258_v29  ;;  %v15302_v29 = vld [vmem:[#allocation2 + $0xfd4] sm:$0xf]  ;;  %v11459_v39 = vor.u32 %v15206_v38, %v11456_v33  ;;  %v15200_v28 = vld [vmem:[#allocation2 + $0xca4] sm:$0xf]  ;;  %v11243_v51 = vor.u32 %v15152_v52, %v11240_v53  ;;  %v11192_v33 = vld [vmem:[#allocation2 + $0xad8] sm:$0xf0]  ;;  %v11387_v52 = vor.u32 %v15188_v36, %v11384_v56 }
 0x43a   :  { %9111 = vmatpush.bf16.msrb.mxu3 %v11915_v20  ;;  %v11843_v30 = vor.u32 %v15302_v29, %v11840_v57  ;;  %v15248_v20 = vld [vmem:[#allocation2 + $0xe24] sm:$0xf]  ;;  %v11435_v24 = vor.u32 %v15200_v28, %v11432_v34  ;;  %v11576_v57 = vld [vmem:[#allocation2 + $0xdd8] sm:$0xf0]  ;;  %v15182_v28 = vld [vmem:[#allocation2 + $0xc14] sm:$0xf] }
 0x43b   :  { %9073 = vmatpush.bf16.msrb.mxu0 %v11315_v41  ;;  %v11627_v40 = vor.u32 %v15248_v20, %v11624_v63  ;;  %v15146_v41 = vld [vmem:[#allocation2 + $0xaf4] sm:$0xf]  ;;  %v8847_v42 = vpop.f32.mrf.mxu2  ;;  %v15236_v29 = vld [vmem:[#allocation2 + $0xdc4] sm:$0xf]  ;;  %v11552_v20 = vld [vmem:[#allocation2 + $0xda8] sm:$0xf0] }
 0x43c   :  { %9086 = vmatpush.bf16.msrb.mxu1 %v11507_v62  ;;  %v11216_v62 = vld [vmem:[#allocation2 + $0xb08] sm:$0xf0]  ;;  %v8848_v45 = vadd.f32 %v8847_v42, %v8835_v26  ;;  %v8860_v0 = vpop.f32.mrf.mxu3  ;;  %v15284_v58 = vld [vmem:[#allocation2 + $0xf44] sm:$0xf]  ;;  %v11579_v53 = vor.u32 %v15236_v29, %v11576_v57  ;;  %v15230_v26 = vld [vmem:[#allocation2 + $0xd94] sm:$0xf] }
 0x43d   :  { %9099 = vmatpush.bf16.msrb.mxu2 %v11699_v1  ;;  %v15194_v1 = vld [vmem:[#allocation2 + $0xc74] sm:$0xf]  ;;  %v12488_v42 = vld [vmem:[#allocation2 + $0x14f8] sm:$0xf0]  ;;  %v12464_v36 = vld [vmem:[#allocation2 + $0x14c8] sm:$0xf0] }
 0x43e   :  { %9112 = vmatpush.bf16.msrb.mxu3 %v11891_v44  ;;  %v15242_v44 = vld [vmem:[#allocation2 + $0xdf4] sm:$0xf]  ;;  %v16519_v37 = vadd.f32 %v8860_v0, %v8848_v45  ;;  %v11411_v55 = vor.u32 %v15194_v1, %v11408_v18  ;;  %v12296_v1 = vld [vmem:[#allocation2 + $0x1378] sm:$0xf0]  ;;  %v12656_v56 = vld [vmem:[#allocation2 + $0x1648] sm:$0xf0] }
 0x43f   :  { %9074 = vmatpush.bf16.msrb.mxu0 %v11291_v17  ;;  %v8823_v17 = vpop.f32.mrf.mxu0  ;;  %v11603_v38 = vor.u32 %v15242_v44, %v11600_v23  ;;  %v15278_v63 = vld [vmem:[#allocation2 + $0xf14] sm:$0xf]  ;;  %v11555_v44 = vor.u32 %v15230_v26, %v11552_v20  ;;  %v15512_v23 = vld [vmem:[#allocation2 + $0x1664] sm:$0xf]  ;;  %v12680_v45 = vld [vmem:[#allocation2 + $0x1678] sm:$0xf0] }
 0x440   :  { %9087 = vmatpush.bf16.msrb.mxu1 %v11483_v54  ;;  %v11219_v54 = vor.u32 %v15146_v41, %v11216_v62  ;;  %v11747_v0 = vor.u32 %v15278_v63, %v11744_v21  ;;  %v12632_v26 = vld [vmem:[#allocation2 + $0x1618] sm:$0xf0]  ;;  %v15350_v21 = vld [vmem:[#allocation2 + $0x1154] sm:$0xf] }
 0x441   :  { %9100 = vmatpush.bf16.msrb.mxu2 %v11675_v4  ;;  %v8836_v4 = vpop.f32.mrf.mxu1 }
 0x442   :  { %9113 = vmatpush.bf16.msrb.mxu3 %v11867_v59  ;;  %v15140_v59 = vld [vmem:[#allocation2 + $0xac4] sm:$0xf]  ;;  %v12080_v4 = vld [vmem:[#allocation2 + $0x11c8] sm:$0xf0] }
 0x443   :  { %9075 = vmatpush.bf16.msrb.mxu0 %v11267_v25  ;;  %v11768_v25 = vld [vmem:[#allocation2 + $0xf58] sm:$0xf0]  ;;  %v11195_v31 = vor.u32 %v15140_v59, %v11192_v33  ;;  %v8849_v35 = vpop.f32.mrf.mxu2  ;;  %v12272_v59 = vld [vmem:[#allocation2 + $0x1348] sm:$0xf0]  ;;  %v15458_v33 = vld [vmem:[#allocation2 + $0x14b4] sm:$0xf] }
 0x444   :  { %9088 = vmatpush.bf16.msrb.mxu1 %v11459_v39  ;;  %v15134_v39 = vld [vmem:[#allocation2 + $0xa94] sm:$0xf]  ;;  %v11771_v34 = vor.u32 %v15284_v58, %v11768_v25  ;;  %v8862_v41 = vpop.f32.mrf.mxu3  ;;  %v12467_v58 = vor.u32 %v15458_v33, %v12464_v36  ;;  %v15356_v25 = vld [vmem:[#allocation2 + $0x1184] sm:$0xf]  ;;  %v11984_v36 = vld [vmem:[#allocation2 + $0x1108] sm:$0xf0] }
 0x445   :  { %9101 = vmatpush.bf16.msrb.mxu2 %v11651_v61  ;;  %v11168_v61 = vld [vmem:[#allocation2 + $0xaa8] sm:$0xf0]  ;;  %v15398_v35 = vld [vmem:[#allocation2 + $0x12d4] sm:$0xf] }
 0x446   :  { %9114 = vmatpush.bf16.msrb.mxu3 %v11843_v30  ;;  %v11360_v30 = vld [vmem:[#allocation2 + $0xc28] sm:$0xf0]  ;;  %v11171_v62 = vor.u32 %v15134_v39, %v11168_v61  ;;  %v15404_v39 = vld [vmem:[#allocation2 + $0x1304] sm:$0xf]  ;;  %v15338_v33 = vld [vmem:[#allocation2 + $0x10f4] sm:$0xf] }
 0x447   :  { %9076 = vmatpush.bf16.msrb.mxu0 %v11243_v51  ;;  %v15368_v51 = vld [vmem:[#allocation2 + $0x11e4] sm:$0xf]  ;;  %v11363_v18 = vor.u32 %v15182_v28, %v11360_v30  ;;  %v12440_v28 = vld [vmem:[#allocation2 + $0x1498] sm:$0xf0] }
 0x448   :  { %9089 = vmatpush.bf16.msrb.mxu1 %v11435_v24  ;;  %v12104_v24 = vld [vmem:[#allocation2 + $0x11f8] sm:$0xf0]  ;;  %v15500_v30 = vld [vmem:[#allocation2 + $0x1604] sm:$0xf] }
 0x449   :  { %9102 = vmatpush.bf16.msrb.mxu2 %v11627_v40  ;;  %v15416_v40 = vld [vmem:[#allocation2 + $0x1364] sm:$0xf]  ;;  %v12107_v43 = vor.u32 %v15368_v51, %v12104_v24  ;;  %v12635_v51 = vor.u32 %v15500_v30, %v12632_v26  ;;  %v12224_v24 = vld [vmem:[#allocation2 + $0x12e8] sm:$0xf0] }
 0x44a   :  { %9115 = vmatpush.bf16.msrb.mxu3 %v11819_v6  ;;  %v15464_v6 = vld [vmem:[#allocation2 + $0x14e4] sm:$0xf]  ;;  %v12299_v50 = vor.u32 %v15416_v40, %v12296_v1  ;;  %v15446_v40 = vld [vmem:[#allocation2 + $0x1454] sm:$0xf] }
 0x44b   :  { %9077 = vmatpush.bf16.msrb.mxu0 %v11219_v54  ;;  %v12491_v17 = vor.u32 %v15464_v6, %v12488_v42  ;;  %v15362_v54 = vld [vmem:[#allocation2 + $0x11b4] sm:$0xf]  ;;  %v12227_v42 = vor.u32 %v15398_v35, %v12224_v24  ;;  %v15428_v24 = vld [vmem:[#allocation2 + $0x13c4] sm:$0xf] }
 0x44c   :  { %9090 = vmatpush.bf16.msrb.mxu1 %v11411_v55  ;;  %v15410_v55 = vld [vmem:[#allocation2 + $0x1334] sm:$0xf]  ;;  %v12083_v29 = vor.u32 %v15362_v54, %v12080_v4  ;;  %v12392_v54 = vld [vmem:[#allocation2 + $0x1438] sm:$0xf0]  ;;  %v15488_v4 = vld [vmem:[#allocation2 + $0x15a4] sm:$0xf] }
 0x44d   :  { %9103 = vmatpush.bf16.msrb.mxu2 %v11603_v38  ;;  %v12683_v38 = vor.u32 %v15512_v23, %v12680_v45  ;;  %v12275_v57 = vor.u32 %v15410_v55, %v12272_v59  ;;  %v12008_v23 = vld [vmem:[#allocation2 + $0x1138] sm:$0xf0]  ;;  %v15392_v45 = vld [vmem:[#allocation2 + $0x12a4] sm:$0xf] }
 0x44e   :  { %9116 = vmatpush.bf16.msrb.mxu3 %v11795_v22  ;;  %v15506_v22 = vld [vmem:[#allocation2 + $0x1634] sm:$0xf]  ;;  %v12584_v55 = vld [vmem:[#allocation2 + $0x15b8] sm:$0xf0] }
 0x44f   :  { %9078 = vmatpush.bf16.msrb.mxu0 %v11195_v31  ;;  %v12056_v31 = vld [vmem:[#allocation2 + $0x1198] sm:$0xf0]  ;;  %v12659_v61 = vor.u32 %v15506_v22, %v12656_v56  ;;  %v15386_v22 = vld [vmem:[#allocation2 + $0x1274] sm:$0xf]  ;;  %v12587_v56 = vor.u32 %v15488_v4, %v12584_v55  ;;  %v15608_v4 = vld [vmem:[#allocation2 + $0x1964] sm:$0xf] }
 0x450   :  { %9091 = vmatpush.bf16.msrb.mxu1 %v11387_v52  ;;  %v12248_v52 = vld [vmem:[#allocation2 + $0x1318] sm:$0xf0] }
 0x451   :  { %9104 = vmatpush.bf16.msrb.mxu2 %v11579_v53  ;;  %v15452_v53 = vld [vmem:[#allocation2 + $0x1484] sm:$0xf]  ;;  %v12251_v20 = vor.u32 %v15404_v39, %v12248_v52  ;;  %v12560_v52 = vld [vmem:[#allocation2 + $0x1588] sm:$0xf0] }
 0x452   :  { %9117 = vmatpush.bf16.msrb.mxu3 %v11771_v34  ;;  %v12059_v34 = vor.u32 %v15356_v25, %v12056_v31  ;;  %v12443_v63 = vor.u32 %v15452_v53, %v12440_v28  ;;  %v12368_v25 = vld [vmem:[#allocation2 + $0x1408] sm:$0xf0]  ;;  %v11987_v28 = vor.u32 %v15338_v33, %v11984_v36  ;;  %v13256_v33 = vld [vmem:[#allocation2 + $0x1af8] sm:$0xf0] }
 0x453   :  { %9079 = vmatpush.bf16.msrb.mxu0 %v11171_v62  ;;  %v8873_v41 = vpop.f32.mrf.mxu0  ;;  %v12608_v62 = vld [vmem:[#allocation2 + $0x15e8] sm:$0xf0] }
 0x454   :  { %9092 = vmatpush.bf16.msrb.mxu1 %v11363_v18  ;;  %v8886_v6 = vpop.f32.mrf.mxu1 }
 0x455   :  { %9105 = vmatpush.bf16.msrb.mxu2 %v11555_v44  ;;  %v15344_v44 = vld [vmem:[#allocation2 + $0x1124] sm:$0xf] }
 0x456   :  { %9118 = vmatpush.bf16.msrb.mxu3 %v11747_v0  ;;  %9080 = vmatmul.bf16.vlgmr.msrb.gmra.mxu0 %v16262_v32  ;;  %v12032_v32 = vld [vmem:[#allocation2 + $0x1168] sm:$0xf0] }
 0x457   :  { %9124 = vmatpush.bf16.msra.mxu0 %v12107_v43  ;;  %9093 = vmatmul.bf16.vlgmr.msrb.gmra.mxu1 %v16273_v8  ;;  %v15494_v8 = vld [vmem:[#allocation2 + $0x15d4] sm:$0xf]  ;;  %v12035_v1 = vor.u32 %v15350_v21, %v12032_v32  ;;  %v11960_v21 = vld [vmem:[#allocation2 + $0x10d8] sm:$0xf0]  ;;  %v15380_v32 = vld [vmem:[#allocation2 + $0x1244] sm:$0xf] }
 0x458   :  { %9137 = vmatpush.bf16.msra.mxu1 %v12299_v50  ;;  %9106 = vmatmul.bf16.vlgmr.msrb.gmra.mxu2 %v16277_v12  ;;  %v12416_v12 = vld [vmem:[#allocation2 + $0x1468] sm:$0xf0]  ;;  %v12611_v0 = vor.u32 %v15494_v8, %v12608_v62  ;;  %v12200_v50 = vld [vmem:[#allocation2 + $0x12b8] sm:$0xf0]  ;;  %v15326_v62 = vld [vmem:[#allocation2 + $0x1094] sm:$0xf] }
 0x459   :  { %9150 = vmatpush.bf16.msra.mxu2 %v12491_v17  ;;  %9119 = vmatmul.bf16.vlgmr.msrb.gmra.mxu3 %v16275_v11  ;;  %v8874_v11 = vadd.f32 %v8873_v41, %v16519_v37  ;;  %v12419_v18 = vor.u32 %v15446_v40, %v12416_v12  ;;  %v15440_v17 = vld [vmem:[#allocation2 + $0x1424] sm:$0xf]  ;;  %v12203_v37 = vor.u32 %v15392_v45, %v12200_v50  ;;  %v12344_v40 = vld [vmem:[#allocation2 + $0x13d8] sm:$0xf0]  ;;  %v12320_v45 = vld [vmem:[#allocation2 + $0x13a8] sm:$0xf0] }
 0x45a   :  { %9163 = vmatpush.bf16.msra.mxu3 %v12683_v38  ;;  %v12011_v38 = vor.u32 %v15344_v44, %v12008_v23  ;;  %v12395_v59 = vor.u32 %v15440_v17, %v12392_v54  ;;  %v15476_v12 = vld [vmem:[#allocation2 + $0x1544] sm:$0xf]  ;;  %v12536_v41 = vld [vmem:[#allocation2 + $0x1558] sm:$0xf0]  ;;  %v15422_v44 = vld [vmem:[#allocation2 + $0x1394] sm:$0xf] }
 0x45b   :  { %9125 = vmatpush.bf16.msra.mxu0 %v12083_v29  ;;  %v8887_v43 = vadd.f32 %v8886_v6, %v8874_v11  ;;  %v8899_v29 = vpop.f32.mrf.mxu2  ;;  %v8875_v53 = vpop.f32.mrf.mxu0  ;;  %v11936_v11 = vld [vmem:[#allocation2 + $0x10a8] sm:$0xf0]  ;;  %v12347_v6 = vor.u32 %v15428_v24, %v12344_v40  ;;  %v12539_v23 = vor.u32 %v15476_v12, %v12536_v41  ;;  %v15560_v17 = vld [vmem:[#allocation2 + $0x17e4] sm:$0xf]  ;;  %v12872_v54 = vld [vmem:[#allocation2 + $0x17f8] sm:$0xf0] }
 0x45c   :  { %9138 = vmatpush.bf16.msra.mxu1 %v12275_v57  ;;  %v12176_v57 = vld [vmem:[#allocation2 + $0x1288] sm:$0xf0]  ;;  %v8912_v39 = vpop.f32.mrf.mxu3  ;;  %v8888_v30 = vpop.f32.mrf.mxu1  ;;  %v12824_v24 = vld [vmem:[#allocation2 + $0x1798] sm:$0xf0]  ;;  %v15596_v40 = vld [vmem:[#allocation2 + $0x1904] sm:$0xf] }
 0x45d   :  { %9151 = vmatpush.bf16.msra.mxu2 %v12467_v58  ;;  %v15434_v58 = vld [vmem:[#allocation2 + $0x13f4] sm:$0xf]  ;;  %v8900_v31 = vadd.f32 %v8899_v29, %v8887_v43  ;;  %v12512_v43 = vld [vmem:[#allocation2 + $0x1528] sm:$0xf0]  ;;  %v13448_v29 = vld [vmem:[#allocation2 + $0x1c78] sm:$0xf0] }
 0x45e   :  { %9164 = vmatpush.bf16.msra.mxu3 %v12659_v61  ;;  %v15482_v61 = vld [vmem:[#allocation2 + $0x1574] sm:$0xf]  ;;  %v13016_v41 = vld [vmem:[#allocation2 + $0x1918] sm:$0xf0] }
 0x45f   :  { %9126 = vmatpush.bf16.msra.mxu0 %v12059_v34  ;;  %v16526_v26 = vadd.f32 %v8912_v39, %v8900_v31  ;;  %v12179_v34 = vor.u32 %v15386_v22, %v12176_v57  ;;  %v12563_v35 = vor.u32 %v15482_v61, %v12560_v52  ;;  %v12323_v22 = vor.u32 %v15422_v44, %v12320_v45  ;;  %v15554_v39 = vld [vmem:[#allocation2 + $0x17b4] sm:$0xf]  ;;  %v12848_v61 = vld [vmem:[#allocation2 + $0x17c8] sm:$0xf0] }
 0x460   :  { %9139 = vmatpush.bf16.msra.mxu1 %v12251_v20  ;;  %v12371_v20 = vor.u32 %v15434_v58, %v12368_v25  ;;  %v12875_v58 = vor.u32 %v15560_v17, %v12872_v54  ;;  %v15602_v52 = vld [vmem:[#allocation2 + $0x1934] sm:$0xf]  ;;  %v13376_v17 = vld [vmem:[#allocation2 + $0x1be8] sm:$0xf0] }
 0x461   :  { %9152 = vmatpush.bf16.msra.mxu2 %v12443_v63  ;;  %v15332_v63 = vld [vmem:[#allocation2 + $0x10c4] sm:$0xf]  ;;  %v15650_v30 = vld [vmem:[#allocation2 + $0x1ab4] sm:$0xf] }
 0x462   :  { %9165 = vmatpush.bf16.msra.mxu3 %v12635_v51  ;;  %v12152_v51 = vld [vmem:[#allocation2 + $0x1258] sm:$0xf0]  ;;  %v11963_v8 = vor.u32 %v15332_v63, %v11960_v21  ;;  %v13424_v63 = vld [vmem:[#allocation2 + $0x1c48] sm:$0xf0]  ;;  %v12851_v21 = vor.u32 %v15554_v39, %v12848_v61  ;;  %v15542_v44 = vld [vmem:[#allocation2 + $0x1754] sm:$0xf] }
 0x463   :  { %9127 = vmatpush.bf16.msra.mxu0 %v12035_v1  ;;  %v12155_v1 = vor.u32 %v15380_v32, %v12152_v51  ;;  %v8901_v50 = vpop.f32.mrf.mxu2  ;;  %v15548_v51 = vld [vmem:[#allocation2 + $0x1784] sm:$0xf]  ;;  %v15530_v61 = vld [vmem:[#allocation2 + $0x16f4] sm:$0xf] }
 0x464   :  { %9140 = vmatpush.bf16.msra.mxu1 %v12227_v42  ;;  %v15374_v42 = vld [vmem:[#allocation2 + $0x1214] sm:$0xf]  ;;  %v8914_v55 = vpop.f32.mrf.mxu3 }
 0x465   :  { %9153 = vmatpush.bf16.msra.mxu2 %v12419_v18  ;;  %v12128_v18 = vld [vmem:[#allocation2 + $0x1228] sm:$0xf0] }
 0x466   :  { %9166 = vmatpush.bf16.msra.mxu3 %v12611_v0  ;;  %v15470_v0 = vld [vmem:[#allocation2 + $0x1514] sm:$0xf]  ;;  %v12131_v36 = vor.u32 %v15374_v42, %v12128_v18  ;;  %v13019_v42 = vor.u32 %v15596_v40, %v13016_v41 }
 0x467   :  { %9128 = vmatpush.bf16.msra.mxu0 %v12011_v38  ;;  %v11939_v38 = vor.u32 %v15326_v62, %v11936_v11  ;;  %v12515_v57 = vor.u32 %v15470_v0, %v12512_v43  ;;  %v13208_v62 = vld [vmem:[#allocation2 + $0x1a98] sm:$0xf0]  ;;  %v15692_v11 = vld [vmem:[#allocation2 + $0x1c04] sm:$0xf]  ;;  %v12992_v0 = vld [vmem:[#allocation2 + $0x18e8] sm:$0xf0] }
 0x468   :  { %9141 = vmatpush.bf16.msra.mxu1 %v12203_v37  ;;  %v13064_v37 = vld [vmem:[#allocation2 + $0x1978] sm:$0xf0]  ;;  %v15638_v43 = vld [vmem:[#allocation2 + $0x1a54] sm:$0xf] }
 0x469   :  { %9154 = vmatpush.bf16.msra.mxu2 %v12395_v59  ;;  %v15656_v59 = vld [vmem:[#allocation2 + $0x1ae4] sm:$0xf]  ;;  %v13067_v25 = vor.u32 %v15608_v4, %v13064_v37 }
 0x46a   :  { %9167 = vmatpush.bf16.msra.mxu3 %v12587_v56  ;;  %v15704_v56 = vld [vmem:[#allocation2 + $0x1c64] sm:$0xf]  ;;  %v13259_v31 = vor.u32 %v15656_v59, %v13256_v33  ;;  %v12776_v59 = vld [vmem:[#allocation2 + $0x1738] sm:$0xf0] }
 0x46b   :  { %9129 = vmatpush.bf16.msra.mxu0 %v11987_v28  ;;  %v13451_v53 = vor.u32 %v15704_v56, %v13448_v29  ;;  %v13040_v28 = vld [vmem:[#allocation2 + $0x1948] sm:$0xf0]  ;;  %v15536_v37 = vld [vmem:[#allocation2 + $0x1724] sm:$0xf]  ;;  %v12968_v56 = vld [vmem:[#allocation2 + $0x18b8] sm:$0xf0] }
 0x46c   :  { %9142 = vmatpush.bf16.msra.mxu1 %v12179_v34  ;;  %v13232_v34 = vld [vmem:[#allocation2 + $0x1ac8] sm:$0xf0]  ;;  %v13043_v32 = vor.u32 %v15602_v52, %v13040_v28  ;;  %v15584_v33 = vld [vmem:[#allocation2 + $0x18a4] sm:$0xf] }
 0x46d   :  { %9155 = vmatpush.bf16.msra.mxu2 %v12371_v20  ;;  %v15698_v20 = vld [vmem:[#allocation2 + $0x1c34] sm:$0xf]  ;;  %v15632_v29 = vld [vmem:[#allocation2 + $0x1a24] sm:$0xf]  ;;  %v12752_v52 = vld [vmem:[#allocation2 + $0x1708] sm:$0xf0] }
 0x46e   :  { %9168 = vmatpush.bf16.msra.mxu3 %v12563_v35  ;;  %v13235_v35 = vor.u32 %v15650_v30, %v13232_v34  ;;  %v13427_v12 = vor.u32 %v15698_v20, %v13424_v63  ;;  %v12944_v34 = vld [vmem:[#allocation2 + $0x1888] sm:$0xf0]  ;;  %v15626_v20 = vld [vmem:[#allocation2 + $0x19f4] sm:$0xf]  ;;  %v12755_v40 = vor.u32 %v15530_v61, %v12752_v52  ;;  %v14216_v61 = vld [vmem:[#allocation2 + $0x2278] sm:$0xf0] }
 0x46f   :  { %9130 = vmatpush.bf16.msra.mxu0 %v11963_v8  ;;  %v15644_v8 = vld [vmem:[#allocation2 + $0x1a84] sm:$0xf]  ;;  %v13136_v63 = vld [vmem:[#allocation2 + $0x1a08] sm:$0xf0] }
 0x470   :  { %9143 = vmatpush.bf16.msra.mxu1 %v12155_v1  ;;  %v13400_v1 = vld [vmem:[#allocation2 + $0x1c18] sm:$0xf0]  ;;  %v13211_v18 = vor.u32 %v15644_v8, %v13208_v62  ;;  %v13139_v62 = vor.u32 %v15626_v20, %v13136_v63  ;;  %v13616_v20 = vld [vmem:[#allocation2 + $0x1dc8] sm:$0xf0]  ;;  %v15794_v63 = vld [vmem:[#allocation2 + $0x1f34] sm:$0xf] }
 0x471   :  { %9156 = vmatpush.bf16.msra.mxu2 %v12347_v6  ;;  %v12827_v6 = vor.u32 %v15548_v51, %v12824_v24  ;;  %v13403_v45 = vor.u32 %v15692_v11, %v13400_v1  ;;  %v13328_v51 = vld [vmem:[#allocation2 + $0x1b88] sm:$0xf0]  ;;  %v15524_v11 = vld [vmem:[#allocation2 + $0x16c4] sm:$0xf]  ;;  %v12728_v1 = vld [vmem:[#allocation2 + $0x16d8] sm:$0xf0] }
 0x472   :  { %9169 = vmatpush.bf16.msra.mxu3 %v12539_v23  ;;  %v15590_v23 = vld [vmem:[#allocation2 + $0x18d4] sm:$0xf] }
 0x473   :  { %9131 = vmatpush.bf16.msra.mxu0 %v11939_v38  ;;  %v8925_v50 = vpop.f32.mrf.mxu0  ;;  %v12995_v55 = vor.u32 %v15590_v23, %v12992_v0  ;;  %v15668_v23 = vld [vmem:[#allocation2 + $0x1b44] sm:$0xf]  ;;  %v12731_v0 = vor.u32 %v15524_v11, %v12728_v1  ;;  %v13592_v1 = vld [vmem:[#allocation2 + $0x1d98] sm:$0xf0] }
 0x474   :  { %9144 = vmatpush.bf16.msra.mxu1 %v12131_v36  ;;  %v8938_v4 = vpop.f32.mrf.mxu1  ;;  %v15740_v11 = vld [vmem:[#allocation2 + $0x1d84] sm:$0xf] }
 0x475   :  { %9157 = vmatpush.bf16.msra.mxu2 %v12323_v22 }
 0x476   :  { %9170 = vmatpush.bf16.msra.mxu3 %v12515_v57  ;;  %9132 = vmatmul.bf16.vlgmr.msra.gmra.mxu0 %v16279_v15  ;;  %v12800_v15 = vld [vmem:[#allocation2 + $0x1768] sm:$0xf0]  ;;  %v13160_v57 = vld [vmem:[#allocation2 + $0x1a38] sm:$0xf0] }
 0x477   :  { %9176 = vmatpush.bf16.msrb.mxu0 %v12875_v58  ;;  %9145 = vmatmul.bf16.vlgmr.msra.gmra.mxu1 %v16285_v46  ;;  %v15686_v46 = vld [vmem:[#allocation2 + $0x1bd4] sm:$0xf]  ;;  %v12803_v54 = vor.u32 %v15542_v44, %v12800_v15  ;;  %v15680_v58 = vld [vmem:[#allocation2 + $0x1ba4] sm:$0xf]  ;;  %v13163_v39 = vor.u32 %v15632_v29, %v13160_v57  ;;  %v13112_v15 = vld [vmem:[#allocation2 + $0x19d8] sm:$0xf0] }
 0x478   :  { %9189 = vmatpush.bf16.msrb.mxu1 %v13067_v25  ;;  %9158 = vmatmul.bf16.vlgmr.msra.gmra.mxu2 %v16289_v48  ;;  %v13184_v48 = vld [vmem:[#allocation2 + $0x1a68] sm:$0xf0]  ;;  %v13379_v36 = vor.u32 %v15686_v46, %v13376_v17  ;;  %v13352_v25 = vld [vmem:[#allocation2 + $0x1bb8] sm:$0xf0]  ;;  %v15620_v44 = vld [vmem:[#allocation2 + $0x19c4] sm:$0xf] }
 0x479   :  { %9202 = vmatpush.bf16.msrb.mxu2 %v13259_v31  ;;  %9171 = vmatmul.bf16.vlgmr.msra.gmra.mxu3 %v16287_v47  ;;  %v8926_v47 = vadd.f32 %v8925_v50, %v16526_v26  ;;  %v13187_v38 = vor.u32 %v15638_v43, %v13184_v48  ;;  %v12779_v31 = vor.u32 %v15536_v37, %v12776_v59  ;;  %v15518_v43 = vld [vmem:[#allocation2 + $0x1694] sm:$0xf]  ;;  %v12704_v48 = vld [vmem:[#allocation2 + $0x16a8] sm:$0xf0]  ;;  %v13832_v57 = vld [vmem:[#allocation2 + $0x1f78] sm:$0xf0] }
 0x47a   :  { %9215 = vmatpush.bf16.msrb.mxu3 %v13451_v53  ;;  %v12971_v26 = vor.u32 %v15584_v33, %v12968_v56  ;;  %v15578_v53 = vld [vmem:[#allocation2 + $0x1874] sm:$0xf]  ;;  %v13355_v28 = vor.u32 %v15680_v58, %v13352_v25  ;;  %v13115_v46 = vor.u32 %v15620_v44, %v13112_v15  ;;  %v13280_v37 = vld [vmem:[#allocation2 + $0x1b28] sm:$0xf0]  ;;  %v15752_v33 = vld [vmem:[#allocation2 + $0x1de4] sm:$0xf]  ;;  %v12707_v29 = vor.u32 %v15518_v43, %v12704_v48 }
 0x47b   :  { %9177 = vmatpush.bf16.msrb.mxu0 %v12851_v21  ;;  %v8939_v22 = vadd.f32 %v8938_v4, %v8926_v47  ;;  %v8951_v30 = vpop.f32.mrf.mxu2  ;;  %v8927_v24 = vpop.f32.mrf.mxu0  ;;  %v12947_v8 = vor.u32 %v15578_v53, %v12944_v34  ;;  %v15566_v17 = vld [vmem:[#allocation2 + $0x1814] sm:$0xf]  ;;  %v12896_v47 = vld [vmem:[#allocation2 + $0x1828] sm:$0xf0]  ;;  %v15848_v58 = vld [vmem:[#allocation2 + $0x20e4] sm:$0xf] }
 0x47c   :  { %9190 = vmatpush.bf16.msrb.mxu1 %v13043_v32  ;;  %v8964_v32 = vpop.f32.mrf.mxu3  ;;  %v14024_v25 = vld [vmem:[#allocation2 + $0x20f8] sm:$0xf0]  ;;  %v15746_v34 = vld [vmem:[#allocation2 + $0x1db4] sm:$0xf]  ;;  %v15836_v44 = vld [vmem:[#allocation2 + $0x2084] sm:$0xf] }
 0x47d   :  { %9203 = vmatpush.bf16.msrb.mxu2 %v13235_v35  ;;  %v8952_v21 = vadd.f32 %v8951_v30, %v8939_v22  ;;  %v15674_v35 = vld [vmem:[#allocation2 + $0x1b74] sm:$0xf]  ;;  %v15800_v22 = vld [vmem:[#allocation2 + $0x1f64] sm:$0xf]  ;;  %v14027_v30 = vor.u32 %v15848_v58, %v14024_v25  ;;  %v13976_v15 = vld [vmem:[#allocation2 + $0x2098] sm:$0xf0] }
 0x47e   :  { %9216 = vmatpush.bf16.msrb.mxu3 %v13427_v12  ;;  %v8940_v12 = vpop.f32.mrf.mxu1  ;;  %v15890_v24 = vld [vmem:[#allocation2 + $0x2234] sm:$0xf]  ;;  %v13979_v48 = vor.u32 %v15836_v44, %v13976_v15  ;;  %v13736_v25 = vld [vmem:[#allocation2 + $0x1eb8] sm:$0xf0]  ;;  %v15764_v44 = vld [vmem:[#allocation2 + $0x1e44] sm:$0xf] }
 0x47f   :  { %9178 = vmatpush.bf16.msrb.mxu0 %v12827_v6  ;;  %v16533_v41 = vadd.f32 %v8964_v32, %v8952_v21  ;;  %v15572_v6 = vld [vmem:[#allocation2 + $0x1844] sm:$0xf]  ;;  %v13808_v32 = vld [vmem:[#allocation2 + $0x1f48] sm:$0xf0]  ;;  %v13619_v12 = vor.u32 %v15746_v34, %v13616_v20  ;;  %v15770_v20 = vld [vmem:[#allocation2 + $0x1e74] sm:$0xf] }
 0x480   :  { %9191 = vmatpush.bf16.msrb.mxu1 %v13019_v42  ;;  %v13331_v42 = vor.u32 %v15674_v35, %v13328_v51  ;;  %v15842_v35 = vld [vmem:[#allocation2 + $0x20b4] sm:$0xf]  ;;  %v14000_v51 = vld [vmem:[#allocation2 + $0x20c8] sm:$0xf0] }
 0x481   :  { %9204 = vmatpush.bf16.msrb.mxu2 %v13211_v18  ;;  %v12920_v18 = vld [vmem:[#allocation2 + $0x1858] sm:$0xf0]  ;;  %v13520_v34 = vld [vmem:[#allocation2 + $0x1d08] sm:$0xf0] }
 0x482   :  { %9217 = vmatpush.bf16.msrb.mxu3 %v13403_v45  ;;  %v13304_v45 = vld [vmem:[#allocation2 + $0x1b58] sm:$0xf0]  ;;  %v12923_v50 = vor.u32 %v15572_v6, %v12920_v18  ;;  %v15788_v6 = vld [vmem:[#allocation2 + $0x1f04] sm:$0xf] }
 0x483   :  { %9179 = vmatpush.bf16.msrb.mxu0 %v12803_v54  ;;  %v15614_v54 = vld [vmem:[#allocation2 + $0x1994] sm:$0xf]  ;;  %v13307_v4 = vor.u32 %v15668_v23, %v13304_v45  ;;  %v8953_v59 = vpop.f32.mrf.mxu2  ;;  %v13784_v18 = vld [vmem:[#allocation2 + $0x1f18] sm:$0xf0]  ;;  %v15884_v23 = vld [vmem:[#allocation2 + $0x2204] sm:$0xf] }
 0x484   :  { %9192 = vmatpush.bf16.msrb.mxu1 %v12995_v55  ;;  %v13088_v55 = vld [vmem:[#allocation2 + $0x19a8] sm:$0xf0]  ;;  %v8966_v56 = vpop.f32.mrf.mxu3  ;;  %v14168_v45 = vld [vmem:[#allocation2 + $0x2218] sm:$0xf0]  ;;  %v13787_v43 = vor.u32 %v15788_v6, %v13784_v18 }
 0x485   :  { %9205 = vmatpush.bf16.msrb.mxu2 %v13187_v38  ;;  %v15662_v38 = vld [vmem:[#allocation2 + $0x1b14] sm:$0xf]  ;;  %v13544_v56 = vld [vmem:[#allocation2 + $0x1d38] sm:$0xf0] }
 0x486   :  { %9218 = vmatpush.bf16.msrb.mxu3 %v13379_v36  ;;  %v13640_v36 = vld [vmem:[#allocation2 + $0x1df8] sm:$0xf0]  ;;  %v13283_v52 = vor.u32 %v15662_v38, %v13280_v37  ;;  %v16062_v38 = vld [vmem:[#allocation5] sm:$0x3f] }
 0x487   :  { %9180 = vmatpush.bf16.msrb.mxu0 %v12779_v31  ;;  %v12899_v31 = vor.u32 %v15566_v17, %v12896_v47  ;;  %v13643_v53 = vor.u32 %v15752_v33, %v13640_v36  ;;  %v14171_v17 = vor.u32 %v15884_v23, %v14168_v45  ;;  %v13760_v47 = vld [vmem:[#allocation2 + $0x1ee8] sm:$0xf0]  ;;  %v1291_v37 = vperm.slane %v16062_v38, 5  ;;  %v13496_v18 = vld [vmem:[#allocation2 + $0x1cd8] sm:$0xf0] }
 0x488   :  { %9193 = vmatpush.bf16.msrb.mxu1 %v12971_v26  ;;  %v13091_v26 = vor.u32 %v15614_v54, %v13088_v55  ;;  %v15830_v54 = vld [vmem:[#allocation2 + $0x2054] sm:$0xf]  ;;  %v14144_v55 = vld [vmem:[#allocation2 + $0x21e8] sm:$0xf0] }
 0x489   :  { %9206 = vmatpush.bf16.msrb.mxu2 %v13163_v39  ;;  %v15896_v39 = vld [vmem:[#allocation2 + $0x2264] sm:$0xf]  ;;  %v15806_v38 = vld [vmem:[#allocation2 + $0x1f94] sm:$0xf] }
 0x48a   :  { %9219 = vmatpush.bf16.msrb.mxu3 %v13355_v28  ;;  %v13835_v28 = vor.u32 %v15800_v22, %v13832_v57  ;;  %v14219_v21 = vor.u32 %v15896_v39, %v14216_v61  ;;  %v15728_v22 = vld [vmem:[#allocation2 + $0x1d24] sm:$0xf]  ;;  %v14120_v61 = vld [vmem:[#allocation2 + $0x21b8] sm:$0xf0] }
 0x48b   :  { %9181 = vmatpush.bf16.msrb.mxu0 %v12755_v40  ;;  %v14192_v40 = vld [vmem:[#allocation2 + $0x2248] sm:$0xf0]  ;;  %v15872_v39 = vld [vmem:[#allocation2 + $0x21a4] sm:$0xf] }
 0x48c   :  { %9194 = vmatpush.bf16.msrb.mxu1 %v12947_v8  ;;  %v13811_v8 = vor.u32 %v15794_v63, %v13808_v32  ;;  %v14123_v63 = vor.u32 %v15872_v39, %v14120_v61  ;;  %v15818_v32 = vld [vmem:[#allocation2 + $0x1ff4] sm:$0xf] }
 0x48d   :  { %9207 = vmatpush.bf16.msrb.mxu2 %v13139_v62  ;;  %v14003_v62 = vor.u32 %v15842_v35, %v14000_v51  ;;  %v13904_v35 = vld [vmem:[#allocation2 + $0x2008] sm:$0xf0] }
 0x48e   :  { %9220 = vmatpush.bf16.msrb.mxu3 %v13331_v42  ;;  %v14195_v42 = vor.u32 %v15890_v24, %v14192_v40  ;;  %v15866_v40 = vld [vmem:[#allocation2 + $0x2174] sm:$0xf]  ;;  %v13907_v6 = vor.u32 %v15818_v32, %v13904_v35  ;;  %v15932_v35 = vld [vmem:[#allocation2 + $0x2384] sm:$0xf] }
 0x48f   :  { %9182 = vmatpush.bf16.msrb.mxu0 %v12731_v0  ;;  %v13595_v0 = vor.u32 %v15740_v11, %v13592_v1  ;;  %v16002_v32 = vld [vmem:[#allocation7 + $0x30] sm:$0xff] }
 0x490   :  { %9195 = vmatpush.bf16.msrb.mxu1 %v12923_v50  ;;  %v15734_v50 = vld [vmem:[#allocation2 + $0x1d54] sm:$0xf] }
 0x491   :  { %9208 = vmatpush.bf16.msrb.mxu2 %v13115_v46  ;;  %v15782_v46 = vld [vmem:[#allocation2 + $0x1ed4] sm:$0xf] }
 0x492   :  { %9221 = vmatpush.bf16.msrb.mxu3 %v13307_v4  ;;  %v13763_v33 = vor.u32 %v15782_v46, %v13760_v47 }
 0x493   :  { %9183 = vmatpush.bf16.msrb.mxu0 %v12707_v29  ;;  %v8977_v4 = vpop.f32.mrf.mxu0  ;;  %v15776_v29 = vld [vmem:[#allocation2 + $0x1ea4] sm:$0xf] }
 0x494   :  { %9196 = vmatpush.bf16.msrb.mxu1 %v12899_v31  ;;  %v8990_v57 = vpop.f32.mrf.mxu1  ;;  %v15824_v31 = vld [vmem:[#allocation2 + $0x2024] sm:$0xf] }
 0x495   :  { %9209 = vmatpush.bf16.msrb.mxu2 %v13091_v26  ;;  %v13928_v26 = vld [vmem:[#allocation2 + $0x2038] sm:$0xf0] }
 0x496   :  { %9222 = vmatpush.bf16.msrb.mxu3 %v13283_v52  ;;  %9184 = vmatmul.bf16.vlgmr.msrb.gmra.mxu0 %v16291_v49  ;;  %v13568_v49 = vld [vmem:[#allocation2 + $0x1d68] sm:$0xf0]  ;;  %v8991_v52 = vadd.f32 %v8990_v57, %v1291_v37 }
 0x497   :  { %9228 = vmatpush.bf16.msra.mxu0 %v13643_v53  ;;  %9197 = vmatmul.bf16.vlgmr.msrb.gmra.mxu1 %v16300_v5  ;;  %v15878_v5 = vld [vmem:[#allocation2 + $0x21d4] sm:$0xf]  ;;  %v13571_v59 = vor.u32 %v15734_v50, %v13568_v49  ;;  %v13739_v53 = vor.u32 %v15776_v29, %v13736_v25  ;;  %v15860_v50 = vld [vmem:[#allocation2 + $0x2144] sm:$0xf]  ;;  %v14072_v49 = vld [vmem:[#allocation2 + $0x2158] sm:$0xf0] }
 0x498   :  { %9241 = vmatpush.bf16.msra.mxu1 %v13835_v28  ;;  %9210 = vmatmul.bf16.vlgmr.msrb.gmra.mxu2 %v16304_v10  ;;  %v13952_v10 = vld [vmem:[#allocation2 + $0x2068] sm:$0xf0]  ;;  %v14147_v58 = vor.u32 %v15878_v5, %v14144_v55  ;;  %v13931_v28 = vor.u32 %v15824_v31, %v13928_v26  ;;  %v14075_v55 = vor.u32 %v15860_v50, %v14072_v49  ;;  %v14408_v29 = vld [vmem:[#allocation2 + $0x23f8] sm:$0xf0]  ;;  %v15968_v50 = vld [vmem:[#allocation2 + $0x24a4] sm:$0xf] }
 0x499   :  { %9254 = vmatpush.bf16.msra.mxu2 %v14027_v30  ;;  %9223 = vmatmul.bf16.vlgmr.msrb.gmra.mxu3 %v16302_v9  ;;  %v16540_v9 = vadd.f32 %v8977_v4, %v16533_v41  ;;  %v13955_v36 = vor.u32 %v15830_v54, %v13952_v10  ;;  %v13547_v41 = vor.u32 %v15728_v22, %v13544_v56  ;;  %v15722_v30 = vld [vmem:[#allocation2 + $0x1cf4] sm:$0xf]  ;;  %v13472_v10 = vld [vmem:[#allocation2 + $0x1ca8] sm:$0xf0]  ;;  %v15944_v56 = vld [vmem:[#allocation2 + $0x23e4] sm:$0xf] }
 0x49a   :  { %9267 = vmatpush.bf16.msra.mxu3 %v14219_v21  ;;  %v13712_v21 = vld [vmem:[#allocation2 + $0x1e88] sm:$0xf0]  ;;  %v13523_v11 = vor.u32 %v15722_v30, %v13520_v34  ;;  %v15758_v4 = vld [vmem:[#allocation2 + $0x1e14] sm:$0xf]  ;;  %v14600_v25 = vld [vmem:[#allocation2 + $0x2578] sm:$0xf0]  ;;  %v14411_v61 = vor.u32 %v15944_v56, %v14408_v29 }
 0x49b   :  { %9229 = vmatpush.bf16.msra.mxu0 %v13619_v12  ;;  %v9003_v51 = vpop.f32.mrf.mxu2  ;;  %v14096_v12 = vld [vmem:[#allocation2 + $0x2188] sm:$0xf0]  ;;  %v13715_v1 = vor.u32 %v15770_v20, %v13712_v21  ;;  %v16011_v30 = vld [vmem:[#allocation7 + $0x78] sm:$0xff]  ;;  %v15986_v34 = vld [vmem:[#allocation2 + $0x2534] sm:$0xf] }
 0x49c   :  { %9242 = vmatpush.bf16.msra.mxu1 %v13811_v8  ;;  %v9016_v24 = vpop.f32.mrf.mxu3  ;;  %v9004_v8 = vadd.f32 %v9003_v51, %v8991_v52  ;;  %v8992_v23 = vpop.f32.mrf.mxu1  ;;  %v14099_v45 = vor.u32 %v15866_v40, %v14096_v12  ;;  %v13664_v5 = vld [vmem:[#allocation2 + $0x1e28] sm:$0xf0]  ;;  %v14360_v51 = vld [vmem:[#allocation2 + $0x2398] sm:$0xf0]  ;;  %v15980_v40 = vld [vmem:[#allocation2 + $0x2504] sm:$0xf] }
 0x49d   :  { %9255 = vmatpush.bf16.msra.mxu2 %v14003_v62  ;;  %v8979_v62 = vpop.f32.mrf.mxu0  ;;  %v13856_v37 = vld [vmem:[#allocation2 + $0x1fa8] sm:$0xf0]  ;;  %v13667_v31 = vor.u32 %v15758_v4, %v13664_v5  ;;  %v14552_v12 = vld [vmem:[#allocation2 + $0x2518] sm:$0xf0] }
 0x49e   :  { %9268 = vmatpush.bf16.msra.mxu3 %v14195_v42  ;;  %v15716_v42 = vld [vmem:[#allocation2 + $0x1cc4] sm:$0xf]  ;;  %v16542_v15 = vadd.f32 %v9016_v24, %v9004_v8  ;;  %v14048_v22 = vld [vmem:[#allocation2 + $0x2128] sm:$0xf0]  ;;  %v13859_v26 = vor.u32 %v15806_v38, %v13856_v37  ;;  %v16010_v24 = vld [vmem:[#allocation7 + $0x70] sm:$0xff]  ;;  %v14363_v8 = vor.u32 %v15932_v35, %v14360_v51  ;;  %v14555_v62 = vor.u32 %v15980_v40, %v14552_v12 }
 0x49f   :  { %9230 = vmatpush.bf16.msra.mxu0 %v13595_v0  ;;  %v13688_v0 = vld [vmem:[#allocation2 + $0x1e58] sm:$0xf0]  ;;  %v13499_v46 = vor.u32 %v15716_v42, %v13496_v18  ;;  %v14576_v20 = vld [vmem:[#allocation2 + $0x2548] sm:$0xf0]  ;;  %v15962_v38 = vld [vmem:[#allocation2 + $0x2474] sm:$0xf] }
 0x4a0   :  { %9243 = vmatpush.bf16.msra.mxu1 %v13787_v43  ;;  %v15812_v43 = vld [vmem:[#allocation2 + $0x1fc4] sm:$0xf]  ;;  %v13691_v47 = vor.u32 %v15764_v44, %v13688_v0  ;;  %v14579_v21 = vor.u32 %v15986_v34, %v14576_v20  ;;  %v16009_v42 = vld [vmem:[#allocation7 + $0x68] sm:$0xff]  ;;  %v14504_v49 = vld [vmem:[#allocation2 + $0x24b8] sm:$0xf0]  ;;  %v9306_v12 = vmax.f32 %v16364_v16, 0.0 }
 0x4a1   :  { %9256 = vmatpush.bf16.msra.mxu2 %v13979_v48  ;;  %v13880_v48 = vld [vmem:[#allocation2 + $0x1fd8] sm:$0xf0]  ;;  %v14528_v18 = vld [vmem:[#allocation2 + $0x24e8] sm:$0xf0]  ;;  %v15950_v20 = vld [vmem:[#allocation2 + $0x2414] sm:$0xf] }
 0x4a2   :  { %9269 = vmatpush.bf16.msra.mxu3 %v14171_v17  ;;  %v15710_v17 = vld [vmem:[#allocation2 + $0x1c94] sm:$0xf]  ;;  %v13883_v54 = vor.u32 %v15812_v43, %v13880_v48  ;;  %v16008_v48 = vld [vmem:[#allocation7 + $0x60] sm:$0xff]  ;;  %v16019_v40 = vld [vmem:[#allocation7 + $0xb8] sm:$0xff] }
 0x4a3   :  { %9231 = vmatpush.bf16.msra.mxu0 %v13571_v59  ;;  %v15854_v59 = vld [vmem:[#allocation2 + $0x2114] sm:$0xf]  ;;  %v13475_v57 = vor.u32 %v15710_v17, %v13472_v10  ;;  %v14288_v4 = vld [vmem:[#allocation2 + $0x2308] sm:$0xf0] }
 0x4a4   :  { %9244 = vmatpush.bf16.msra.mxu1 %v13763_v33  ;;  %v9005_v33 = vpop.f32.mrf.mxu2  ;;  %v14051_v39 = vor.u32 %v15854_v59, %v14048_v22  ;;  %v15914_v10 = vld [vmem:[#allocation2 + $0x22f4] sm:$0xf]  ;;  %v14480_v37 = vld [vmem:[#allocation2 + $0x2488] sm:$0xf0] }
 0x4a5   :  { %9257 = vmatpush.bf16.msra.mxu2 %v13955_v36  ;;  %v9018_v36 = vpop.f32.mrf.mxu3  ;;  %v14291_v33 = vor.u32 %v15914_v10, %v14288_v4  ;;  %v14483_v56 = vor.u32 %v15962_v38, %v14480_v37  ;;  %v15998_v29 = vld [vmem:[#allocation7 + $0x10] sm:$0xff]  ;;  %v16005_v34 = vld [vmem:[#allocation7 + $0x48] sm:$0xff]  ;;  %v15996_v51 = vld [vmem:[#allocation7] sm:$0xff] }
 0x4a6   :  { %9270 = vmatpush.bf16.msra.mxu3 %v14147_v58  ;;  %v15992_v58 = vld [vmem:[#allocation2 + $0x2564] sm:$0xf]  ;;  %v16017_v16 = vld [vmem:[#allocation7 + $0xa8] sm:$0xff]  ;;  %v16014_v10 = vld [vmem:[#allocation7 + $0x90] sm:$0xff] }
 0x4a7   :  { %9232 = vmatpush.bf16.msra.mxu0 %v13547_v41  ;;  %v14603_v52 = vor.u32 %v15992_v58, %v14600_v25  ;;  %v16003_v41 = vld [vmem:[#allocation7 + $0x38] sm:$0xff]  ;;  %v16030_v38 = vld [vmem:[#allocation7 + $0x110] sm:$0xff]  ;;  %v16013_v37 = vld [vmem:[#allocation7 + $0x88] sm:$0xff] }
 0x4a8   :  { %9245 = vmatpush.bf16.msra.mxu1 %v13739_v53  ;;  %v15938_v53 = vld [vmem:[#allocation2 + $0x23b4] sm:$0xf]  ;;  %v14264_v58 = vld [vmem:[#allocation2 + $0x22d8] sm:$0xf0] }
 0x4a9   :  { %9258 = vmatpush.bf16.msra.mxu2 %v13931_v28  ;;  %v14384_v28 = vld [vmem:[#allocation2 + $0x23c8] sm:$0xf0] }
 0x4aa   :  { %9271 = vmatpush.bf16.msra.mxu3 %v14123_v63  ;;  %v14387_v63 = vor.u32 %v15938_v53, %v14384_v28  ;;  %v15902_v53 = vld [vmem:[#allocation2 + $0x2294] sm:$0xf]  ;;  %v14240_v28 = vld [vmem:[#allocation2 + $0x22a8] sm:$0xf0] }
 0x4ab   :  { %9233 = vmatpush.bf16.msra.mxu0 %v13523_v11  ;;  %v16001_v11 = vld [vmem:[#allocation7 + $0x28] sm:$0xff] }
 0x4ac   :  { %9246 = vmatpush.bf16.msra.mxu1 %v13715_v1  ;;  %v15926_v1 = vld [vmem:[#allocation2 + $0x2354] sm:$0xf] }
 0x4ad   :  { %9259 = vmatpush.bf16.msra.mxu2 %v13907_v6  ;;  %v14336_v6 = vld [vmem:[#allocation2 + $0x2368] sm:$0xf0] }
 0x4ae   :  { %9272 = vmatpush.bf16.msra.mxu3 %v14099_v45  ;;  %v14339_v44 = vor.u32 %v15926_v1, %v14336_v6  ;;  %v14312_v45 = vld [vmem:[#allocation2 + $0x2338] sm:$0xf0]  ;;  %v9312_v6 = vpack.c.bf16 %v9306_v12, %v9306_v12 }
 0x4af   :  { %9234 = vmatpush.bf16.msra.mxu0 %v13499_v46  ;;  %v16018_v1 = vld [vmem:[#allocation7 + $0xb0] sm:$0xff] }
 0x4b0   :  { %9247 = vmatpush.bf16.msra.mxu1 %v13691_v47  ;;  %v14507_v47 = vor.u32 %v15968_v50, %v14504_v49  ;;  %v16023_v50 = vld [vmem:[#allocation7 + $0xd8] sm:$0xff]  ;;  %v16042_v12 = vld [vmem:[#allocation7 + $0x170] sm:$0xff] }
 0x4b1   :  { %9260 = vmatpush.bf16.msra.mxu2 %v13883_v54  ;;  %v15999_v54 = vld [vmem:[#allocation7 + $0x18] sm:$0xff] }
 0x4b2   :  { %9273 = vmatpush.bf16.msra.mxu3 %v14075_v55  ;;  %v16007_v55 = vld [vmem:[#allocation7 + $0x58] sm:$0xff] }
 0x4b3   :  { %9235 = vmatpush.bf16.msra.mxu0 %v13475_v57  ;;  %v9029_v23 = vpop.f32.mrf.mxu0  ;;  %v15908_v57 = vld [vmem:[#allocation2 + $0x22c4] sm:$0xf] }
 0x4b4   :  { %9248 = vmatpush.bf16.msra.mxu1 %v13667_v31  ;;  %v9030_v0 = vadd.f32 %v9029_v23, %v16542_v15  ;;  %v9042_v43 = vpop.f32.mrf.mxu1  ;;  %v16006_v31 = vld [vmem:[#allocation7 + $0x50] sm:$0xff]  ;;  %v16033_v23 = vld [vmem:[#allocation7 + $0x128] sm:$0xff]  ;;  %v16031_v49 = vld [vmem:[#allocation7 + $0x118] sm:$0xff] }
 0x4b5   :  { %9261 = vmatpush.bf16.msra.mxu2 %v13859_v26  ;;  %v15956_v26 = vld [vmem:[#allocation2 + $0x2444] sm:$0xf] }
 0x4b6   :  { %9274 = vmatpush.bf16.msra.mxu3 %v14051_v39  ;;  %9236 = vmatmul.bf16.vlgmr.msra.gmra.mxu0 %v16306_v13  ;;  %v15974_v13 = vld [vmem:[#allocation2 + $0x24d4] sm:$0xf]  ;;  %v9043_v46 = vadd.f32 %v9042_v43, %v9030_v0  ;;  %v14456_v39 = vld [vmem:[#allocation2 + $0x2458] sm:$0xf0]  ;;  %v16024_v0 = vld [vmem:[#allocation7 + $0xe0] sm:$0xff] }
 0x4b7   :  { %9280 = vmatpush.bf16.msrb.mxu0 %v14411_v61  ;;  %9249 = vmatmul.bf16.vlgmr.msra.gmra.mxu1 %v16312_v2  ;;  %v14531_v2 = vor.u32 %v15974_v13, %v14528_v18  ;;  %v14267_v61 = vor.u32 %v15908_v57, %v14264_v58  ;;  %v16026_v13 = vld [vmem:[#allocation7 + $0xf0] sm:$0xff]  ;;  %v16028_v57 = vld [vmem:[#allocation7 + $0x100] sm:$0xff]  ;;  %v9309_v58 = vmax.f32 %v16493_v60, 0.0 }
 0x4b8   :  { %9293 = vmatpush.bf16.msrb.mxu1 %v14603_v52  ;;  %9262 = vmatmul.bf16.vlgmr.msra.gmra.mxu2 %v16316_v7  ;;  %v16000_v7 = vld [vmem:[#allocation7 + $0x20] sm:$0xff]  ;;  %v14459_v52 = vor.u32 %v15956_v26, %v14456_v39  ;;  %v16034_v18 = vld [vmem:[#allocation7 + $0x130] sm:$0xff] }
 0x4b9   :  { %9706 = vmatpush.bf16.msrb.mxu2 %v16003_v41  ;;  %9275 = vmatmul.bf16.vlgmr.msra.gmra.mxu3 %v16314_v3  ;;  %v15920_v3 = vld [vmem:[#allocation2 + $0x2324] sm:$0xf]  ;;  %v15997_v41 = vld [vmem:[#allocation7 + $0x8] sm:$0xff]  ;;  %v9315_v26 = vpack.c.bf16 %v9309_v58, %v9309_v58 }
 0x4ba   :  { %9719 = vmatpush.bf16.msrb.mxu3 %v16011_v30  ;;  %v14315_v17 = vor.u32 %v15920_v3, %v14312_v45  ;;  %v16016_v3 = vld [vmem:[#allocation7 + $0xa0] sm:$0xff] }
 0x4bb   :  { %9281 = vmatpush.bf16.msrb.mxu0 %v14387_v63  ;;  %v9055_v5 = vpop.f32.mrf.mxu2  ;;  %v9031_v22 = vpop.f32.mrf.mxu0  ;;  %v14432_v63 = vld [vmem:[#allocation2 + $0x2428] sm:$0xf0] }
 0x4bc   :  { %9294 = vmatpush.bf16.msrb.mxu1 %v14579_v21  ;;  %v9056_v15 = vadd.f32 %v9055_v5, %v9043_v46  ;;  %v9068_v59 = vpop.f32.mrf.mxu3  ;;  %v9044_v25 = vpop.f32.mrf.mxu1  ;;  %v14435_v35 = vor.u32 %v15950_v20, %v14432_v63  ;;  %v16012_v22 = vld [vmem:[#allocation7 + $0x80] sm:$0xff] }
 0x4bd   :  { %9707 = vmatpush.bf16.msrb.mxu2 %v16002_v32  ;;  %v14243_v32 = vor.u32 %v15902_v53, %v14240_v28  ;;  %v9310_v25 = vmax.f32 %v16540_v9, 0.0 }
 0x4be   :  { %9720 = vmatpush.bf16.msrb.mxu3 %v16010_v24  ;;  %v16549_v36 = vadd.f32 %v9068_v59, %v9056_v15  ;;  %v16004_v24 = vld [vmem:[#allocation7 + $0x40] sm:$0xff]  ;;  %v16021_v15 = vld [vmem:[#allocation7 + $0xc8] sm:$0xff] }
 0x4bf   :  { %9282 = vmatpush.bf16.msrb.mxu0 %v14363_v8  ;;  %v9307_v8 = vmax.f32 %v16407_v27, 0.0  ;;  %v16025_v27 = vld [vmem:[#allocation7 + $0xe8] sm:$0xff]  ;;  %v9316_v39 = vpack.c.bf16 %v9310_v25, %v9310_v25 }
 0x4c0   :  { %9295 = vmatpush.bf16.msrb.mxu1 %v14555_v62  ;;  %v16027_v62 = vld [vmem:[#allocation7 + $0xf8] sm:$0xff]  ;;  %v16029_v59 = vld [vmem:[#allocation7 + $0x108] sm:$0xff] }
 0x4c1   :  { %9708 = vmatpush.bf16.msrb.mxu2 %v16001_v11  ;;  %v16035_v11 = vld [vmem:[#allocation7 + $0x138] sm:$0xff] }
 0x4c2   :  { %9721 = vmatpush.bf16.msrb.mxu3 %v16009_v42  ;;  %v9313_v42 = vpack.c.bf16 %v9307_v8, %v9307_v8 }
 0x4c3   :  { %9283 = vmatpush.bf16.msrb.mxu0 %v14339_v44  ;;  %v9057_v30 = vpop.f32.mrf.mxu2  ;;  %v16063_v44 = vld [vmem:[#allocation1] sm:$0xff] }
 0x4c4   :  { %9296 = vmatpush.bf16.msrb.mxu1 %v14531_v2  ;;  %v9070_v21 = vpop.f32.mrf.mxu3 }
 0x4c5   :  { %9709 = vmatpush.bf16.msrb.mxu2 %v16000_v7 }
 0x4c6   :  { %9722 = vmatpush.bf16.msrb.mxu3 %v16008_v48  ;;  %v16015_v48 = vld [vmem:[#allocation7 + $0x98] sm:$0xff] }
 0x4c7   :  { %9284 = vmatpush.bf16.msrb.mxu0 %v14315_v17 }
 0x4c8   :  { %9297 = vmatpush.bf16.msrb.mxu1 %v14507_v47 }
 0x4c9   :  { %9710 = vmatpush.bf16.msrb.mxu2 %v15999_v54 }
 0x4ca   :  { %9723 = vmatpush.bf16.msrb.mxu3 %v16007_v55  ;;  %v16022_v55 = vld [vmem:[#allocation7 + $0xd0] sm:$0xff] }
 0x4cb   :  { %9285 = vmatpush.bf16.msrb.mxu0 %v14291_v33 }
 0x4cc   :  { %9298 = vmatpush.bf16.msrb.mxu1 %v14483_v56  ;;  %v9308_v56 = vmax.f32 %v16450_v19, 0.0 }
 0x4cd   :  { %9711 = vmatpush.bf16.msrb.mxu2 %v15998_v29  ;;  %v16020_v29 = vld [vmem:[#allocation7 + $0xc0] sm:$0xff] }
 0x4ce   :  { %9724 = vmatpush.bf16.msrb.mxu3 %v16006_v31  ;;  %v9314_v31 = vpack.c.bf16 %v9308_v56, %v9308_v56 }
 0x4cf   :  { %9286 = vmatpush.bf16.msrb.mxu0 %v14267_v61 }
 0x4d0   :  { %9299 = vmatpush.bf16.msrb.mxu1 %v14459_v52 }
 0x4d1   :  { %9712 = vmatpush.bf16.msrb.mxu2 %v15997_v41 }
 0x4d2   :  { %9725 = vmatpush.bf16.msrb.mxu3 %v16005_v34 }
 0x4d3   :  { %9287 = vmatpush.bf16.msrb.mxu0 %v14243_v32  ;;  %v9081_v2 = vpop.f32.mrf.mxu0 }
 0x4d4   :  { %9300 = vmatpush.bf16.msrb.mxu1 %v14435_v35  ;;  %v9082_v7 = vadd.f32 %v9081_v2, %v16549_v36  ;;  %v9094_v45 = vpop.f32.mrf.mxu1  ;;  %v16043_v35 = vld [vmem:[#allocation7 + $0x178] sm:$0xff] }
 0x4d5   :  { %9713 = vmatpush.bf16.msrb.mxu2 %v15996_v51 }
 0x4d6   :  { %9726 = vmatpush.bf16.msrb.mxu3 %v16004_v24  ;;  %9288 = vmatmul.bf16.vlgmr.msrb.gmra.mxu0 %v16318_v14  ;;  %v16032_v14 = vld [vmem:[#allocation7 + $0x120] sm:$0xff]  ;;  %v9095_v43 = vadd.f32 %v9094_v45, %v9082_v7 }
 0x4d7   :  { %9732 = vmatpush.bf16.msra.mxu0 %v16019_v40  ;;  %9301 = vmatmul.bf16.vlgmr.msrb.gmra.mxu1 %v16063_v44 }
 0x4d8   :  { %9745 = vmatpush.bf16.msra.mxu1 %v16027_v62  ;;  %9714 = vmatmul.bf16.vlgmr.msrb.gmra.mxu2 %v9312_v6  ;;  %v16041_v62 = vld [vmem:[#allocation7 + $0x168] sm:$0xff] }
 0x4d9   :  { %9758 = vmatpush.bf16.msra.mxu2 %v16035_v11  ;;  %9727 = vmatmul.bf16.vlgmr.msrb.gmra.mxu3 %v9313_v42  ;;  %v16039_v42 = vld [vmem:[#allocation7 + $0x158] sm:$0xff] }
 0x4da   :  { %9771 = vmatpush.bf16.msra.mxu3 %v16043_v35 }
 0x4db   :  { %9733 = vmatpush.bf16.msra.mxu0 %v16018_v1  ;;  %v9107_v46 = vpop.f32.mrf.mxu2  ;;  %v9083_v54 = vpop.f32.mrf.mxu0  ;;  %v16040_v1 = vld [vmem:[#allocation7 + $0x160] sm:$0xff] }
 0x4dc   :  { %9746 = vmatpush.bf16.msra.mxu1 %v16026_v13  ;;  %v9108_v17 = vadd.f32 %v9107_v46, %v9095_v43  ;;  %v9120_v47 = vpop.f32.mrf.mxu3  ;;  %v9096_v4 = vpop.f32.mrf.mxu1  ;;  %v16038_v13 = vld [vmem:[#allocation7 + $0x150] sm:$0xff] }
 0x4dd   :  { %9759 = vmatpush.bf16.msra.mxu2 %v16034_v18  ;;  %v16037_v18 = vld [vmem:[#allocation7 + $0x148] sm:$0xff] }
 0x4de   :  { %v9121_v5 = vadd.f32 %v9120_v47, %v9108_v17  ;;  %9772 = vmatpush.bf16.msra.mxu3 %v16042_v12 }
 0x4df   :  { %9734 = vmatpush.bf16.msra.mxu0 %v16017_v16 }
 0x4e0   :  { %9747 = vmatpush.bf16.msra.mxu1 %v16025_v27  ;;  %v16036_v27 = vld [vmem:[#allocation7 + $0x140] sm:$0xff] }
 0x4e1   :  { %9760 = vmatpush.bf16.msra.mxu2 %v16033_v23 }
 0x4e2   :  { %9773 = vmatpush.bf16.msra.mxu3 %v16041_v62 }
 0x4e3   :  { %9735 = vmatpush.bf16.msra.mxu0 %v16016_v3  ;;  %v9109_v33 = vpop.f32.mrf.mxu2 }
 0x4e4   :  { %9748 = vmatpush.bf16.msra.mxu1 %v16024_v0  ;;  %v9122_v36 = vpop.f32.mrf.mxu3 }
 0x4e5   :  { %9761 = vmatpush.bf16.msra.mxu2 %v16032_v14 }
 0x4e6   :  { %9774 = vmatpush.bf16.msra.mxu3 %v16040_v1 }
 0x4e7   :  { %9736 = vmatpush.bf16.msra.mxu0 %v16015_v48 }
 0x4e8   :  { %9749 = vmatpush.bf16.msra.mxu1 %v16023_v50 }
 0x4e9   :  { %9762 = vmatpush.bf16.msra.mxu2 %v16031_v49 }
 0x4ea   :  { %9775 = vmatpush.bf16.msra.mxu3 %v16039_v42 }
 0x4eb   :  { %9737 = vmatpush.bf16.msra.mxu0 %v16014_v10 }
 0x4ec   :  { %9750 = vmatpush.bf16.msra.mxu1 %v16022_v55  ;;  %v16053_v55 = vld [vmem:[#allocation8] ss:$0 sm:$0xff] }
 0x4ed   :  { %9763 = vmatpush.bf16.msra.mxu2 %v16030_v38 }
 0x4ee   :  { %9776 = vmatpush.bf16.msra.mxu3 %v16038_v13 }
 0x4ef   :  { %9738 = vmatpush.bf16.msra.mxu0 %v16013_v37 }
 0x4f0   :  { %9751 = vmatpush.bf16.msra.mxu1 %v16021_v15 }
 0x4f1   :  { %9764 = vmatpush.bf16.msra.mxu2 %v16029_v59 }
 0x4f2   :  { %9777 = vmatpush.bf16.msra.mxu3 %v16037_v18 }
 0x4f3   :  { %9739 = vmatpush.bf16.msra.mxu0 %v16012_v22  ;;  %v9133_v61 = vpop.f32.mrf.mxu0 }
 0x4f4   :  { %9752 = vmatpush.bf16.msra.mxu1 %v16020_v29  ;;  %v9134_v52 = vadd.f32 %v9133_v61, %v9121_v5  ;;  %v9146_v19 = vpop.f32.mrf.mxu1 }
 0x4f5   :  { %9765 = vmatpush.bf16.msra.mxu2 %v16028_v57 }
 0x4f6   :  { %9740 = vmatmul.bf16.vlgmr.msra.gmra.mxu0 %v9314_v31  ;;  %v9147_v41 = vadd.f32 %v9146_v19, %v9134_v52  ;;  %9778 = vmatpush.bf16.msra.mxu3 %v16036_v27 }
 0x4f7   :  { %9753 = vmatmul.bf16.vlgmr.msra.gmra.mxu1 %v9315_v26 }
 0x4f8   :  { %9766 = vmatmul.bf16.vlgmr.msra.gmra.mxu2 %v9316_v39 }
 0x4fb   :  { %v9159_v53 = vpop.f32.mrf.mxu2  ;;  %v9135_v34 = vpop.f32.mrf.mxu0 }
 0x4fc   :  { %v9160_v28 = vadd.f32 %v9159_v53, %v9147_v41  ;;  %v9172_v30 = vpop.f32.mrf.mxu3  ;;  %v9148_v60 = vpop.f32.mrf.mxu1 }
 0x4fe   :  { %v9173_v20 = vadd.f32 %v9172_v30, %v9160_v28 }
 0x503   :  { %v9161_v9 = vpop.f32.mrf.mxu2 }
 0x504   :  { %v9174_v63 = vpop.f32.mrf.mxu3 }
 0x513   :  { %v9185_v21 = vpop.f32.mrf.mxu0 }
 0x514   :  { %v9198_v32 = vpop.f32.mrf.mxu1  ;;  %v9186_v23 = vadd.f32 %v9185_v21, %v9173_v20 }
 0x516   :  { %v9199_v0 = vadd.f32 %v9198_v32, %v9186_v23 }
 0x51b   :  { %v9211_v51 = vpop.f32.mrf.mxu2  ;;  %v9187_v40 = vpop.f32.mrf.mxu0 }
 0x51c   :  { %v9224_v24 = vpop.f32.mrf.mxu3  ;;  %v9200_v8 = vpop.f32.mrf.mxu1  ;;  %v9212_v14 = vadd.f32 %v9211_v51, %v9199_v0 }
 0x51e   :  { %v9225_v50 = vadd.f32 %v9224_v24, %v9212_v14 }
 0x523   :  { %v9213_v11 = vpop.f32.mrf.mxu2 }
 0x524   :  { %v9226_v6 = vpop.f32.mrf.mxu3 }
 0x533   :  { %v9237_v44 = vpop.f32.mrf.mxu0 }
 0x534   :  { %v9250_v16 = vpop.f32.mrf.mxu1  ;;  %v9238_v49 = vadd.f32 %v9237_v44, %v9225_v50 }
 0x536   :  { %v9251_v46 = vadd.f32 %v9250_v16, %v9238_v49 }
 0x53b   :  { %v9263_v2 = vpop.f32.mrf.mxu2  ;;  %v9239_v3 = vpop.f32.mrf.mxu0 }
 0x53c   :  { %v9276_v7 = vpop.f32.mrf.mxu3  ;;  %v9252_v45 = vpop.f32.mrf.mxu1  ;;  %v9264_v17 = vadd.f32 %v9263_v2, %v9251_v46 }
 0x53e   :  { %v9277_v47 = vadd.f32 %v9276_v7, %v9264_v17 }
 0x543   :  { %v9265_v43 = vpop.f32.mrf.mxu2 }
 0x544   :  { %v9278_v48 = vpop.f32.mrf.mxu3 }
 0x553   :  { %v9289_v54 = vpop.f32.mrf.mxu0 }
 0x554   :  { %v9302_v10 = vpop.f32.mrf.mxu1  ;;  %v9290_v4 = vadd.f32 %v9289_v54, %v9277_v47 }
 0x556   :  { %v9303_v5 = vadd.f32 %v9302_v10, %v9290_v4 }
 0x558   :  { %v9311_v38 = vmax.f32 %v9303_v5, 0.0 }
 0x55a   :  { %v9317_v37 = vpack.c.bf16 %v9311_v38, %v9311_v38 }
 0x55b   :  { %v9715_v15 = vpop.f32.mrf.mxu2  ;;  %v9291_v36 = vpop.f32.mrf.mxu0 }
 0x55c   :  { %v9728_v59 = vpop.f32.mrf.mxu3  ;;  %v9716_v33 = vadd.f32 %v16053_v55, %v9715_v15  ;;  %v9304_v22 = vpop.f32.mrf.mxu1  ;;  %9779 = vmatmul.bf16.vlgmr.msra.gmra.mxu3 %v9317_v37 }
 0x55e   :  { %v9729_v56 = vadd.f32 %v9728_v59, %v9716_v33 }
 0x563   :  { %v9717_v29 = vpop.f32.mrf.mxu2 }
 0x564   :  { %v9730_v57 = vpop.f32.mrf.mxu3 }
 0x573   :  { %v9741_v58 = vpop.f32.mrf.mxu0 }
 0x574   :  { %v9742_v25 = vadd.f32 %v9741_v58, %v9729_v56  ;;  %v9754_v31 = vpop.f32.mrf.mxu1 }
 0x576   :  { %v9755_v26 = vadd.f32 %v9754_v31, %v9742_v25 }
 0x57b   :  { %v9767_v39 = vpop.f32.mrf.mxu2  ;;  %v9743_v52 = vpop.f32.mrf.mxu0 }
 0x57c   :  { %v9768_v61 = vadd.f32 %v9767_v39, %v9755_v26  ;;  %v9756_v19 = vpop.f32.mrf.mxu1 }
 0x583   :  { %v9769_v41 = vpop.f32.mrf.mxu2 }
 0x5df   :  { %v9780_v53 = vpop.f32.mrf.mxu3 }
 0x5e0   :  { %v9781_v28 = vadd.f32 %v9780_v53, %v9768_v61 }
 0x5e2   :  { %9784 = vst [vmem:[#allocation10] sm:$0x3] %v9781_v28 }
 0x5e3   :  { %9795 = dma.vmem_to_hbm [thread:$0]  %s9791_s21, 32, %s9793_s24, [#allocation4]  }
 0x5e7   :  { %v9782_v30 = vpop.f32.mrf.mxu3 }
 0x5e8   :  { %16190 = dma.done.wait [#allocation4], 32  }
 0x5e9   :  { %16191 = vsyncadd [#allocation4], 4294967264 }
 0x5ea   :  { %9800 = vsyncpa [#allocation3], 1 }
 0x5eb   :  { %9801 = vsyncpa [#allocation6], 1 }
 0x5ec   :  { %9802 = vsyncpa [#allocation9], 1 }
 0x5ed   :  { %9803 = vsyncpa [#allocation4], 1 }

</bundles_post_ra>
